<compile_context>
chip_gen: v7x
topology: tpu7x:2x2x1
jax: 0.10.0
libtpu: 0.0.40
codegen_flags: <defaults>
</compile_context>

<pallas_src>
import functools
import math

import jax
import jax.numpy as jnp
from jax import lax
from jax.experimental import pallas as pl
from jax.experimental.pallas import tpu as pltpu

RMS_EPS = 1.1920928955078125e-07  # torch.finfo(torch.float32).eps (F.rms_norm default)
NEG_BIG = -1.0e30                 # finite mask value (robust vs. -inf NaN pitfalls)


# ----------------------------- Pallas kernel --------------------------------

def _mha_kernel(x_ref, wqkv_ref, wp_t_ref, cos_ref, sin_ref, o_ref, *, num_heads):
    """Fused per-batch step: wide QKV proj, per-head RMSNorm + RoPE + causal
    attention, then one fused output projection on the concatenated heads."""
    xb = x_ref[0]                      # (S, E)  f32
    cos = cos_ref[...]                 # (S, D//2)  (bf16-quantized, stored f32)
    sin = sin_ref[...]                 # (S, D//2)

    S, E = xb.shape
    D = 2 * cos.shape[1]
    H = num_heads
    scale = 1.0 / math.sqrt(D)

    # One wide projection: (S, E) @ (E, 3E) -> (S, 3E), f32 accumulation on MXU.
    qkv = jnp.dot(xb, wqkv_ref[...], preferred_element_type=jnp.float32)

    # Causal mask built once, reused by every head.
    row = lax.broadcasted_iota(jnp.int32, (S, S), 0)
    col = lax.broadcasted_iota(jnp.int32, (S, S), 1)
    causal = col <= row

    def rms_rope(t, post_scale):
        # RMS norm (with the softmax scale optionally folded in) followed by RoPE.
        inv = lax.rsqrt(jnp.mean(t * t, axis=-1, keepdims=True) + RMS_EPS) * post_scale
        t = t * inv
        t1 = t[:, : D // 2]
        t2 = t[:, D // 2:]
        return jnp.concatenate([t1 * cos + t2 * sin, t2 * cos - t1 * sin], axis=-1)

    head_outs = []
    for h in range(H):                                    # small unrolled loop
        q = qkv[:, h * D:(h + 1) * D]                     # (S, D)
        k = qkv[:, E + h * D: E + (h + 1) * D]
        v = qkv[:, 2 * E + h * D: 2 * E + (h + 1) * D]

        q = rms_rope(q, scale)          # 1/sqrt(D) folded into q's norm factor
        k = rms_rope(k, 1.0)

        # scores = q @ k^T without materializing an explicit transpose.
        scores = lax.dot_general(
            q, k, (((1,), (1,)), ((), ())),
            preferred_element_type=jnp.float32)           # (S, S), already scaled
        scores = jnp.where(causal, scores, NEG_BIG)

        m = jnp.max(scores, axis=-1, keepdims=True)
        p = jnp.exp(scores - m)
        l = jnp.sum(p, axis=-1, keepdims=True)

        o = jnp.dot(p, v, preferred_element_type=jnp.float32)   # (S, D)
        head_outs.append(o * (1.0 / l))                         # normalize after PV

    # Concatenate heads back to a lane-dense (S, E) slab and project once.
    o_cat = jnp.concatenate(head_outs, axis=-1)                 # (S, E)
    out = jnp.dot(o_cat, wp_t_ref[...], preferred_element_type=jnp.float32)
    o_ref[0] = out.astype(o_ref.dtype)                          # lane-dense store


# ------------------------------ JAX wrapper ---------------------------------

def _rotary_tables(seq_len, head_dim):
    """cos/sin tables; the PyTorch module caches them as bfloat16, then they
    participate in f32 math (bf16 quantization preserved here)."""
    inv_freq = 1.0 / (10000.0 ** (jnp.arange(0, head_dim, 2, dtype=jnp.float32) / head_dim))
    t = jnp.arange(seq_len, dtype=jnp.float32)
    freqs = jnp.outer(t, inv_freq)                        # (S, D//2)
    cos = jnp.cos(freqs).astype(jnp.bfloat16).astype(jnp.float32)
    sin = jnp.sin(freqs).astype(jnp.bfloat16).astype(jnp.float32)
    return cos, sin


def multi_attention_head(x, wq, wk, wv, wp, num_heads):
    B, S, E = x.shape
    D = E // num_heads
    assert D % 2 == 0

    cos, sin = _rotary_tables(S, D)

    # Pre-transpose / stack weights once in the wrapper (no in-kernel .T):
    #   qkv = x @ [Wq^T | Wk^T | Wv^T]   (E, 3E)
    #   out = o_cat @ Wp^T               (E, E)
    wqkv = jnp.concatenate([wq.T, wk.T, wv.T], axis=1)    # (E, 3E)
    wp_t = wp.T                                           # (E, E)

    kernel = functools.partial(_mha_kernel, num_heads=num_heads)

    out = pl.pallas_call(
        kernel,
        out_shape=jax.ShapeDtypeStruct((B, S, E), x.dtype),
        grid=(B,),
        in_specs=[
            pl.BlockSpec((1, S, E), lambda b: (b, 0, 0)),       # x
            pl.BlockSpec((E, 3 * E), lambda b: (0, 0)),         # [Wq^T|Wk^T|Wv^T]
            pl.BlockSpec((E, E), lambda b: (0, 0)),             # Wp^T
            pl.BlockSpec((S, D // 2), lambda b: (0, 0)),        # cos
            pl.BlockSpec((S, D // 2), lambda b: (0, 0)),        # sin
        ],
        out_specs=pl.BlockSpec((1, S, E), lambda b: (b, 0, 0)),
        compiler_params=pltpu.CompilerParams(
            dimension_semantics=("parallel",)),                 # batch split on megacore
    )(x, wqkv, wp_t, cos, sin)
    return out


# ---------------------------- pure-JAX reference ----------------------------

def reference(x, wq, wk, wv, wp, num_heads):
    B, S, E = x.shape
    D = E // num_heads
    cos, sin = _rotary_tables(S, D)

    q = (x @ wq.T).reshape(B, S, num_heads, D)
    k = (x @ wk.T).reshape(B, S, num_heads, D)
    v = (x @ wv.T).reshape(B, S, num_heads, D)

    def rms(t):
        return t * lax.rsqrt(jnp.mean(t * t, axis=-1, keepdims=True) + RMS_EPS)

    q, k = rms(q), rms(k)
    c = cos[None, :, None, :]
    s = sin[None, :, None, :]

    def rope(t):
        t1, t2 = t[..., : D // 2], t[..., D // 2:]
        return jnp.concatenate([t1 * c + t2 * s, t2 * c - t1 * s], axis=-1)

    q, k = rope(q), rope(k)
    q, k, v = (a.transpose(0, 2, 1, 3) for a in (q, k, v))
    scores = jnp.einsum("bhqd,bhkd->bhqk", q, k) / math.sqrt(D)
    mask = jnp.tril(jnp.ones((S, S), dtype=bool))
    scores = jnp.where(mask, scores, -jnp.inf)
    p = jax.nn.softmax(scores, axis=-1)
    o = jnp.einsum("bhqk,bhkd->bhqd", p, v)
    o = o.transpose(0, 2, 1, 3).reshape(B, S, E)
    return o @ wp.T


# ----------------------------------- main ------------------------------------

if __name__ == "__main__":
    B, S, E, H = 2, 128, 64, 4
    D = E // H

    key = jax.random.PRNGKey(0)
    kx, kq, kk, kv, kp = jax.random.split(key, 5)
    bound = 1.0 / math.sqrt(E)  # nn.Linear default init bound

    x = jax.random.normal(kx, (B, S, E), dtype=jnp.float32)
    wq = jax.random.uniform(kq, (E, E), jnp.float32, -bound, bound)
    wk = jax.random.uniform(kk, (E, E), jnp.float32, -bound, bound)
    wv = jax.random.uniform(kv, (E, E), jnp.float32, -bound, bound)
    # NOTE: the PyTorch __init__ zeroes projection.weight (output would be all zeros).
    # We use a random deterministic matrix so the kernel output is non-trivial;
    # set wp = jnp.zeros((E, E), jnp.float32) to match __init__ exactly.
    wp = jax.random.uniform(kp, (E, E), jnp.float32, -bound, bound)

    out = jax.block_until_ready(multi_attention_head(x, wq, wk, wv, wp, H))
    ref = reference(x, wq, wk, wv, wp, H)

    assert out.shape == (B, S, E)
    err = float(jnp.max(jnp.abs(out - ref)))
    assert jnp.allclose(out, ref, atol=2e-4, rtol=2e-4), f"max abs err {err}"
    print("KERNEL_OK")
</pallas_src>

<mosaic_0001>
module attributes {stable_mosaic.version = 11 : i64} {
  func.func @_mha_kernel(%arg0: i32, %arg1: memref<1x128x64xf32, #tpu.memory_space<vmem>>, %arg2: memref<64x192xf32, #tpu.memory_space<vmem>>, %arg3: memref<64x64xf32, #tpu.memory_space<vmem>>, %arg4: memref<128x8xf32, #tpu.memory_space<vmem>>, %arg5: memref<128x8xf32, #tpu.memory_space<vmem>>, %arg6: memref<1x128x64xf32, #tpu.memory_space<vmem>>) attributes {dimension_semantics = [#tpu.dimension_semantics<parallel>], iteration_bounds = array<i64: 2>, scalar_prefetch = 0 : i64, scratch_operands = 0 : i64, tpu.core_type = #tpu.core_type<tc>, window_params = [{transform_indices = @transform_0, window_bounds = array<i64: 1, 128, 64>}, {pipeline_mode = #tpu.pipeline_mode<synchronous>, transform_indices = @transform_1, window_bounds = array<i64: 64, 192>}, {pipeline_mode = #tpu.pipeline_mode<synchronous>, transform_indices = @transform_2, window_bounds = array<i64: 64, 64>}, {pipeline_mode = #tpu.pipeline_mode<synchronous>, transform_indices = @transform_3, window_bounds = array<i64: 128, 8>}, {pipeline_mode = #tpu.pipeline_mode<synchronous>, transform_indices = @transform_4, window_bounds = array<i64: 128, 8>}, {transform_indices = @transform_5, window_bounds = array<i64: 1, 128, 64>}]} {
    %c0 = arith.constant 0 : index
    %c0_0 = arith.constant 0 : index
    %c0_1 = arith.constant 0 : index
    %0 = vector.load %arg1[%c0, %c0_0, %c0_1] : memref<1x128x64xf32, #tpu.memory_space<vmem>>, vector<1x128x64xf32>
    %1 = vector.shape_cast %0 : vector<1x128x64xf32> to vector<128x64xf32>
    %c0_2 = arith.constant 0 : index
    %c0_3 = arith.constant 0 : index
    %2 = vector.load %arg4[%c0_2, %c0_3] : memref<128x8xf32, #tpu.memory_space<vmem>>, vector<128x8xf32>
    %c0_4 = arith.constant 0 : index
    %c0_5 = arith.constant 0 : index
    %3 = vector.load %arg5[%c0_4, %c0_5] : memref<128x8xf32, #tpu.memory_space<vmem>>, vector<128x8xf32>
    %c0_6 = arith.constant 0 : index
    %c0_7 = arith.constant 0 : index
    %4 = vector.load %arg2[%c0_6, %c0_7] : memref<64x192xf32, #tpu.memory_space<vmem>>, vector<64x192xf32>
    %cst = arith.constant dense<0.000000e+00> : vector<128x192xf32>
    %5 = tpu.matmul %1, %4, %cst {dimension_numbers = #tpu.dot_dimension_numbers<[1], [0], [0], [1], [0, 0, 1, 1], [], []>} : vector<128x64xf32>, vector<64x192xf32>, vector<128x192xf32> -> vector<128x192xf32>
    %6 = tpu.iota {dimensions = array<i32: 0>} : vector<128x128xi32>
    %7 = tpu.iota {dimensions = array<i32: 1>} : vector<128x128xi32>
    %8 = arith.cmpi sle, %7, %6 : vector<128x128xi32>
    %9 = vector.extract_strided_slice %5 {offsets = [0, 0], sizes = [128, 16], strides = [1, 1]} : vector<128x192xf32> to vector<128x16xf32>
    %10 = vector.extract_strided_slice %5 {offsets = [0, 64], sizes = [128, 16], strides = [1, 1]} : vector<128x192xf32> to vector<128x16xf32>
    %11 = vector.extract_strided_slice %5 {offsets = [0, 128], sizes = [128, 16], strides = [1, 1]} : vector<128x192xf32> to vector<128x16xf32>
    %12 = arith.mulf %9, %9 : vector<128x16xf32>
    %cst_8 = arith.constant dense<0.000000e+00> : vector<128xf32>
    %13 = vector.multi_reduction <add>, %12, %cst_8 [1] : vector<128x16xf32> to vector<128xf32>
    %14 = vector.shape_cast %13 : vector<128xf32> to vector<128x1xf32>
    %cst_9 = arith.constant 1.600000e+01 : f32
    %15 = vector.broadcast %cst_9 : f32 to vector<128x1xf32>
    %16 = arith.divf %14, %15 : vector<128x1xf32>
    %cst_10 = arith.constant 1.1920929E-7 : f32
    %17 = vector.broadcast %cst_10 : f32 to vector<128x1xf32>
    %18 = arith.addf %16, %17 : vector<128x1xf32>
    %19 = math.rsqrt %18 : vector<128x1xf32>
    %cst_11 = arith.constant 2.500000e-01 : f32
    %20 = vector.broadcast %cst_11 : f32 to vector<128x1xf32>
    %21 = arith.mulf %19, %20 : vector<128x1xf32>
    %22 = vector.broadcast %21 : vector<128x1xf32> to vector<128x16xf32>
    %23 = arith.mulf %9, %22 : vector<128x16xf32>
    %24 = vector.extract_strided_slice %23 {offsets = [0, 0], sizes = [128, 8], strides = [1, 1]} : vector<128x16xf32> to vector<128x8xf32>
    %25 = vector.extract_strided_slice %23 {offsets = [0, 8], sizes = [128, 8], strides = [1, 1]} : vector<128x16xf32> to vector<128x8xf32>
    %26 = arith.mulf %24, %2 : vector<128x8xf32>
    %27 = arith.mulf %25, %3 : vector<128x8xf32>
    %28 = arith.addf %26, %27 : vector<128x8xf32>
    %29 = arith.mulf %25, %2 : vector<128x8xf32>
    %30 = arith.mulf %24, %3 : vector<128x8xf32>
    %31 = arith.subf %29, %30 : vector<128x8xf32>
    %32 = tpu.concatenate %28, %31 in 1 : vector<128x8xf32>, vector<128x8xf32> -> vector<128x16xf32>
    %33 = arith.mulf %10, %10 : vector<128x16xf32>
    %cst_12 = arith.constant dense<0.000000e+00> : vector<128xf32>
    %34 = vector.multi_reduction <add>, %33, %cst_12 [1] : vector<128x16xf32> to vector<128xf32>
    %35 = vector.shape_cast %34 : vector<128xf32> to vector<128x1xf32>
    %cst_13 = arith.constant 1.600000e+01 : f32
    %36 = vector.broadcast %cst_13 : f32 to vector<128x1xf32>
    %37 = arith.divf %35, %36 : vector<128x1xf32>
    %cst_14 = arith.constant 1.1920929E-7 : f32
    %38 = vector.broadcast %cst_14 : f32 to vector<128x1xf32>
    %39 = arith.addf %37, %38 : vector<128x1xf32>
    %40 = math.rsqrt %39 : vector<128x1xf32>
    %cst_15 = arith.constant 1.000000e+00 : f32
    %41 = vector.broadcast %cst_15 : f32 to vector<128x1xf32>
    %42 = arith.mulf %40, %41 : vector<128x1xf32>
    %43 = vector.broadcast %42 : vector<128x1xf32> to vector<128x16xf32>
    %44 = arith.mulf %10, %43 : vector<128x16xf32>
    %45 = vector.extract_strided_slice %44 {offsets = [0, 0], sizes = [128, 8], strides = [1, 1]} : vector<128x16xf32> to vector<128x8xf32>
    %46 = vector.extract_strided_slice %44 {offsets = [0, 8], sizes = [128, 8], strides = [1, 1]} : vector<128x16xf32> to vector<128x8xf32>
    %47 = arith.mulf %45, %2 : vector<128x8xf32>
    %48 = arith.mulf %46, %3 : vector<128x8xf32>
    %49 = arith.addf %47, %48 : vector<128x8xf32>
    %50 = arith.mulf %46, %2 : vector<128x8xf32>
    %51 = arith.mulf %45, %3 : vector<128x8xf32>
    %52 = arith.subf %50, %51 : vector<128x8xf32>
    %53 = tpu.concatenate %49, %52 in 1 : vector<128x8xf32>, vector<128x8xf32> -> vector<128x16xf32>
    %cst_16 = arith.constant dense<0.000000e+00> : vector<128x128xf32>
    %54 = tpu.matmul %32, %53, %cst_16 {dimension_numbers = #tpu.dot_dimension_numbers<[1], [1], [0], [0], [0, 0, 1, 0], [], []>} : vector<128x16xf32>, vector<128x16xf32>, vector<128x128xf32> -> vector<128x128xf32>
    %cst_17 = arith.constant -1.000000e+30 : f32
    %55 = vector.broadcast %cst_17 : f32 to vector<128x128xf32>
    %56 = arith.select %8, %54, %55 : vector<128x128xi1>, vector<128x128xf32>
    %cst_18 = arith.constant dense<0xFF800000> : vector<128xf32>
    %57 = vector.multi_reduction <maximumf>, %56, %cst_18 [1] : vector<128x128xf32> to vector<128xf32>
    %58 = vector.shape_cast %57 : vector<128xf32> to vector<128x1xf32>
    %59 = vector.broadcast %58 : vector<128x1xf32> to vector<128x128xf32>
    %60 = arith.subf %56, %59 : vector<128x128xf32>
    %61 = math.exp %60 : vector<128x128xf32>
    %cst_19 = arith.constant dense<0.000000e+00> : vector<128xf32>
    %62 = vector.multi_reduction <add>, %61, %cst_19 [1] : vector<128x128xf32> to vector<128xf32>
    %63 = vector.shape_cast %62 : vector<128xf32> to vector<128x1xf32>
    %cst_20 = arith.constant dense<0.000000e+00> : vector<128x16xf32>
    %64 = tpu.matmul %61, %11, %cst_20 {dimension_numbers = #tpu.dot_dimension_numbers<[1], [0], [0], [1], [0, 0, 1, 1], [], []>} : vector<128x128xf32>, vector<128x16xf32>, vector<128x16xf32> -> vector<128x16xf32>
    %cst_21 = arith.constant 1.000000e+00 : f32
    %65 = vector.broadcast %cst_21 : f32 to vector<128x1xf32>
    %66 = arith.divf %65, %63 : vector<128x1xf32>
    %67 = vector.broadcast %66 : vector<128x1xf32> to vector<128x16xf32>
    %68 = arith.mulf %64, %67 : vector<128x16xf32>
    %69 = vector.extract_strided_slice %5 {offsets = [0, 16], sizes = [128, 16], strides = [1, 1]} : vector<128x192xf32> to vector<128x16xf32>
    %70 = vector.extract_strided_slice %5 {offsets = [0, 80], sizes = [128, 16], strides = [1, 1]} : vector<128x192xf32> to vector<128x16xf32>
    %71 = vector.extract_strided_slice %5 {offsets = [0, 144], sizes = [128, 16], strides = [1, 1]} : vector<128x192xf32> to vector<128x16xf32>
    %72 = arith.mulf %69, %69 : vector<128x16xf32>
    %cst_22 = arith.constant dense<0.000000e+00> : vector<128xf32>
    %73 = vector.multi_reduction <add>, %72, %cst_22 [1] : vector<128x16xf32> to vector<128xf32>
    %74 = vector.shape_cast %73 : vector<128xf32> to vector<128x1xf32>
    %cst_23 = arith.constant 1.600000e+01 : f32
    %75 = vector.broadcast %cst_23 : f32 to vector<128x1xf32>
    %76 = arith.divf %74, %75 : vector<128x1xf32>
    %cst_24 = arith.constant 1.1920929E-7 : f32
    %77 = vector.broadcast %cst_24 : f32 to vector<128x1xf32>
    %78 = arith.addf %76, %77 : vector<128x1xf32>
    %79 = math.rsqrt %78 : vector<128x1xf32>
    %cst_25 = arith.constant 2.500000e-01 : f32
    %80 = vector.broadcast %cst_25 : f32 to vector<128x1xf32>
    %81 = arith.mulf %79, %80 : vector<128x1xf32>
    %82 = vector.broadcast %81 : vector<128x1xf32> to vector<128x16xf32>
    %83 = arith.mulf %69, %82 : vector<128x16xf32>
    %84 = vector.extract_strided_slice %83 {offsets = [0, 0], sizes = [128, 8], strides = [1, 1]} : vector<128x16xf32> to vector<128x8xf32>
    %85 = vector.extract_strided_slice %83 {offsets = [0, 8], sizes = [128, 8], strides = [1, 1]} : vector<128x16xf32> to vector<128x8xf32>
    %86 = arith.mulf %84, %2 : vector<128x8xf32>
    %87 = arith.mulf %85, %3 : vector<128x8xf32>
    %88 = arith.addf %86, %87 : vector<128x8xf32>
    %89 = arith.mulf %85, %2 : vector<128x8xf32>
    %90 = arith.mulf %84, %3 : vector<128x8xf32>
    %91 = arith.subf %89, %90 : vector<128x8xf32>
    %92 = tpu.concatenate %88, %91 in 1 : vector<128x8xf32>, vector<128x8xf32> -> vector<128x16xf32>
    %93 = arith.mulf %70, %70 : vector<128x16xf32>
    %cst_26 = arith.constant dense<0.000000e+00> : vector<128xf32>
    %94 = vector.multi_reduction <add>, %93, %cst_26 [1] : vector<128x16xf32> to vector<128xf32>
    %95 = vector.shape_cast %94 : vector<128xf32> to vector<128x1xf32>
    %cst_27 = arith.constant 1.600000e+01 : f32
    %96 = vector.broadcast %cst_27 : f32 to vector<128x1xf32>
    %97 = arith.divf %95, %96 : vector<128x1xf32>
    %cst_28 = arith.constant 1.1920929E-7 : f32
    %98 = vector.broadcast %cst_28 : f32 to vector<128x1xf32>
    %99 = arith.addf %97, %98 : vector<128x1xf32>
    %100 = math.rsqrt %99 : vector<128x1xf32>
    %cst_29 = arith.constant 1.000000e+00 : f32
    %101 = vector.broadcast %cst_29 : f32 to vector<128x1xf32>
    %102 = arith.mulf %100, %101 : vector<128x1xf32>
    %103 = vector.broadcast %102 : vector<128x1xf32> to vector<128x16xf32>
    %104 = arith.mulf %70, %103 : vector<128x16xf32>
    %105 = vector.extract_strided_slice %104 {offsets = [0, 0], sizes = [128, 8], strides = [1, 1]} : vector<128x16xf32> to vector<128x8xf32>
    %106 = vector.extract_strided_slice %104 {offsets = [0, 8], sizes = [128, 8], strides = [1, 1]} : vector<128x16xf32> to vector<128x8xf32>
    %107 = arith.mulf %105, %2 : vector<128x8xf32>
    %108 = arith.mulf %106, %3 : vector<128x8xf32>
    %109 = arith.addf %107, %108 : vector<128x8xf32>
    %110 = arith.mulf %106, %2 : vector<128x8xf32>
    %111 = arith.mulf %105, %3 : vector<128x8xf32>
    %112 = arith.subf %110, %111 : vector<128x8xf32>
    %113 = tpu.concatenate %109, %112 in 1 : vector<128x8xf32>, vector<128x8xf32> -> vector<128x16xf32>
    %cst_30 = arith.constant dense<0.000000e+00> : vector<128x128xf32>
    %114 = tpu.matmul %92, %113, %cst_30 {dimension_numbers = #tpu.dot_dimension_numbers<[1], [1], [0], [0], [0, 0, 1, 0], [], []>} : vector<128x16xf32>, vector<128x16xf32>, vector<128x128xf32> -> vector<128x128xf32>
    %cst_31 = arith.constant -1.000000e+30 : f32
    %115 = vector.broadcast %cst_31 : f32 to vector<128x128xf32>
    %116 = arith.select %8, %114, %115 : vector<128x128xi1>, vector<128x128xf32>
    %cst_32 = arith.constant dense<0xFF800000> : vector<128xf32>
    %117 = vector.multi_reduction <maximumf>, %116, %cst_32 [1] : vector<128x128xf32> to vector<128xf32>
    %118 = vector.shape_cast %117 : vector<128xf32> to vector<128x1xf32>
    %119 = vector.broadcast %118 : vector<128x1xf32> to vector<128x128xf32>
    %120 = arith.subf %116, %119 : vector<128x128xf32>
    %121 = math.exp %120 : vector<128x128xf32>
    %cst_33 = arith.constant dense<0.000000e+00> : vector<128xf32>
    %122 = vector.multi_reduction <add>, %121, %cst_33 [1] : vector<128x128xf32> to vector<128xf32>
    %123 = vector.shape_cast %122 : vector<128xf32> to vector<128x1xf32>
    %cst_34 = arith.constant dense<0.000000e+00> : vector<128x16xf32>
    %124 = tpu.matmul %121, %71, %cst_34 {dimension_numbers = #tpu.dot_dimension_numbers<[1], [0], [0], [1], [0, 0, 1, 1], [], []>} : vector<128x128xf32>, vector<128x16xf32>, vector<128x16xf32> -> vector<128x16xf32>
    %cst_35 = arith.constant 1.000000e+00 : f32
    %125 = vector.broadcast %cst_35 : f32 to vector<128x1xf32>
    %126 = arith.divf %125, %123 : vector<128x1xf32>
    %127 = vector.broadcast %126 : vector<128x1xf32> to vector<128x16xf32>
    %128 = arith.mulf %124, %127 : vector<128x16xf32>
    %129 = vector.extract_strided_slice %5 {offsets = [0, 32], sizes = [128, 16], strides = [1, 1]} : vector<128x192xf32> to vector<128x16xf32>
    %130 = vector.extract_strided_slice %5 {offsets = [0, 96], sizes = [128, 16], strides = [1, 1]} : vector<128x192xf32> to vector<128x16xf32>
    %131 = vector.extract_strided_slice %5 {offsets = [0, 160], sizes = [128, 16], strides = [1, 1]} : vector<128x192xf32> to vector<128x16xf32>
    %132 = arith.mulf %129, %129 : vector<128x16xf32>
    %cst_36 = arith.constant dense<0.000000e+00> : vector<128xf32>
    %133 = vector.multi_reduction <add>, %132, %cst_36 [1] : vector<128x16xf32> to vector<128xf32>
    %134 = vector.shape_cast %133 : vector<128xf32> to vector<128x1xf32>
    %cst_37 = arith.constant 1.600000e+01 : f32
    %135 = vector.broadcast %cst_37 : f32 to vector<128x1xf32>
    %136 = arith.divf %134, %135 : vector<128x1xf32>
    %cst_38 = arith.constant 1.1920929E-7 : f32
    %137 = vector.broadcast %cst_38 : f32 to vector<128x1xf32>
    %138 = arith.addf %136, %137 : vector<128x1xf32>
    %139 = math.rsqrt %138 : vector<128x1xf32>
    %cst_39 = arith.constant 2.500000e-01 : f32
    %140 = vector.broadcast %cst_39 : f32 to vector<128x1xf32>
    %141 = arith.mulf %139, %140 : vector<128x1xf32>
    %142 = vector.broadcast %141 : vector<128x1xf32> to vector<128x16xf32>
    %143 = arith.mulf %129, %142 : vector<128x16xf32>
    %144 = vector.extract_strided_slice %143 {offsets = [0, 0], sizes = [128, 8], strides = [1, 1]} : vector<128x16xf32> to vector<128x8xf32>
    %145 = vector.extract_strided_slice %143 {offsets = [0, 8], sizes = [128, 8], strides = [1, 1]} : vector<128x16xf32> to vector<128x8xf32>
    %146 = arith.mulf %144, %2 : vector<128x8xf32>
    %147 = arith.mulf %145, %3 : vector<128x8xf32>
    %148 = arith.addf %146, %147 : vector<128x8xf32>
    %149 = arith.mulf %145, %2 : vector<128x8xf32>
    %150 = arith.mulf %144, %3 : vector<128x8xf32>
    %151 = arith.subf %149, %150 : vector<128x8xf32>
    %152 = tpu.concatenate %148, %151 in 1 : vector<128x8xf32>, vector<128x8xf32> -> vector<128x16xf32>
    %153 = arith.mulf %130, %130 : vector<128x16xf32>
    %cst_40 = arith.constant dense<0.000000e+00> : vector<128xf32>
    %154 = vector.multi_reduction <add>, %153, %cst_40 [1] : vector<128x16xf32> to vector<128xf32>
    %155 = vector.shape_cast %154 : vector<128xf32> to vector<128x1xf32>
    %cst_41 = arith.constant 1.600000e+01 : f32
    %156 = vector.broadcast %cst_41 : f32 to vector<128x1xf32>
    %157 = arith.divf %155, %156 : vector<128x1xf32>
    %cst_42 = arith.constant 1.1920929E-7 : f32
    %158 = vector.broadcast %cst_42 : f32 to vector<128x1xf32>
    %159 = arith.addf %157, %158 : vector<128x1xf32>
    %160 = math.rsqrt %159 : vector<128x1xf32>
    %cst_43 = arith.constant 1.000000e+00 : f32
    %161 = vector.broadcast %cst_43 : f32 to vector<128x1xf32>
    %162 = arith.mulf %160, %161 : vector<128x1xf32>
    %163 = vector.broadcast %162 : vector<128x1xf32> to vector<128x16xf32>
    %164 = arith.mulf %130, %163 : vector<128x16xf32>
    %165 = vector.extract_strided_slice %164 {offsets = [0, 0], sizes = [128, 8], strides = [1, 1]} : vector<128x16xf32> to vector<128x8xf32>
    %166 = vector.extract_strided_slice %164 {offsets = [0, 8], sizes = [128, 8], strides = [1, 1]} : vector<128x16xf32> to vector<128x8xf32>
    %167 = arith.mulf %165, %2 : vector<128x8xf32>
    %168 = arith.mulf %166, %3 : vector<128x8xf32>
    %169 = arith.addf %167, %168 : vector<128x8xf32>
    %170 = arith.mulf %166, %2 : vector<128x8xf32>
    %171 = arith.mulf %165, %3 : vector<128x8xf32>
    %172 = arith.subf %170, %171 : vector<128x8xf32>
    %173 = tpu.concatenate %169, %172 in 1 : vector<128x8xf32>, vector<128x8xf32> -> vector<128x16xf32>
    %cst_44 = arith.constant dense<0.000000e+00> : vector<128x128xf32>
    %174 = tpu.matmul %152, %173, %cst_44 {dimension_numbers = #tpu.dot_dimension_numbers<[1], [1], [0], [0], [0, 0, 1, 0], [], []>} : vector<128x16xf32>, vector<128x16xf32>, vector<128x128xf32> -> vector<128x128xf32>
    %cst_45 = arith.constant -1.000000e+30 : f32
    %175 = vector.broadcast %cst_45 : f32 to vector<128x128xf32>
    %176 = arith.select %8, %174, %175 : vector<128x128xi1>, vector<128x128xf32>
    %cst_46 = arith.constant dense<0xFF800000> : vector<128xf32>
    %177 = vector.multi_reduction <maximumf>, %176, %cst_46 [1] : vector<128x128xf32> to vector<128xf32>
    %178 = vector.shape_cast %177 : vector<128xf32> to vector<128x1xf32>
    %179 = vector.broadcast %178 : vector<128x1xf32> to vector<128x128xf32>
    %180 = arith.subf %176, %179 : vector<128x128xf32>
    %181 = math.exp %180 : vector<128x128xf32>
    %cst_47 = arith.constant dense<0.000000e+00> : vector<128xf32>
    %182 = vector.multi_reduction <add>, %181, %cst_47 [1] : vector<128x128xf32> to vector<128xf32>
    %183 = vector.shape_cast %182 : vector<128xf32> to vector<128x1xf32>
    %cst_48 = arith.constant dense<0.000000e+00> : vector<128x16xf32>
    %184 = tpu.matmul %181, %131, %cst_48 {dimension_numbers = #tpu.dot_dimension_numbers<[1], [0], [0], [1], [0, 0, 1, 1], [], []>} : vector<128x128xf32>, vector<128x16xf32>, vector<128x16xf32> -> vector<128x16xf32>
    %cst_49 = arith.constant 1.000000e+00 : f32
    %185 = vector.broadcast %cst_49 : f32 to vector<128x1xf32>
    %186 = arith.divf %185, %183 : vector<128x1xf32>
    %187 = vector.broadcast %186 : vector<128x1xf32> to vector<128x16xf32>
    %188 = arith.mulf %184, %187 : vector<128x16xf32>
    %189 = vector.extract_strided_slice %5 {offsets = [0, 48], sizes = [128, 16], strides = [1, 1]} : vector<128x192xf32> to vector<128x16xf32>
    %190 = vector.extract_strided_slice %5 {offsets = [0, 112], sizes = [128, 16], strides = [1, 1]} : vector<128x192xf32> to vector<128x16xf32>
    %191 = vector.extract_strided_slice %5 {offsets = [0, 176], sizes = [128, 16], strides = [1, 1]} : vector<128x192xf32> to vector<128x16xf32>
    %192 = arith.mulf %189, %189 : vector<128x16xf32>
    %cst_50 = arith.constant dense<0.000000e+00> : vector<128xf32>
    %193 = vector.multi_reduction <add>, %192, %cst_50 [1] : vector<128x16xf32> to vector<128xf32>
    %194 = vector.shape_cast %193 : vector<128xf32> to vector<128x1xf32>
    %cst_51 = arith.constant 1.600000e+01 : f32
    %195 = vector.broadcast %cst_51 : f32 to vector<128x1xf32>
    %196 = arith.divf %194, %195 : vector<128x1xf32>
    %cst_52 = arith.constant 1.1920929E-7 : f32
    %197 = vector.broadcast %cst_52 : f32 to vector<128x1xf32>
    %198 = arith.addf %196, %197 : vector<128x1xf32>
    %199 = math.rsqrt %198 : vector<128x1xf32>
    %cst_53 = arith.constant 2.500000e-01 : f32
    %200 = vector.broadcast %cst_53 : f32 to vector<128x1xf32>
    %201 = arith.mulf %199, %200 : vector<128x1xf32>
    %202 = vector.broadcast %201 : vector<128x1xf32> to vector<128x16xf32>
    %203 = arith.mulf %189, %202 : vector<128x16xf32>
    %204 = vector.extract_strided_slice %203 {offsets = [0, 0], sizes = [128, 8], strides = [1, 1]} : vector<128x16xf32> to vector<128x8xf32>
    %205 = vector.extract_strided_slice %203 {offsets = [0, 8], sizes = [128, 8], strides = [1, 1]} : vector<128x16xf32> to vector<128x8xf32>
    %206 = arith.mulf %204, %2 : vector<128x8xf32>
    %207 = arith.mulf %205, %3 : vector<128x8xf32>
    %208 = arith.addf %206, %207 : vector<128x8xf32>
    %209 = arith.mulf %205, %2 : vector<128x8xf32>
    %210 = arith.mulf %204, %3 : vector<128x8xf32>
    %211 = arith.subf %209, %210 : vector<128x8xf32>
    %212 = tpu.concatenate %208, %211 in 1 : vector<128x8xf32>, vector<128x8xf32> -> vector<128x16xf32>
    %213 = arith.mulf %190, %190 : vector<128x16xf32>
    %cst_54 = arith.constant dense<0.000000e+00> : vector<128xf32>
    %214 = vector.multi_reduction <add>, %213, %cst_54 [1] : vector<128x16xf32> to vector<128xf32>
    %215 = vector.shape_cast %214 : vector<128xf32> to vector<128x1xf32>
    %cst_55 = arith.constant 1.600000e+01 : f32
    %216 = vector.broadcast %cst_55 : f32 to vector<128x1xf32>
    %217 = arith.divf %215, %216 : vector<128x1xf32>
    %cst_56 = arith.constant 1.1920929E-7 : f32
    %218 = vector.broadcast %cst_56 : f32 to vector<128x1xf32>
    %219 = arith.addf %217, %218 : vector<128x1xf32>
    %220 = math.rsqrt %219 : vector<128x1xf32>
    %cst_57 = arith.constant 1.000000e+00 : f32
    %221 = vector.broadcast %cst_57 : f32 to vector<128x1xf32>
    %222 = arith.mulf %220, %221 : vector<128x1xf32>
    %223 = vector.broadcast %222 : vector<128x1xf32> to vector<128x16xf32>
    %224 = arith.mulf %190, %223 : vector<128x16xf32>
    %225 = vector.extract_strided_slice %224 {offsets = [0, 0], sizes = [128, 8], strides = [1, 1]} : vector<128x16xf32> to vector<128x8xf32>
    %226 = vector.extract_strided_slice %224 {offsets = [0, 8], sizes = [128, 8], strides = [1, 1]} : vector<128x16xf32> to vector<128x8xf32>
    %227 = arith.mulf %225, %2 : vector<128x8xf32>
    %228 = arith.mulf %226, %3 : vector<128x8xf32>
    %229 = arith.addf %227, %228 : vector<128x8xf32>
    %230 = arith.mulf %226, %2 : vector<128x8xf32>
    %231 = arith.mulf %225, %3 : vector<128x8xf32>
    %232 = arith.subf %230, %231 : vector<128x8xf32>
    %233 = tpu.concatenate %229, %232 in 1 : vector<128x8xf32>, vector<128x8xf32> -> vector<128x16xf32>
    %cst_58 = arith.constant dense<0.000000e+00> : vector<128x128xf32>
    %234 = tpu.matmul %212, %233, %cst_58 {dimension_numbers = #tpu.dot_dimension_numbers<[1], [1], [0], [0], [0, 0, 1, 0], [], []>} : vector<128x16xf32>, vector<128x16xf32>, vector<128x128xf32> -> vector<128x128xf32>
    %cst_59 = arith.constant -1.000000e+30 : f32
    %235 = vector.broadcast %cst_59 : f32 to vector<128x128xf32>
    %236 = arith.select %8, %234, %235 : vector<128x128xi1>, vector<128x128xf32>
    %cst_60 = arith.constant dense<0xFF800000> : vector<128xf32>
    %237 = vector.multi_reduction <maximumf>, %236, %cst_60 [1] : vector<128x128xf32> to vector<128xf32>
    %238 = vector.shape_cast %237 : vector<128xf32> to vector<128x1xf32>
    %239 = vector.broadcast %238 : vector<128x1xf32> to vector<128x128xf32>
    %240 = arith.subf %236, %239 : vector<128x128xf32>
    %241 = math.exp %240 : vector<128x128xf32>
    %cst_61 = arith.constant dense<0.000000e+00> : vector<128xf32>
    %242 = vector.multi_reduction <add>, %241, %cst_61 [1] : vector<128x128xf32> to vector<128xf32>
    %243 = vector.shape_cast %242 : vector<128xf32> to vector<128x1xf32>
    %cst_62 = arith.constant dense<0.000000e+00> : vector<128x16xf32>
    %244 = tpu.matmul %241, %191, %cst_62 {dimension_numbers = #tpu.dot_dimension_numbers<[1], [0], [0], [1], [0, 0, 1, 1], [], []>} : vector<128x128xf32>, vector<128x16xf32>, vector<128x16xf32> -> vector<128x16xf32>
    %cst_63 = arith.constant 1.000000e+00 : f32
    %245 = vector.broadcast %cst_63 : f32 to vector<128x1xf32>
    %246 = arith.divf %245, %243 : vector<128x1xf32>
    %247 = vector.broadcast %246 : vector<128x1xf32> to vector<128x16xf32>
    %248 = arith.mulf %244, %247 : vector<128x16xf32>
    %249 = tpu.concatenate %68, %128, %188, %248 in 1 : vector<128x16xf32>, vector<128x16xf32>, vector<128x16xf32>, vector<128x16xf32> -> vector<128x64xf32>
    %c0_64 = arith.constant 0 : index
    %c0_65 = arith.constant 0 : index
    %250 = vector.load %arg3[%c0_64, %c0_65] : memref<64x64xf32, #tpu.memory_space<vmem>>, vector<64x64xf32>
    %cst_66 = arith.constant dense<0.000000e+00> : vector<128x64xf32>
    %251 = tpu.matmul %249, %250, %cst_66 {dimension_numbers = #tpu.dot_dimension_numbers<[1], [0], [0], [1], [0, 0, 1, 1], [], []>} : vector<128x64xf32>, vector<64x64xf32>, vector<128x64xf32> -> vector<128x64xf32>
    %c0_67 = arith.constant 0 : index
    %c0_68 = arith.constant 0 : index
    %c0_69 = arith.constant 0 : index
    %252 = vector.load %arg6[%c0_67, %c0_68, %c0_69] : memref<1x128x64xf32, #tpu.memory_space<vmem>>, vector<1x128x64xf32>
    %253 = vector.shape_cast %252 : vector<1x128x64xf32> to vector<128x64xf32>
    %254 = vector.shape_cast %251 : vector<128x64xf32> to vector<1x128x64xf32>
    tpu.vector_store %arg6[%c0_67, %c0_68, %c0_69], %254 {strides = array<i32>} : memref<1x128x64xf32, #tpu.memory_space<vmem>>, vector<1x128x64xf32>,
    return
  }
  func.func @transform_0(%arg0: i32) -> (i32, i32, i32) {
    %c0_i32 = arith.constant 0 : i32
    %c0_i32_0 = arith.constant 0 : i32
    %c0_i32_1 = arith.constant 0 : i32
    return %arg0, %c0_i32, %c0_i32_0 : i32, i32, i32
  }
  func.func @transform_1(%arg0: i32) -> (i32, i32) {
    %c0_i32 = arith.constant 0 : i32
    %c0_i32_0 = arith.constant 0 : i32
    %c0_i32_1 = arith.constant 0 : i32
    return %c0_i32, %c0_i32_0 : i32, i32
  }
  func.func @transform_2(%arg0: i32) -> (i32, i32) {
    %c0_i32 = arith.constant 0 : i32
    %c0_i32_0 = arith.constant 0 : i32
    %c0_i32_1 = arith.constant 0 : i32
    return %c0_i32, %c0_i32_0 : i32, i32
  }
  func.func @transform_3(%arg0: i32) -> (i32, i32) {
    %c0_i32 = arith.constant 0 : i32
    %c0_i32_0 = arith.constant 0 : i32
    %c0_i32_1 = arith.constant 0 : i32
    return %c0_i32, %c0_i32_0 : i32, i32
  }
  func.func @transform_4(%arg0: i32) -> (i32, i32) {
    %c0_i32 = arith.constant 0 : i32
    %c0_i32_0 = arith.constant 0 : i32
    %c0_i32_1 = arith.constant 0 : i32
    return %c0_i32, %c0_i32_0 : i32, i32
  }
  func.func @transform_5(%arg0: i32) -> (i32, i32, i32) {
    %c0_i32 = arith.constant 0 : i32
    %c0_i32_0 = arith.constant 0 : i32
    %c0_i32_1 = arith.constant 0 : i32
    return %arg0, %c0_i32, %c0_i32_0 : i32, i32, i32
  }
}

</mosaic_0001>

<bundles_post_ra>
// kernel: tpu_custom_call.1
= control target key start
LH: loop header
LB: loop body
LE: loop exit
PB: predicated region body
PF: predicated region fallthrough
CT: control target
= control target key end

     0   :  { %s11578_s18 = smov 0   ;;  %s18751_s0 = inlined_call_operand.vmem [shape: f32[2,128,64], index: 0, kind: input, shape index: {}]   ;;  %s18752_s1 = inlined_call_operand.vmem [shape: f32[64,192], index: 1, kind: input, shape index: {}]   ;;  %s18753_s2 = inlined_call_operand.vmem [shape: f32[64,64], index: 2, kind: input, shape index: {}]   ;;  %s18754_s3 = inlined_call_operand.vmem [shape: f32[128,8], index: 3, kind: input, shape index: {}]   ;;  %s18755_s4 = inlined_call_operand.vmem [shape: f32[128,8], index: 4, kind: input, shape index: {}]   ;;  %s18756_s5 = inlined_call_operand.vmem [shape: f32[2,128,64], index: 5, kind: output, shape index: {}]  }
   0x1 LB: > { %s9075_s19 = sadd.s32 4294967295, %s11530_s18   ;;  %p9079_p0 = scmp.ge.s32.totalorder %s11530_s18, 1  ;;  %s11530_s18 = sphi %s11578_s18, %s15_s18  }
   0x2   : > { %p187_p1 = scmp.lt.s32.totalorder %s11530_s18, 3 }
   0x4   : > { %p188_p2 = pnand %p9079_p0, %p187_p1 }
   0x6   : > { %191 = sbr.rel (%p188_p2) target bundleno = 7151 (0x1bef), region = 40 }
   0xd   : > { %v274_v0 = vld [vmem:[%s18752_s1 + $0x8] sm:$0xff]  ;;  %v276_v1 = vld [vmem:[%s18752_s1 + $0x18] sm:$0xff]  ;;  %v273_v2 = vld [vmem:[%s18752_s1] sm:$0xff]  ;;  %v11532_v7 = vmov 0.0   ;;  %p215_p3 = scmp.lt.s32.totalorder %s9075_s19, 1  ;;  %s11533_s27 = smov 8  }
   0xe   : > { %v10016_v3 = vpack.c.bf16 %v276_v1, %v274_v0  ;;  %v275_v4 = vld [vmem:[%s18752_s1 + $0x10] sm:$0xff]  ;;  %v278_v5 = vld [vmem:[%s18752_s1 + $0x28] sm:$0xff]  ;;  %v280_v6 = vld [vmem:[%s18752_s1 + $0x38] sm:$0xff]  ;;  %402 = vmatprep.mubr.f32.mxu0 %v11532_v7  ;;  %vm18903_vm0 = vcmask 523264   ;;  %s11534_s11 = smov 64   ;;  %s11535_s12 = smov 72  }
   0xf   : > { %v10018_v8 = vpack.c.bf16 %v275_v4, %v273_v2  ;;  %v10020_v9 = vpack.c.bf16 %v280_v6, %v278_v5  ;;  %v277_v10 = vld [vmem:[%s18752_s1 + $0x20] sm:$0xff]  ;;  %v279_v11 = vld [vmem:[%s18752_s1 + $0x30] sm:$0xff]  ;;  %v282_v12 = vld [vmem:[%s18752_s1 + $0x48] sm:$0xff]  ;;  %s20318_s19 = smov (!%p215_p3, %s9075_s19), 1  ;;  %vm550_vm1 = vcmask 130048   ;;  %s11537_s14 = smov 120  }
  0x10   : > { %10017 = vmatprep.subr.bf16.mxu0 %v10016_v3  ;;  %v284_v13 = vld [vmem:[%s18752_s1 + $0x58] sm:$0xff]  ;;  %v10022_v14 = vpack.c.bf16 %v279_v11, %v277_v10  ;;  %v281_v16 = vld [vmem:[%s18752_s1 + $0x40] sm:$0xff]  ;;  %v283_v17 = vld [vmem:[%s18752_s1 + $0x50] sm:$0xff]  ;;  %s9246_s13 = sshll.u32 %s20318_s19, 7  ;;  %vm1032_vm2 = vcmask 64512   ;;  %s11538_s8 = smov 16  }
  0x11   : > { %10019 = vmatpush1.bf16.msra.mxu0 %v10018_v8  ;;  %v10024_v15 = vpack.c.bf16 %v284_v13, %v282_v12  ;;  %v11628_v18 = vld [vmem:[%s18755_s4 + $0x8] sm:$0xff]  ;;  %v288_v20 = vld [vmem:[%s18752_s1 + $0x78] sm:$0xff]  ;;  %v11645_v21 = vld [vmem:[%s18755_s4 + $0x10] sm:$0xff]  ;;  %v10026_v23 = vpack.c.bf16 %v283_v17, %v281_v16  ;;  %s11680_s20 = scalar_lea.vmem %s18751_s0, %s9246_s13  ;;  %s11539_s24 = smov 24  }
  0x12   : > { %10021 = vmatprep.subr.bf16.mxu0 %v10020_v9  ;;  %v286_v19 = vld [vmem:[%s18752_s1 + $0x68] sm:$0xff]  ;;  %714 = vrot.lane.b32.xlu1 %v11628_v18, %s11533_s27  ;;  %v11650_v22 = vld [vmem:[%s18755_s4] sm:$0xff]  ;;  %v287_v26 = vld [vmem:[%s18752_s1 + $0x70] sm:$0xff]  ;;  %s11540_s29 = smov 48   ;;  %s11542_s26 = smov 88  }
  0x13   : > { %712 = vrot.lane.b32.xlu0 %v11650_v22, %s11533_s27  ;;  %v10028_v24 = vpack.c.bf16 %v288_v20, %v286_v19  ;;  %v285_v25 = vld [vmem:[%s18752_s1 + $0x60] sm:$0xff]  ;;  %v11671_v28 = vld [vmem:[%s18755_s4 + $0x18] sm:$0xff]  ;;  %v11685_v30 = vld [vmem:[%s18755_s4 + $0x30] sm:$0xff]  ;;  %s11543_s6 = smov 96   ;;  %s11544_s10 = smov 32  }
  0x14   : > { %v11663_v27 = vld [vmem:[%s18755_s4 + $0x20] sm:$0xff]  ;;  %v10030_v29 = vpack.c.bf16 %v287_v26, %v285_v25  ;;  %v11692_v31 = vld [vmem:[%s18755_s4 + $0x28] sm:$0xff]  ;;  %v11708_v34 = vld [vmem:[%s18755_s4 + $0x38] sm:$0xff]  ;;  %s11545_s15 = smov 40   ;;  %s11547_s16 = smov 56  }
  0x15   : > { %10023 = vmatpush1.bf16.msra.mxu0 %v10022_v14  ;;  %v225_v32 = vld [vmem:[%s11680_s20] sm:$0xff]  ;;  %v226_v35 = vld [vmem:[%s11680_s20 + $0x8] sm:$0xff]  ;;  %v11717_v36 = vld [vmem:[%s18755_s4 + $0x50] sm:$0xff] }
  0x16   : > { %10025 = vmatprep.subr.bf16.mxu0 %v10024_v15  ;;  %716 = vrot.lane.b32.xlu1 %v11645_v21, %s11533_s27  ;;  %v11700_v33 = vld [vmem:[%s18755_s4 + $0x40] sm:$0xff]  ;;  %v11725_v37 = vld [vmem:[%s18755_s4 + $0x48] sm:$0xff]  ;;  %v227_v38 = vld [vmem:[%s11680_s20 + $0x10] sm:$0xff] }
  0x17   : > { %720 = vrot.lane.b32.xlu0 %v11663_v27, %s11533_s27  ;;  %v11734_v39 = vld [vmem:[%s18755_s4 + $0x60] sm:$0xff]  ;;  %v11742_v40 = vld [vmem:[%s18755_s4 + $0x58] sm:$0xff]  ;;  %v11751_v42 = vld [vmem:[%s18755_s4 + $0x70] sm:$0xff] }
  0x18   : > { %v228_v41 = vld [vmem:[%s11680_s20 + $0x18] sm:$0xff]  ;;  %v11759_v43 = vld [vmem:[%s18755_s4 + $0x68] sm:$0xff]  ;;  %v229_v44 = vld [vmem:[%s11680_s20 + $0x20] sm:$0xff] }
  0x19   : > { %10027 = vmatpush1.bf16.msra.mxu0 %v10026_v23  ;;  %v11768_v45 = vld [vmem:[%s18754_s3] sm:$0xff]  ;;  %v11775_v46 = vld [vmem:[%s18755_s4 + $0x78] sm:$0xff]  ;;  %v230_v47 = vld [vmem:[%s11680_s20 + $0x28] sm:$0xff] }
  0x1a   : > { %10029 = vmatprep.subr.bf16.mxu0 %v10028_v24  ;;  %718 = vrot.lane.b32.xlu1 %v11671_v28, %s11533_s27  ;;  %v11785_v48 = vld [vmem:[%s18754_s3 + $0x10] sm:$0xff]  ;;  %v11792_v49 = vld [vmem:[%s18754_s3 + $0x8] sm:$0xff]  ;;  %v11802_v51 = vld [vmem:[%s18754_s3 + $0x20] sm:$0xff] }
  0x1b   : > { %724 = vrot.lane.b32.xlu0 %v11685_v30, %s11533_s27  ;;  %v231_v50 = vld [vmem:[%s11680_s20 + $0x30] sm:$0xff]  ;;  %v11809_v52 = vld [vmem:[%s18754_s3 + $0x18] sm:$0xff]  ;;  %v11826_v55 = vld [vmem:[%s18754_s3 + $0x28] sm:$0xff] }
  0x1c   : > { %v232_v53 = vld [vmem:[%s11680_s20 + $0x38] sm:$0xff]  ;;  %v11819_v54 = vld [vmem:[%s18754_s3 + $0x30] sm:$0xff]  ;;  %v233_v56 = vld [vmem:[%s11680_s20 + $0x40] sm:$0xff] }
  0x1d   : > { %10031 = vmatpush1.bf16.msra.mxu0 %v10030_v29  ;;  %v11836_v57 = vld [vmem:[%s18754_s3 + $0x40] sm:$0xff]  ;;  %v11843_v58 = vld [vmem:[%s18754_s3 + $0x38] sm:$0xff]  ;;  %v11852_v59 = vld [vmem:[%s18754_s3 + $0x50] sm:$0xff] }
  0x1e   : > { %722 = vrot.lane.b32.xlu1 %v11692_v31, %s11533_s27  ;;  %v11859_v60 = vld [vmem:[%s18754_s3 + $0x48] sm:$0xff]  ;;  %v253_v61 = vld [vmem:[%s18754_s3 + $0x60] sm:$0xff]  ;;  %v11871_v62 = vld [vmem:[%s18754_s3 + $0x58] sm:$0xff] }
  0x1f   : > { %728 = vrot.lane.b32.xlu0 %v11700_v33, %s11533_s27  ;;  %v255_v63 = vld [vmem:[%s18754_s3 + $0x70] sm:$0xff]  ;;  %v11882_v0 = vld [vmem:[%s18754_s3 + $0x68] sm:$0xff]  ;;  %v11890_v1 = vld [vmem:[%s18754_s3 + $0x78] sm:$0xff] }
  0x20   : > { %9084 = vmatmul.mubr.msk.f32.vlgmr.msra.gmra.mrb[0].mxu0 %vm18903_vm0, %v225_v32  ;;  %v234_v2 = vld [vmem:[%s11680_s20 + $0x48] sm:$0xff]  ;;  %v235_v3 = vld [vmem:[%s11680_s20 + $0x50] sm:$0xff]  ;;  %v236_v4 = vld [vmem:[%s11680_s20 + $0x58] sm:$0xff] }
  0x21   : > { %408 = vmatprep.mubr.f32.mxu0 %v11532_v7  ;;  %v237_v5 = vld [vmem:[%s11680_s20 + $0x60] sm:$0xff]  ;;  %v238_v6 = vld [vmem:[%s11680_s20 + $0x68] sm:$0xff]  ;;  %v239_v9 = vld [vmem:[%s11680_s20 + $0x70] sm:$0xff] }
  0x22   : > { %726 = vrot.lane.b32.xlu1 %v11708_v34, %s11533_s27  ;;  %v240_v29 = vld [vmem:[%s11680_s20 + $0x78] sm:$0xff]  ;;  %s11536_s20 = smov 112   ;;  %vm13266_vm3 = vmpackc.low %vm550_vm1, %vm550_vm1 }
  0x23   : > { %732 = vrot.lane.b32.xlu0 %v11717_v36, %s11533_s27 }
  0x24   : > { %9085 = vmatmul.mubr.msk.f32.gmra.mrb[2].mxu0 %vm18903_vm0, %v226_v35 }
  0x25   : > { %414 = vmatprep.mubr.f32.mxu0 %v11532_v7 }
  0x26   : > { %730 = vrot.lane.b32.xlu1 %v11725_v37, %s11533_s27 }
  0x27   : > { %736 = vrot.lane.b32.xlu0 %v11734_v39, %s11533_s27 }
  0x28   : > { %9086 = vmatmul.mubr.msk.f32.gmra.mrb[4].mxu0 %vm18903_vm0, %v227_v38 }
  0x29   : > { %420 = vmatprep.mubr.f32.mxu0 %v11532_v7 }
  0x2a   : > { %734 = vrot.lane.b32.xlu1 %v11742_v40, %s11533_s27 }
  0x2b   : > { %740 = vrot.lane.b32.xlu0 %v11751_v42, %s11533_s27 }
  0x2c   : > { %9087 = vmatmul.mubr.msk.f32.gmra.mrb[6].mxu0 %vm18903_vm0, %v228_v41 }
  0x2d   : > { %426 = vmatprep.mubr.f32.mxu0 %v11532_v7 }
  0x2e   : > { %738 = vrot.lane.b32.xlu1 %v11759_v43, %s11533_s27 }
  0x2f   : > { %872 = vrot.lane.b32.xlu0 %v11768_v45, %s11533_s27 }
  0x30   : > { %9088 = vmatmul.mubr.msk.f32.gmra.mrb[8].mxu0 %vm18903_vm0, %v229_v44 }
  0x31   : > { %432 = vmatprep.mubr.f32.mxu0 %v11532_v7 }
  0x32   : > { %742 = vrot.lane.b32.xlu1 %v11775_v46, %s11533_s27 }
  0x33   : > { %876 = vrot.lane.b32.xlu0 %v11785_v48, %s11533_s27 }
  0x34   : > { %9089 = vmatmul.mubr.msk.f32.gmra.mrb[10].mxu0 %vm18903_vm0, %v230_v47 }
  0x35   : > { %438 = vmatprep.mubr.f32.mxu0 %v11532_v7 }
  0x36   : > { %874 = vrot.lane.b32.xlu1 %v11792_v49, %s11533_s27 }
  0x37   : > { %880 = vrot.lane.b32.xlu0 %v11802_v51, %s11533_s27 }
  0x38   : > { %9090 = vmatmul.mubr.msk.f32.gmra.mrb[12].mxu0 %vm18903_vm0, %v231_v50 }
  0x39   : > { %444 = vmatprep.mubr.f32.mxu0 %v11532_v7 }
  0x3a   : > { %878 = vrot.lane.b32.xlu1 %v11809_v52, %s11533_s27 }
  0x3b   : > { %884 = vrot.lane.b32.xlu0 %v11819_v54, %s11533_s27 }
  0x3c   : > { %9091 = vmatmul.mubr.msk.f32.gmra.mrb[14].mxu0 %vm18903_vm0, %v232_v53 }
  0x3d   : > { %450 = vmatprep.mubr.f32.mxu0 %v11532_v7 }
  0x3e   : > { %882 = vrot.lane.b32.xlu1 %v11826_v55, %s11533_s27 }
  0x3f   : > { %888 = vrot.lane.b32.xlu0 %v11836_v57, %s11533_s27 }
  0x40   : > { %9092 = vmatmul.mubr.msk.f32.gmra.mrb[16].mxu0 %vm18903_vm0, %v233_v56 }
  0x41   : > { %456 = vmatprep.mubr.f32.mxu0 %v11532_v7 }
  0x42   : > { %886 = vrot.lane.b32.xlu1 %v11843_v58, %s11533_s27 }
  0x43   : > { %892 = vrot.lane.b32.xlu0 %v11852_v59, %s11533_s27 }
  0x44   : > { %9093 = vmatmul.mubr.msk.f32.gmra.mrb[18].mxu0 %vm18903_vm0, %v234_v2 }
  0x45   : > { %462 = vmatprep.mubr.f32.mxu0 %v11532_v7 }
  0x46   : > { %890 = vrot.lane.b32.xlu1 %v11859_v60, %s11533_s27 }
  0x47   : > { %896 = vrot.lane.b32.xlu0 %v253_v61, %s11533_s27 }
  0x48   : > { %9094 = vmatmul.mubr.msk.f32.gmra.mrb[20].mxu0 %vm18903_vm0, %v235_v3 }
  0x49   : > { %468 = vmatprep.mubr.f32.mxu0 %v11532_v7 }
  0x4a   : > { %894 = vrot.lane.b32.xlu1 %v11871_v62, %s11533_s27 }
  0x4b   : > { %900 = vrot.lane.b32.xlu0 %v255_v63, %s11533_s27 }
  0x4c   : > { %9095 = vmatmul.mubr.msk.f32.gmra.mrb[22].mxu0 %vm18903_vm0, %v236_v4 }
  0x4d   : > { %474 = vmatprep.mubr.f32.mxu0 %v11532_v7 }
  0x4e   : > { %898 = vrot.lane.b32.xlu1 %v11882_v0, %s11533_s27 }
  0x4f   : > { %1225 = vrot.lane.b32.xlu0 %v11768_v45, %s11534_s11 }
  0x50   : > { %9096 = vmatmul.mubr.msk.f32.gmra.mrb[24].mxu0 %vm18903_vm0, %v237_v5 }
  0x51   : > { %480 = vmatprep.mubr.f32.mxu0 %v11532_v7 }
  0x52   : > { %902 = vrot.lane.b32.xlu1 %v11890_v1, %s11533_s27 }
  0x53   : > { %1233 = vrot.lane.b32.xlu0 %v11802_v51, %s11534_s11 }
  0x54   : > { %9097 = vmatmul.mubr.msk.f32.gmra.mrb[26].mxu0 %vm18903_vm0, %v238_v6 }
  0x55   : > { %486 = vmatprep.mubr.f32.mxu0 %v11532_v7 }
  0x56   : > { %1227 = vrot.lane.b32.xlu1 %v11792_v49, %s11534_s11 }
  0x57   : > { %1237 = vrot.lane.b32.xlu0 %v11819_v54, %s11534_s11 }
  0x58   : > { %9098 = vmatmul.mubr.msk.f32.gmra.mrb[28].mxu0 %vm18903_vm0, %v239_v9 }
  0x59   : > { %492 = vmatprep.mubr.f32.mxu0 %v11532_v7 }
  0x5a   : > { %1229 = vrot.lane.b32.xlu1 %v11785_v48, %s11534_s11 }
  0x5b   : > { %1241 = vrot.lane.b32.xlu0 %v11836_v57, %s11534_s11 }
  0x5c   : > { %9099 = vmatmul.mubr.msk.f32.gmra.mrb[30].mxu0 %vm18903_vm0, %v240_v29 }
  0x5e   : > { %1231 = vrot.lane.b32.xlu1 %v11809_v52, %s11534_s11 }
  0x5f   : > { %1245 = vrot.lane.b32.xlu0 %v11852_v59, %s11534_s11 }
  0x62   : > { %1235 = vrot.lane.b32.xlu1 %v11826_v55, %s11534_s11 }
  0x63   : > { %1249 = vrot.lane.b32.xlu0 %v253_v61, %s11534_s11 }
  0x66   : > { %1239 = vrot.lane.b32.xlu1 %v11843_v58, %s11534_s11 }
  0x67   : > { %1253 = vrot.lane.b32.xlu0 %v255_v63, %s11534_s11 }
  0x6a   : > { %1243 = vrot.lane.b32.xlu1 %v11859_v60, %s11534_s11 }
  0x6b   : > { %1289 = vrot.lane.b32.xlu0 %v11650_v22, %s11535_s12 }
  0x6e   : > { %1247 = vrot.lane.b32.xlu1 %v11871_v62, %s11534_s11 }
  0x6f   : > { %1293 = vrot.lane.b32.xlu0 %v11645_v21, %s11535_s12 }
  0x72   : > { %1251 = vrot.lane.b32.xlu1 %v11882_v0, %s11534_s11 }
  0x73   : > { %1297 = vrot.lane.b32.xlu0 %v11663_v27, %s11535_s12 }
  0x76   : > { %1255 = vrot.lane.b32.xlu1 %v11890_v1, %s11534_s11 }
  0x77   : > { %1301 = vrot.lane.b32.xlu0 %v11685_v30, %s11535_s12 }
  0x7a   : > { %1291 = vrot.lane.b32.xlu1 %v11628_v18, %s11535_s12 }
  0x7b   : > { %1305 = vrot.lane.b32.xlu0 %v11700_v33, %s11535_s12 }
  0x7e   : > { %1295 = vrot.lane.b32.xlu1 %v11671_v28, %s11535_s12 }
  0x7f   : > { %1309 = vrot.lane.b32.xlu0 %v11717_v36, %s11535_s12 }
  0x82   : > { %1299 = vrot.lane.b32.xlu1 %v11692_v31, %s11535_s12 }
  0x83   : > { %1313 = vrot.lane.b32.xlu0 %v11734_v39, %s11535_s12 }
  0x84   : > { %v12031_v8 = vpop.permute.xlu1 %714 }
  0x86   : > { %1303 = vrot.lane.b32.xlu1 %v11708_v34, %s11535_s12 }
  0x87   : > { %1317 = vrot.lane.b32.xlu0 %v11751_v42, %s11535_s12 }
  0x88   : > { %v12054_v17 = vpop.permute.xlu1 %716 }
  0x8a   : > { %1307 = vrot.lane.b32.xlu1 %v11725_v37, %s11535_s12 }
  0x8b   : > { %1433 = vrot.lane.b32.xlu0 %v11768_v45, %s11535_s12  ;;  %v12096_v45 = vpop.permute.xlu0 %712 }
  0x8e   : > { %1311 = vrot.lane.b32.xlu1 %v11742_v40, %s11535_s12 }
  0x8f   : > { %1437 = vrot.lane.b32.xlu0 %v11785_v48, %s11535_s12  ;;  %v12108_v48 = vpop.permute.xlu0 %720 }
  0x92   : > { %1315 = vrot.lane.b32.xlu1 %v11759_v43, %s11535_s12 }
  0x93   : > { %1441 = vrot.lane.b32.xlu0 %v11802_v51, %s11535_s12  ;;  %v12120_v56 = vpop.permute.xlu0 %724 }
  0x96   : > { %1319 = vrot.lane.b32.xlu1 %v11775_v46, %s11535_s12 }
  0x97   : > { %1445 = vrot.lane.b32.xlu0 %v11819_v54, %s11535_s12 }
  0x9a   : > { %1435 = vrot.lane.b32.xlu1 %v11792_v49, %s11535_s12 }
  0x9b   : > { %1449 = vrot.lane.b32.xlu0 %v11836_v57, %s11535_s12 }
  0x9e   : > { %1439 = vrot.lane.b32.xlu1 %v11809_v52, %s11535_s12 }
  0x9f   : > { %1453 = vrot.lane.b32.xlu0 %v11852_v59, %s11535_s12 }
  0xa2   : > { %1443 = vrot.lane.b32.xlu1 %v11826_v55, %s11535_s12 }
  0xa3   : > { %1457 = vrot.lane.b32.xlu0 %v253_v61, %s11535_s12 }
  0xa6   : > { %1447 = vrot.lane.b32.xlu1 %v11843_v58, %s11535_s12 }
  0xa7   : > { %1461 = vrot.lane.b32.xlu0 %v255_v63, %s11535_s12 }
  0xaa   : > { %1451 = vrot.lane.b32.xlu1 %v11859_v60, %s11535_s12 }
  0xab   : > { %1497 = vrot.lane.b32.xlu0 %v11650_v22, %s11534_s11 }
  0xae   : > { %1455 = vrot.lane.b32.xlu1 %v11871_v62, %s11535_s12  ;;  %v12138_v62 = vpop.permute.xlu0 %728 }
  0xaf   : > { %1501 = vrot.lane.b32.xlu0 %v11645_v21, %s11534_s11 }
  0xb2   : > { %1459 = vrot.lane.b32.xlu1 %v11882_v0, %s11535_s12  ;;  %v12150_v6 = vpop.permute.xlu0 %732 }
  0xb3   : > { %1505 = vrot.lane.b32.xlu0 %v11663_v27, %s11534_s11 }
  0xb6   : > { %1463 = vrot.lane.b32.xlu1 %v11890_v1, %s11535_s12 }
  0xb7   : > { %1509 = vrot.lane.b32.xlu0 %v11685_v30, %s11534_s11 }
  0xba   : > { %1499 = vrot.lane.b32.xlu1 %v11628_v18, %s11534_s11 }
  0xbb   : > { %1513 = vrot.lane.b32.xlu0 %v11700_v33, %s11534_s11 }
  0xbe   : > { %1503 = vrot.lane.b32.xlu1 %v11671_v28, %s11534_s11 }
  0xbf   : > { %1517 = vrot.lane.b32.xlu0 %v11717_v36, %s11534_s11 }
  0xc2   : > { %1507 = vrot.lane.b32.xlu1 %v11692_v31, %s11534_s11 }
  0xc3   : > { %1521 = vrot.lane.b32.xlu0 %v11734_v39, %s11534_s11 }
  0xc6   : > { %1511 = vrot.lane.b32.xlu1 %v11708_v34, %s11534_s11 }
  0xc7   : > { %1525 = vrot.lane.b32.xlu0 %v11751_v42, %s11534_s11 }
  0xca   : > { %1515 = vrot.lane.b32.xlu1 %v11725_v37, %s11534_s11 }
  0xce   : > { %1519 = vrot.lane.b32.xlu1 %v11742_v40, %s11534_s11 }
  0xd2   : > { %1523 = vrot.lane.b32.xlu1 %v11759_v43, %s11534_s11  ;;  %v12090_v43 = vpop.permute.xlu1 %718 }
  0xd6   : > { %1527 = vrot.lane.b32.xlu1 %v11775_v46, %s11534_s11  ;;  %v12098_v46 = vpop.permute.xlu1 %722 }
  0xda   : > { %v12124_v58 = vpop.permute.xlu1 %726 }
  0xde   : > { %v12130_v60 = vpop.permute.xlu1 %730 }
  0xf3   : > { %v12038_v10 = vpop.f32.mrb[0].mxu0 }
  0xf4   : > { %19099 = vst [vmem:[#allocation2_spill] sm:$0xff] %v12038_v10  ;;  %v12042_v11 = vmul.f32 %v12038_v10, %v12038_v10  ;;  %v406_v12 = vpop.f32.mrb[1].mxu0 }
  0xf6   : > { %19100 = vst [vmem:[#allocation3_spill] sm:$0xff] %v12042_v11  ;;  %1065 = vrot.lane.b32.xlu0 %v12042_v11, %s11534_s11  ;;  %v551_v38 = vsel %vm550_vm1, %v12042_v11, 0.0 }
  0xf7   : > { %v12046_v13 = vpop.f32.mrb[2].mxu0 }
  0xf8   : > { %19101 = vst [vmem:[#allocation4_spill] sm:$0xff] %v12046_v13  ;;  %v12050_v14 = vmul.f32 %v12046_v13, %v12046_v13  ;;  %v412_v15 = vpop.f32.mrb[3].mxu0 }
  0xf9   : > { %v12052_v16 = vpack.i.bf16 %v412_v15, %v406_v12  ;;  %v10080_v7 = vpack.c.bf16 %v412_v15, %v406_v12  ;;  %v12154_v12 = vpop.permute.xlu1 %734 }
  0xfa   : > { %19102 = vst [vmem:[#allocation5_spill] sm:$0xff] %v12050_v14  ;;  %1067 = vrot.lane.b32.xlu1 %v12050_v14, %s11534_s11  ;;  %v554_v40 = vsel %vm550_vm1, %v12050_v14, 0.0 }
  0xfb   : > { %19103 = vst [vmem:[#allocation6_spill] sm:$0xff] %v12052_v16  ;;  %10081 = vmatprep.subr.bf16.mxu0 %v10080_v7  ;;  %v12058_v18 = vpop.f32.mrb[4].mxu0 }
  0xfc   : > { %19104 = vst [vmem:[#allocation7_spill] sm:$0xff] %v12058_v18  ;;  %10083 = vmatpush3.bf16.msra.mxu0 %v10080_v7  ;;  %v418_v19 = vpop.f32.mrb[5].mxu0  ;;  %v12082_v39 = vmul.f32 %v12058_v18, %v12058_v18 }
  0xfd   : > { %v12160_v7 = vpop.permute.xlu1 %738 }
  0xfe   : > { %19113 = vst [vmem:[#allocation16_spill] sm:$0xff] %v12082_v39  ;;  %v557_v42 = vsel %vm550_vm1, %v12082_v39, 0.0 }
  0xff   : > { %v12060_v20 = vpop.f32.mrb[6].mxu0 }
 0x100   : > { %19105 = vst [vmem:[#allocation8_spill] sm:$0xff] %v12060_v20  ;;  %v424_v21 = vpop.f32.mrb[7].mxu0  ;;  %v12094_v44 = vmul.f32 %v12060_v20, %v12060_v20 }
 0x101   : > { %v12062_v23 = vpack.i.bf16 %v424_v21, %v418_v19  ;;  %v10084_v24 = vpack.c.bf16 %v424_v21, %v418_v19  ;;  %v12168_v21 = vpop.permute.xlu0 %736 }
 0x102   : > { %19115 = vst [vmem:[#allocation18_spill] sm:$0xff] %v12094_v44  ;;  %v560_v57 = vsel %vm550_vm1, %v12094_v44, 0.0 }
 0x103   : > { %19106 = vst [vmem:[#allocation9_spill] sm:$0xff] %v12062_v23  ;;  %10085 = vmatprep.subr.bf16.mxu0 %v10084_v24  ;;  %v12064_v25 = vpop.f32.mrb[8].mxu0 }
 0x104   : > { %19107 = vst [vmem:[#allocation10_spill] sm:$0xff] %v12064_v25  ;;  %10087 = vmatpush3.bf16.msra.mxu0 %v10084_v24  ;;  %v430_v26 = vpop.f32.mrb[9].mxu0  ;;  %v12106_v47 = vmul.f32 %v12064_v25, %v12064_v25 }
 0x105   : > { %v12172_v24 = vpop.permute.xlu0 %740 }
 0x106   : > { %19116 = vst [vmem:[#allocation19_spill] sm:$0xff] %v12106_v47  ;;  %v563_v54 = vsel %vm550_vm1, %v12106_v47, 0.0 }
 0x107   : > { %v12066_v27 = vpop.f32.mrb[10].mxu0 }
 0x108   : > { %19108 = vst [vmem:[#allocation11_spill] sm:$0xff] %v12066_v27  ;;  %v436_v28 = vpop.f32.mrb[11].mxu0  ;;  %v12128_v59 = vmul.f32 %v12066_v27, %v12066_v27 }
 0x109   : > { %v12069_v30 = vpack.i.bf16 %v436_v28, %v430_v26  ;;  %v10088_v31 = vpack.c.bf16 %v436_v28, %v430_v26 }
 0x10a   : > { %19120 = vst [vmem:[#allocation23_spill] sm:$0xff] %v12128_v59  ;;  %v566_v9 = vsel %vm550_vm1, %v12128_v59, 0.0 }
 0x10b   : > { %19109 = vst [vmem:[#allocation12_spill] sm:$0xff] %v12069_v30  ;;  %10089 = vmatprep.subr.bf16.mxu0 %v10088_v31  ;;  %v12072_v32 = vpop.f32.mrb[12].mxu0 }
 0x10c   : > { %19110 = vst [vmem:[#allocation13_spill] sm:$0xff] %v12072_v32  ;;  %10091 = vmatpush3.bf16.msra.mxu0 %v10088_v31  ;;  %v442_v33 = vpop.f32.mrb[13].mxu0  ;;  %v12136_v61 = vmul.f32 %v12072_v32, %v12072_v32  ;;  %v12176_v31 = vpop.permute.xlu0 %872 }
 0x10e   : > { %19121 = vst [vmem:[#allocation24_spill] sm:$0xff] %v12136_v61  ;;  %v569_v5 = vsel %vm550_vm1, %v12136_v61, 0.0 }
 0x10f   : > { %v12074_v34 = vpop.f32.mrb[14].mxu0 }
 0x110   : > { %19111 = vst [vmem:[#allocation14_spill] sm:$0xff] %v12074_v34  ;;  %v448_v35 = vpop.f32.mrb[15].mxu0  ;;  %v12158_v15 = vmul.f32 %v12074_v34, %v12074_v34 }
 0x111   : > { %v12076_v36 = vpack.i.bf16 %v448_v35, %v442_v33  ;;  %v10092_v37 = vpack.c.bf16 %v448_v35, %v442_v33 }
 0x112   : > { %19125 = vst [vmem:[#allocation28_spill] sm:$0xff] %v12158_v15 }
 0x113   : > { %19112 = vst [vmem:[#allocation15_spill] sm:$0xff] %v12076_v36  ;;  %10093 = vmatprep.subr.bf16.mxu0 %v10092_v37  ;;  %v12086_v41 = vpop.f32.mrb[16].mxu0 }
 0x114   : > { %10095 = vmatpush3.bf16.msra.mxu0 %v10092_v37  ;;  %19114 = vst [vmem:[#allocation17_spill] sm:$0xff] %v12086_v41  ;;  %v454_v49 = vpop.f32.mrb[17].mxu0  ;;  %v12166_v19 = vmul.f32 %v12086_v41, %v12086_v41  ;;  %v12180_v37 = vpop.permute.xlu0 %876 }
 0x115   : > { %552 = vadd.xlane.f32.xlu0 %v551_v38  ;;  %19129 = vst [vmem:[#allocation32_spill] sm:$0xff] %v12180_v37 }
 0x116   : > { %19126 = vst [vmem:[#allocation29_spill] sm:$0xff] %v12166_v19 }
 0x117   : > { %v12112_v50 = vpop.f32.mrb[18].mxu0 }
 0x118   : > { %19117 = vst [vmem:[#allocation20_spill] sm:$0xff] %v12112_v50  ;;  %v460_v51 = vpop.f32.mrb[19].mxu0  ;;  %v12182_v38 = vpop.permute.xlu0 %880 }
 0x119   : > { %555 = vadd.xlane.f32.xlu0 %v554_v40  ;;  %v12114_v52 = vpack.i.bf16 %v460_v51, %v454_v49  ;;  %v10096_v53 = vpack.c.bf16 %v460_v51, %v454_v49  ;;  %19130 = vst [vmem:[#allocation33_spill] sm:$0xff] %v12182_v38  ;;  %v572_v51 = vsel %vm550_vm1, %v12158_v15, 0.0 }
 0x11b   : > { %19118 = vst [vmem:[#allocation21_spill] sm:$0xff] %v12114_v52  ;;  %10097 = vmatprep.subr.bf16.mxu0 %v10096_v53  ;;  %v12118_v55 = vpop.f32.mrb[20].mxu0 }
 0x11c   : > { %10099 = vmatpush3.bf16.msra.mxu0 %v10096_v53  ;;  %19119 = vst [vmem:[#allocation22_spill] sm:$0xff] %v12118_v55  ;;  %v466_v63 = vpop.f32.mrb[21].mxu0  ;;  %v12188_v49 = vpop.permute.xlu0 %884 }
 0x11d   : > { %19132 = vst [vmem:[#allocation35_spill] sm:$0xff] %v12188_v49  ;;  %v12192_v53 = vpop.permute.xlu1 %742 }
 0x11e   : > { %558 = vadd.xlane.f32.xlu1 %v557_v42  ;;  %v575_v42 = vsel %vm550_vm1, %v12166_v19, 0.0 }
 0x11f   : > { %v12142_v0 = vpop.f32.mrb[22].mxu0 }
 0x120   : > { %19122 = vst [vmem:[#allocation25_spill] sm:$0xff] %v12142_v0  ;;  %v472_v1 = vpop.f32.mrb[23].mxu0 }
 0x121   : > { %v12144_v2 = vpack.i.bf16 %v472_v1, %v466_v63  ;;  %v10100_v3 = vpack.c.bf16 %v472_v1, %v466_v63  ;;  %v12200_v63 = vmul.f32 %v12112_v50, %v12112_v50  ;;  %v12202_v1 = vpop.permute.xlu1 %874 }
 0x122   : > { %19136 = vst [vmem:[#allocation39_spill] sm:$0xff] %v12202_v1 }
 0x123   : > { %19123 = vst [vmem:[#allocation26_spill] sm:$0xff] %v12144_v2  ;;  %10101 = vmatprep.subr.bf16.mxu0 %v10100_v3  ;;  %v12146_v4 = vpop.f32.mrb[24].mxu0  ;;  %19135 = vst [vmem:[#allocation38_spill] sm:$0xff] %v12200_v63 }
 0x124   : > { %10103 = vmatpush3.bf16.msra.mxu0 %v10100_v3  ;;  %19124 = vst [vmem:[#allocation27_spill] sm:$0xff] %v12146_v4  ;;  %v478_v26 = vpop.f32.mrb[25].mxu0 }
 0x127   : > { %v12174_v28 = vpop.f32.mrb[26].mxu0 }
 0x128   : > { %19127 = vst [vmem:[#allocation30_spill] sm:$0xff] %v12174_v28  ;;  %v484_v29 = vpop.f32.mrb[27].mxu0 }
 0x129   : > { %v12178_v33 = vpack.i.bf16 %v484_v29, %v478_v26  ;;  %v10104_v35 = vpack.c.bf16 %v484_v29, %v478_v26  ;;  %v12218_v29 = vpop.permute.xlu1 %878 }
 0x12a   : > { %19141 = vst [vmem:[#allocation44_spill] sm:$0xff] %v12218_v29 }
 0x12b   : > { %19128 = vst [vmem:[#allocation31_spill] sm:$0xff] %v12178_v33  ;;  %10105 = vmatprep.subr.bf16.mxu0 %v10104_v35  ;;  %v12184_v40 = vpop.f32.mrb[28].mxu0 }
 0x12c   : > { %10107 = vmatpush3.bf16.msra.mxu0 %v10104_v35  ;;  %19131 = vst [vmem:[#allocation34_spill] sm:$0xff] %v12184_v40  ;;  %v490_v35 = vpop.f32.mrb[29].mxu0 }
 0x12d   : > { %v12226_v36 = vpop.permute.xlu1 %882 }
 0x12e   : > { %19145 = vst [vmem:[#allocation48_spill] sm:$0xff] %v12226_v36 }
 0x12f   : > { %1069 = vrot.lane.b32.xlu0 %v12082_v39, %s11534_s11  ;;  %1071 = vrot.lane.b32.xlu1 %v12094_v44, %s11534_s11 }
 0x131   : > { %v12230_v30 = vpop.permute.xlu1 %886 }
 0x132   : > { %19147 = vst [vmem:[#allocation50_spill] sm:$0xff] %v12230_v30 }
 0x133   : > { %1073 = vrot.lane.b32.xlu0 %v12106_v47, %s11534_s11 }
 0x152   : > { %564 = vadd.xlane.f32.xlu0 %v563_v54  ;;  %v12194_v54 = vpop.permute.xlu0 %888 }
 0x153   : > { %561 = vadd.xlane.f32.xlu1 %v560_v57  ;;  %19133 = vst [vmem:[#allocation36_spill] sm:$0xff] %v12194_v54 }
 0x156   : > { %v12196_v57 = vpop.permute.xlu0 %892 }
 0x157   : > { %19134 = vst [vmem:[#allocation37_spill] sm:$0xff] %v12196_v57 }
 0x15a   : > { %v12204_v3 = vpop.permute.xlu0 %896 }
 0x15b   : > { %19137 = vst [vmem:[#allocation40_spill] sm:$0xff] %v12204_v3 }
 0x164   : > { %1075 = vrot.lane.b32.xlu1 %v12128_v59, %s11534_s11 }
 0x168   : > { %1077 = vrot.lane.b32.xlu0 %v12136_v61, %s11534_s11 }
 0x187   : > { %570 = vadd.xlane.f32.xlu0 %v569_v5  ;;  %v12210_v5 = vmul.f32 %v12118_v55, %v12118_v55 }
 0x188   : > { %567 = vadd.xlane.f32.xlu1 %v566_v9  ;;  %v12214_v9 = vpop.permute.xlu0 %900 }
 0x189   : > { %19138 = vst [vmem:[#allocation41_spill] sm:$0xff] %v12210_v5  ;;  %19139 = vst [vmem:[#allocation42_spill] sm:$0xff] %v12214_v9  ;;  %v12234_v9 = vpop.permute.xlu1 %890  ;;  %v581_v3 = vsel %vm550_vm1, %v12210_v5, 0.0 }
 0x18a   : > { %19149 = vst [vmem:[#allocation52_spill] sm:$0xff] %v12234_v9  ;;  %v12254_v9 = vmul.f32 %v12142_v0, %v12142_v0 }
 0x18c   : > { %v12216_v26 = vpop.permute.xlu0 %1225  ;;  %19156 = vst [vmem:[#allocation59_spill] sm:$0xff] %v12254_v9 }
 0x18d   : > { %19140 = vst [vmem:[#allocation43_spill] sm:$0xff] %v12216_v26 }
 0x190   : > { %v12224_v52 = vpop.permute.xlu0 %1233 }
 0x191   : > { %19144 = vst [vmem:[#allocation47_spill] sm:$0xff] %v12224_v52 }
 0x194   : > { %v12228_v16 = vpop.permute.xlu0 %1237 }
 0x195   : > { %19146 = vst [vmem:[#allocation49_spill] sm:$0xff] %v12228_v16 }
 0x198   : > { %v12232_v23 = vpop.permute.xlu0 %1241 }
 0x199   : > { %1079 = vrot.lane.b32.xlu1 %v12158_v15, %s11534_s11  ;;  %19148 = vst [vmem:[#allocation51_spill] sm:$0xff] %v12232_v23  ;;  %v584_v23 = vsel %vm550_vm1, %v12254_v9, 0.0 }
 0x19d   : > { %1081 = vrot.lane.b32.xlu0 %v12166_v19, %s11534_s11 }
 0x1bc   : > { %576 = vadd.xlane.f32.xlu0 %v575_v42  ;;  %v12220_v42 = vpop.f32.mrb[30].mxu0 }
 0x1bd   : > { %573 = vadd.xlane.f32.xlu1 %v572_v51  ;;  %19142 = vst [vmem:[#allocation45_spill] sm:$0xff] %v12220_v42  ;;  %v496_v51 = vpop.f32.mrb[31].mxu0 }
 0x1be   : > { %v12222_v33 = vpack.i.bf16 %v496_v51, %v490_v35  ;;  %v10108_v2 = vpack.c.bf16 %v496_v51, %v490_v35  ;;  %v578_v35 = vsel %vm550_vm1, %v12200_v63, 0.0  ;;  %v12240_v51 = vpop.permute.xlu0 %1245 }
 0x1bf   : > { %19150 = vst [vmem:[#allocation53_spill] sm:$0xff] %v12240_v51 }
 0x1c0   : > { %19143 = vst [vmem:[#allocation46_spill] sm:$0xff] %v12222_v33  ;;  %10109 = vmatprep.subr.bf16.mxu0 %v10108_v2  ;;  %v12242_v33 = vpop.permute.xlu1 %894 }
 0x1c1   : > { %10111 = vmatpush3.bf16.msra.mxu0 %v10108_v2  ;;  %19151 = vst [vmem:[#allocation54_spill] sm:$0xff] %v12242_v33 }
 0x1c2   : > { %v12244_v2 = vpop.permute.xlu0 %1249 }
 0x1c3   : > { %19152 = vst [vmem:[#allocation55_spill] sm:$0xff] %v12244_v2 }
 0x1c4   : > { %v12246_v57 = vpop.permute.xlu1 %898 }
 0x1c5   : > { %19153 = vst [vmem:[#allocation56_spill] sm:$0xff] %v12246_v57 }
 0x1c6   : > { %v12248_v54 = vpop.permute.xlu0 %1253 }
 0x1c7   : > { %19154 = vst [vmem:[#allocation57_spill] sm:$0xff] %v12248_v54 }
 0x1c8   : > { %v12250_v30 = vpop.permute.xlu1 %902 }
 0x1c9   : > { %19155 = vst [vmem:[#allocation58_spill] sm:$0xff] %v12250_v30 }
 0x1cc   : > { %v12264_v33 = vpop.permute.xlu1 %1227 }
 0x1cd   : > { %19158 = vst [vmem:[#allocation61_spill] sm:$0xff] %v12264_v33 }
 0x1ce   : > { %1083 = vrot.lane.b32.xlu1 %v12200_v63, %s11534_s11 }
 0x1d0   : > { %v12270_v30 = vpop.permute.xlu1 %1229 }
 0x1d1   : > { %19159 = vst [vmem:[#allocation62_spill] sm:$0xff] %v12270_v30 }
 0x1d2   : > { %1085 = vrot.lane.b32.xlu0 %v12210_v5, %s11534_s11 }
 0x1d4   : > { %v12274_v36 = vpop.permute.xlu1 %1231 }
 0x1d5   : > { %19160 = vst [vmem:[#allocation63_spill] sm:$0xff] %v12274_v36 }
 0x1d8   : > { %v12278_v29 = vpop.permute.xlu1 %1235 }
 0x1d9   : > { %19162 = vst [vmem:[#allocation65_spill] sm:$0xff] %v12278_v29 }
 0x1dc   : > { %v12282_v1 = vpop.permute.xlu1 %1239 }
 0x1dd   : > { %19164 = vst [vmem:[#allocation67_spill] sm:$0xff] %v12282_v1 }
 0x1e0   : > { %v12286_v2 = vpop.permute.xlu1 %1243 }
 0x1e1   : > { %19166 = vst [vmem:[#allocation69_spill] sm:$0xff] %v12286_v2  ;;  %v12304_v2 = vmul.f32 %v12174_v28, %v12174_v28 }
 0x1e3   : > { %19172 = vst [vmem:[#allocation75_spill] sm:$0xff] %v12304_v2 }
 0x1e4   : > { %v12294_v52 = vpop.permute.xlu1 %1247 }
 0x1e5   : > { %19168 = vst [vmem:[#allocation71_spill] sm:$0xff] %v12294_v52 }
 0x1e8   : > { %v12298_v36 = vpop.permute.xlu1 %1251 }
 0x1e9   : > { %19170 = vst [vmem:[#allocation73_spill] sm:$0xff] %v12298_v36 }
 0x1ec   : > { %v12306_v30 = vpop.permute.xlu1 %1255 }
 0x1ed   : > { %19173 = vst [vmem:[#allocation76_spill] sm:$0xff] %v12306_v30 }
 0x1f0   : > { %v12316_v52 = vpop.permute.xlu1 %1291 }
 0x1f1   : > { %582 = vadd.xlane.f32.xlu0 %v581_v3  ;;  %v12260_v3 = vmul.f32 %v12146_v4, %v12146_v4  ;;  %19176 = vst [vmem:[#allocation79_spill] sm:$0xff] %v12316_v52 }
 0x1f2   : > { %579 = vadd.xlane.f32.xlu1 %v578_v35  ;;  %v12262_v35 = vpop.permute.xlu0 %1289 }
 0x1f3   : > { %19157 = vst [vmem:[#allocation60_spill] sm:$0xff] %v12260_v3  ;;  %v587_v51 = vsel %vm550_vm1, %v12260_v3, 0.0 }
 0x1f6   : > { %v12268_v57 = vpop.permute.xlu0 %1293 }
 0x1fa   : > { %v12272_v49 = vpop.permute.xlu0 %1297 }
 0x1fe   : > { %v12276_v38 = vpop.permute.xlu0 %1301 }
 0x1ff   : > { %19161 = vst [vmem:[#allocation64_spill] sm:$0xff] %v12276_v38 }
 0x202   : > { %v12280_v37 = vpop.permute.xlu0 %1305 }
 0x203   : > { %1087 = vrot.lane.b32.xlu1 %v12254_v9, %s11534_s11  ;;  %19163 = vst [vmem:[#allocation66_spill] sm:$0xff] %v12280_v37 }
 0x206   : > { %v12284_v54 = vpop.permute.xlu0 %1309 }
 0x207   : > { %1089 = vrot.lane.b32.xlu0 %v12260_v3, %s11534_s11  ;;  %19165 = vst [vmem:[#allocation68_spill] sm:$0xff] %v12284_v54 }
 0x20a   : > { %v12292_v16 = vpop.permute.xlu0 %1313 }
 0x20b   : > { %19167 = vst [vmem:[#allocation70_spill] sm:$0xff] %v12292_v16 }
 0x20e   : > { %v12296_v29 = vpop.permute.xlu0 %1317 }
 0x20f   : > { %19169 = vst [vmem:[#allocation72_spill] sm:$0xff] %v12296_v29 }
 0x212   : > { %v12300_v1 = vpop.permute.xlu0 %1433 }
 0x213   : > { %19171 = vst [vmem:[#allocation74_spill] sm:$0xff] %v12300_v1  ;;  %v12322_v1 = vpop.permute.xlu1 %1295 }
 0x214   : > { %19178 = vst [vmem:[#allocation81_spill] sm:$0xff] %v12322_v1 }
 0x217   : > { %v12326_v30 = vpop.permute.xlu1 %1299 }
 0x218   : > { %19180 = vst [vmem:[#allocation83_spill] sm:$0xff] %v12326_v30 }
 0x21b   : > { %v12330_v29 = vpop.permute.xlu1 %1303 }
 0x21c   : > { %19182 = vst [vmem:[#allocation85_spill] sm:$0xff] %v12330_v29 }
 0x226   : > { %588 = vadd.xlane.f32.xlu0 %v587_v51  ;;  %v12314_v51 = vpop.permute.xlu0 %1437 }
 0x227   : > { %585 = vadd.xlane.f32.xlu1 %v584_v23  ;;  %v12312_v23 = vmul.f32 %v12184_v40, %v12184_v40  ;;  %19175 = vst [vmem:[#allocation78_spill] sm:$0xff] %v12314_v51  ;;  %v12334_v51 = vpop.permute.xlu1 %1307 }
 0x228   : > { %19184 = vst [vmem:[#allocation87_spill] sm:$0xff] %v12334_v51 }
 0x229   : > { %19174 = vst [vmem:[#allocation77_spill] sm:$0xff] %v12312_v23  ;;  %v593_v54 = vsel %vm550_vm1, %v12312_v23, 0.0 }
 0x22a   : > { %v12320_v36 = vpop.permute.xlu0 %1441 }
 0x22b   : > { %19177 = vst [vmem:[#allocation80_spill] sm:$0xff] %v12320_v36  ;;  %v12340_v36 = vpop.permute.xlu1 %1311 }
 0x22c   : > { %19186 = vst [vmem:[#allocation89_spill] sm:$0xff] %v12340_v36 }
 0x22e   : > { %v12324_v33 = vpop.permute.xlu0 %1445 }
 0x22f   : > { %19179 = vst [vmem:[#allocation82_spill] sm:$0xff] %v12324_v33  ;;  %v590_v33 = vsel %vm550_vm1, %v12304_v2, 0.0 }
 0x232   : > { %v12328_v26 = vpop.permute.xlu0 %1449 }
 0x233   : > { %19181 = vst [vmem:[#allocation84_spill] sm:$0xff] %v12328_v26  ;;  %v12346_v26 = vpop.permute.xlu1 %1315 }
 0x234   : > { %19188 = vst [vmem:[#allocation91_spill] sm:$0xff] %v12346_v26 }
 0x236   : > { %v12332_v16 = vpop.permute.xlu0 %1453 }
 0x237   : > { %19183 = vst [vmem:[#allocation86_spill] sm:$0xff] %v12332_v16  ;;  %v12350_v16 = vpop.permute.xlu1 %1319 }
 0x238   : > { %1091 = vrot.lane.b32.xlu1 %v12304_v2, %s11534_s11  ;;  %19189 = vst [vmem:[#allocation92_spill] sm:$0xff] %v12350_v16 }
 0x23a   : > { %v12336_v52 = vpop.permute.xlu0 %1457 }
 0x23b   : > { %19185 = vst [vmem:[#allocation88_spill] sm:$0xff] %v12336_v52  ;;  %v12354_v52 = vmul.f32 %v12220_v42, %v12220_v42  ;;  %v12358_v36 = vpop.permute.xlu1 %1435 }
 0x23c   : > { %1093 = vrot.lane.b32.xlu0 %v12312_v23, %s11534_s11  ;;  %19191 = vst [vmem:[#allocation94_spill] sm:$0xff] %v12358_v36 }
 0x23d   : > { %19190 = vst [vmem:[#allocation93_spill] sm:$0xff] %v12354_v52 }
 0x23e   : > { %v12344_v30 = vpop.permute.xlu0 %1461 }
 0x23f   : > { %19187 = vst [vmem:[#allocation90_spill] sm:$0xff] %v12344_v30 }
 0x242   : > { %v12348_v29 = vpop.permute.xlu0 %1497 }
 0x246   : > { %v12356_v51 = vpop.permute.xlu0 %1501 }
 0x25b   : > { %594 = vadd.xlane.f32.xlu0 %v593_v54  ;;  %v12364_v54 = vpop.permute.xlu1 %1439 }
 0x25c   : > { %591 = vadd.xlane.f32.xlu1 %v590_v33  ;;  %v12362_v33 = vpop.permute.xlu0 %1505  ;;  %19192 = vst [vmem:[#allocation95_spill] sm:$0xff] %v12364_v54 }
 0x25f   : > { %v12372_v16 = vpop.permute.xlu1 %1443 }
 0x260   : > { %v12370_v30 = vpop.permute.xlu0 %1509  ;;  %19194 = vst [vmem:[#allocation97_spill] sm:$0xff] %v12372_v16  ;;  %v596_v16 = vsel %vm550_vm1, %v12354_v52, 0.0 }
 0x261   : > { %19193 = vst [vmem:[#allocation96_spill] sm:$0xff] %v12370_v30 }
 0x263   : > { %v12378_v26 = vpop.permute.xlu1 %1447 }
 0x264   : > { %v12376_v36 = vpop.permute.xlu0 %1513  ;;  %19196 = vst [vmem:[#allocation99_spill] sm:$0xff] %v12378_v26 }
 0x265   : > { %19195 = vst [vmem:[#allocation98_spill] sm:$0xff] %v12376_v36 }
 0x267   : > { %v12382_v54 = vpop.permute.xlu1 %1451 }
 0x268   : > { %v12380_v1 = vpop.permute.xlu0 %1517  ;;  %19198 = vst [vmem:[#allocation101_spill] sm:$0xff] %v12382_v54 }
 0x269   : > { %19197 = vst [vmem:[#allocation100_spill] sm:$0xff] %v12380_v1 }
 0x26c   : > { %v12384_v37 = vpop.permute.xlu0 %1521 }
 0x26d   : > { %1095 = vrot.lane.b32.xlu1 %v12354_v52, %s11534_s11  ;;  %19199 = vst [vmem:[#allocation102_spill] sm:$0xff] %v12384_v37 }
 0x271   : > { %2347 = vrot.lane.b32.xlu0 %v12042_v11, %s11536_s20  ;;  %v12386_v11 = vpop.permute.xlu1 %1455 }
 0x272   : > { %19200 = vst [vmem:[#allocation103_spill] sm:$0xff] %v12386_v11 }
 0x275   : > { %2355 = vrot.lane.b32.xlu0 %v12106_v47, %s11536_s20  ;;  %v12388_v47 = vpop.permute.xlu0 %1525  ;;  %v12390_v30 = vpop.permute.xlu1 %1459 }
 0x276   : > { %19201 = vst [vmem:[#allocation104_spill] sm:$0xff] %v12388_v47  ;;  %19202 = vst [vmem:[#allocation105_spill] sm:$0xff] %v12390_v30 }
 0x279   : > { %2359 = vrot.lane.b32.xlu0 %v12136_v61, %s11536_s20  ;;  %v1066_v61 = vpop.permute.xlu0 %1065  ;;  %v12394_v36 = vpop.permute.xlu1 %1463 }
 0x27a   : > { %19203 = vst [vmem:[#allocation106_spill] sm:$0xff] %v12394_v36  ;;  %v1113_v26 = vsel %vm550_vm1, %v1066_v61, 0.0 }
 0x27d   : > { %v12397_v1 = vpop.permute.xlu1 %1499 }
 0x27e   : > { %19204 = vst [vmem:[#allocation107_spill] sm:$0xff] %v12397_v1 }
 0x281   : > { %v12399_v54 = vpop.permute.xlu1 %1503 }
 0x282   : > { %19205 = vst [vmem:[#allocation108_spill] sm:$0xff] %v12399_v54 }
 0x285   : > { %v12405_v30 = vpop.permute.xlu1 %1507 }
 0x286   : > { %19206 = vst [vmem:[#allocation109_spill] sm:$0xff] %v12405_v30 }
 0x291   : > { %597 = vadd.xlane.f32.xlu1 %v596_v16  ;;  %v12409_v16 = vpop.permute.xlu1 %1511 }
 0x292   : > { %19207 = vst [vmem:[#allocation110_spill] sm:$0xff] %v12409_v16 }
 0x295   : > { %v12417_v61 = vpop.permute.xlu1 %1515 }
 0x296   : > { %19208 = vst [vmem:[#allocation111_spill] sm:$0xff] %v12417_v61 }
 0x298   : > { %1114 = vadd.xlane.f32.xlu0 %v1113_v26 }
 0x299   : > { %v12421_v26 = vpop.permute.xlu1 %1519 }
 0x29a   : > { %19209 = vst [vmem:[#allocation112_spill] sm:$0xff] %v12421_v26 }
 0x2a2   : > { %2349 = vrot.lane.b32.xlu1 %v12050_v14, %s11536_s20  ;;  %v12423_v14 = vpop.permute.xlu1 %1523 }
 0x2a3   : > { %19210 = vst [vmem:[#allocation113_spill] sm:$0xff] %v12423_v14 }
 0x2a6   : > { %2351 = vrot.lane.b32.xlu1 %v12082_v39, %s11536_s20  ;;  %v553_v39 = vpop.xlane.xlu0 %552 }
 0x2aa   : > { %2353 = vrot.lane.b32.xlu1 %v12094_v44, %s11536_s20  ;;  %v12425_v44 = vpop.permute.xlu1 %1527 }
 0x2ab   : > { %19211 = vst [vmem:[#allocation114_spill] sm:$0xff] %v12425_v44 }
 0x2ae   : > { %2363 = vrot.lane.b32.xlu0 %v12166_v19, %s11536_s20  ;;  %2357 = vrot.lane.b32.xlu1 %v12128_v59, %s11536_s20  ;;  %v1068_v36 = vpop.permute.xlu1 %1067  ;;  %v556_v19 = vpop.xlane.xlu0 %555 }
 0x2af   : > { %v1116_v59 = vsel %vm550_vm1, %v1068_v36, 0.0 }
 0x2b2   : > { %2367 = vrot.lane.b32.xlu0 %v12210_v5, %s11536_s20  ;;  %v559_v11 = vpop.xlane.xlu1 %558  ;;  %v1070_v16 = vpop.permute.xlu0 %1069 }
 0x2b3   : > { %v1119_v5 = vsel %vm550_vm1, %v1070_v16, 0.0 }
 0x2b6   : > { %2371 = vrot.lane.b32.xlu0 %v12260_v3, %s11536_s20  ;;  %v1072_v61 = vpop.permute.xlu1 %1071  ;;  %v1074_v30 = vpop.permute.xlu0 %1073 }
 0x2b7   : > { %v1122_v3 = vsel %vm550_vm1, %v1072_v61, 0.0  ;;  %v1125_v14 = vsel %vm550_vm1, %v1074_v30, 0.0  ;;  %v600_v61 = vmul.f32 0.0625, %v553_v39 }
 0x2ba   : > { %v12439_v36 = vpop.xlane.xlu0 %564 }
 0x2bb   : > { %v604_v1 = vmul.f32 0.0625, %v12439_v36 }
 0x2d2   : > { %1117 = vadd.xlane.f32.xlu1 %v1116_v59  ;;  %v12441_v59 = vpop.xlane.xlu1 %561 }
 0x2d5   : > { %1120 = vadd.xlane.f32.xlu0 %v1119_v5  ;;  %v1078_v5 = vpop.permute.xlu0 %1077 }
 0x2d9   : > { %1123 = vadd.xlane.f32.xlu0 %v1122_v3  ;;  %v12443_v3 = vpop.xlane.xlu0 %570 }
 0x2dd   : > { %1126 = vadd.xlane.f32.xlu0 %v1125_v14  ;;  %v1076_v14 = vpop.permute.xlu1 %1075  ;;  %v1082_v30 = vpop.permute.xlu0 %1081 }
 0x2de   : > { %v1128_v16 = vsel %vm550_vm1, %v1076_v14, 0.0 }
 0x2e3   : > { %2361 = vrot.lane.b32.xlu1 %v12158_v15, %s11536_s20  ;;  %v12447_v15 = vpop.xlane.xlu0 %576 }
 0x2e7   : > { %2365 = vrot.lane.b32.xlu1 %v12200_v63, %s11536_s20  ;;  %v1131_v63 = vsel %vm550_vm1, %v1078_v5, 0.0  ;;  %v1086_v44 = vpop.permute.xlu0 %1085  ;;  %v12456_v5 = vpop.xlane.xlu1 %567 }
 0x2e8   : > { %v1143_v26 = vsel %vm550_vm1, %v1086_v44, 0.0 }
 0x2eb   : > { %2369 = vrot.lane.b32.xlu1 %v12254_v9, %s11536_s20  ;;  %v616_v9 = vadd.f32 1.1920929e-07, %v600_v61 }
 0x2ed   : > { %10848 = vrsqrt.f32 %v616_v9  ;;  %v1080_v9 = vpop.permute.xlu1 %1079 }
 0x2f3   : > { %2375 = vrot.lane.b32.xlu0 %v12312_v23, %s11536_s20  ;;  %v1137_v23 = vsel %vm550_vm1, %v1082_v30, 0.0 }
 0x2f7   : > { %v10849_v14 = vpop.eup %10848 }
 0x30f   : > { %1129 = vadd.xlane.f32.xlu1 %v1128_v16  ;;  %v648_v16 = vmul.f32 0.25, %v10849_v14 }
 0x311   : > { %v12454_v39 = vmul.f32 %v648_v16, %v12038_v10  ;;  %v1134_v16 = vsel %vm550_vm1, %v1080_v9, 0.0 }
 0x312   : > { %1132 = vadd.xlane.f32.xlu0 %v1131_v63 }
 0x313   : > { %v760_v63 = vmul.f32 %v12096_v45, %v12454_v39  ;;  %v936_v44 = vmul.f32 %v12454_v39, %v11650_v22  ;;  %v12470_v22 = vpop.xlane.xlu0 %582 }
 0x316   : > { %1138 = vadd.xlane.f32.xlu0 %v1137_v23  ;;  %v12464_v23 = vpop.xlane.xlu1 %573 }
 0x31a   : > { %1144 = vadd.xlane.f32.xlu0 %v1143_v26  ;;  %v601_v26 = vmul.f32 0.0625, %v556_v19  ;;  %v1084_v30 = vpop.permute.xlu1 %1083  ;;  %v1090_v19 = vpop.permute.xlu0 %1089 }
 0x31b   : > { %v1140_v45 = vsel %vm550_vm1, %v1084_v30, 0.0 }
 0x31c   : > { %v617_v61 = vadd.f32 1.1920929e-07, %v601_v26  ;;  %v1149_v26 = vsel %vm550_vm1, %v1090_v19, 0.0  ;;  %v12505_v19 = vld [vmem:[%s18755_s4 + $0x10] sm:$0xff] }
 0x31d   : > { %19215 = vst [vmem:[#allocation118_spill] sm:$0xff] %v12505_v19 }
 0x31e   : > { %v12466_v14 = vpop.xlane.xlu1 %579  ;;  %10850 = vrsqrt.f32 %v617_v61  ;;  %v12474_v9 = vpop.xlane.xlu0 %588 }
 0x320   : > { %2373 = vrot.lane.b32.xlu1 %v12304_v2, %s11536_s20  ;;  %v602_v2 = vmul.f32 0.0625, %v559_v11 }
 0x322   : > { %v618_v47 = vadd.f32 1.1920929e-07, %v602_v2  ;;  %v1094_v61 = vpop.permute.xlu0 %1093 }
 0x324   : > { %10852 = vrsqrt.f32 %v618_v47  ;;  %v12487_v47 = vld [vmem:[%s18755_s4 + $0x8] sm:$0xff] }
 0x325   : > { %19213 = vst [vmem:[#allocation116_spill] sm:$0xff] %v12487_v47 }
 0x328   : > { %v10851_v54 = vpop.eup %10850 }
 0x329   : > { %v649_v37 = vmul.f32 0.25, %v10851_v54 }
 0x32b   : > { %v12477_v30 = vmul.f32 %v649_v37, %v12046_v13 }
 0x32d   : > { %19212 = vst [vmem:[#allocation115_spill] sm:$0xff] %v12477_v30  ;;  %v761_v11 = vmul.f32 %v12031_v8, %v12477_v30  ;;  %v937_v54 = vmul.f32 %v12487_v47, %v12477_v30 }
 0x330   : > { %792 = vrot.lane.b32.xlu0 %v760_v63, %s11537_s14  ;;  %v1088_v63 = vpop.permute.xlu1 %1087 }
 0x334   : > { %968 = vrot.lane.b32.xlu0 %v936_v44, %s11533_s27  ;;  %v1146_v44 = vsel %vm550_vm1, %v1088_v63, 0.0 }
 0x344   : > { %1135 = vadd.xlane.f32.xlu1 %v1134_v16  ;;  %v10853_v16 = vpop.eup %10852 }
 0x345   : > { %v650_v2 = vmul.f32 0.25, %v10853_v16 }
 0x347   : > { %v12493_v37 = vmul.f32 %v650_v2, %v12058_v18 }
 0x348   : > { %1141 = vadd.xlane.f32.xlu1 %v1140_v45  ;;  %v12481_v45 = vpop.xlane.xlu0 %594 }
 0x349   : > { %19214 = vst [vmem:[#allocation117_spill] sm:$0xff] %v12493_v37  ;;  %v762_v63 = vmul.f32 %v12054_v17, %v12493_v37  ;;  %v603_v17 = vmul.f32 0.0625, %v12441_v59  ;;  %v606_v59 = vmul.f32 0.0625, %v12443_v3 }
 0x34c   : > { %1147 = vadd.xlane.f32.xlu1 %v1146_v44  ;;  %v12495_v8 = vpop.permute.xlu0 %2347 }
 0x350   : > { %v12499_v44 = vpop.permute.xlu0 %2355 }
 0x353   : > { %1150 = vadd.xlane.f32.xlu0 %v1149_v26  ;;  %v938_v26 = vmul.f32 %v12505_v19, %v12493_v37  ;;  %v620_v19 = vadd.f32 1.1920929e-07, %v604_v1 }
 0x35d   : > { %794 = vrot.lane.b32.xlu1 %v761_v11, %s11537_s14  ;;  %v12510_v11 = vpop.permute.xlu0 %2359 }
 0x361   : > { %970 = vrot.lane.b32.xlu1 %v937_v54, %s11533_s27  ;;  %v12512_v16 = vpop.xlane.xlu0 %1114  ;;  %v619_v54 = vadd.f32 1.1920929e-07, %v603_v17  ;;  %v1155_v17 = vsel %vm550_vm1, %v1094_v61, 0.0  ;;  %v12543_v61 = vld [vmem:[%s18755_s4 + $0x18] sm:$0xff] }
 0x362   : > { %19219 = vst [vmem:[#allocation122_spill] sm:$0xff] %v12543_v61 }
 0x363   : > { %10854 = vrsqrt.f32 %v619_v54 }
 0x364   : > { %10856 = vrsqrt.f32 %v620_v19 }
 0x365   : > { %v12515_v2 = vpop.permute.xlu0 %2363 }
 0x366   : > { %19216 = vst [vmem:[#allocation119_spill] sm:$0xff] %v12515_v2 }
 0x369   : > { %796 = vrot.lane.b32.xlu0 %v762_v63, %s11537_s14  ;;  %v12517_v63 = vpop.xlane.xlu1 %585  ;;  %v12519_v30 = vpop.permute.xlu0 %2367 }
 0x36a   : > { %19217 = vst [vmem:[#allocation120_spill] sm:$0xff] %v12519_v30  ;;  %v622_v30 = vadd.f32 1.1920929e-07, %v606_v59 }
 0x36c   : > { %10858 = vrsqrt.f32 %v622_v30 }
 0x36d   : > { %972 = vrot.lane.b32.xlu0 %v938_v26, %s11533_s27  ;;  %v1092_v47 = vpop.permute.xlu1 %1091  ;;  %v12523_v26 = vpop.permute.xlu0 %2371 }
 0x36e   : > { %v1152_v37 = vsel %vm550_vm1, %v1092_v47, 0.0  ;;  %v10855_v13 = vpop.eup %10854  ;;  %v608_v47 = vmul.f32 0.0625, %v12447_v15 }
 0x36f   : > { %v651_v54 = vmul.f32 0.25, %v10855_v13 }
 0x370   : > { %v624_v3 = vadd.f32 1.1920929e-07, %v608_v47 }
 0x371   : > { %v12525_v38 = vpop.xlane.xlu0 %1120  ;;  %v12532_v36 = vmul.f32 %v651_v54, %v12060_v20 }
 0x372   : > { %10860 = vrsqrt.f32 %v624_v3  ;;  %v612_v3 = vmul.f32 0.0625, %v12474_v9 }
 0x373   : > { %19218 = vst [vmem:[#allocation121_spill] sm:$0xff] %v12532_v36  ;;  %v763_v1 = vmul.f32 %v12090_v43, %v12532_v36  ;;  %v939_v30 = vmul.f32 %v12543_v61, %v12532_v36  ;;  %v610_v43 = vmul.f32 0.0625, %v12470_v22 }
 0x375   : > { %v12529_v2 = vpop.xlane.xlu0 %1123  ;;  %v626_v54 = vadd.f32 1.1920929e-07, %v610_v43 }
 0x377   : > { %10862 = vrsqrt.f32 %v626_v54 }
 0x379   : > { %v12537_v19 = vpop.xlane.xlu0 %1126 }
 0x37d   : > { %v12549_v15 = vpop.permute.xlu0 %2375 }
 0x37e   : > { %19220 = vst [vmem:[#allocation123_spill] sm:$0xff] %v12549_v15 }
 0x385   : > { %1153 = vadd.xlane.f32.xlu1 %v1152_v37  ;;  %v10857_v37 = vpop.eup %10856 }
 0x386   : > { %v652_v13 = vmul.f32 0.25, %v10857_v37 }
 0x388   : > { %v12552_v59 = vmul.f32 %v652_v13, %v12064_v25  ;;  %v12568_v13 = vld [vmem:[%s18755_s4 + $0x20] sm:$0xff] }
 0x389   : > { %19223 = vst [vmem:[#allocation126_spill] sm:$0xff] %v12568_v13 }
 0x38a   : > { %19221 = vst [vmem:[#allocation124_spill] sm:$0xff] %v12552_v59  ;;  %v764_v37 = vmul.f32 %v12108_v48, %v12552_v59  ;;  %v940_v43 = vmul.f32 %v12568_v13, %v12552_v59  ;;  %v628_v48 = vadd.f32 1.1920929e-07, %v612_v3 }
 0x38c   : > { %1156 = vadd.xlane.f32.xlu0 %v1155_v17  ;;  %v10859_v17 = vpop.eup %10858  ;;  %10864 = vrsqrt.f32 %v628_v48  ;;  %v920_v48 = vmul.f32 %v12176_v31, %v12454_v39 }
 0x396   : > { %798 = vrot.lane.b32.xlu1 %v763_v1, %s11537_s14  ;;  %v654_v1 = vmul.f32 0.25, %v10859_v17  ;;  %v10861_v17 = vpop.eup %10860 }
 0x397   : > { %v656_v9 = vmul.f32 0.25, %v10861_v17  ;;  %v10863_v17 = vpop.eup %10862 }
 0x398   : > { %v12563_v22 = vmul.f32 %v654_v1, %v12072_v32  ;;  %v614_v1 = vmul.f32 0.0625, %v12481_v45 }
 0x399   : > { %v12580_v61 = vmul.f32 %v656_v9, %v12086_v41  ;;  %v605_v9 = vmul.f32 0.0625, %v12456_v5  ;;  %v12611_v5 = vld [vmem:[%s18755_s4 + $0x40] sm:$0xff] }
 0x39a   : > { %974 = vrot.lane.b32.xlu1 %v939_v30, %s11533_s27  ;;  %19222 = vst [vmem:[#allocation125_spill] sm:$0xff] %v12563_v22 }
 0x39b   : > { %19224 = vst [vmem:[#allocation127_spill] sm:$0xff] %v12580_v61  ;;  %v768_v15 = vmul.f32 %v12138_v62, %v12580_v61  ;;  %v944_v62 = vmul.f32 %v12611_v5, %v12580_v61 }
 0x39f   : > { %v12554_v47 = vpop.xlane.xlu0 %1132 }
 0x3a2   : > { %800 = vrot.lane.b32.xlu0 %v764_v37, %s11537_s14  ;;  %v766_v37 = vmul.f32 %v12120_v56, %v12563_v22  ;;  %v12592_v56 = vld [vmem:[%s18754_s3] sm:$0xff] }
 0x3a3   : > { %v12560_v30 = vpop.xlane.xlu0 %1138  ;;  %19226 = vst [vmem:[#allocation129_spill] sm:$0xff] %v12592_v56  ;;  %v680_v45 = vmul.f32 %v12592_v56, %v12454_v39  ;;  %v592_v39 = vpop.xlane.xlu1 %591 }
 0x3a6   : > { %976 = vrot.lane.b32.xlu0 %v940_v43, %s11533_s27  ;;  %v12585_v43 = vld [vmem:[%s18755_s4 + $0x30] sm:$0xff] }
 0x3a7   : > { %v12573_v54 = vpop.xlane.xlu0 %1144  ;;  %19225 = vst [vmem:[#allocation128_spill] sm:$0xff] %v12585_v43  ;;  %v942_v3 = vmul.f32 %v12585_v43, %v12563_v22  ;;  %v658_v22 = vmul.f32 0.25, %v10863_v17  ;;  %v12626_v17 = vld [vmem:[%s18755_s4 + $0x50] sm:$0xff] }
 0x3a9   : > { %v12606_v31 = vmul.f32 %v658_v22, %v12118_v55 }
 0x3aa   : > { %804 = vrot.lane.b32.xlu0 %v766_v37, %s11537_s14  ;;  %v630_v37 = vadd.f32 1.1920929e-07, %v614_v1 }
 0x3ab   : > { %v793_v36 = vpop.permute.xlu0 %792  ;;  %19227 = vst [vmem:[#allocation130_spill] sm:$0xff] %v12606_v31  ;;  %v770_v22 = vmul.f32 %v12150_v6, %v12606_v31  ;;  %v609_v6 = vmul.f32 0.0625, %v12466_v14 }
 0x3ac   : > { %v840_v43 = vadd.f32 %v793_v36, %v680_v45  ;;  %10866 = vrsqrt.f32 %v630_v37  ;;  %v10865_v36 = vpop.eup %10864 }
 0x3ae   : > { %980 = vrot.lane.b32.xlu0 %v942_v3, %s11533_s27  ;;  %v621_v3 = vadd.f32 1.1920929e-07, %v605_v9 }
 0x3af   : > { %v969_v59 = vpop.permute.xlu0 %968 }
 0x3b0   : > { %v1016_v13 = vsub.f32 %v920_v48, %v969_v59  ;;  %10868 = vrsqrt.f32 %v621_v3  ;;  %v660_v59 = vmul.f32 0.25, %v10865_v36  ;;  %v625_v3 = vadd.f32 1.1920929e-07, %v609_v6  ;;  %v12642_v36 = vld [vmem:[%s18755_s4 + $0x60] sm:$0xff] }
 0x3b2   : > { %808 = vrot.lane.b32.xlu0 %v768_v15, %s11537_s14  ;;  %v1033_v56 = vsel %vm1032_vm2, %v840_v43, %v1016_v13  ;;  %v607_v15 = vmul.f32 0.0625, %v12464_v23  ;;  %v1096_v13 = vpop.permute.xlu1 %1095  ;;  %v12621_v43 = vmul.f32 %v660_v59, %v12146_v4 }
 0x3b3   : > { %9560 = vmatprep.mubr.msk.f32.mxu1 %vm550_vm1, %v1033_v56  ;;  %v946_v56 = vmul.f32 %v12626_v17, %v12606_v31  ;;  %v1158_v45 = vsel %vm550_vm1, %v1096_v13, 0.0 }
 0x3b4   : > { %v623_v1 = vadd.f32 1.1920929e-07, %v607_v15  ;;  %19228 = vst [vmem:[#allocation131_spill] sm:$0xff] %v12621_v43  ;;  %v772_v9 = vmul.f32 %v12168_v21, %v12621_v43  ;;  %v948_v15 = vmul.f32 %v12642_v36, %v12621_v43  ;;  %v611_v21 = vmul.f32 0.0625, %v12517_v63 }
 0x3b6   : > { %984 = vrot.lane.b32.xlu0 %v944_v62, %s11533_s27  ;;  %v10867_v23 = vpop.eup %10866  ;;  %10870 = vrsqrt.f32 %v623_v1  ;;  %v627_v1 = vadd.f32 1.1920929e-07, %v611_v21 }
 0x3b7   : > { %v662_v48 = vmul.f32 0.25, %v10867_v23  ;;  %10872 = vrsqrt.f32 %v625_v3 }
 0x3b8   : > { %10874 = vrsqrt.f32 %v627_v1 }
 0x3b9   : > { %v12637_v62 = vmul.f32 %v662_v48, %v12184_v40  ;;  %v12671_v48 = vld [vmem:[%s18755_s4 + $0x28] sm:$0xff] }
 0x3ba   : > { %812 = vrot.lane.b32.xlu0 %v770_v22, %s11537_s14  ;;  %v10869_v37 = vpop.eup %10868 }
 0x3bb   : > { %19229 = vst [vmem:[#allocation132_spill] sm:$0xff] %v12637_v62  ;;  %v653_v14 = vmul.f32 0.25, %v10869_v37  ;;  %v774_v59 = vmul.f32 %v12172_v24, %v12637_v62  ;;  %v613_v24 = vmul.f32 0.0625, %v592_v39 }
 0x3bd   : > { %v12651_v22 = vmul.f32 %v653_v14, %v12066_v27 }
 0x3be   : > { %988 = vrot.lane.b32.xlu0 %v946_v56, %s11533_s27  ;;  %1159 = vadd.xlane.f32.xlu1 %v1158_v45  ;;  %v12657_v56 = vld [vmem:[%s18755_s4 + $0x70] sm:$0xff] }
 0x3bf   : > { %19230 = vst [vmem:[#allocation133_spill] sm:$0xff] %v12651_v22  ;;  %v950_v23 = vmul.f32 %v12657_v56, %v12637_v62  ;;  %v765_v63 = vmul.f32 %v12098_v46, %v12651_v22  ;;  %v629_v46 = vadd.f32 1.1920929e-07, %v613_v24  ;;  %v12699_v24 = vld [vmem:[%s18755_s4 + $0x48] sm:$0xff] }
 0x3c0   : > { %v10871_v13 = vpop.eup %10870 }
 0x3c1   : > { %v655_v45 = vmul.f32 0.25, %v10871_v13  ;;  %v10873_v37 = vpop.eup %10872  ;;  %10876 = vrsqrt.f32 %v629_v46 }
 0x3c2   : > { %816 = vrot.lane.b32.xlu0 %v772_v9, %s11537_s14  ;;  %v941_v9 = vmul.f32 %v12671_v48, %v12651_v22  ;;  %v657_v3 = vmul.f32 0.25, %v10873_v37  ;;  %v10875_v1 = vpop.eup %10874 }
 0x3c3   : > { %v12666_v6 = vmul.f32 %v655_v45, %v12074_v34 }
 0x3c4   : > { %v12680_v21 = vmul.f32 %v657_v3, %v12112_v50 }
 0x3c5   : > { %19231 = vst [vmem:[#allocation134_spill] sm:$0xff] %v12666_v6  ;;  %v767_v39 = vmul.f32 %v12124_v58, %v12666_v6  ;;  %v659_v58 = vmul.f32 0.25, %v10875_v1 }
 0x3c6   : > { %992 = vrot.lane.b32.xlu0 %v948_v15, %s11533_s27  ;;  %v598_v15 = vpop.xlane.xlu1 %597  ;;  %19232 = vst [vmem:[#allocation135_spill] sm:$0xff] %v12680_v21  ;;  %v769_v45 = vmul.f32 %v12130_v60, %v12680_v21 }
 0x3c7   : > { %v615_v14 = vmul.f32 0.0625, %v598_v15 }
 0x3ca   : > { %820 = vrot.lane.b32.xlu0 %v774_v59, %s11537_s14  ;;  %v12685_v59 = vld [vmem:[%s18755_s4 + $0x38] sm:$0xff]  ;;  %v12704_v3 = vpop.permute.xlu1 %2349 }
 0x3cb   : > { %v943_v13 = vmul.f32 %v12685_v59, %v12666_v6  ;;  %v10877_v37 = vpop.eup %10876 }
 0x3cc   : > { %v661_v46 = vmul.f32 0.25, %v10877_v37 }
 0x3ce   : > { %996 = vrot.lane.b32.xlu0 %v950_v23, %s11533_s27  ;;  %v631_v23 = vadd.f32 1.1920929e-07, %v615_v14  ;;  %v12710_v15 = vmul.f32 %v661_v46, %v12174_v28  ;;  %v2352_v1 = vpop.permute.xlu1 %2351  ;;  %v12732_v46 = vld [vmem:[%s18755_s4 + $0x68] sm:$0xff] }
 0x3cf   : > { %802 = vrot.lane.b32.xlu1 %v765_v63, %s11537_s14  ;;  %v12694_v63 = vmul.f32 %v659_v58, %v12142_v0 }
 0x3d0   : > { %10878 = vrsqrt.f32 %v631_v23  ;;  %19234 = vst [vmem:[#allocation137_spill] sm:$0xff] %v12710_v15  ;;  %v773_v58 = vmul.f32 %v12160_v7, %v12710_v15 }
 0x3d1   : > { %19233 = vst [vmem:[#allocation136_spill] sm:$0xff] %v12694_v63  ;;  %v771_v60 = vmul.f32 %v12154_v12, %v12694_v63  ;;  %v2395_v12 = vsel %vm550_vm1, %v12495_v8, 0.0  ;;  %v949_v8 = vmul.f32 %v12732_v46, %v12710_v15 }
 0x3d2   : > { %v2354_v37 = vpop.permute.xlu1 %2353 }
 0x3d3   : > { %978 = vrot.lane.b32.xlu1 %v941_v9, %s11533_s27  ;;  %v945_v9 = vmul.f32 %v12699_v24, %v12680_v21  ;;  %v2404_v7 = vsel %vm550_vm1, %v2354_v37, 0.0 }
 0x3d7   : > { %806 = vrot.lane.b32.xlu1 %v767_v39, %s11537_s14  ;;  %v12715_v39 = vld [vmem:[%s18755_s4 + $0x58] sm:$0xff] }
 0x3d8   : > { %v947_v14 = vmul.f32 %v12715_v39, %v12694_v63 }
 0x3db   : > { %982 = vrot.lane.b32.xlu1 %v943_v13, %s11533_s27  ;;  %v10879_v13 = vpop.eup %10878 }
 0x3dc   : > { %v663_v23 = vmul.f32 0.25, %v10879_v13  ;;  %v2407_v13 = vsel %vm550_vm1, %v12499_v44, 0.0  ;;  %v1163_v44 = vmul.f32 0.0625, %v12525_v38 }
 0x3df   : > { %810 = vrot.lane.b32.xlu1 %v769_v45, %s11537_s14  ;;  %v2401_v45 = vsel %vm550_vm1, %v2352_v1, 0.0  ;;  %v12747_v1 = vld [vmem:[%s18755_s4 + $0x78] sm:$0xff] }
 0x3e3   : > { %986 = vrot.lane.b32.xlu1 %v945_v9, %s11533_s27  ;;  %v12727_v9 = vmul.f32 %v663_v23, %v12220_v42 }
 0x3e5   : > { %19235 = vst [vmem:[#allocation138_spill] sm:$0xff] %v12727_v9 }
 0x3e7   : > { %814 = vrot.lane.b32.xlu1 %v771_v60, %s11537_s14  ;;  %v775_v60 = vmul.f32 %v12192_v53, %v12727_v9  ;;  %v2413_v53 = vsel %vm550_vm1, %v12510_v11, 0.0  ;;  %v1167_v11 = vmul.f32 0.0625, %v12554_v47  ;;  %v1169_v47 = vmul.f32 0.0625, %v12560_v30 }
 0x3e8   : > { %v1171_v30 = vmul.f32 0.0625, %v12573_v54 }
 0x3e9   : > { %v1183_v38 = vadd.f32 1.1920929e-07, %v1167_v11 }
 0x3eb   : > { %990 = vrot.lane.b32.xlu1 %v947_v14, %s11533_s27  ;;  %v1161_v14 = vmul.f32 0.0625, %v12512_v16  ;;  %v1179_v16 = vadd.f32 1.1920929e-07, %v1163_v44 }
 0x3ed   : > { %2396 = vadd.xlane.f32.xlu0 %v2395_v12  ;;  %v951_v12 = vmul.f32 %v12747_v1, %v12727_v9  ;;  %v1177_v23 = vadd.f32 1.1920929e-07, %v1161_v14 }
 0x3ef   : > { %818 = vrot.lane.b32.xlu1 %v773_v58, %s11537_s14  ;;  %10880 = vrsqrt.f32 %v1177_v23  ;;  %v2358_v58 = vpop.permute.xlu1 %2357 }
 0x3f0   : > { %10882 = vrsqrt.f32 %v1179_v16 }
 0x3f1   : > { %2402 = vadd.xlane.f32.xlu0 %v2401_v45  ;;  %v1165_v45 = vmul.f32 0.0625, %v12537_v19 }
 0x3f3   : > { %994 = vrot.lane.b32.xlu1 %v949_v8, %s11533_s27  ;;  %v1118_v8 = vpop.xlane.xlu1 %1117 }
 0x3f5   : > { %2405 = vadd.xlane.f32.xlu0 %v2404_v7  ;;  %v1181_v7 = vadd.f32 1.1920929e-07, %v1165_v45  ;;  %v1185_v45 = vadd.f32 1.1920929e-07, %v1169_v47 }
 0x3f7   : > { %822 = vrot.lane.b32.xlu1 %v775_v60, %s11537_s14  ;;  %v2362_v14 = vpop.permute.xlu1 %2361  ;;  %10884 = vrsqrt.f32 %v1181_v7 }
 0x3f8   : > { %10886 = vrsqrt.f32 %v1183_v38  ;;  %v2398_v38 = vsel %vm550_vm1, %v12704_v3, 0.0 }
 0x3f9   : > { %2408 = vadd.xlane.f32.xlu0 %v2407_v13  ;;  %v10881_v37 = vpop.eup %10880  ;;  %10888 = vrsqrt.f32 %v1185_v45 }
 0x3fa   : > { %v12759_v60 = vmul.f32 %v10881_v37, %v12038_v10 }
 0x3fb   : > { %998 = vrot.lane.b32.xlu1 %v951_v12, %s11533_s27  ;;  %v10883_v12 = vpop.eup %10882 }
 0x3fc   : > { %v1337_v13 = vmul.f32 %v12262_v35, %v12759_v60  ;;  %v12766_v23 = vmul.f32 %v10883_v12, %v12058_v18  ;;  %v1545_v19 = vmul.f32 %v12348_v29, %v12759_v60  ;;  %v1151_v29 = vpop.xlane.xlu0 %1150 }
 0x3fd   : > { %2414 = vadd.xlane.f32.xlu0 %v2413_v53  ;;  %v12770_v53 = vpop.permute.xlu1 %2365  ;;  %v1173_v3 = vmul.f32 0.0625, %v1151_v29 }
 0x3fe   : > { %v1339_v35 = vmul.f32 %v12268_v57, %v12766_v23  ;;  %v1547_v7 = vmul.f32 %v12356_v51, %v12766_v23  ;;  %v1162_v57 = vmul.f32 0.0625, %v1118_v8  ;;  %v1187_v51 = vadd.f32 1.1920929e-07, %v1171_v30 }
 0x3ff   : > { %2377 = vrot.lane.b32.xlu1 %v12354_v52, %s11536_s20  ;;  %v19242_v52 = vld [vmem:[#allocation4_spill] sm:$0xff] }
 0x400   : > { %v1178_v47 = vadd.f32 1.1920929e-07, %v1162_v57  ;;  %10890 = vrsqrt.f32 %v1187_v51 }
 0x401   : > { %v10885_v44 = vpop.eup %10884  ;;  %v12777_v16 = vpop.permute.xlu1 %2369 }
 0x402   : > { %v12780_v37 = vmul.f32 %v10885_v44, %v12064_v25  ;;  %v10887_v12 = vpop.eup %10886  ;;  %10892 = vrsqrt.f32 %v1178_v47  ;;  %v1164_v44 = vmul.f32 0.0625, %v12529_v2  ;;  %v19239_v2 = vld [vmem:[#allocation96_spill] sm:$0xff] }
 0x403   : > { %v10889_v57 = vpop.eup %10888 }
 0x404   : > { %v1549_v54 = vmul.f32 %v12362_v33, %v12780_v37  ;;  %v2416_v33 = vsel %vm550_vm1, %v2362_v14, 0.0  ;;  %v19240_v14 = vld [vmem:[#allocation66_spill] sm:$0xff] }
 0x405   : > { %v1130_v11 = vpop.xlane.xlu1 %1129 }
 0x409   : > { %v12798_v8 = vpop.permute.xlu1 %2373 }
 0x413   : > { %1369 = vrot.lane.b32.xlu0 %v1337_v13, %s11537_s14  ;;  %v1341_v13 = vmul.f32 %v12272_v49, %v12780_v37  ;;  %v2410_v49 = vsel %vm550_vm1, %v2358_v58, 0.0  ;;  %v1189_v58 = vadd.f32 1.1920929e-07, %v1173_v3 }
 0x415   : > { %10894 = vrsqrt.f32 %v1189_v58 }
 0x417   : > { %1577 = vrot.lane.b32.xlu0 %v1545_v19, %s11533_s27  ;;  %v12790_v19 = vpop.permute.xlu0 %796 }
 0x418   : > { %19236 = vst [vmem:[#allocation139_spill] sm:$0xff] %v12790_v19 }
 0x41b   : > { %1373 = vrot.lane.b32.xlu0 %v1339_v35, %s11537_s14  ;;  %v12794_v35 = vmul.f32 %v10887_v12, %v12072_v32  ;;  %v12803_v45 = vpop.permute.xlu0 %972  ;;  %v1180_v12 = vadd.f32 1.1920929e-07, %v1164_v44 }
 0x41c   : > { %19237 = vst [vmem:[#allocation140_spill] sm:$0xff] %v12803_v45 }
 0x41d   : > { %v1551_v51 = vmul.f32 %v19239_v2, %v12794_v35  ;;  %10896 = vrsqrt.f32 %v1180_v12  ;;  %v19241_v2 = vld [vmem:[#allocation98_spill] sm:$0xff] }
 0x41f   : > { %1581 = vrot.lane.b32.xlu0 %v1547_v7, %s11533_s27  ;;  %v19238_v7 = vld [vmem:[#allocation64_spill] sm:$0xff]  ;;  %v1157_v29 = vpop.xlane.xlu0 %1156 }
 0x420   : > { %v1343_v30 = vmul.f32 %v19238_v7, %v12794_v35 }
 0x423   : > { %2399 = vadd.xlane.f32.xlu1 %v2398_v38  ;;  %1377 = vrot.lane.b32.xlu0 %v1341_v13, %s11537_s14  ;;  %v1136_v13 = vpop.xlane.xlu1 %1135  ;;  %v12810_v38 = vmul.f32 %v10889_v57, %v12086_v41 }
 0x425   : > { %v1345_v7 = vmul.f32 %v19240_v14, %v12810_v38 }
 0x427   : > { %1585 = vrot.lane.b32.xlu0 %v1549_v54, %s11533_s27  ;;  %2411 = vadd.xlane.f32.xlu1 %v2410_v49  ;;  %v1142_v47 = vpop.xlane.xlu1 %1141  ;;  %v1175_v54 = vmul.f32 0.0625, %v1157_v29  ;;  %v1166_v49 = vmul.f32 0.0625, %v1130_v11  ;;  %v12827_v11 = vpop.permute.xlu0 %800  ;;  %v1168_v29 = vmul.f32 0.0625, %v1136_v13  ;;  %v19247_v13 = vld [vmem:[#allocation100_spill] sm:$0xff] }
 0x428   : > { %19243 = vst [vmem:[#allocation64_spill] sm:$0xff] %v12827_v11 }
 0x429   : > { %v1191_v44 = vadd.f32 1.1920929e-07, %v1175_v54  ;;  %v1182_v57 = vadd.f32 1.1920929e-07, %v1166_v49  ;;  %v19244_v54 = vld [vmem:[#allocation68_spill] sm:$0xff] }
 0x42b   : > { %1381 = vrot.lane.b32.xlu0 %v1343_v30, %s11537_s14  ;;  %2417 = vadd.xlane.f32.xlu1 %v2416_v33  ;;  %v10891_v30 = vpop.eup %10890  ;;  %v1148_v12 = vpop.xlane.xlu1 %1147  ;;  %10898 = vrsqrt.f32 %v1191_v44 }
 0x42c   : > { %v10893_v3 = vpop.eup %10892  ;;  %v12819_v33 = vmul.f32 %v10891_v30, %v12118_v55  ;;  %10900 = vrsqrt.f32 %v1182_v57 }
 0x42d   : > { %v12824_v58 = vmul.f32 %v10893_v3, %v19242_v52  ;;  %v10895_v14 = vpop.eup %10894 }
 0x42e   : > { %v1347_v49 = vmul.f32 %v19244_v54, %v12819_v33  ;;  %v10897_v9 = vpop.eup %10896  ;;  %v12838_v44 = vmul.f32 %v10895_v14, %v12146_v4  ;;  %v1555_v57 = vmul.f32 %v19247_v13, %v12819_v33  ;;  %v12845_v54 = vpop.permute.xlu0 %976 }
 0x42f   : > { %1589 = vrot.lane.b32.xlu0 %v1551_v51, %s11533_s27  ;;  %v1553_v51 = vmul.f32 %v19241_v2, %v12810_v38  ;;  %v12834_v3 = vpop.permute.xlu1 %794  ;;  %v1184_v2 = vadd.f32 1.1920929e-07, %v1168_v29  ;;  %19248 = vst [vmem:[#allocation66_spill] sm:$0xff] %v12845_v54  ;;  %v1170_v29 = vmul.f32 0.0625, %v1142_v47  ;;  %v19254_v47 = vld [vmem:[#allocation102_spill] sm:$0xff] }
 0x430   : > { %19246 = vst [vmem:[#allocation96_spill] sm:$0xff] %v12834_v3 }
 0x431   : > { %10902 = vrsqrt.f32 %v1184_v2  ;;  %v1557_v2 = vmul.f32 %v19254_v47, %v12838_v44  ;;  %v19258_v47 = vld [vmem:[#allocation83_spill] sm:$0xff] }
 0x432   : > { %v12858_v63 = vpop.permute.xlu0 %804 }
 0x433   : > { %1385 = vrot.lane.b32.xlu0 %v1345_v7, %s11537_s14  ;;  %v19245_v7 = vld [vmem:[#allocation79_spill] sm:$0xff]  ;;  %v12853_v15 = vpop.permute.xlu1 %970  ;;  %19253 = vst [vmem:[#allocation68_spill] sm:$0xff] %v12858_v63 }
 0x434   : > { %v1338_v30 = vmul.f32 %v19245_v7, %v12824_v58  ;;  %v19249_v7 = vld [vmem:[#allocation107_spill] sm:$0xff]  ;;  %19251 = vst [vmem:[#allocation98_spill] sm:$0xff] %v12853_v15  ;;  %v19304_v15 = vld [vmem:[#allocation61_spill] sm:$0xff] }
 0x435   : > { %v1546_v62 = vmul.f32 %v19249_v7, %v12824_v58 }
 0x437   : > { %1593 = vrot.lane.b32.xlu0 %v1553_v51, %s11533_s27  ;;  %v12843_v51 = vmul.f32 %v10897_v9, %v12060_v20  ;;  %v19252_v9 = vld [vmem:[#allocation81_spill] sm:$0xff] }
 0x439   : > { %v1340_v13 = vmul.f32 %v19252_v9, %v12843_v51  ;;  %v19255_v9 = vld [vmem:[#allocation108_spill] sm:$0xff] }
 0x43a   : > { %v1548_v31 = vmul.f32 %v19255_v9, %v12843_v51  ;;  %v19261_v9 = vld [vmem:[#allocation109_spill] sm:$0xff] }
 0x43b   : > { %1389 = vrot.lane.b32.xlu0 %v1347_v49, %s11537_s14  ;;  %v19250_v49 = vld [vmem:[#allocation70_spill] sm:$0xff] }
 0x43c   : > { %1371 = vrot.lane.b32.xlu1 %v1338_v30, %s11537_s14  ;;  %v1349_v14 = vmul.f32 %v19250_v49, %v12838_v44  ;;  %v10899_v30 = vpop.eup %10898  ;;  %v1154_v49 = vpop.xlane.xlu1 %1153 }
 0x43d   : > { %v10901_v43 = vpop.eup %10900 }
 0x43e   : > { %v12867_v7 = vmul.f32 %v10901_v43, %v12066_v27  ;;  %v10903_v43 = vpop.eup %10902 }
 0x43f   : > { %1597 = vrot.lane.b32.xlu0 %v1555_v57, %s11533_s27  ;;  %v1186_v57 = vadd.f32 1.1920929e-07, %v1170_v29  ;;  %v19256_v29 = vld [vmem:[#allocation72_spill] sm:$0xff] }
 0x440   : > { %1579 = vrot.lane.b32.xlu1 %v1546_v62, %s11533_s27  ;;  %v12862_v62 = vmul.f32 %v10899_v30, %v12184_v40  ;;  %v1342_v21 = vmul.f32 %v19258_v47, %v12867_v7  ;;  %v12880_v61 = vpop.permute.xlu1 %798 }
 0x441   : > { %10904 = vrsqrt.f32 %v1186_v57  ;;  %19259 = vst [vmem:[#allocation100_spill] sm:$0xff] %v12880_v61  ;;  %v2434_v61 = vsel %vm550_vm1, %v12798_v8, 0.0 }
 0x442   : > { %v1351_v30 = vmul.f32 %v19256_v29, %v12862_v62  ;;  %v1550_v29 = vmul.f32 %v19261_v9, %v12867_v7 }
 0x443   : > { %1393 = vrot.lane.b32.xlu0 %v1349_v14, %s11537_s14  ;;  %v1172_v14 = vmul.f32 0.0625, %v1148_v12  ;;  %v12886_v12 = vmul.f32 %v10903_v43, %v12074_v34 }
 0x444   : > { %1375 = vrot.lane.b32.xlu1 %v1340_v13, %s11537_s14  ;;  %v12875_v13 = vpop.permute.xlu0 %980  ;;  %v12894_v63 = vpop.permute.xlu1 %974 }
 0x445   : > { %19257 = vst [vmem:[#allocation79_spill] sm:$0xff] %v12875_v13  ;;  %19263 = vst [vmem:[#allocation70_spill] sm:$0xff] %v12894_v63 }
 0x447   : > { %1601 = vrot.lane.b32.xlu0 %v1557_v2, %s11533_s27  ;;  %v1188_v2 = vadd.f32 1.1920929e-07, %v1172_v14 }
 0x448   : > { %1583 = vrot.lane.b32.xlu1 %v1548_v31, %s11533_s27  ;;  %v19260_v31 = vld [vmem:[#allocation104_spill] sm:$0xff]  ;;  %v12891_v47 = vpop.permute.xlu0 %808 }
 0x449   : > { %v1559_v57 = vmul.f32 %v19260_v31, %v12862_v62  ;;  %19262 = vst [vmem:[#allocation107_spill] sm:$0xff] %v12891_v47  ;;  %10906 = vrsqrt.f32 %v1188_v2  ;;  %v19266_v47 = vld [vmem:[#allocation110_spill] sm:$0xff]  ;;  %v19267_v2 = vld [vmem:[#allocation87_spill] sm:$0xff] }
 0x44b   : > { %1397 = vrot.lane.b32.xlu0 %v1351_v30, %s11537_s14  ;;  %v1174_v30 = vmul.f32 0.0625, %v1154_v49  ;;  %v10905_v31 = vpop.eup %10904 }
 0x44c   : > { %1379 = vrot.lane.b32.xlu1 %v1342_v21, %s11537_s14  ;;  %v19264_v21 = vld [vmem:[#allocation85_spill] sm:$0xff]  ;;  %v12900_v6 = vmul.f32 %v10905_v31, %v12112_v50  ;;  %v12902_v9 = vpop.permute.xlu0 %984 }
 0x44d   : > { %v1344_v14 = vmul.f32 %v19264_v21, %v12886_v12  ;;  %v1190_v43 = vadd.f32 1.1920929e-07, %v1174_v30  ;;  %19265 = vst [vmem:[#allocation81_spill] sm:$0xff] %v12902_v9 }
 0x44e   : > { %v1346_v21 = vmul.f32 %v19267_v2, %v12900_v6 }
 0x44f   : > { %1605 = vrot.lane.b32.xlu0 %v1559_v57, %s11533_s27  ;;  %v1160_v57 = vpop.xlane.xlu1 %1159  ;;  %10908 = vrsqrt.f32 %v1190_v43 }
 0x450   : > { %1587 = vrot.lane.b32.xlu1 %v1550_v29, %s11533_s27  ;;  %v1552_v29 = vmul.f32 %v19266_v47, %v12886_v12  ;;  %v1176_v49 = vmul.f32 0.0625, %v1160_v57  ;;  %v12909_v11 = vpop.permute.xlu0 %812  ;;  %v19270_v47 = vld [vmem:[#allocation111_spill] sm:$0xff] }
 0x451   : > { %19268 = vst [vmem:[#allocation102_spill] sm:$0xff] %v12909_v11  ;;  %v1554_v9 = vmul.f32 %v19270_v47, %v12900_v6 }
 0x453   : > { %v10907_v13 = vpop.eup %10906  ;;  %v12911_v30 = vpop.permute.xlu1 %802 }
 0x454   : > { %1383 = vrot.lane.b32.xlu1 %v1344_v14, %s11537_s14  ;;  %19269 = vst [vmem:[#allocation108_spill] sm:$0xff] %v12911_v30  ;;  %v1192_v14 = vadd.f32 1.1920929e-07, %v1176_v49  ;;  %v12915_v31 = vmul.f32 %v10907_v13, %v12142_v0  ;;  %v12920_v43 = vpop.permute.xlu0 %988  ;;  %v19274_v13 = vld [vmem:[#allocation112_spill] sm:$0xff] }
 0x455   : > { %19271 = vst [vmem:[#allocation72_spill] sm:$0xff] %v12920_v43 }
 0x456   : > { %10910 = vrsqrt.f32 %v1192_v14  ;;  %v19277_v14 = vld [vmem:[#allocation91_spill] sm:$0xff] }
 0x457   : > { %v12922_v57 = vpop.permute.xlu1 %978 }
 0x458   : > { %1591 = vrot.lane.b32.xlu1 %v1552_v29, %s11533_s27  ;;  %19272 = vst [vmem:[#allocation83_spill] sm:$0xff] %v12922_v57  ;;  %v19273_v29 = vld [vmem:[#allocation89_spill] sm:$0xff]  ;;  %v12932_v47 = vpop.permute.xlu0 %816 }
 0x459   : > { %v1348_v2 = vmul.f32 %v19273_v29, %v12915_v31  ;;  %v10909_v11 = vpop.eup %10908  ;;  %19275 = vst [vmem:[#allocation104_spill] sm:$0xff] %v12932_v47  ;;  %v19278_v29 = vld [vmem:[#allocation119_spill] sm:$0xff]  ;;  %v19281_v47 = vld [vmem:[#allocation113_spill] sm:$0xff] }
 0x45a   : > { %v12928_v49 = vmul.f32 %v10909_v11, %v12174_v28  ;;  %v1274_v28 = vmul.f32 %v19304_v15, %v12824_v58 }
 0x45c   : > { %1387 = vrot.lane.b32.xlu1 %v1346_v21, %s11537_s14  ;;  %v1556_v21 = vmul.f32 %v19274_v13, %v12915_v31  ;;  %v1350_v43 = vmul.f32 %v19277_v14, %v12928_v49  ;;  %v12942_v11 = vpop.permute.xlu0 %992  ;;  %v19282_v14 = vld [vmem:[#allocation120_spill] sm:$0xff] }
 0x45d   : > { %19279 = vst [vmem:[#allocation85_spill] sm:$0xff] %v12942_v11 }
 0x460   : > { %1595 = vrot.lane.b32.xlu1 %v1554_v9, %s11533_s27  ;;  %v12934_v9 = vpop.permute.xlu1 %806  ;;  %v10911_v30 = vpop.eup %10910 }
 0x461   : > { %19276 = vst [vmem:[#allocation109_spill] sm:$0xff] %v12934_v9  ;;  %v12945_v57 = vmul.f32 %v10911_v30, %v12220_v42  ;;  %v2425_v9 = vsel %vm550_vm1, %v19282_v14, 0.0  ;;  %v12956_v22 = vpop.permute.xlu0 %820  ;;  %v2431_v30 = vsel %vm550_vm1, %v12523_v26, 0.0 }
 0x462   : > { %19284 = vst [vmem:[#allocation87_spill] sm:$0xff] %v12956_v22 }
 0x464   : > { %1391 = vrot.lane.b32.xlu1 %v1348_v2, %s11537_s14  ;;  %v2419_v2 = vsel %vm550_vm1, %v19278_v29, 0.0  ;;  %v12947_v13 = vpop.permute.xlu1 %982 }
 0x465   : > { %19280 = vst [vmem:[#allocation110_spill] sm:$0xff] %v12947_v13  ;;  %v12968_v14 = vpop.permute.xlu0 %996  ;;  %v2428_v13 = vsel %vm550_vm1, %v12777_v16, 0.0 }
 0x466   : > { %19288 = vst [vmem:[#allocation89_spill] sm:$0xff] %v12968_v14 }
 0x468   : > { %1599 = vrot.lane.b32.xlu1 %v1556_v21, %s11533_s27  ;;  %v1558_v21 = vmul.f32 %v19281_v47, %v12928_v49  ;;  %v12958_v11 = vpop.permute.xlu1 %810  ;;  %v19286_v47 = vld [vmem:[#allocation114_spill] sm:$0xff] }
 0x469   : > { %19285 = vst [vmem:[#allocation111_spill] sm:$0xff] %v12958_v11 }
 0x46c   : > { %1395 = vrot.lane.b32.xlu1 %v1350_v43, %s11537_s14  ;;  %v19283_v43 = vld [vmem:[#allocation92_spill] sm:$0xff] }
 0x46d   : > { %v1352_v29 = vmul.f32 %v19283_v43, %v12945_v57  ;;  %v12970_v43 = vpop.permute.xlu1 %986 }
 0x46e   : > { %2420 = vadd.xlane.f32.xlu0 %v2419_v2  ;;  %v1560_v2 = vmul.f32 %v19286_v47, %v12945_v57  ;;  %19289 = vst [vmem:[#allocation112_spill] sm:$0xff] %v12970_v43  ;;  %v13013_v43 = vld [vmem:[%s18754_s3 + $0x40] sm:$0xff] }
 0x470   : > { %1603 = vrot.lane.b32.xlu1 %v1558_v21, %s11533_s27  ;;  %v19287_v21 = vld [vmem:[#allocation123_spill] sm:$0xff] }
 0x472   : > { %2426 = vadd.xlane.f32.xlu0 %v2425_v9  ;;  %v2437_v9 = vsel %vm550_vm1, %v19287_v21, 0.0  ;;  %v19293_v21 = vld [vmem:[#allocation129_spill] sm:$0xff] }
 0x473   : > { %19298 = vst [vmem:[#allocation129_spill] sm:$0xff] %v13013_v43 }
 0x474   : > { %1399 = vrot.lane.b32.xlu1 %v1352_v29, %s11537_s14  ;;  %v12974_v29 = vpop.permute.xlu1 %814 }
 0x475   : > { %19290 = vst [vmem:[#allocation91_spill] sm:$0xff] %v12974_v29 }
 0x476   : > { %2432 = vadd.xlane.f32.xlu0 %v2431_v30 }
 0x478   : > { %1607 = vrot.lane.b32.xlu1 %v1560_v2, %s11533_s27  ;;  %v12978_v26 = vpop.permute.xlu1 %990 }
 0x479   : > { %19291 = vst [vmem:[#allocation119_spill] sm:$0xff] %v12978_v26 }
 0x47a   : > { %2438 = vadd.xlane.f32.xlu0 %v2437_v9  ;;  %v12972_v22 = vpop.xlane.xlu0 %2396  ;;  %v12993_v9 = vld [vmem:[%s18754_s3 + $0x20] sm:$0xff] }
 0x47b   : > { %19295 = vst [vmem:[#allocation92_spill] sm:$0xff] %v12993_v9 }
 0x47c   : > { %v12982_v47 = vpop.permute.xlu1 %818 }
 0x47d   : > { %19292 = vst [vmem:[#allocation113_spill] sm:$0xff] %v12982_v47  ;;  %v13004_v47 = vld [vmem:[%s18754_s3 + $0x30] sm:$0xff] }
 0x47e   : > { %v12976_v11 = vpop.xlane.xlu0 %2402  ;;  %19297 = vst [vmem:[#allocation123_spill] sm:$0xff] %v13004_v47 }
 0x480   : > { %v12988_v14 = vpop.permute.xlu1 %994 }
 0x481   : > { %19294 = vst [vmem:[#allocation120_spill] sm:$0xff] %v12988_v14 }
 0x482   : > { %v12980_v30 = vpop.xlane.xlu0 %2405 }
 0x484   : > { %v12999_v26 = vpop.permute.xlu1 %822 }
 0x485   : > { %19296 = vst [vmem:[#allocation114_spill] sm:$0xff] %v12999_v26 }
 0x486   : > { %v12984_v2 = vpop.xlane.xlu0 %2408 }
 0x488   : > { %v13017_v26 = vpop.permute.xlu1 %998 }
 0x489   : > { %19299 = vst [vmem:[#allocation141_spill] sm:$0xff] %v13017_v26  ;;  %v13033_v26 = vld [vmem:[%s18754_s3 + $0x60] sm:$0xff] }
 0x48a   : > { %v12997_v29 = vpop.xlane.xlu0 %2414  ;;  %19301 = vst [vmem:[#allocation143_spill] sm:$0xff] %v13033_v26 }
 0x48c   : > { %v2378_v54 = vpop.permute.xlu1 %2377 }
 0x48d   : > { %v2440_v16 = vsel %vm550_vm1, %v2378_v54, 0.0  ;;  %v19303_v54 = vld [vmem:[#allocation43_spill] sm:$0xff] }
 0x48e   : > { %v1370_v14 = vpop.permute.xlu0 %1369 }
 0x490   : > { %2523 = vrot.lane.b32.xlu0 %v19293_v21, %s11538_s8  ;;  %v2422_v21 = vsel %vm550_vm1, %v12770_v53, 0.0  ;;  %v13024_v53 = vld [vmem:[%s18754_s3 + $0x50] sm:$0xff] }
 0x491   : > { %19300 = vst [vmem:[#allocation142_spill] sm:$0xff] %v13024_v53 }
 0x494   : > { %2531 = vrot.lane.b32.xlu0 %v12993_v9, %s11538_s8 }
 0x498   : > { %2535 = vrot.lane.b32.xlu0 %v13004_v47, %s11538_s8 }
 0x49c   : > { %2423 = vadd.xlane.f32.xlu1 %v2422_v21  ;;  %2539 = vrot.lane.b32.xlu0 %v13013_v43, %s11538_s8  ;;  %v1578_v21 = vpop.permute.xlu0 %1577  ;;  %v13058_v43 = vld [vmem:[%s18754_s3 + $0x10] sm:$0xff] }
 0x4a0   : > { %2429 = vadd.xlane.f32.xlu1 %v2428_v13  ;;  %2543 = vrot.lane.b32.xlu0 %v13024_v53, %s11538_s8  ;;  %v1374_v13 = vpop.permute.xlu0 %1373 }
 0x4a4   : > { %2435 = vadd.xlane.f32.xlu1 %v2434_v61  ;;  %2547 = vrot.lane.b32.xlu0 %v13033_v26, %s11538_s8  ;;  %v1582_v63 = vpop.permute.xlu0 %1581  ;;  %v13047_v61 = vld [vmem:[%s18754_s3 + $0x8] sm:$0xff] }
 0x4a5   : > { %19302 = vst [vmem:[#allocation144_spill] sm:$0xff] %v13047_v61 }
 0x4a8   : > { %2441 = vadd.xlane.f32.xlu1 %v2440_v16  ;;  %v1378_v42 = vpop.permute.xlu0 %1377  ;;  %v1273_v16 = vmul.f32 %v19303_v54, %v12759_v60  ;;  %v19306_v54 = vld [vmem:[#allocation94_spill] sm:$0xff] }
 0x4a9   : > { %v1482_v9 = vmul.f32 %v19306_v54, %v12824_v58  ;;  %v19308_v58 = vld [vmem:[#allocation63_spill] sm:$0xff] }
 0x4aa   : > { %v1417_v0 = vadd.f32 %v1370_v14, %v1273_v16  ;;  %v19309_v16 = vld [vmem:[#allocation78_spill] sm:$0xff] }
 0x4ac   : > { %v1586_v45 = vpop.permute.xlu0 %1585 }
 0x4b0   : > { %v13038_v19 = vpop.xlane.xlu1 %2399  ;;  %v1382_v34 = vpop.permute.xlu0 %1381 }
 0x4b4   : > { %v13040_v3 = vpop.xlane.xlu1 %2411 }
 0x4b8   : > { %v13042_v8 = vpop.xlane.xlu1 %2417 }
 0x4b9   : > { %2525 = vrot.lane.b32.xlu1 %v13047_v61, %s11538_s8  ;;  %v19305_v61 = vld [vmem:[#allocation74_spill] sm:$0xff] }
 0x4ba   : > { %v1481_v47 = vmul.f32 %v19305_v61, %v12759_v60  ;;  %v19307_v60 = vld [vmem:[#allocation62_spill] sm:$0xff] }
 0x4bc   : > { %v1372_v26 = vpop.permute.xlu1 %1371  ;;  %v1625_v27 = vsub.f32 %v1481_v47, %v1578_v21  ;;  %v13081_v21 = vld [vmem:[%s18754_s3 + $0x28] sm:$0xff] }
 0x4bd   : > { %v1418_v53 = vadd.f32 %v1372_v26, %v1274_v28  ;;  %2527 = vrot.lane.b32.xlu1 %v13058_v43, %s11538_s8  ;;  %v13069_v28 = vld [vmem:[%s18754_s3 + $0x18] sm:$0xff] }
 0x4bf   : > { %v10408_v50 = vpack.i.bf16 %v1418_v53, %v1417_v0  ;;  %v1275_v0 = vmul.f32 %v19307_v60, %v12766_v23  ;;  %v1276_v53 = vmul.f32 %v19308_v58, %v12843_v51  ;;  %v13093_v58 = vld [vmem:[%s18754_s3 + $0x38] sm:$0xff] }
 0x4c0   : > { %v1580_v15 = vpop.permute.xlu1 %1579  ;;  %19311 = vst [vmem:[#allocation43_spill] sm:$0xff] %v13093_v58 }
 0x4c1   : > { %v1626_v14 = vsub.f32 %v1482_v9, %v1580_v15  ;;  %2529 = vrot.lane.b32.xlu1 %v13069_v28, %s11538_s8  ;;  %10409 = vrot.lane.b32.xlu0 %v10408_v50, %s11534_s11  ;;  %v1419_v47 = vadd.f32 %v1374_v13, %v1275_v0  ;;  %v1590_v50 = vpop.permute.xlu0 %1589  ;;  %v19310_v15 = vld [vmem:[#allocation95_spill] sm:$0xff] }
 0x4c3   : > { %v10413_v26 = vpack.i.bf16 %v1626_v14, %v1625_v27  ;;  %v1483_v27 = vmul.f32 %v19309_v16, %v12766_v23  ;;  %v1484_v14 = vmul.f32 %v19310_v15, %v12843_v51  ;;  %v19312_v23 = vld [vmem:[#allocation47_spill] sm:$0xff] }
 0x4c4   : > { %v1376_v61 = vpop.permute.xlu1 %1375  ;;  %v13111_v15 = vld [vmem:[%s18754_s3 + $0x48] sm:$0xff] }
 0x4c5   : > { %v1420_v9 = vadd.f32 %v1376_v61, %v1276_v53  ;;  %2533 = vrot.lane.b32.xlu1 %v13081_v21, %s11538_s8  ;;  %10414 = vrot.lane.b32.xlu0 %v10413_v26, %s11534_s11  ;;  %v1627_v60 = vsub.f32 %v1483_v27, %v1582_v63  ;;  %v13100_v26 = vld [vmem:[%s18754_s3 + $0x70] sm:$0xff]  ;;  %v1277_v63 = vmul.f32 %v19312_v23, %v12780_v37  ;;  %v19313_v53 = vld [vmem:[#allocation65_spill] sm:$0xff] }
 0x4c6   : > { %v1278_v61 = vmul.f32 %v19313_v53, %v12867_v7  ;;  %19314 = vst [vmem:[#allocation61_spill] sm:$0xff] %v13111_v15 }
 0x4c7   : > { %v10418_v54 = vpack.i.bf16 %v1420_v9, %v1419_v47  ;;  %v1386_v47 = vpop.permute.xlu0 %1385  ;;  %v1421_v16 = vadd.f32 %v1378_v42, %v1277_v63  ;;  %v19315_v42 = vld [vmem:[#allocation80_spill] sm:$0xff] }
 0x4c8   : > { %v1584_v13 = vpop.permute.xlu1 %1583 }
 0x4c9   : > { %v1628_v0 = vsub.f32 %v1484_v14, %v1584_v13  ;;  %2537 = vrot.lane.b32.xlu1 %v13093_v58, %s11538_s8  ;;  %2551 = vrot.lane.b32.xlu0 %v13100_v26, %s11538_s8  ;;  %v13118_v14 = vld [vmem:[%s18755_s4] sm:$0xff]  ;;  %v1485_v13 = vmul.f32 %v19315_v42, %v12780_v37  ;;  %v19318_v37 = vld [vmem:[#allocation49_spill] sm:$0xff] }
 0x4ca   : > { %v19325_v58 = vld [vmem:[#allocation69_spill] sm:$0xff] }
 0x4cb   : > { %v10423_v51 = vpack.i.bf16 %v1628_v0, %v1627_v60  ;;  %v19316_v0 = vld [vmem:[#allocation97_spill] sm:$0xff]  ;;  %v1629_v53 = vsub.f32 %v1485_v13, %v1586_v45 }
 0x4cc   : > { %v1380_v9 = vpop.permute.xlu1 %1379  ;;  %v1486_v23 = vmul.f32 %v19316_v0, %v12867_v7  ;;  %v19319_v7 = vld [vmem:[#allocation67_spill] sm:$0xff] }
 0x4cd   : > { %v1422_v27 = vadd.f32 %v1380_v9, %v1278_v61  ;;  %2541 = vrot.lane.b32.xlu1 %v13111_v15, %s11538_s8  ;;  %2587 = vrot.lane.b32.xlu0 %v13118_v14, %s11539_s24  ;;  %v13129_v9 = vld [vmem:[%s18754_s3 + $0x58] sm:$0xff]  ;;  %v1594_v15 = vpop.permute.xlu0 %1593  ;;  %v1280_v42 = vmul.f32 %v19319_v7, %v12886_v12 }
 0x4ce   : > { %19317 = vst [vmem:[#allocation74_spill] sm:$0xff] %v13129_v9 }
 0x4cf   : > { %v10428_v60 = vpack.i.bf16 %v1422_v27, %v1421_v16  ;;  %v1279_v16 = vmul.f32 %v19318_v37, %v12794_v35 }
 0x4d0   : > { %v1588_v63 = vpop.permute.xlu1 %1587 }
 0x4d1   : > { %v1630_v61 = vsub.f32 %v1486_v23, %v1588_v63  ;;  %2545 = vrot.lane.b32.xlu1 %v13129_v9, %s11538_s8  ;;  %10429 = vrot.lane.b32.xlu0 %v10428_v60, %s11534_s11  ;;  %v1423_v13 = vadd.f32 %v1382_v34, %v1279_v16  ;;  %v13141_v23 = vld [vmem:[%s18754_s3 + $0x68] sm:$0xff]  ;;  %v19321_v60 = vld [vmem:[#allocation82_spill] sm:$0xff]  ;;  %v1390_v7 = vpop.permute.xlu0 %1389 }
 0x4d2   : > { %19320 = vst [vmem:[#allocation94_spill] sm:$0xff] %v13141_v23  ;;  %v1487_v63 = vmul.f32 %v19321_v60, %v12794_v35  ;;  %v1282_v35 = vmul.f32 %v19325_v58, %v12900_v6  ;;  %v13167_v58 = vld [vmem:[%s18754_s3 + $0x78] sm:$0xff] }
 0x4d3   : > { %v10433_v27 = vpack.i.bf16 %v1630_v61, %v1629_v53  ;;  %v19322_v61 = vld [vmem:[#allocation99_spill] sm:$0xff] }
 0x4d4   : > { %v1384_v45 = vpop.permute.xlu1 %1383  ;;  %v1488_v37 = vmul.f32 %v19322_v61, %v12886_v12  ;;  %v1631_v16 = vsub.f32 %v1487_v63, %v1590_v50  ;;  %v19326_v12 = vld [vmem:[#allocation126_spill] sm:$0xff] }
 0x4d5   : > { %v1424_v0 = vadd.f32 %v1384_v45, %v1280_v42  ;;  %2549 = vrot.lane.b32.xlu1 %v13141_v23, %s11538_s8  ;;  %10434 = vrot.lane.b32.xlu0 %v10433_v27, %s11534_s11  ;;  %v19323_v45 = vld [vmem:[#allocation118_spill] sm:$0xff]  ;;  %v19324_v23 = vld [vmem:[#allocation51_spill] sm:$0xff]  ;;  %v1598_v50 = vpop.permute.xlu0 %1597 }
 0x4d6   : > { %v1281_v9 = vmul.f32 %v19324_v23, %v12810_v38 }
 0x4d7   : > { %v10438_v53 = vpack.i.bf16 %v1424_v0, %v1423_v13 }
 0x4d8   : > { %v1592_v34 = vpop.permute.xlu1 %1591  ;;  %v1425_v0 = vadd.f32 %v1386_v47, %v1281_v9  ;;  %v19330_v9 = vld [vmem:[#allocation71_spill] sm:$0xff] }
 0x4d9   : > { %v1632_v42 = vsub.f32 %v1488_v37, %v1592_v34  ;;  %10419 = vrot.lane.b32.xlu1 %v10418_v54, %s11534_s11  ;;  %2591 = vrot.lane.b32.xlu0 %v19323_v45, %s11539_s24  ;;  %v19327_v54 = vld [vmem:[#allocation84_spill] sm:$0xff]  ;;  %v19328_v37 = vld [vmem:[#allocation101_spill] sm:$0xff]  ;;  %v1394_v45 = vpop.permute.xlu0 %1393 }
 0x4da   : > { %v1489_v63 = vmul.f32 %v19327_v54, %v12810_v38  ;;  %v1490_v23 = vmul.f32 %v19328_v37, %v12900_v6  ;;  %v1284_v6 = vmul.f32 %v19330_v9, %v12915_v31 }
 0x4db   : > { %v10443_v27 = vpack.i.bf16 %v1632_v42, %v1631_v16 }
 0x4dc   : > { %v1388_v13 = vpop.permute.xlu1 %1387  ;;  %v1633_v16 = vsub.f32 %v1489_v63, %v1594_v15  ;;  %v19333_v63 = vld [vmem:[#allocation103_spill] sm:$0xff] }
 0x4dd   : > { %v1426_v60 = vadd.f32 %v1388_v13, %v1282_v35  ;;  %10424 = vrot.lane.b32.xlu1 %v10423_v51, %s11534_s11  ;;  %2595 = vrot.lane.b32.xlu0 %v19326_v12, %s11539_s24  ;;  %v19329_v51 = vld [vmem:[#allocation53_spill] sm:$0xff] }
 0x4de   : > { %v1283_v38 = vmul.f32 %v19329_v51, %v12819_v33 }
 0x4df   : > { %v10448_v61 = vpack.i.bf16 %v1426_v60, %v1425_v0  ;;  %v19331_v0 = vld [vmem:[#allocation116_spill] sm:$0xff]  ;;  %v19332_v60 = vld [vmem:[#allocation86_spill] sm:$0xff] }
 0x4e0   : > { %v1596_v34 = vpop.permute.xlu1 %1595  ;;  %v1427_v35 = vadd.f32 %v1390_v7, %v1283_v38  ;;  %v1491_v12 = vmul.f32 %v19332_v60, %v12819_v33  ;;  %v19334_v7 = vld [vmem:[#allocation128_spill] sm:$0xff] }
 0x4e1   : > { %v1634_v42 = vsub.f32 %v1490_v23, %v1596_v34  ;;  %2553 = vrot.lane.b32.xlu1 %v13167_v58, %s11538_s8  ;;  %10449 = vrot.lane.b32.xlu0 %v10448_v61, %s11534_s11  ;;  %v1492_v61 = vmul.f32 %v19333_v63, %v12915_v31  ;;  %v19337_v31 = vld [vmem:[#allocation88_spill] sm:$0xff] }
 0x4e2   : > { %v1635_v23 = vsub.f32 %v1491_v12, %v1598_v50 }
 0x4e3   : > { %v10453_v47 = vpack.i.bf16 %v1634_v42, %v1633_v16  ;;  %v1602_v16 = vpop.permute.xlu0 %1601  ;;  %v19335_v42 = vld [vmem:[#allocation55_spill] sm:$0xff] }
 0x4e4   : > { %v1392_v15 = vpop.permute.xlu1 %1391  ;;  %v1285_v51 = vmul.f32 %v19335_v42, %v12838_v44 }
 0x4e5   : > { %v1428_v13 = vadd.f32 %v1392_v15, %v1284_v6  ;;  %2589 = vrot.lane.b32.xlu1 %v19331_v0, %s11539_s24  ;;  %10454 = vrot.lane.b32.xlu0 %v10453_v47, %s11534_s11  ;;  %v19336_v47 = vld [vmem:[#allocation73_spill] sm:$0xff] }
 0x4e6   : > { %v1286_v33 = vmul.f32 %v19336_v47, %v12928_v49  ;;  %v1429_v6 = vadd.f32 %v1394_v45, %v1285_v51  ;;  %v19343_v47 = vld [vmem:[#allocation106_spill] sm:$0xff] }
 0x4e7   : > { %v10458_v54 = vpack.i.bf16 %v1428_v13, %v1427_v35  ;;  %v19338_v35 = vld [vmem:[#allocation105_spill] sm:$0xff]  ;;  %v1398_v0 = vpop.permute.xlu0 %1397 }
 0x4e8   : > { %v1600_v37 = vpop.permute.xlu1 %1599  ;;  %v1494_v13 = vmul.f32 %v19338_v35, %v12928_v49  ;;  %v2445_v35 = vmul.f32 0.0625, %v12976_v11 }
 0x4e9   : > { %v1636_v34 = vsub.f32 %v1492_v61, %v1600_v37  ;;  %10439 = vrot.lane.b32.xlu1 %v10438_v53, %s11534_s11  ;;  %2599 = vrot.lane.b32.xlu0 %v19334_v7, %s11539_s24  ;;  %v1493_v53 = vmul.f32 %v19337_v31, %v12838_v44  ;;  %v19339_v61 = vld [vmem:[#allocation122_spill] sm:$0xff]  ;;  %v19341_v37 = vld [vmem:[#allocation76_spill] sm:$0xff] }
 0x4ea   : > { %v1288_v44 = vmul.f32 %v19341_v37, %v12945_v57 }
 0x4eb   : > { %v10463_v38 = vpack.i.bf16 %v1636_v34, %v1635_v23  ;;  %v1637_v12 = vsub.f32 %v1493_v53, %v1602_v16  ;;  %v1606_v49 = vpop.permute.xlu0 %1605  ;;  %v19342_v16 = vld [vmem:[#allocation90_spill] sm:$0xff] }
 0x4ec   : > { %v1396_v9 = vpop.permute.xlu1 %1395  ;;  %v1495_v42 = vmul.f32 %v19342_v16, %v12862_v62 }
 0x4ed   : > { %v1430_v15 = vadd.f32 %v1396_v9, %v1286_v33  ;;  %10444 = vrot.lane.b32.xlu1 %v10443_v27, %s11534_s11  ;;  %2603 = vrot.lane.b32.xlu0 %v12611_v5, %s11539_s24  ;;  %v19340_v27 = vld [vmem:[#allocation57_spill] sm:$0xff]  ;;  %v1496_v33 = vmul.f32 %v19343_v47, %v12945_v57 }
 0x4ee   : > { %v1287_v45 = vmul.f32 %v19340_v27, %v12862_v62 }
 0x4ef   : > { %v10468_v50 = vpack.i.bf16 %v1430_v15, %v1429_v6  ;;  %v1639_v6 = vsub.f32 %v1495_v42, %v1606_v49 }
 0x4f0   : > { %v1604_v60 = vpop.permute.xlu1 %1603  ;;  %v1431_v34 = vadd.f32 %v1398_v0, %v1287_v45  ;;  %v2461_v0 = vadd.f32 1.1920929e-07, %v2445_v35 }
 0x4f1   : > { %v1638_v63 = vsub.f32 %v1494_v13, %v1604_v60  ;;  %2593 = vrot.lane.b32.xlu1 %v19339_v61, %s11539_s24  ;;  %10469 = vrot.lane.b32.xlu0 %v10468_v50, %s11534_s11  ;;  %v2447_v60 = vmul.f32 0.0625, %v12984_v2  ;;  %v19344_v2 = vmov 0 }
 0x4f2   : > { %v19345_v2 = vsel %vm13266_vm3, 4294967295, %v19344_v2 }
 0x4f3   : > { %v10473_v5 = vpack.i.bf16 %v1638_v63, %v1637_v12  ;;  %v2463_v37 = vadd.f32 1.1920929e-07, %v2447_v60  ;;  %19346 = vst [vmem:[#allocation62_spill] sm:$0xff] %v19345_v2 }
 0x4f4   : > { %v1400_v23 = vpop.permute.xlu1 %1399 }
 0x4f5   : > { %v1432_v7 = vadd.f32 %v1400_v23, %v1288_v44  ;;  %2597 = vrot.lane.b32.xlu1 %v12671_v48, %s11539_s24  ;;  %10474 = vrot.lane.b32.xlu0 %v10473_v5, %s11534_s11 }
 0x4f7   : > { %v10478_v51 = vpack.i.bf16 %v1432_v7, %v1431_v34 }
 0x4f8   : > { %v1608_v9 = vpop.permute.xlu1 %1607 }
 0x4f9   : > { %v1640_v15 = vsub.f32 %v1496_v33, %v1608_v9  ;;  %10459 = vrot.lane.b32.xlu1 %v10458_v54, %s11534_s11  ;;  %2607 = vrot.lane.b32.xlu0 %v12626_v17, %s11539_s24  ;;  %v2443_v54 = vmul.f32 0.0625, %v12972_v22  ;;  %v2449_v33 = vmul.f32 0.0625, %v12997_v29 }
 0x4fb   : > { %v10483_v31 = vpack.i.bf16 %v1640_v15, %v1639_v6  ;;  %v2421_v48 = vpop.xlane.xlu0 %2420 }
 0x4fd   : > { %10464 = vrot.lane.b32.xlu1 %v10463_v38, %s11534_s11  ;;  %2611 = vrot.lane.b32.xlu0 %v12642_v36, %s11539_s24  ;;  %v2459_v38 = vadd.f32 1.1920929e-07, %v2443_v54  ;;  %v2465_v54 = vadd.f32 1.1920929e-07, %v2449_v33  ;;  %v2446_v33 = vmul.f32 0.0625, %v12980_v30 }
 0x4ff   : > { %v13217_v62 = vpop.xlane.xlu0 %2426  ;;  %10912 = vrsqrt.f32 %v2459_v38 }
 0x500   : > { %10914 = vrsqrt.f32 %v2461_v0 }
 0x501   : > { %2601 = vrot.lane.b32.xlu1 %v12685_v59, %s11539_s24  ;;  %2615 = vrot.lane.b32.xlu0 %v12657_v56, %s11539_s24  ;;  %10916 = vrsqrt.f32 %v2463_v37 }
 0x502   : > { %10918 = vrsqrt.f32 %v2465_v54 }
 0x503   : > { %v13223_v57 = vpop.xlane.xlu0 %2432 }
 0x505   : > { %2605 = vrot.lane.b32.xlu1 %v12699_v24, %s11539_s24 }
 0x507   : > { %v13228_v17 = vpop.xlane.xlu0 %2438 }
 0x509   : > { %10479 = vrot.lane.b32.xlu1 %v10478_v51, %s11534_s11  ;;  %v10913_v22 = vpop.eup %10912 }
 0x50a   : > { %v2491_v23 = vmul.f32 0.25, %v10913_v22  ;;  %v10915_v6 = vpop.eup %10914 }
 0x50b   : > { %v13231_v36 = vpop.permute.xlu0 %2523  ;;  %v2493_v35 = vmul.f32 0.25, %v10915_v6 }
 0x50c   : > { %v13277_v42 = vmul.f32 %v2491_v23, %v12038_v10 }
 0x50d   : > { %10484 = vrot.lane.b32.xlu1 %v10483_v31, %s11534_s11  ;;  %v2451_v31 = vmul.f32 0.0625, %v2421_v48  ;;  %v13293_v29 = vmul.f32 %v2493_v35, %v12058_v18  ;;  %s11541_s11 = smov 80  }
 0x50f   : > { %v13237_v56 = vpop.permute.xlu0 %2531  ;;  %v2467_v60 = vadd.f32 1.1920929e-07, %v2451_v31 }
 0x511   : > { %2609 = vrot.lane.b32.xlu1 %v12715_v39, %s11539_s24  ;;  %10920 = vrsqrt.f32 %v2467_v60 }
 0x513   : > { %v13241_v59 = vpop.permute.xlu0 %2535 }
 0x515   : > { %2613 = vrot.lane.b32.xlu1 %v12732_v46, %s11539_s24 }
 0x517   : > { %v13243_v24 = vpop.permute.xlu0 %2539 }
 0x519   : > { %2617 = vrot.lane.b32.xlu1 %v12747_v1, %s11539_s24 }
 0x51b   : > { %v13246_v53 = vpop.permute.xlu0 %2543 }
 0x51f   : > { %v13252_v46 = vpop.permute.xlu0 %2547 }
 0x529   : > { %v13248_v50 = vpop.xlane.xlu1 %2423 }
 0x52d   : > { %v13250_v39 = vpop.xlane.xlu1 %2429 }
 0x531   : > { %v13255_v13 = vpop.xlane.xlu1 %2435 }
 0x533   : > { %v10410_v1 = vpop.permute.xlu0 %10409 }
 0x534   : > { %v10412_v61 = vunpack.i.h.bf16 %v10410_v1  ;;  %v10411_v27 = vunpack.i.l.bf16 %v10410_v1  ;;  %v10917_v1 = vpop.eup %10916 }
 0x535   : > { %v13258_v12 = vpop.xlane.xlu1 %2441 }
 0x537   : > { %v10415_v63 = vpop.permute.xlu0 %10414 }
 0x538   : > { %v10417_v45 = vunpack.i.h.bf16 %v10415_v63  ;;  %v10416_v5 = vunpack.i.l.bf16 %v10415_v63  ;;  %v2495_v63 = vmul.f32 0.25, %v10917_v1 }
 0x539   : > { %v13260_v44 = vpop.permute.xlu1 %2525 }
 0x53a   : > { %v1769_v11 = vsel %vm1032_vm2, %v10411_v27, %v10416_v5  ;;  %v1770_v34 = vsel %vm1032_vm2, %v10412_v61, %v10417_v45  ;;  %v2444_v61 = vmul.f32 0.0625, %v13038_v19  ;;  %v13300_v5 = vmul.f32 %v2495_v63, %v12064_v25  ;;  %v10919_v19 = vpop.eup %10918 }
 0x53b   : > { %v13270_v7 = vpop.permute.xlu0 %2551  ;;  %v10032_v49 = vpack.c.bf16 %v1770_v34, %v1769_v11  ;;  %v2453_v34 = vmul.f32 0.0625, %v13217_v62  ;;  %v10921_v54 = vpop.eup %10920  ;;  %v2497_v35 = vmul.f32 0.25, %v10919_v19  ;;  %v2457_v62 = vmul.f32 0.0625, %v13228_v17 }
 0x53c   : > { %v2460_v37 = vadd.f32 1.1920929e-07, %v2444_v61  ;;  %v2462_v63 = vadd.f32 1.1920929e-07, %v2446_v33  ;;  %v2448_v61 = vmul.f32 0.0625, %v13040_v3 }
 0x53d   : > { %10034 = vmatprep.subr.msk.bf16.mxu1 %vm13266_vm3, %v10032_v49  ;;  %v13274_v16 = vpop.permute.xlu1 %2527  ;;  %v2469_v6 = vadd.f32 1.1920929e-07, %v2453_v34  ;;  %v2473_v30 = vadd.f32 1.1920929e-07, %v2457_v62 }
 0x53e   : > { %10037 = vmatpush3.bf16.xpose.msk.msra.mxu1 %vm13266_vm3, %v10032_v49  ;;  %10922 = vrsqrt.f32 %v2460_v37  ;;  %v2464_v19 = vadd.f32 1.1920929e-07, %v2448_v61 }
 0x53f   : > { %v2588_v51 = vpop.permute.xlu0 %2587  ;;  %10924 = vrsqrt.f32 %v2469_v6 }
 0x540   : > { %v2635_v47 = vmul.f32 %v2588_v51, %v13277_v42  ;;  %v2455_v51 = vmul.f32 0.0625, %v13223_v57 }
 0x541   : > { %v13283_v9 = vpop.permute.xlu1 %2529 }
 0x542   : > { %2667 = vrot.lane.b32.xlu0 %v2635_v47, %s11537_s14  ;;  %v2471_v1 = vadd.f32 1.1920929e-07, %v2455_v51 }
 0x543   : > { %v13286_v15 = vpop.permute.xlu0 %10429 }
 0x544   : > { %10926 = vrsqrt.f32 %v2471_v1  ;;  %v10432_v3 = vunpack.i.h.bf16 %v13286_v15  ;;  %v10431_v33 = vunpack.i.l.bf16 %v13286_v15 }
 0x545   : > { %v13288_v38 = vpop.permute.xlu1 %2533  ;;  %10928 = vrsqrt.f32 %v2462_v63 }
 0x546   : > { %10930 = vrsqrt.f32 %v2473_v30 }
 0x547   : > { %v10435_v0 = vpop.permute.xlu0 %10434  ;;  %10932 = vrsqrt.f32 %v2464_v19 }
 0x548   : > { %v10437_v37 = vunpack.i.h.bf16 %v10435_v0  ;;  %v10436_v34 = vunpack.i.l.bf16 %v10435_v0 }
 0x549   : > { %v13290_v22 = vpop.permute.xlu1 %2537 }
 0x54a   : > { %v1774_v0 = vsel %vm1032_vm2, %v10432_v3, %v10437_v37  ;;  %v1773_v61 = vsel %vm1032_vm2, %v10431_v33, %v10436_v34  ;;  %v2450_v34 = vmul.f32 0.0625, %v13042_v8  ;;  %v2452_v8 = vmul.f32 0.0625, %v13248_v50 }
 0x54b   : > { %v2592_v27 = vpop.permute.xlu0 %2591  ;;  %v10044_v30 = vpack.c.bf16 %v1774_v0, %v1773_v61 }
 0x54c   : > { %v2637_v48 = vmul.f32 %v2592_v27, %v13293_v29  ;;  %v2499_v27 = vmul.f32 0.25, %v10921_v54 }
 0x54d   : > { %v13297_v45 = vpop.permute.xlu1 %2541 }
 0x54e   : > { %2671 = vrot.lane.b32.xlu0 %v2637_v48, %s11537_s14  ;;  %v13319_v48 = vmul.f32 %v2497_v35, %v12072_v32  ;;  %v13323_v51 = vmul.f32 %v2499_v27, %v12086_v41 }
 0x54f   : > { %v2596_v23 = vpop.permute.xlu0 %2595 }
 0x550   : > { %v2639_v11 = vmul.f32 %v2596_v23, %v13300_v5 }
 0x551   : > { %v13305_v49 = vpop.permute.xlu1 %2545 }
 0x552   : > { %2675 = vrot.lane.b32.xlu0 %v2639_v11, %s11537_s14  ;;  %v10923_v11 = vpop.eup %10922 }
 0x553   : > { %v13309_v47 = vpop.permute.xlu0 %10449  ;;  %v2492_v32 = vmul.f32 0.25, %v10923_v11 }
 0x555   : > { %v13312_v31 = vpop.permute.xlu1 %2549  ;;  %v13341_v37 = vmul.f32 %v2492_v32, %v19242_v52 }
 0x557   : > { %v13315_v60 = vpop.permute.xlu0 %10454 }
 0x559   : > { %v10420_v57 = vpop.permute.xlu1 %10419 }
 0x55a   : > { %v10422_v54 = vunpack.i.h.bf16 %v10420_v57  ;;  %v10421_v35 = vunpack.i.l.bf16 %v10420_v57 }
 0x55b   : > { %v2600_v23 = vpop.permute.xlu0 %2599 }
 0x55c   : > { %v2641_v17 = vmul.f32 %v2600_v23, %v13319_v48 }
 0x55d   : > { %v10425_v6 = vpop.permute.xlu1 %10424 }
 0x55e   : > { %v10427_v1 = vunpack.i.h.bf16 %v10425_v6  ;;  %v10426_v62 = vunpack.i.l.bf16 %v10425_v6  ;;  %2679 = vrot.lane.b32.xlu0 %v2641_v17, %s11537_s14  ;;  %v10925_v17 = vpop.eup %10924 }
 0x55f   : > { %v2604_v63 = vpop.permute.xlu0 %2603  ;;  %v10927_v3 = vpop.eup %10926  ;;  %v2501_v6 = vmul.f32 0.25, %v10925_v17  ;;  %v10456_v17 = vunpack.i.l.bf16 %v13315_v60 }
 0x560   : > { %v1771_v27 = vsel %vm1032_vm2, %v10421_v35, %v10426_v62  ;;  %v1772_v23 = vsel %vm1032_vm2, %v10422_v54, %v10427_v1  ;;  %v2643_v15 = vmul.f32 %v2604_v63, %v13323_v51  ;;  %v10929_v19 = vpop.eup %10928  ;;  %v2466_v1 = vadd.f32 1.1920929e-07, %v2450_v34 }
 0x561   : > { %v13333_v41 = vpop.permute.xlu1 %2553  ;;  %v10038_v57 = vpack.c.bf16 %v1772_v23, %v1771_v27  ;;  %v2503_v62 = vmul.f32 0.25, %v10927_v3  ;;  %v10931_v32 = vpop.eup %10930  ;;  %v13354_v63 = vmul.f32 %v2501_v6, %v12118_v55  ;;  %v2494_v61 = vmul.f32 0.25, %v10929_v19 }
 0x562   : > { %19347 = vst [vmem:[#allocation63_spill] sm:$0xff] %v13333_v41  ;;  %2683 = vrot.lane.b32.xlu0 %v2643_v15, %s11537_s14  ;;  %v10457_v27 = vunpack.i.h.bf16 %v13315_v60  ;;  %v10933_v15 = vpop.eup %10932  ;;  %10934 = vrsqrt.f32 %v2466_v1  ;;  %v2505_v50 = vmul.f32 0.25, %v10931_v32  ;;  %v2468_v3 = vadd.f32 1.1920929e-07, %v2452_v8 }
 0x563   : > { %v13336_v11 = vpop.permute.xlu0 %10469  ;;  %10040 = vmatprep.subr.msk.bf16.mxu1 %vm13266_vm3, %v10038_v57  ;;  %v10451_v19 = vunpack.i.l.bf16 %v13309_v47  ;;  %v13368_v60 = vmul.f32 %v2494_v61, %v12060_v20  ;;  %v19368_v20 = vld [vmem:[#allocation45_spill] sm:$0xff] }
 0x564   : > { %10043 = vmatpush3.bf16.xpose.msk.msra.mxu1 %vm13266_vm3, %v10038_v57  ;;  %v13358_v57 = vmul.f32 %v2503_v62, %v12146_v4  ;;  %v2496_v62 = vmul.f32 0.25, %v10933_v15  ;;  %10936 = vrsqrt.f32 %v2468_v3  ;;  %v2454_v3 = vmul.f32 0.0625, %v13250_v39  ;;  %v19349_v39 = vld [vmem:[#allocation14_spill] sm:$0xff] }
 0x565   : > { %v2590_v33 = vpop.permute.xlu1 %2589  ;;  %10046 = vmatprep.subr.msk.bf16.mxu1 %vm13266_vm3, %v10044_v30  ;;  %v1777_v32 = vsel %vm1032_vm2, %v10451_v19, %v10456_v17 }
 0x566   : > { %v2636_v54 = vmul.f32 %v2590_v33, %v13341_v37  ;;  %v10452_v33 = vunpack.i.h.bf16 %v13309_v47 }
 0x567   : > { %v13349_v35 = vpop.permute.xlu0 %10474 }
 0x568   : > { %2669 = vrot.lane.b32.xlu1 %v2636_v54, %s11537_s14 }
 0x569   : > { %v10440_v0 = vpop.permute.xlu1 %10439 }
 0x56a   : > { %v10442_v54 = vunpack.i.h.bf16 %v10440_v0  ;;  %v10441_v55 = vunpack.i.l.bf16 %v10440_v0 }
 0x56b   : > { %v2608_v23 = vpop.permute.xlu0 %2607 }
 0x56c   : > { %v2645_v34 = vmul.f32 %v2608_v23, %v13354_v63  ;;  %10049 = vmatpush3.bf16.xpose.msk.msra.mxu1 %vm13266_vm3, %v10044_v30  ;;  %v1778_v23 = vsel %vm1032_vm2, %v10452_v33, %v10457_v27 }
 0x56d   : > { %v10445_v6 = vpop.permute.xlu1 %10444  ;;  %v10056_v15 = vpack.c.bf16 %v1778_v23, %v1777_v32  ;;  %v10477_v23 = vunpack.i.h.bf16 %v13349_v35 }
 0x56e   : > { %v10447_v1 = vunpack.i.h.bf16 %v10445_v6  ;;  %v10446_v25 = vunpack.i.l.bf16 %v10445_v6  ;;  %2687 = vrot.lane.b32.xlu0 %v2645_v34, %s11537_s14  ;;  %v13376_v6 = vmul.f32 %v2505_v50, %v12184_v40  ;;  %v19358_v40 = vld [vmem:[#allocation39_spill] sm:$0xff] }
 0x56f   : > { %v2612_v30 = vpop.permute.xlu0 %2611 }
 0x570   : > { %v1775_v8 = vsel %vm1032_vm2, %v10441_v55, %v10446_v25  ;;  %v1776_v47 = vsel %vm1032_vm2, %v10442_v54, %v10447_v1  ;;  %v2647_v4 = vmul.f32 %v2612_v30, %v13358_v57  ;;  %v19348_v25 = vld [vmem:[#allocation11_spill] sm:$0xff]  ;;  %v11392_v54 = vld [vmem:[%s18754_s3] sm:$0xff]  ;;  %v2456_v1 = vmul.f32 0.0625, %v13255_v13 }
 0x571   : > { %v2594_v0 = vpop.permute.xlu1 %2593  ;;  %v10050_v18 = vpack.c.bf16 %v1776_v47, %v1775_v8  ;;  %v13383_v55 = vmul.f32 %v2496_v62, %v19348_v25  ;;  %v10476_v30 = vunpack.i.l.bf16 %v13349_v35  ;;  %v10472_v8 = vunpack.i.h.bf16 %v13336_v11 }
 0x572   : > { %v2638_v61 = vmul.f32 %v2594_v0, %v13368_v60  ;;  %2691 = vrot.lane.b32.xlu0 %v2647_v4, %s11537_s14  ;;  %v10935_v4 = vpop.eup %10934  ;;  %v10471_v47 = vunpack.i.l.bf16 %v13336_v11  ;;  %v2472_v35 = vadd.f32 1.1920929e-07, %v2456_v1  ;;  %v19351_v1 = vld [vmem:[#allocation20_spill] sm:$0xff] }
 0x573   : > { %v2616_v27 = vpop.permute.xlu0 %2615  ;;  %10052 = vmatprep.subr.msk.bf16.mxu1 %vm13266_vm3, %v10050_v18  ;;  %v2498_v33 = vmul.f32 0.25, %v10935_v4  ;;  %v10937_v62 = vpop.eup %10936  ;;  %v1782_v4 = vsel %vm1032_vm2, %v10472_v8, %v10477_v23  ;;  %v19352_v8 = vld [vmem:[#allocation123_spill] sm:$0xff] }
 0x574   : > { %v2649_v17 = vmul.f32 %v2616_v27, %v13376_v6  ;;  %2673 = vrot.lane.b32.xlu1 %v2638_v61, %s11537_s14  ;;  %10055 = vmatpush3.bf16.xpose.msk.msra.mxu1 %vm13266_vm3, %v10050_v18  ;;  %v2470_v18 = vadd.f32 1.1920929e-07, %v2454_v3 }
 0x575   : > { %v2598_v34 = vpop.permute.xlu1 %2597  ;;  %10058 = vmatprep.subr.msk.bf16.mxu1 %vm13266_vm3, %v10056_v15  ;;  %v13405_v32 = vmul.f32 %v2498_v33, %v19349_v39 }
 0x576   : > { %v2640_v50 = vmul.f32 %v2598_v34, %v13383_v55  ;;  %2695 = vrot.lane.b32.xlu0 %v2649_v17, %s11537_s14  ;;  %v2500_v34 = vmul.f32 0.25, %v10937_v62  ;;  %10938 = vrsqrt.f32 %v2470_v18 }
 0x577   : > { %10940 = vrsqrt.f32 %v2472_v35 }
 0x578   : > { %2677 = vrot.lane.b32.xlu1 %v2640_v50, %s11537_s14  ;;  %v1781_v50 = vsel %vm1032_vm2, %v10471_v47, %v10476_v30  ;;  %v13422_v62 = vmul.f32 %v2500_v34, %v19351_v1  ;;  %v19363_v1 = vld [vmem:[#allocation98_spill] sm:$0xff] }
 0x579   : > { %v10460_v19 = vpop.permute.xlu1 %10459 }
 0x57a   : > { %2731 = vrot.lane.b32.xlu0 %v11392_v54, %s11539_s24  ;;  %v10462_v61 = vunpack.i.h.bf16 %v10460_v19  ;;  %v10461_v27 = vunpack.i.l.bf16 %v10460_v19 }
 0x57c   : > { %10061 = vmatpush3.bf16.xpose.msk.msra.mxu1 %vm13266_vm3, %v10056_v15  ;;  %v2458_v15 = vmul.f32 0.0625, %v13258_v12  ;;  %v10068_v12 = vpack.c.bf16 %v1782_v4, %v1781_v50 }
 0x57d   : > { %v10465_v0 = vpop.permute.xlu1 %10464 }
 0x57e   : > { %v10467_v17 = vunpack.i.h.bf16 %v10465_v0  ;;  %v10466_v13 = vunpack.i.l.bf16 %v10465_v0  ;;  %2735 = vrot.lane.b32.xlu0 %v13058_v43, %s11539_s24  ;;  %v19350_v0 = vld [vmem:[#allocation92_spill] sm:$0xff]  ;;  %v2474_v18 = vadd.f32 1.1920929e-07, %v2458_v15 }
 0x580   : > { %v1779_v3 = vsel %vm1032_vm2, %v10461_v27, %v10466_v13  ;;  %v1780_v11 = vsel %vm1032_vm2, %v10462_v61, %v10467_v17  ;;  %10942 = vrsqrt.f32 %v2474_v18  ;;  %v10939_v47 = vpop.eup %10938  ;;  %v19353_v27 = vld [vmem:[#allocation129_spill] sm:$0xff] }
 0x581   : > { %v2602_v33 = vpop.permute.xlu1 %2601  ;;  %v10062_v19 = vpack.c.bf16 %v1780_v11, %v1779_v3  ;;  %v2502_v17 = vmul.f32 0.25, %v10939_v47  ;;  %v10941_v13 = vpop.eup %10940  ;;  %v19354_v3 = vld [vmem:[#allocation142_spill] sm:$0xff]  ;;  %v19355_v11 = vld [vmem:[#allocation25_spill] sm:$0xff] }
 0x582   : > { %v2642_v54 = vmul.f32 %v2602_v33, %v13405_v32  ;;  %2739 = vrot.lane.b32.xlu0 %v19350_v0, %s11539_s24 }
 0x583   : > { %10064 = vmatprep.subr.msk.bf16.mxu1 %vm13266_vm3, %v10062_v19  ;;  %v13440_v33 = vmul.f32 %v2502_v17, %v19355_v11  ;;  %v19359_v11 = vld [vmem:[#allocation30_spill] sm:$0xff] }
 0x584   : > { %2681 = vrot.lane.b32.xlu1 %v2642_v54, %s11537_s14  ;;  %10067 = vmatpush3.bf16.xpose.msk.msra.mxu1 %vm13266_vm3, %v10062_v19  ;;  %v2504_v19 = vmul.f32 0.25, %v10941_v13 }
 0x585   : > { %v2606_v23 = vpop.permute.xlu1 %2605  ;;  %10070 = vmatprep.subr.msk.bf16.mxu1 %vm13266_vm3, %v10068_v12 }
 0x586   : > { %v2644_v30 = vmul.f32 %v2606_v23, %v13422_v62  ;;  %2743 = vrot.lane.b32.xlu0 %v19352_v8, %s11539_s24  ;;  %v13452_v13 = vmul.f32 %v2504_v19, %v19359_v11  ;;  %v19366_v11 = vld [vmem:[#allocation121_spill] sm:$0xff] }
 0x588   : > { %2685 = vrot.lane.b32.xlu1 %v2644_v30, %s11537_s14 }
 0x589   : > { %v10480_v61 = vpop.permute.xlu1 %10479 }
 0x58a   : > { %2747 = vrot.lane.b32.xlu0 %v19353_v27, %s11539_s24  ;;  %v10482_v35 = vunpack.i.h.bf16 %v10480_v61  ;;  %v10481_v15 = vunpack.i.l.bf16 %v10480_v61  ;;  %v10943_v23 = vpop.eup %10942  ;;  %v19356_v61 = vld [vmem:[#allocation143_spill] sm:$0xff] }
 0x58c   : > { %10073 = vmatpush3.bf16.xpose.msk.msra.mxu1 %vm13266_vm3, %v10068_v12 }
 0x58d   : > { %v10485_v34 = vpop.permute.xlu1 %10484 }
 0x58e   : > { %v10487_v4 = vunpack.i.h.bf16 %v10485_v34  ;;  %v10486_v50 = vunpack.i.l.bf16 %v10485_v34  ;;  %2751 = vrot.lane.b32.xlu0 %v19354_v3, %s11539_s24  ;;  %v19357_v34 = vld [vmem:[#allocation115_spill] sm:$0xff] }
 0x58f   : > { %v921_v17 = vmul.f32 %v19358_v40, %v19357_v34 }
 0x590   : > { %v1783_v54 = vsel %vm1032_vm2, %v10481_v15, %v10486_v50  ;;  %v1784_v18 = vsel %vm1032_vm2, %v10482_v35, %v10487_v4  ;;  %v2506_v15 = vmul.f32 0.25, %v10943_v23  ;;  %v19360_v35 = vld [vmem:[#allocation117_spill] sm:$0xff]  ;;  %v19361_v4 = vld [vmem:[#allocation32_spill] sm:$0xff] }
 0x591   : > { %v2610_v30 = vpop.permute.xlu1 %2609  ;;  %v10074_v12 = vpack.c.bf16 %v1784_v18, %v1783_v54  ;;  %v922_v50 = vmul.f32 %v19361_v4, %v19360_v35  ;;  %v19362_v18 = vld [vmem:[#allocation144_spill] sm:$0xff]  ;;  %v1017_v39 = vsub.f32 %v921_v17, %v19363_v1  ;;  %v682_v19 = vmul.f32 %v13058_v43, %v19360_v35  ;;  %v19369_v1 = vld [vmem:[#allocation139_spill] sm:$0xff]  ;;  %v19372_v35 = vld [vmem:[#allocation70_spill] sm:$0xff] }
 0x592   : > { %v2646_v47 = vmul.f32 %v2610_v30, %v13440_v33  ;;  %2755 = vrot.lane.b32.xlu0 %v19356_v61, %s11539_s24  ;;  %v681_v30 = vmul.f32 %v19362_v18, %v19357_v34  ;;  %v19364_v23 = vld [vmem:[#allocation140_spill] sm:$0xff]  ;;  %v13472_v10 = vmul.f32 %v2506_v15, %v19368_v20  ;;  %v683_v43 = vmul.f32 %v13069_v28, %v19366_v11 }
 0x593   : > { %10076 = vmatprep.subr.msk.bf16.mxu1 %vm13266_vm3, %v10074_v12  ;;  %v19367_v4 = vld [vmem:[#allocation44_spill] sm:$0xff]  ;;  %v842_v34 = vadd.f32 %v19369_v1, %v682_v19  ;;  %v19373_v19 = vld [vmem:[#allocation66_spill] sm:$0xff]  ;;  %v19375_v1 = vld [vmem:[#allocation133_spill] sm:$0xff] }
 0x594   : > { %2689 = vrot.lane.b32.xlu1 %v2646_v47, %s11537_s14  ;;  %10079 = vmatpush3.bf16.xpose.msk.msra.mxu1 %vm13266_vm3, %v10074_v12  ;;  %v1018_v47 = vsub.f32 %v922_v50, %v19364_v23  ;;  %v19365_v12 = vld [vmem:[#allocation96_spill] sm:$0xff]  ;;  %v923_v25 = vmul.f32 %v19367_v4, %v19366_v11 }
 0x595   : > { %v2614_v54 = vpop.permute.xlu1 %2613  ;;  %v841_v2 = vadd.f32 %v19365_v12, %v681_v30  ;;  %v19370_v17 = vld [vmem:[#allocation124_spill] sm:$0xff] }
 0x596   : > { %v2648_v40 = vmul.f32 %v2614_v54, %v13452_v13  ;;  %2759 = vrot.lane.b32.xlu0 %v13100_v26, %s11539_s24  ;;  %v19371_v54 = vld [vmem:[#allocation33_spill] sm:$0xff]  ;;  %v1019_v50 = vsub.f32 %v923_v25, %v19372_v35  ;;  %v1035_v12 = vsel %vm1032_vm2, %v842_v34, %v1018_v47  ;;  %v19374_v4 = vld [vmem:[#allocation100_spill] sm:$0xff] }
 0x597   : > { %v924_v52 = vmul.f32 %v19371_v54, %v19370_v17  ;;  %v1034_v15 = vsel %vm1032_vm2, %v841_v2, %v1017_v39  ;;  %v843_v11 = vadd.f32 %v19374_v4, %v683_v43  ;;  %v19376_v25 = vld [vmem:[#allocation48_spill] sm:$0xff]  ;;  %v19378_v2 = vld [vmem:[#allocation125_spill] sm:$0xff]  ;;  %v19379_v39 = vld [vmem:[#allocation35_spill] sm:$0xff] }
 0x598   : > { %2693 = vrot.lane.b32.xlu1 %v2648_v40, %s11537_s14  ;;  %v684_v40 = vmul.f32 %v19350_v0, %v19370_v17  ;;  %v925_v54 = vmul.f32 %v19376_v25, %v19375_v1  ;;  %v926_v0 = vmul.f32 %v19379_v39, %v19378_v2  ;;  %v19380_v17 = vld [vmem:[#allocation83_spill] sm:$0xff]  ;;  %v13504_v47 = vld [vmem:[%s18755_s4 + $0x10] sm:$0xff]  ;;  %v686_v43 = vmul.f32 %v19352_v8, %v19378_v2  ;;  %v19384_v4 = vld [vmem:[#allocation134_spill] sm:$0xff] }
 0x599   : > { %v2618_v41 = vpop.permute.xlu1 %2617  ;;  %v1020_v23 = vsub.f32 %v924_v52, %v19373_v19  ;;  %v685_v52 = vmul.f32 %v13081_v21, %v19375_v1  ;;  %19381 = vst [vmem:[#allocation78_spill] sm:$0xff] %v13504_v47  ;;  %v1036_v34 = vsel %vm1032_vm2, %v843_v11, %v1019_v50  ;;  %v19383_v19 = vld [vmem:[#allocation108_spill] sm:$0xff]  ;;  %v19385_v1 = vld [vmem:[#allocation50_spill] sm:$0xff]  ;;  %v19389_v2 = vld [vmem:[#allocation43_spill] sm:$0xff] }
 0x59a   : > { %v2650_v30 = vmul.f32 %v2618_v41, %v13472_v10  ;;  %2795 = vrot.lane.b32.xlu0 %v13118_v14, %s11538_s8  ;;  %v19377_v41 = vld [vmem:[#allocation64_spill] sm:$0xff]  ;;  %v1021_v35 = vsub.f32 %v925_v54, %v19380_v17  ;;  %v927_v25 = vmul.f32 %v19385_v1, %v19384_v4  ;;  %v19387_v54 = vld [vmem:[#allocation127_spill] sm:$0xff]  ;;  %v687_v39 = vmul.f32 %v19389_v2, %v19384_v4  ;;  %v19392_v17 = vld [vmem:[#allocation81_spill] sm:$0xff] }
 0x59b   : > { %9561 = vmatmul.mubr.msk.f32.vlgmr.msra.gmra.mrb[0].mxu1 %vm550_vm1, %v1034_v15  ;;  %v844_v14 = vadd.f32 %v19377_v41, %v684_v40  ;;  %v19386_v50 = vld [vmem:[#allocation68_spill] sm:$0xff] }
 0x59c   : > { %2697 = vrot.lane.b32.xlu1 %v2650_v30, %s11537_s14  ;;  %9563 = vmatprep.mubr.msk.f32.mxu1 %vm550_vm1, %v1035_v12  ;;  %v19382_v30 = vld [vmem:[#allocation79_spill] sm:$0xff]  ;;  %v845_v12 = vadd.f32 %v19383_v19, %v685_v52  ;;  %v846_v11 = vadd.f32 %v19386_v50, %v686_v43  ;;  %v19388_v8 = vld [vmem:[#allocation36_spill] sm:$0xff]  ;;  %v688_v52 = vmul.f32 %v19353_v27, %v19387_v54  ;;  %v19398_v27 = vld [vmem:[#allocation37_spill] sm:$0xff] }
 0x59d   : > { %v1022_v15 = vsub.f32 %v926_v0, %v19382_v30  ;;  %v1037_v40 = vsel %vm1032_vm2, %v844_v14, %v1020_v23  ;;  %v928_v41 = vmul.f32 %v19388_v8, %v19387_v54  ;;  %v19390_v0 = vld [vmem:[#allocation110_spill] sm:$0xff]  ;;  %v19393_v30 = vld [vmem:[#allocation109_spill] sm:$0xff]  ;;  %v19394_v19 = vld [vmem:[#allocation135_spill] sm:$0xff] }
 0x59e   : > { %2799 = vrot.lane.b32.xlu0 %v13504_v47, %s11538_s8  ;;  %v1023_v23 = vsub.f32 %v927_v25, %v19390_v0  ;;  %v13529_v14 = vld [vmem:[%s18755_s4 + $0x20] sm:$0xff]  ;;  %v19395_v4 = vld [vmem:[#allocation52_spill] sm:$0xff]  ;;  %v19399_v54 = vld [vmem:[#allocation61_spill] sm:$0xff] }
 0x59f   : > { %9564 = vmatmul.mubr.msk.f32.gmra.mrb[2].mxu1 %vm550_vm1, %v1036_v34  ;;  %19391 = vst [vmem:[#allocation95_spill] sm:$0xff] %v13529_v14  ;;  %v1024_v34 = vsub.f32 %v928_v41, %v19392_v17  ;;  %v1039_v43 = vsel %vm1032_vm2, %v846_v11, %v1022_v15  ;;  %v929_v1 = vmul.f32 %v19395_v4, %v19394_v19  ;;  %v19397_v25 = vld [vmem:[#allocation130_spill] sm:$0xff]  ;;  %v19400_v41 = vld [vmem:[#allocation112_spill] sm:$0xff]  ;;  %v19403_v17 = vld [vmem:[#allocation111_spill] sm:$0xff] }
 0x5a0   : > { %2733 = vrot.lane.b32.xlu1 %v19362_v18, %s11539_s24  ;;  %9566 = vmatprep.mubr.msk.f32.mxu1 %vm550_vm1, %v1037_v40  ;;  %v1038_v18 = vsel %vm1032_vm2, %v845_v12, %v1021_v35  ;;  %v847_v40 = vadd.f32 %v19393_v30, %v687_v39  ;;  %v19396_v35 = vld [vmem:[#allocation107_spill] sm:$0xff]  ;;  %v930_v50 = vmul.f32 %v19398_v27, %v19397_v25  ;;  %v13554_v11 = vld [vmem:[%s18755_s4 + $0x30] sm:$0xff] }
 0x5a1   : > { %v848_v12 = vadd.f32 %v19396_v35, %v688_v52  ;;  %v689_v8 = vmul.f32 %v19399_v54, %v19394_v19  ;;  %v1025_v15 = vsub.f32 %v929_v1, %v19400_v41  ;;  %19401 = vst [vmem:[#allocation47_spill] sm:$0xff] %v13554_v11  ;;  %v690_v39 = vmul.f32 %v19354_v3, %v19397_v25  ;;  %v19402_v0 = vld [vmem:[#allocation72_spill] sm:$0xff]  ;;  %v19405_v19 = vld [vmem:[#allocation54_spill] sm:$0xff]  ;;  %v19407_v1 = vld [vmem:[#allocation131_spill] sm:$0xff] }
 0x5a2   : > { %2803 = vrot.lane.b32.xlu0 %v13529_v14, %s11538_s8  ;;  %v19404_v30 = vld [vmem:[#allocation136_spill] sm:$0xff]  ;;  %v19409_v25 = vld [vmem:[#allocation74_spill] sm:$0xff]  ;;  %v19412_v41 = vld [vmem:[#allocation85_spill] sm:$0xff] }
 0x5a3   : > { %9567 = vmatmul.mubr.msk.f32.gmra.mrb[4].mxu1 %vm550_vm1, %v1038_v18  ;;  %v1026_v18 = vsub.f32 %v930_v50, %v19402_v0  ;;  %v1041_v52 = vsel %vm1032_vm2, %v848_v12, %v1024_v34  ;;  %v931_v4 = vmul.f32 %v19405_v19, %v19404_v30  ;;  %v19408_v3 = vld [vmem:[#allocation40_spill] sm:$0xff]  ;;  %v691_v27 = vmul.f32 %v19409_v25, %v19404_v30  ;;  %v19410_v50 = vld [vmem:[#allocation119_spill] sm:$0xff]  ;;  %v13579_v12 = vld [vmem:[%s18755_s4 + $0x40] sm:$0xff] }
 0x5a4   : > { %2737 = vrot.lane.b32.xlu1 %v13069_v28, %s11539_s24  ;;  %9569 = vmatprep.mubr.msk.f32.mxu1 %vm550_vm1, %v1039_v43  ;;  %v1040_v28 = vsel %vm1032_vm2, %v847_v40, %v1023_v23  ;;  %v849_v43 = vadd.f32 %v19403_v17, %v689_v8  ;;  %v19406_v23 = vld [vmem:[#allocation102_spill] sm:$0xff]  ;;  %v932_v35 = vmul.f32 %v19408_v3, %v19407_v1  ;;  %v19413_v0 = vld [vmem:[#allocation91_spill] sm:$0xff]  ;;  %v19414_v17 = vld [vmem:[#allocation137_spill] sm:$0xff] }
 0x5a5   : > { %v850_v40 = vadd.f32 %v19406_v23, %v690_v39  ;;  %v1027_v34 = vsub.f32 %v931_v4, %v19410_v50  ;;  %19411 = vst [vmem:[#allocation65_spill] sm:$0xff] %v13579_v12  ;;  %v692_v8 = vmul.f32 %v19356_v61, %v19407_v1  ;;  %v19415_v30 = vld [vmem:[#allocation56_spill] sm:$0xff]  ;;  %v19418_v61 = vld [vmem:[#allocation42_spill] sm:$0xff]  ;;  %v19422_v50 = vld [vmem:[#allocation89_spill] sm:$0xff] }
 0x5a6   : > { %2807 = vrot.lane.b32.xlu0 %v13554_v11, %s11538_s8  ;;  %v933_v19 = vmul.f32 %v19415_v30, %v19414_v17  ;;  %v19417_v4 = vld [vmem:[#allocation132_spill] sm:$0xff]  ;;  %v19419_v1 = vld [vmem:[#allocation94_spill] sm:$0xff] }
 0x5a7   : > { %9570 = vmatmul.mubr.msk.f32.gmra.mrb[6].mxu1 %vm550_vm1, %v1040_v28  ;;  %v1028_v28 = vsub.f32 %v932_v35, %v19412_v41  ;;  %v1043_v39 = vsel %vm1032_vm2, %v850_v40, %v1026_v18  ;;  %v934_v23 = vmul.f32 %v19418_v61, %v19417_v4  ;;  %v693_v3 = vmul.f32 %v19419_v1, %v19414_v17  ;;  %v19420_v35 = vld [vmem:[#allocation120_spill] sm:$0xff]  ;;  %v19423_v41 = vld [vmem:[#allocation113_spill] sm:$0xff]  ;;  %v19425_v17 = vld [vmem:[#allocation58_spill] sm:$0xff] }
 0x5a8   : > { %2741 = vrot.lane.b32.xlu1 %v13081_v21, %s11539_s24  ;;  %9572 = vmatprep.mubr.msk.f32.mxu1 %vm550_vm1, %v1041_v52  ;;  %v1042_v21 = vsel %vm1032_vm2, %v849_v43, %v1025_v15  ;;  %v851_v52 = vadd.f32 %v19413_v0, %v691_v27  ;;  %v19416_v15 = vld [vmem:[#allocation104_spill] sm:$0xff]  ;;  %v1029_v18 = vsub.f32 %v933_v19, %v19420_v35  ;;  %v19424_v0 = vld [vmem:[#allocation138_spill] sm:$0xff]  ;;  %v19427_v19 = vld [vmem:[#allocation141_spill] sm:$0xff] }
 0x5a9   : > { %v852_v43 = vadd.f32 %v19416_v15, %v692_v8  ;;  %v13604_v40 = vld [vmem:[%s18755_s4 + $0x50] sm:$0xff]  ;;  %v694_v27 = vmul.f32 %v13100_v26, %v19417_v4  ;;  %v935_v30 = vmul.f32 %v19425_v17, %v19424_v0  ;;  %v695_v26 = vmul.f32 %v13167_v58, %v19424_v0  ;;  %v19429_v4 = vld [vmem:[#allocation114_spill] sm:$0xff]  ;;  %v13661_v35 = vld [vmem:[%s18755_s4 + $0x18] sm:$0xff] }
 0x5aa   : > { %2811 = vrot.lane.b32.xlu0 %v13579_v12, %s11538_s8  ;;  %19421 = vst [vmem:[#allocation80_spill] sm:$0xff] %v13604_v40  ;;  %19432 = vst [vmem:[#allocation82_spill] sm:$0xff] %v13661_v35  ;;  %v13713_v0 = vld [vmem:[%s18755_s4 + $0x78] sm:$0xff] }
 0x5ab   : > { %9573 = vmatmul.mubr.msk.f32.gmra.mrb[8].mxu1 %vm550_vm1, %v1042_v21  ;;  %v1030_v21 = vsub.f32 %v934_v23, %v19422_v50  ;;  %v1045_v8 = vsel %vm1032_vm2, %v852_v43, %v1028_v28  ;;  %v1031_v15 = vsub.f32 %v935_v30, %v19427_v19  ;;  %v13627_v28 = vld [vmem:[%s18755_s4 + $0x60] sm:$0xff]  ;;  %v855_v61 = vadd.f32 %v19429_v4, %v695_v26  ;;  %v13641_v23 = vld [vmem:[%s18755_s4 + $0x70] sm:$0xff] }
 0x5ac   : > { %2745 = vrot.lane.b32.xlu1 %v19389_v2, %s11539_s24  ;;  %9575 = vmatprep.mubr.msk.f32.mxu1 %vm550_vm1, %v1043_v39  ;;  %v1044_v2 = vsel %vm1032_vm2, %v851_v52, %v1027_v34  ;;  %v853_v39 = vadd.f32 %v19423_v41, %v693_v3  ;;  %v19426_v34 = vld [vmem:[#allocation87_spill] sm:$0xff]  ;;  %19428 = vst [vmem:[#allocation97_spill] sm:$0xff] %v13627_v28  ;;  %19430 = vst [vmem:[#allocation49_spill] sm:$0xff] %v13641_v23 }
 0x5ad   : > { %v854_v52 = vadd.f32 %v19426_v34, %v694_v27  ;;  %v1048_v3 = vsel %vm1032_vm2, %v855_v61, %v1031_v15  ;;  %v13686_v27 = vld [vmem:[%s18755_s4 + $0x48] sm:$0xff]  ;;  %19438 = vst [vmem:[#allocation84_spill] sm:$0xff] %v13713_v0 }
 0x5ae   : > { %2815 = vrot.lane.b32.xlu0 %v13604_v40, %s11538_s8  ;;  %v1046_v43 = vsel %vm1032_vm2, %v853_v39, %v1029_v18  ;;  %19435 = vst [vmem:[#allocation51_spill] sm:$0xff] %v13686_v27  ;;  %v13704_v41 = vld [vmem:[%s18755_s4 + $0x68] sm:$0xff] }
 0x5af   : > { %9576 = vmatmul.mubr.msk.f32.gmra.mrb[10].mxu1 %vm550_vm1, %v1044_v2  ;;  %v13679_v2 = vld [vmem:[%s18755_s4 + $0x38] sm:$0xff]  ;;  %19437 = vst [vmem:[#allocation126_spill] sm:$0xff] %v13704_v41 }
 0x5b0   : > { %2749 = vrot.lane.b32.xlu1 %v19399_v54, %s11539_s24  ;;  %9578 = vmatprep.mubr.msk.f32.mxu1 %vm550_vm1, %v1045_v8  ;;  %v1047_v54 = vsel %vm1032_vm2, %v854_v52, %v1030_v21  ;;  %19434 = vst [vmem:[#allocation118_spill] sm:$0xff] %v13679_v2  ;;  %v13695_v21 = vld [vmem:[%s18755_s4 + $0x58] sm:$0xff] }
 0x5b1   : > { %19436 = vst [vmem:[#allocation69_spill] sm:$0xff] %v13695_v21 }
 0x5b2   : > { %2819 = vrot.lane.b32.xlu0 %v13627_v28, %s11538_s8 }
 0x5b3   : > { %9579 = vmatmul.mubr.msk.f32.gmra.mrb[12].mxu1 %vm550_vm1, %v1046_v43 }
 0x5b4   : > { %2753 = vrot.lane.b32.xlu1 %v19409_v25, %s11539_s24  ;;  %9581 = vmatprep.mubr.msk.f32.mxu1 %vm550_vm1, %v1047_v54  ;;  %v13654_v25 = vld [vmem:[%s18755_s4 + $0x8] sm:$0xff] }
 0x5b5   : > { %19431 = vst [vmem:[#allocation67_spill] sm:$0xff] %v13654_v25 }
 0x5b6   : > { %2823 = vrot.lane.b32.xlu0 %v13641_v23, %s11538_s8 }
 0x5b7   : > { %9582 = vmatmul.mubr.msk.f32.gmra.mrb[14].mxu1 %vm550_vm1, %v1048_v3 }
 0x5b8   : > { %2757 = vrot.lane.b32.xlu1 %v19419_v1, %s11539_s24  ;;  %v13665_v1 = vpop.permute.xlu0 %2667 }
 0x5bc   : > { %2761 = vrot.lane.b32.xlu1 %v13167_v58, %s11539_s24  ;;  %v13670_v58 = vld [vmem:[%s18755_s4 + $0x28] sm:$0xff] }
 0x5bd   : > { %19433 = vst [vmem:[#allocation99_spill] sm:$0xff] %v13670_v58 }
 0x5c0   : > { %2797 = vrot.lane.b32.xlu1 %v13654_v25, %s11538_s8  ;;  %v13674_v18 = vpop.permute.xlu0 %2671 }
 0x5c4   : > { %2801 = vrot.lane.b32.xlu1 %v13661_v35, %s11538_s8  ;;  %v13690_v50 = vpop.permute.xlu0 %2675 }
 0x5c8   : > { %2805 = vrot.lane.b32.xlu1 %v13670_v58, %s11538_s8 }
 0x5cc   : > { %2809 = vrot.lane.b32.xlu1 %v13679_v2, %s11538_s8 }
 0x5d0   : > { %2813 = vrot.lane.b32.xlu1 %v13686_v27, %s11538_s8  ;;  %v13699_v8 = vpop.permute.xlu0 %2679 }
 0x5d4   : > { %2817 = vrot.lane.b32.xlu1 %v13695_v21, %s11538_s8  ;;  %v13708_v39 = vpop.permute.xlu0 %2683 }
 0x5d8   : > { %2821 = vrot.lane.b32.xlu1 %v13704_v41, %s11538_s8 }
 0x5da   : > { %v13725_v26 = vpop.permute.xlu1 %2669 }
 0x5dc   : > { %2825 = vrot.lane.b32.xlu1 %v13713_v0, %s11538_s8 }
 0x5e0   : > { %v13717_v17 = vpop.permute.xlu0 %2687 }
 0x5e4   : > { %v13719_v30 = vpop.permute.xlu0 %2691 }
 0x5e6   : > { %v13729_v15 = vpop.permute.xlu1 %2673 }
 0x5e8   : > { %v13721_v34 = vpop.permute.xlu0 %2695 }
 0x5ea   : > { %v13733_v54 = vpop.permute.xlu1 %2677 }
 0x5ec   : > { %v13723_v52 = vpop.permute.xlu0 %2731 }
 0x5f0   : > { %v13727_v19 = vpop.permute.xlu0 %2735 }
 0x5f4   : > { %v13731_v43 = vpop.permute.xlu0 %2739 }
 0x5f6   : > { %v13737_v61 = vpop.permute.xlu1 %2681 }
 0x5f8   : > { %v13735_v4 = vpop.permute.xlu0 %2743 }
 0x5fa   : > { %v13743_v23 = vpop.permute.xlu1 %2685 }
 0x5fc   : > { %v13739_v3 = vpop.permute.xlu0 %2747 }
 0x600   : > { %v13741_v20 = vpop.permute.xlu0 %2751 }
 0x604   : > { %v13745_v28 = vpop.permute.xlu0 %2755 }
 0x606   : > { %v13747_v0 = vpop.permute.xlu1 %2689 }
 0x608   : > { %v13749_v40 = vpop.permute.xlu0 %2759 }
 0x609   : > { %19439 = vst [vmem:[#allocation101_spill] sm:$0xff] %v13749_v40 }
 0x60a   : > { %v13751_v41 = vpop.permute.xlu1 %2693 }
 0x60c   : > { %v2796_v12 = vpop.permute.xlu0 %2795 }
 0x60d   : > { %v2843_v21 = vmul.f32 %v2796_v12, %v13277_v42 }
 0x60e   : > { %v13754_v11 = vpop.permute.xlu1 %2697 }
 0x60f   : > { %2875 = vrot.lane.b32.xlu0 %v2843_v21, %s11533_s27 }
 0x610   : > { %v2800_v27 = vpop.permute.xlu0 %2799 }
 0x611   : > { %v2845_v14 = vmul.f32 %v2800_v27, %v13293_v29 }
 0x612   : > { %v13758_v2 = vpop.permute.xlu1 %2733 }
 0x613   : > { %19440 = vst [vmem:[#allocation53_spill] sm:$0xff] %v13758_v2  ;;  %2879 = vrot.lane.b32.xlu0 %v2845_v14, %s11533_s27 }
 0x614   : > { %v2804_v47 = vpop.permute.xlu0 %2803 }
 0x615   : > { %v2847_v58 = vmul.f32 %v2804_v47, %v13300_v5 }
 0x616   : > { %v13762_v35 = vpop.permute.xlu1 %2737 }
 0x617   : > { %19441 = vst [vmem:[#allocation71_spill] sm:$0xff] %v13762_v35  ;;  %2883 = vrot.lane.b32.xlu0 %v2847_v58, %s11533_s27 }
 0x618   : > { %v2808_v25 = vpop.permute.xlu0 %2807 }
 0x619   : > { %v2849_v12 = vmul.f32 %v2808_v25, %v13319_v48 }
 0x61a   : > { %v13766_v40 = vpop.permute.xlu1 %2741 }
 0x61b   : > { %19442 = vst [vmem:[#allocation116_spill] sm:$0xff] %v13766_v40  ;;  %2887 = vrot.lane.b32.xlu0 %v2849_v12, %s11533_s27 }
 0x61c   : > { %v2812_v21 = vpop.permute.xlu0 %2811 }
 0x61d   : > { %v2851_v27 = vmul.f32 %v2812_v21, %v13323_v51 }
 0x61e   : > { %v13770_v2 = vpop.permute.xlu1 %2745 }
 0x61f   : > { %19443 = vst [vmem:[#allocation86_spill] sm:$0xff] %v13770_v2  ;;  %2891 = vrot.lane.b32.xlu0 %v2851_v27, %s11533_s27  ;;  %v2571_v27 = vmul.f32 %v13231_v36, %v13277_v42 }
 0x620   : > { %v2816_v14 = vpop.permute.xlu0 %2815 }
 0x621   : > { %v2853_v47 = vmul.f32 %v2816_v14, %v13354_v63  ;;  %v2715_v14 = vadd.f32 %v13665_v1, %v2571_v27  ;;  %v2581_v27 = vmul.f32 %v13246_v53, %v13354_v63 }
 0x622   : > { %v13774_v35 = vpop.permute.xlu1 %2749 }
 0x623   : > { %2895 = vrot.lane.b32.xlu0 %v2853_v47, %s11533_s27 }
 0x624   : > { %v2820_v58 = vpop.permute.xlu0 %2819 }
 0x625   : > { %v2855_v25 = vmul.f32 %v2820_v58, %v13358_v57  ;;  %v2573_v58 = vmul.f32 %v13274_v16, %v13293_v29  ;;  %v2577_v16 = vmul.f32 %v13241_v59, %v13319_v48 }
 0x626   : > { %v13778_v40 = vpop.permute.xlu1 %2753 }
 0x627   : > { %19444 = vst [vmem:[#allocation103_spill] sm:$0xff] %v13778_v40  ;;  %2899 = vrot.lane.b32.xlu0 %v2855_v25, %s11533_s27  ;;  %v2717_v25 = vadd.f32 %v13674_v18, %v2573_v58  ;;  %v2721_v18 = vadd.f32 %v13699_v8, %v2577_v16  ;;  %v2583_v58 = vmul.f32 %v13252_v46, %v13358_v57 }
 0x628   : > { %v2824_v12 = vpop.permute.xlu0 %2823 }
 0x629   : > { %v2857_v21 = vmul.f32 %v2824_v12, %v13376_v6  ;;  %v2575_v12 = vmul.f32 %v13237_v56, %v13300_v5 }
 0x62a   : > { %v13782_v2 = vpop.permute.xlu1 %2757 }
 0x62b   : > { %19445 = vst [vmem:[#allocation128_spill] sm:$0xff] %v13782_v2  ;;  %2903 = vrot.lane.b32.xlu0 %v2857_v21, %s11533_s27  ;;  %v2719_v36 = vadd.f32 %v13690_v50, %v2575_v12  ;;  %v2585_v12 = vmul.f32 %v13270_v7, %v13376_v6  ;;  %v2572_v7 = vmul.f32 %v13260_v44, %v13341_v37 }
 0x62c   : > { %v2578_v44 = vmul.f32 %v13290_v22, %v13405_v32  ;;  %v2584_v22 = vmul.f32 %v13312_v31, %v13452_v13 }
 0x62e   : > { %v13788_v47 = vpop.permute.xlu1 %2761 }
 0x62f   : > { %2955 = vrot.lane.b32.xlu0 %v2715_v14, %s11536_s20  ;;  %v2725_v14 = vadd.f32 %v13717_v17, %v2581_v27 }
 0x632   : > { %v2798_v40 = vpop.permute.xlu1 %2797 }
 0x633   : > { %v2844_v2 = vmul.f32 %v2798_v40, %v13341_v37  ;;  %2959 = vrot.lane.b32.xlu0 %v2717_v25, %s11536_s20  ;;  %v2579_v40 = vmul.f32 %v13243_v24, %v13323_v51  ;;  %v2727_v25 = vadd.f32 %v13719_v30, %v2583_v58 }
 0x635   : > { %2877 = vrot.lane.b32.xlu1 %v2844_v2, %s11533_s27  ;;  %v2723_v2 = vadd.f32 %v13708_v39, %v2579_v40 }
 0x636   : > { %v2802_v1 = vpop.permute.xlu1 %2801 }
 0x637   : > { %v2846_v21 = vmul.f32 %v2802_v1, %v13368_v60  ;;  %2963 = vrot.lane.b32.xlu0 %v2719_v36, %s11536_s20  ;;  %v2729_v36 = vadd.f32 %v13721_v34, %v2585_v12  ;;  %v2574_v34 = vmul.f32 %v13283_v9, %v13368_v60  ;;  %v2580_v9 = vmul.f32 %v13297_v45, %v13422_v62  ;;  %v19446_v45 = vld [vmem:[#allocation63_spill] sm:$0xff] }
 0x638   : > { %v2781_v12 = vmul.f32 %v13727_v19, %v13293_v29  ;;  %v2785_v29 = vmul.f32 %v13735_v4, %v13319_v48  ;;  %v2791_v48 = vmul.f32 %v13745_v28, %v13358_v57 }
 0x639   : > { %2881 = vrot.lane.b32.xlu1 %v2846_v21, %s11533_s27  ;;  %v2716_v21 = vadd.f32 %v13725_v26, %v2572_v7  ;;  %v2722_v26 = vadd.f32 %v13737_v61, %v2578_v44  ;;  %v2728_v61 = vadd.f32 %v13751_v41, %v2584_v22 }
 0x63a   : > { %v2806_v56 = vpop.permute.xlu1 %2805 }
 0x63b   : > { %v2848_v50 = vmul.f32 %v2806_v56, %v13383_v55  ;;  %2967 = vrot.lane.b32.xlu0 %v2721_v18, %s11536_s20  ;;  %v2718_v18 = vadd.f32 %v13729_v15, %v2574_v34  ;;  %v2576_v56 = vmul.f32 %v13288_v38, %v13383_v55  ;;  %v2724_v15 = vadd.f32 %v13743_v23, %v2580_v9 }
 0x63c   : > { %v2582_v38 = vmul.f32 %v13305_v49, %v13440_v33  ;;  %v2787_v34 = vmul.f32 %v13739_v3, %v13323_v51  ;;  %v19447_v51 = vld [vmem:[#allocation101_spill] sm:$0xff] }
 0x63d   : > { %2885 = vrot.lane.b32.xlu1 %v2848_v50, %s11533_s27  ;;  %v2720_v40 = vadd.f32 %v13733_v54, %v2576_v56  ;;  %v2586_v50 = vmul.f32 %v19446_v45, %v13472_v10  ;;  %v2793_v3 = vmul.f32 %v19447_v51, %v13376_v6  ;;  %v19451_v6 = vld [vmem:[#allocation71_spill] sm:$0xff] }
 0x63e   : > { %v2810_v59 = vpop.permute.xlu1 %2809  ;;  %v2726_v54 = vadd.f32 %v13747_v0, %v2582_v38  ;;  %v19450_v38 = vld [vmem:[#allocation16_spill] sm:$0xff]  ;;  %v19452_v45 = vld [vmem:[#allocation19_spill] sm:$0xff] }
 0x63f   : > { %v2850_v8 = vmul.f32 %v2810_v59, %v13405_v32  ;;  %2971 = vrot.lane.b32.xlu0 %v2723_v2, %s11536_s20  ;;  %v2730_v49 = vadd.f32 %v13754_v11, %v2586_v50  ;;  %v2779_v11 = vmul.f32 %v13723_v52, %v13277_v42  ;;  %v2783_v42 = vmul.f32 %v13731_v43, %v13300_v5  ;;  %v19453_v50 = vld [vmem:[#allocation116_spill] sm:$0xff]  ;;  %v19465_v51 = vld [vmem:[#allocation23_spill] sm:$0xff] }
 0x641   : > { %2889 = vrot.lane.b32.xlu1 %v2850_v8, %s11533_s27 }
 0x642   : > { %v2814_v24 = vpop.permute.xlu1 %2813 }
 0x643   : > { %v2852_v39 = vmul.f32 %v2814_v24, %v13422_v62  ;;  %2975 = vrot.lane.b32.xlu0 %v2725_v14, %s11536_s20 }
 0x645   : > { %2893 = vrot.lane.b32.xlu1 %v2852_v39, %s11533_s27 }
 0x646   : > { %v2818_v53 = vpop.permute.xlu1 %2817 }
 0x647   : > { %v2854_v17 = vmul.f32 %v2818_v53, %v13440_v33  ;;  %2979 = vrot.lane.b32.xlu0 %v2727_v25, %s11536_s20 }
 0x649   : > { %2897 = vrot.lane.b32.xlu1 %v2854_v17, %s11533_s27 }
 0x64a   : > { %v2822_v46 = vpop.permute.xlu1 %2821 }
 0x64b   : > { %v2856_v1 = vmul.f32 %v2822_v46, %v13452_v13  ;;  %2983 = vrot.lane.b32.xlu0 %v2729_v36, %s11536_s20 }
 0x64d   : > { %2901 = vrot.lane.b32.xlu1 %v2856_v1, %s11533_s27 }
 0x64e   : > { %v2826_v30 = vpop.permute.xlu1 %2825 }
 0x64f   : > { %v2858_v16 = vmul.f32 %v2826_v30, %v13472_v10 }
 0x651   : > { %2905 = vrot.lane.b32.xlu1 %v2858_v16, %s11533_s27 }
 0x655   : > { %2957 = vrot.lane.b32.xlu1 %v2716_v21, %s11536_s20 }
 0x659   : > { %2961 = vrot.lane.b32.xlu1 %v2718_v18, %s11536_s20  ;;  %v2789_v18 = vmul.f32 %v13741_v20, %v13354_v63  ;;  %v19448_v20 = vld [vmem:[#allocation3_spill] sm:$0xff]  ;;  %v19449_v63 = vld [vmem:[#allocation53_spill] sm:$0xff] }
 0x65a   : > { %v2780_v57 = vmul.f32 %v19449_v63, %v13341_v37 }
 0x65d   : > { %2965 = vrot.lane.b32.xlu1 %v2720_v40, %s11536_s20 }
 0x661   : > { %2969 = vrot.lane.b32.xlu1 %v2722_v26, %s11536_s20 }
 0x665   : > { %2973 = vrot.lane.b32.xlu1 %v2724_v15, %s11536_s20 }
 0x669   : > { %2977 = vrot.lane.b32.xlu1 %v2726_v54, %s11536_s20  ;;  %v2782_v54 = vmul.f32 %v19451_v6, %v13368_v60 }
 0x66d   : > { %2981 = vrot.lane.b32.xlu1 %v2728_v61, %s11536_s20 }
 0x66e   : > { %v13865_v23 = vpop.f32.mrb[0].mxu1 }
 0x66f   : > { %v13868_v2 = vpop.f32.mrb[1].mxu1 }
 0x671   : > { %2985 = vrot.lane.b32.xlu1 %v2730_v49, %s11536_s20  ;;  %v2784_v49 = vmul.f32 %v19453_v50, %v13383_v55  ;;  %v2788_v55 = vmul.f32 %v13774_v35, %v13422_v62 }
 0x672   : > { %v13871_v0 = vpop.f32.mrb[2].mxu1 }
 0x673   : > { %v13873_v31 = vpop.f32.mrb[3].mxu1 }
 0x676   : > { %v13875_v59 = vpop.f32.mrb[4].mxu1 }
 0x677   : > { %v13877_v41 = vpop.f32.mrb[5].mxu1 }
 0x67a   : > { %v13879_v27 = vpop.f32.mrb[6].mxu1 }
 0x67b   : > { %v13881_v8 = vpop.f32.mrb[7].mxu1 }
 0x67e   : > { %v13883_v14 = vpop.f32.mrb[8].mxu1 }
 0x67f   : > { %v13885_v24 = vpop.f32.mrb[9].mxu1 }
 0x681   : > { %v2876_v58 = vpop.permute.xlu0 %2875 }
 0x682   : > { %v2923_v39 = vsub.f32 %v2779_v11, %v2876_v58  ;;  %v13889_v25 = vpop.f32.mrb[10].mxu1  ;;  %v19454_v58 = vld [vmem:[#allocation24_spill] sm:$0xff] }
 0x683   : > { %v13891_v53 = vpop.f32.mrb[11].mxu1 }
 0x684   : > { %3019 = vrot.lane.b32.xlu0 %v2923_v39, %s11536_s20  ;;  %v19455_v39 = vld [vmem:[#allocation86_spill] sm:$0xff] }
 0x685   : > { %v2880_v17 = vpop.permute.xlu0 %2879  ;;  %v2786_v60 = vmul.f32 %v19455_v39, %v13405_v32 }
 0x686   : > { %v2925_v36 = vsub.f32 %v2781_v12, %v2880_v17  ;;  %v13896_v46 = vpop.f32.mrb[12].mxu1 }
 0x687   : > { %v13898_v1 = vpop.f32.mrb[13].mxu1 }
 0x688   : > { %3023 = vrot.lane.b32.xlu0 %v2925_v36, %s11536_s20  ;;  %v19456_v36 = vld [vmem:[#allocation29_spill] sm:$0xff] }
 0x689   : > { %v2884_v52 = vpop.permute.xlu0 %2883 }
 0x68a   : > { %v2927_v30 = vsub.f32 %v2783_v42, %v2884_v52  ;;  %v13903_v16 = vpop.f32.mrb[14].mxu1 }
 0x68b   : > { %v13905_v7 = vpop.f32.mrb[15].mxu1 }
 0x68c   : > { %3027 = vrot.lane.b32.xlu0 %v2927_v30, %s11536_s20  ;;  %v19457_v30 = vld [vmem:[#allocation41_spill] sm:$0xff] }
 0x68d   : > { %v2888_v19 = vpop.permute.xlu0 %2887 }
 0x68e   : > { %v2929_v21 = vsub.f32 %v2785_v29, %v2888_v19  ;;  %v19458_v29 = vld [vmem:[#allocation103_spill] sm:$0xff] }
 0x68f   : > { %v2790_v32 = vmul.f32 %v19458_v29, %v13440_v33  ;;  %v2794_v33 = vmul.f32 %v13788_v47, %v13472_v10  ;;  %v19467_v10 = vld [vmem:[#allocation28_spill] sm:$0xff] }
 0x690   : > { %3031 = vrot.lane.b32.xlu0 %v2929_v21, %s11536_s20 }
 0x691   : > { %v2892_v5 = vpop.permute.xlu0 %2891 }
 0x692   : > { %v2931_v43 = vsub.f32 %v2787_v34, %v2892_v5  ;;  %v19459_v34 = vld [vmem:[#allocation60_spill] sm:$0xff] }
 0x693   : > { %v19460_v5 = vld [vmem:[#allocation128_spill] sm:$0xff] }
 0x694   : > { %3035 = vrot.lane.b32.xlu0 %v2931_v43, %s11536_s20  ;;  %v2792_v62 = vmul.f32 %v19460_v5, %v13452_v13 }
 0x695   : > { %v2896_v56 = vpop.permute.xlu0 %2895 }
 0x696   : > { %v2933_v40 = vsub.f32 %v2789_v18, %v2896_v56  ;;  %v19461_v18 = vld [vmem:[#allocation77_spill] sm:$0xff] }
 0x698   : > { %3039 = vrot.lane.b32.xlu0 %v2933_v40, %s11536_s20 }
 0x699   : > { %v2900_v4 = vpop.permute.xlu0 %2899 }
 0x69a   : > { %v2935_v44 = vsub.f32 %v2791_v48, %v2900_v4  ;;  %v19462_v4 = vld [vmem:[#allocation5_spill] sm:$0xff] }
 0x69c   : > { %3043 = vrot.lane.b32.xlu0 %v2935_v44, %s11536_s20  ;;  %v19464_v44 = vld [vmem:[#allocation18_spill] sm:$0xff] }
 0x69d   : > { %v2904_v26 = vpop.permute.xlu0 %2903 }
 0x69e   : > { %v2937_v9 = vsub.f32 %v2793_v3, %v2904_v26  ;;  %v19469_v26 = vld [vmem:[#allocation38_spill] sm:$0xff] }
 0x6a0   : > { %3047 = vrot.lane.b32.xlu0 %v2937_v9, %s11536_s20  ;;  %v19470_v9 = vld [vmem:[#allocation59_spill] sm:$0xff] }
 0x6a1   : > { %v2956_v48 = vpop.permute.xlu0 %2955 }
 0x6a4   : > { %3083 = vrot.lane.b32.xlu0 %v19448_v20, %s11540_s29 }
 0x6a5   : > { %v13965_v13 = vpop.permute.xlu0 %2959 }
 0x6a6   : > { %19463 = vst [vmem:[#allocation55_spill] sm:$0xff] %v13965_v13 }
 0x6a7   : > { %v2878_v28 = vpop.permute.xlu1 %2877 }
 0x6a8   : > { %v2924_v15 = vsub.f32 %v2780_v57, %v2878_v28  ;;  %3087 = vrot.lane.b32.xlu0 %v19450_v38, %s11540_s29  ;;  %v19472_v57 = vld [vmem:[#allocation75_spill] sm:$0xff] }
 0x6a9   : > { %v13971_v3 = vpop.permute.xlu0 %2963 }
 0x6aa   : > { %3021 = vrot.lane.b32.xlu1 %v2924_v15, %s11536_s20  ;;  %19466 = vst [vmem:[#allocation73_spill] sm:$0xff] %v13971_v3  ;;  %v19474_v15 = vld [vmem:[#allocation93_spill] sm:$0xff] }
 0x6ab   : > { %v2882_v22 = vpop.permute.xlu1 %2881 }
 0x6ac   : > { %v2926_v61 = vsub.f32 %v2782_v54, %v2882_v22  ;;  %3091 = vrot.lane.b32.xlu0 %v19452_v45, %s11540_s29  ;;  %v499_v45 = vlaneseq }
 0x6ad   : > { %v13975_v47 = vpop.permute.xlu0 %2967 }
 0x6ae   : > { %3025 = vrot.lane.b32.xlu1 %v2926_v61, %s11536_s20  ;;  %19468 = vst [vmem:[#allocation88_spill] sm:$0xff] %v13975_v47 }
 0x6af   : > { %v2886_v37 = vpop.permute.xlu1 %2885 }
 0x6b0   : > { %v2928_v11 = vsub.f32 %v2784_v49, %v2886_v37  ;;  %3095 = vrot.lane.b32.xlu0 %v19454_v58, %s11540_s29 }
 0x6b1   : > { %v13981_v63 = vpop.permute.xlu0 %2971 }
 0x6b2   : > { %3029 = vrot.lane.b32.xlu1 %v2928_v11, %s11536_s20  ;;  %19471 = vst [vmem:[#allocation105_spill] sm:$0xff] %v13981_v63 }
 0x6b3   : > { %v2890_v12 = vpop.permute.xlu1 %2889 }
 0x6b4   : > { %v2930_v17 = vsub.f32 %v2786_v60, %v2890_v12  ;;  %3099 = vrot.lane.b32.xlu0 %v19456_v36, %s11540_s29 }
 0x6b5   : > { %v13985_v28 = vpop.permute.xlu0 %2975 }
 0x6b6   : > { %3033 = vrot.lane.b32.xlu1 %v2930_v17, %s11536_s20  ;;  %19473 = vst [vmem:[#allocation122_spill] sm:$0xff] %v13985_v28 }
 0x6b7   : > { %v2894_v42 = vpop.permute.xlu1 %2893 }
 0x6b8   : > { %v2932_v52 = vsub.f32 %v2788_v55, %v2894_v42  ;;  %3103 = vrot.lane.b32.xlu0 %v19457_v30, %s11540_s29 }
 0x6b9   : > { %v13989_v6 = vpop.permute.xlu0 %2979 }
 0x6ba   : > { %3037 = vrot.lane.b32.xlu1 %v2932_v52, %s11536_s20  ;;  %19475 = vst [vmem:[#allocation57_spill] sm:$0xff] %v13989_v6 }
 0x6bb   : > { %v2898_v19 = vpop.permute.xlu1 %2897 }
 0x6bc   : > { %v2934_v21 = vsub.f32 %v2790_v32, %v2898_v19  ;;  %3107 = vrot.lane.b32.xlu0 %v19459_v34, %s11540_s29 }
 0x6bd   : > { %v13993_v22 = vpop.permute.xlu0 %2983 }
 0x6be   : > { %3041 = vrot.lane.b32.xlu1 %v2934_v21, %s11536_s20  ;;  %19477 = vst [vmem:[#allocation90_spill] sm:$0xff] %v13993_v22  ;;  %v19522_v22 = vld [vmem:[#allocation118_spill] sm:$0xff] }
 0x6bf   : > { %v2902_v35 = vpop.permute.xlu1 %2901 }
 0x6c0   : > { %v2936_v43 = vsub.f32 %v2792_v62, %v2902_v35  ;;  %3111 = vrot.lane.b32.xlu0 %v19461_v18, %s11540_s29 }
 0x6c2   : > { %3045 = vrot.lane.b32.xlu1 %v2936_v43, %s11536_s20 }
 0x6c3   : > { %v2906_v56 = vpop.permute.xlu1 %2905 }
 0x6c4   : > { %v2938_v40 = vsub.f32 %v2794_v33, %v2906_v56 }
 0x6c6   : > { %3049 = vrot.lane.b32.xlu1 %v2938_v40, %s11536_s20 }
 0x6c7   : > { %v13991_v54 = vpop.permute.xlu1 %2957 }
 0x6c8   : > { %19476 = vst [vmem:[#allocation76_spill] sm:$0xff] %v13991_v54 }
 0x6ca   : > { %3085 = vrot.lane.b32.xlu1 %v19462_v4, %s11540_s29 }
 0x6cb   : > { %v13995_v61 = vpop.permute.xlu1 %2961 }
 0x6cc   : > { %19478 = vst [vmem:[#allocation106_spill] sm:$0xff] %v13995_v61 }
 0x6ce   : > { %3089 = vrot.lane.b32.xlu1 %v19464_v44, %s11540_s29 }
 0x6cf   : > { %v13999_v37 = vpop.permute.xlu1 %2965 }
 0x6d0   : > { %19479 = vst [vmem:[#allocation92_spill] sm:$0xff] %v13999_v37 }
 0x6d2   : > { %3093 = vrot.lane.b32.xlu1 %v19465_v51, %s11540_s29 }
 0x6d3   : > { %v14005_v60 = vpop.permute.xlu1 %2969 }
 0x6d4   : > { %19482 = vst [vmem:[#allocation142_spill] sm:$0xff] %v14005_v60 }
 0x6d6   : > { %3097 = vrot.lane.b32.xlu1 %v19467_v10, %s11540_s29 }
 0x6d7   : > { %v14009_v17 = vpop.permute.xlu1 %2973 }
 0x6d8   : > { %19484 = vst [vmem:[#allocation115_spill] sm:$0xff] %v14009_v17 }
 0x6da   : > { %3101 = vrot.lane.b32.xlu1 %v19469_v26, %s11540_s29 }
 0x6db   : > { %v14015_v52 = vpop.permute.xlu1 %2977 }
 0x6dc   : > { %19487 = vst [vmem:[#allocation32_spill] sm:$0xff] %v14015_v52 }
 0x6de   : > { %3105 = vrot.lane.b32.xlu1 %v19470_v9, %s11540_s29 }
 0x6df   : > { %v14019_v32 = vpop.permute.xlu1 %2981 }
 0x6e0   : > { %19489 = vst [vmem:[#allocation98_spill] sm:$0xff] %v14019_v32  ;;  %v19525_v32 = vld [vmem:[#allocation47_spill] sm:$0xff] }
 0x6e2   : > { %3109 = vrot.lane.b32.xlu1 %v19472_v57, %s11540_s29 }
 0x6e3   : > { %v14024_v62 = vpop.permute.xlu1 %2985 }
 0x6e4   : > { %19491 = vst [vmem:[#allocation96_spill] sm:$0xff] %v14024_v62  ;;  %v14369_v62 = vld [vmem:[%s18755_s4] sm:$0xff] }
 0x6e5   : > { %19519 = vst [vmem:[#allocation135_spill] sm:$0xff] %v14369_v62 }
 0x6e6   : > { %3113 = vrot.lane.b32.xlu1 %v19474_v15, %s11540_s29 }
 0x6f6   : > { %v3020_v50 = vpop.permute.xlu0 %3019 }
 0x6f7   : > { %v3067_v49 = vsel %vm1032_vm2, %v2956_v48, %v3020_v50 }
 0x6f8   : > { %9672 = vmatprep.mubr.msk.f32.mxu1 %vm550_vm1, %v3067_v49 }
 0x6fa   : > { %v14001_v11 = vpop.permute.xlu0 %3023 }
 0x6fb   : > { %19480 = vst [vmem:[#allocation123_spill] sm:$0xff] %v14001_v11 }
 0x6fe   : > { %v14003_v39 = vpop.permute.xlu0 %3027 }
 0x6ff   : > { %19481 = vst [vmem:[#allocation129_spill] sm:$0xff] %v14003_v39 }
 0x702   : > { %v14007_v12 = vpop.permute.xlu0 %3031 }
 0x703   : > { %19483 = vst [vmem:[#allocation143_spill] sm:$0xff] %v14007_v12 }
 0x706   : > { %v14011_v55 = vpop.permute.xlu0 %3035 }
 0x707   : > { %19485 = vst [vmem:[#allocation39_spill] sm:$0xff] %v14011_v55 }
 0x70a   : > { %v14013_v42 = vpop.permute.xlu0 %3039 }
 0x70b   : > { %19486 = vst [vmem:[#allocation117_spill] sm:$0xff] %v14013_v42 }
 0x70e   : > { %v14017_v29 = vpop.permute.xlu0 %3043 }
 0x70f   : > { %19488 = vst [vmem:[#allocation144_spill] sm:$0xff] %v14017_v29 }
 0x712   : > { %v14021_v19 = vpop.permute.xlu0 %3047 }
 0x713   : > { %19490 = vst [vmem:[#allocation140_spill] sm:$0xff] %v14021_v19  ;;  %v19523_v19 = vld [vmem:[#allocation95_spill] sm:$0xff] }
 0x716   : > { %v3084_v21 = vpop.permute.xlu0 %3083 }
 0x717   : > { %v3131_v5 = vsel %vm550_vm1, %v3084_v21, 0.0 }
 0x718   : > { %3132 = vadd.xlane.f32.xlu0 %v3131_v5 }
 0x71a   : > { %v3088_v35 = vpop.permute.xlu0 %3087 }
 0x71b   : > { %v3137_v43 = vsel %vm550_vm1, %v3088_v35, 0.0 }
 0x71c   : > { %3138 = vadd.xlane.f32.xlu0 %v3137_v43  ;;  %v14027_v33 = vpop.permute.xlu1 %3021 }
 0x71d   : > { %19492 = vst [vmem:[#allocation121_spill] sm:$0xff] %v14027_v33 }
 0x71e   : > { %v3092_v15 = vpop.permute.xlu0 %3091 }
 0x71f   : > { %v3143_v26 = vsel %vm550_vm1, %v3092_v15, 0.0 }
 0x720   : > { %v14029_v56 = vpop.permute.xlu1 %3025 }
 0x721   : > { %19493 = vst [vmem:[#allocation44_spill] sm:$0xff] %v14029_v56 }
 0x722   : > { %v3096_v43 = vpop.permute.xlu0 %3095 }
 0x723   : > { %v3149_v58 = vsel %vm550_vm1, %v3096_v43, 0.0  ;;  %v14053_v43 = vshrl.u32 %v499_v45, 7 }
 0x724   : > { %v14031_v40 = vpop.permute.xlu1 %3029 }
 0x725   : > { %19494 = vst [vmem:[#allocation139_spill] sm:$0xff] %v14031_v40  ;;  %19500 = vst [vmem:[#allocation133_spill] sm:$0xff] %v14053_v43  ;;  %v14166_v44 = vadd.s32 104, %v14053_v43  ;;  %v14185_v38 = vadd.s32 80, %v14053_v43  ;;  %v14190_v4 = vadd.s32 120, %v14053_v43  ;;  %v14209_v20 = vadd.s32 96, %v14053_v43 }
 0x726   : > { %v3100_v9 = vpop.permute.xlu0 %3099 }
 0x727   : > { %19512 = vst [vmem:[#allocation36_spill] sm:$0xff] %v14166_v44  ;;  %19513 = vst [vmem:[#allocation43_spill] sm:$0xff] %v14185_v38 }
 0x728   : > { %v14033_v48 = vpop.permute.xlu1 %3033  ;;  %19514 = vst [vmem:[#allocation110_spill] sm:$0xff] %v14190_v4  ;;  %19515 = vst [vmem:[#allocation81_spill] sm:$0xff] %v14209_v20 }
 0x729   : > { %19495 = vst [vmem:[#allocation124_spill] sm:$0xff] %v14033_v48 }
 0x72c   : > { %v14035_v50 = vpop.permute.xlu1 %3037 }
 0x72d   : > { %19496 = vst [vmem:[#allocation33_spill] sm:$0xff] %v14035_v50 }
 0x730   : > { %v14037_v49 = vpop.permute.xlu1 %3041 }
 0x731   : > { %19497 = vst [vmem:[#allocation70_spill] sm:$0xff] %v14037_v49 }
 0x734   : > { %v14039_v21 = vpop.permute.xlu1 %3045 }
 0x735   : > { %19498 = vst [vmem:[#allocation66_spill] sm:$0xff] %v14039_v21  ;;  %v19526_v21 = vld [vmem:[#allocation69_spill] sm:$0xff] }
 0x738   : > { %v14041_v5 = vpop.permute.xlu1 %3049 }
 0x739   : > { %19499 = vst [vmem:[#allocation100_spill] sm:$0xff] %v14041_v5  ;;  %v19521_v5 = vld [vmem:[#allocation78_spill] sm:$0xff] }
 0x73c   : > { %v3086_v18 = vpop.permute.xlu1 %3085 }
 0x73d   : > { %v3134_v35 = vsel %vm550_vm1, %v3086_v18, 0.0  ;;  %v3104_v18 = vpop.permute.xlu0 %3103 }
 0x73e   : > { %3135 = vadd.xlane.f32.xlu1 %v3134_v35 }
 0x740   : > { %v3090_v57 = vpop.permute.xlu1 %3089 }
 0x741   : > { %v3140_v34 = vsel %vm550_vm1, %v3090_v57, 0.0  ;;  %v3155_v57 = vsel %vm550_vm1, %v3100_v9, 0.0  ;;  %v3108_v15 = vpop.permute.xlu0 %3107  ;;  %v14058_v9 = vadd.s32 8, %v14053_v43 }
 0x742   : > { %3141 = vadd.xlane.f32.xlu0 %v3140_v34 }
 0x743   : > { %19501 = vst [vmem:[#allocation48_spill] sm:$0xff] %v14058_v9 }
 0x744   : > { %v3094_v30 = vpop.permute.xlu1 %3093 }
 0x745   : > { %v3146_v36 = vsel %vm550_vm1, %v3094_v30, 0.0 }
 0x746   : > { %3144 = vadd.xlane.f32.xlu0 %v3143_v26  ;;  %3147 = vadd.xlane.f32.xlu1 %v3146_v36  ;;  %v3161_v36 = vsel %vm550_vm1, %v3104_v18, 0.0 }
 0x748   : > { %v3098_v10 = vpop.permute.xlu1 %3097 }
 0x749   : > { %v3152_v51 = vsel %vm550_vm1, %v3098_v10, 0.0 }
 0x74a   : > { %3150 = vadd.xlane.f32.xlu0 %v3149_v58  ;;  %3153 = vadd.xlane.f32.xlu1 %v3152_v51  ;;  %v3167_v51 = vsel %vm550_vm1, %v3108_v15, 0.0  ;;  %v14069_v15 = vadd.s32 24, %v14053_v43 }
 0x74c   : > { %v3102_v35 = vpop.permute.xlu1 %3101  ;;  %19503 = vst [vmem:[#allocation125_spill] sm:$0xff] %v14069_v15 }
 0x74d   : > { %v3158_v34 = vsel %vm550_vm1, %v3102_v35, 0.0  ;;  %v14060_v35 = vand.u32 127, %v499_v45  ;;  %v14072_v45 = vadd.s32 40, %v14053_v43 }
 0x74e   : > { %3156 = vadd.xlane.f32.xlu0 %v3155_v57  ;;  %3159 = vadd.xlane.f32.xlu1 %v3158_v34  ;;  %v3112_v57 = vpop.permute.xlu0 %3111 }
 0x74f   : > { %19502 = vst [vmem:[#allocation64_spill] sm:$0xff] %v14060_v35  ;;  %v3173_v34 = vsel %vm550_vm1, %v3112_v57, 0.0  ;;  %vm519_vm4 = vcmp.le.s32.totalorder %v14060_v35, %v14058_v9  ;;  %vm518_vm5 = vcmp.le.s32.totalorder %v14060_v35, %v14053_v43  ;;  %19504 = vst [vmem:[#allocation35_spill] sm:$0xff] %v14072_v45  ;;  %vm521_vm6 = vcmp.le.s32.totalorder %v14060_v35, %v14069_v15  ;;  %v14337_v15 = vld [vmem:[%s18754_s3 + $0x50] sm:$0xff] }
 0x750   : > { %v3106_v30 = vpop.permute.xlu1 %3105  ;;  %vm523_vm7 = vcmp.le.s32.totalorder %v14060_v35, %v14072_v45  ;;  %v14118_v57 = vadd.s32 72, %v14053_v43  ;;  %vm18905_vm15 = vcmp.le.s32.totalorder %v14060_v35, %v14166_v44  ;;  %vm528_vm0 = vcmp.le.s32.totalorder %v14060_v35, %v14185_v38  ;;  %v14288_v38 = vld [vmem:[%s18754_s3 + $0x38] sm:$0xff]  ;;  %v14360_v9 = vld [vmem:[%s18754_s3 + $0x70] sm:$0xff] }
 0x751   : > { %v3164_v26 = vsel %vm550_vm1, %v3106_v30, 0.0  ;;  %v14230_v44 = vadd.s32 112, %v14053_v43  ;;  %v14344_v45 = vld [vmem:[%s18754_s3 + $0x78] sm:$0xff] }
 0x752   : > { %3162 = vadd.xlane.f32.xlu0 %v3161_v36  ;;  %3165 = vadd.xlane.f32.xlu1 %v3164_v26  ;;  %v14078_v36 = vsel %vm519_vm4, %v13865_v23, -1e+30  ;;  %v14084_v26 = vsel %vm518_vm5, %v13868_v2, -1e+30  ;;  %v14102_v23 = vsel %vm521_vm6, %v13871_v0, -1e+30  ;;  %vm18943_vm11 = vcmp.le.s32.totalorder %v14060_v35, %v14118_v57 }
 0x753   : > { %v14108_v2 = vsel %vm523_vm7, %v13875_v59, -1e+30  ;;  %19508 = vst [vmem:[#allocation134_spill] sm:$0xff] %v14118_v57  ;;  %19516 = vst [vmem:[#allocation109_spill] sm:$0xff] %v14230_v44  ;;  %v14316_v57 = vld [vmem:[%s18754_s3 + $0x58] sm:$0xff] }
 0x754   : > { %v3110_v58 = vpop.permute.xlu1 %3109 }
 0x755   : > { %v3170_v10 = vsel %vm550_vm1, %v3110_v58, 0.0  ;;  %v14089_v58 = vadd.s32 16, %v14053_v43 }
 0x756   : > { %3168 = vadd.xlane.f32.xlu0 %v3167_v51  ;;  %3171 = vadd.xlane.f32.xlu1 %v3170_v10  ;;  %v14094_v51 = vadd.s32 56, %v14053_v43  ;;  %v14113_v10 = vadd.s32 32, %v14053_v43 }
 0x757   : > { %19505 = vst [vmem:[#allocation83_spill] sm:$0xff] %v14089_v58  ;;  %vm520_vm8 = vcmp.le.s32.totalorder %v14060_v35, %v14089_v58  ;;  %v14351_v58 = vld [vmem:[%s18754_s3 + $0x60] sm:$0xff] }
 0x758   : > { %v3114_v18 = vpop.permute.xlu1 %3113  ;;  %19506 = vst [vmem:[#allocation79_spill] sm:$0xff] %v14094_v51  ;;  %19507 = vst [vmem:[#allocation108_spill] sm:$0xff] %v14113_v10  ;;  %vm18942_vm9 = vcmp.le.s32.totalorder %v14060_v35, %v14094_v51  ;;  %v14126_v0 = vsel %vm520_vm8, %v13873_v31, -1e+30  ;;  %vm522_vm10 = vcmp.le.s32.totalorder %v14060_v35, %v14113_v10  ;;  %v14323_v10 = vld [vmem:[%s18754_s3 + $0x40] sm:$0xff]  ;;  %v14330_v51 = vld [vmem:[%s18754_s3 + $0x68] sm:$0xff] }
 0x759   : > { %v3176_v30 = vsel %vm550_vm1, %v3114_v18, 0.0  ;;  %v14132_v59 = vsel %vm18942_vm9, %v13879_v27, -1e+30  ;;  %v14137_v18 = vadd.s32 48, %v14053_v43  ;;  %v14150_v31 = vsel %vm522_vm10, %v13877_v41, -1e+30 }
 0x75a   : > { %3174 = vadd.xlane.f32.xlu0 %v3173_v34  ;;  %3177 = vadd.xlane.f32.xlu1 %v3176_v30  ;;  %v14142_v34 = vadd.s32 88, %v14053_v43  ;;  %v14156_v27 = vsel %vm18943_vm11, %v13883_v14, -1e+30  ;;  %v14161_v30 = vadd.s32 64, %v14053_v43  ;;  %v19517_v43 = vld [vmem:[#allocation67_spill] sm:$0xff] }
 0x75b   : > { %19509 = vst [vmem:[#allocation50_spill] sm:$0xff] %v14137_v18  ;;  %vm524_vm12 = vcmp.le.s32.totalorder %v14060_v35, %v14137_v18  ;;  %v14309_v18 = vld [vmem:[%s18754_s3 + $0x30] sm:$0xff] }
 0x75c   : > { %19510 = vst [vmem:[#allocation68_spill] sm:$0xff] %v14142_v34  ;;  %19511 = vst [vmem:[#allocation127_spill] sm:$0xff] %v14161_v30  ;;  %vm18904_vm13 = vcmp.le.s32.totalorder %v14060_v35, %v14142_v34  ;;  %v14174_v41 = vsel %vm524_vm12, %v13881_v8, -1e+30  ;;  %vm526_vm14 = vcmp.le.s32.totalorder %v14060_v35, %v14161_v30  ;;  %v14295_v30 = vld [vmem:[%s18754_s3 + $0x20] sm:$0xff]  ;;  %v14302_v34 = vld [vmem:[%s18754_s3 + $0x48] sm:$0xff] }
 0x75d   : > { %v14180_v14 = vsel %vm18904_vm13, %v13889_v25, -1e+30  ;;  %v14198_v8 = vsel %vm526_vm14, %v13885_v24, -1e+30  ;;  %v14204_v25 = vsel %vm18905_vm15, %v13896_v46, -1e+30  ;;  %vm18908_vm13 = vcmp.le.s32.totalorder %v14060_v35, %v14190_v4 }
 0x75e   : > { %2044 = vmax.xlane.f32.xlu1 %v14078_v36  ;;  %2042 = vmax.xlane.f32.xlu0 %v14084_v26  ;;  %v14219_v24 = vsel %vm528_vm0, %v13891_v53, -1e+30  ;;  %v14225_v46 = vsel %vm18908_vm13, %v13903_v16, -1e+30  ;;  %vm530_vm15 = vcmp.le.s32.totalorder %v14060_v35, %v14209_v20  ;;  %vm532_vm13 = vcmp.le.s32.totalorder %v14060_v35, %v14230_v44  ;;  %v14253_v4 = vld [vmem:[%s18754_s3 + $0x8] sm:$0xff]  ;;  %v14281_v20 = vld [vmem:[%s18754_s3] sm:$0xff] }
 0x75f   : > { %v14238_v53 = vsel %vm530_vm15, %v13898_v1, -1e+30  ;;  %v14247_v16 = vsel %vm532_vm13, %v13905_v7, -1e+30  ;;  %v14260_v1 = vld [vmem:[%s18754_s3 + $0x10] sm:$0xff]  ;;  %v14267_v7 = vld [vmem:[%s18754_s3 + $0x18] sm:$0xff] }
 0x760   : > { %v14274_v44 = vld [vmem:[%s18754_s3 + $0x28] sm:$0xff]  ;;  %v19518_v35 = vld [vmem:[#allocation82_spill] sm:$0xff] }
 0x762   : > { %2048 = vmax.xlane.f32.xlu0 %v14102_v23  ;;  %2052 = vmax.xlane.f32.xlu1 %v14108_v2 }
 0x766   : > { %2046 = vmax.xlane.f32.xlu0 %v14126_v0  ;;  %2056 = vmax.xlane.f32.xlu1 %v14132_v59 }
 0x76a   : > { %2050 = vmax.xlane.f32.xlu0 %v14150_v31  ;;  %2060 = vmax.xlane.f32.xlu1 %v14156_v27 }
 0x76e   : > { %2054 = vmax.xlane.f32.xlu0 %v14174_v41  ;;  %2064 = vmax.xlane.f32.xlu1 %v14180_v14 }
 0x772   : > { %2058 = vmax.xlane.f32.xlu0 %v14198_v8  ;;  %2068 = vmax.xlane.f32.xlu1 %v14204_v25 }
 0x776   : > { %2062 = vmax.xlane.f32.xlu0 %v14219_v24  ;;  %2072 = vmax.xlane.f32.xlu1 %v14225_v46 }
 0x77a   : > { %2066 = vmax.xlane.f32.xlu0 %v14238_v53 }
 0x77e   : > { %2070 = vmax.xlane.f32.xlu0 %v14247_v16 }
 0x787   : > { %3245 = vrot.lane.b32.xlu1 %v14253_v4, %s11541_s11 }
 0x78b   : > { %3247 = vrot.lane.b32.xlu1 %v14260_v1, %s11541_s11 }
 0x78f   : > { %3249 = vrot.lane.b32.xlu1 %v14267_v7, %s11541_s11 }
 0x793   : > { %3253 = vrot.lane.b32.xlu1 %v14274_v44, %s11541_s11 }
 0x794   : > { %3243 = vrot.lane.b32.xlu0 %v14281_v20, %s11541_s11 }
 0x797   : > { %3257 = vrot.lane.b32.xlu1 %v14288_v38, %s11541_s11 }
 0x798   : > { %3251 = vrot.lane.b32.xlu0 %v14295_v30, %s11541_s11 }
 0x79b   : > { %3261 = vrot.lane.b32.xlu1 %v14302_v34, %s11541_s11 }
 0x79c   : > { %3255 = vrot.lane.b32.xlu0 %v14309_v18, %s11541_s11 }
 0x79f   : > { %3265 = vrot.lane.b32.xlu1 %v14316_v57, %s11541_s11 }
 0x7a0   : > { %3259 = vrot.lane.b32.xlu0 %v14323_v10, %s11541_s11 }
 0x7a3   : > { %3269 = vrot.lane.b32.xlu1 %v14330_v51, %s11541_s11 }
 0x7a4   : > { %3263 = vrot.lane.b32.xlu0 %v14337_v15, %s11541_s11 }
 0x7a5   : > { %v14393_v6 = vpop.xlane.xlu0 %3132 }
 0x7a7   : > { %3273 = vrot.lane.b32.xlu1 %v14344_v45, %s11541_s11 }
 0x7a8   : > { %3267 = vrot.lane.b32.xlu0 %v14351_v58, %s11541_s11 }
 0x7ab   : > { %3309 = vrot.lane.b32.xlu1 %v19517_v43, %s11542_s26  ;;  %v19520_v43 = vld [vmem:[#allocation99_spill] sm:$0xff] }
 0x7ac   : > { %3271 = vrot.lane.b32.xlu0 %v14360_v9, %s11541_s11 }
 0x7af   : > { %3313 = vrot.lane.b32.xlu1 %v19518_v35, %s11542_s26  ;;  %v19524_v35 = vld [vmem:[#allocation51_spill] sm:$0xff] }
 0x7b0   : > { %3307 = vrot.lane.b32.xlu0 %v14369_v62, %s11542_s26 }
 0x7b3   : > { %3317 = vrot.lane.b32.xlu1 %v19520_v43, %s11542_s26  ;;  %v19527_v43 = vld [vmem:[#allocation65_spill] sm:$0xff] }
 0x7b4   : > { %3311 = vrot.lane.b32.xlu0 %v19521_v5, %s11542_s26  ;;  %v19528_v5 = vld [vmem:[#allocation126_spill] sm:$0xff] }
 0x7b7   : > { %3321 = vrot.lane.b32.xlu1 %v19522_v22, %s11542_s26  ;;  %v19529_v22 = vld [vmem:[#allocation80_spill] sm:$0xff] }
 0x7b8   : > { %3315 = vrot.lane.b32.xlu0 %v19523_v19, %s11542_s26  ;;  %v19530_v19 = vld [vmem:[#allocation84_spill] sm:$0xff] }
 0x7bb   : > { %3325 = vrot.lane.b32.xlu1 %v19524_v35, %s11542_s26  ;;  %v19531_v35 = vld [vmem:[#allocation97_spill] sm:$0xff] }
 0x7bc   : > { %3319 = vrot.lane.b32.xlu0 %v19525_v32, %s11542_s26  ;;  %v14399_v32 = vpop.xlane.xlu0 %3138 }
 0x7bf   : > { %3329 = vrot.lane.b32.xlu1 %v19526_v21, %s11542_s26  ;;  %v19532_v21 = vld [vmem:[#allocation49_spill] sm:$0xff] }
 0x7c0   : > { %3323 = vrot.lane.b32.xlu0 %v19527_v43, %s11542_s26 }
 0x7c3   : > { %3333 = vrot.lane.b32.xlu1 %v19528_v5, %s11542_s26 }
 0x7c4   : > { %3327 = vrot.lane.b32.xlu0 %v19529_v22, %s11542_s26 }
 0x7c7   : > { %3337 = vrot.lane.b32.xlu1 %v19530_v19, %s11542_s26 }
 0x7c8   : > { %3331 = vrot.lane.b32.xlu0 %v19531_v35, %s11542_s26 }
 0x7cb   : > { %v14403_v43 = vpop.xlane.xlu1 %3135 }
 0x7cc   : > { %3335 = vrot.lane.b32.xlu0 %v19532_v21, %s11542_s26 }
 0x7cf   : > { %v14405_v29 = vpop.xlane.xlu0 %3141 }
 0x7d3   : > { %v14407_v5 = vpop.xlane.xlu0 %3144  ;;  %v14409_v22 = vpop.xlane.xlu1 %3147 }
 0x7d7   : > { %v14411_v52 = vpop.xlane.xlu0 %3150  ;;  %v14413_v49 = vpop.xlane.xlu1 %3153 }
 0x7db   : > { %v14415_v19 = vpop.xlane.xlu0 %3156  ;;  %v14417_v35 = vpop.xlane.xlu1 %3159 }
 0x7df   : > { %v14419_v28 = vpop.xlane.xlu0 %3162  ;;  %v14421_v42 = vpop.xlane.xlu1 %3165 }
 0x7e3   : > { %v14423_v21 = vpop.xlane.xlu0 %3168  ;;  %v14425_v17 = vpop.xlane.xlu1 %3171 }
 0x7e7   : > { %v14427_v50 = vpop.xlane.xlu0 %3174  ;;  %v14429_v63 = vpop.xlane.xlu1 %3177 }
 0x7eb   : > { %v2045_v55 = vpop.xlane.xlu1 %2044  ;;  %v2043_v60 = vpop.xlane.xlu0 %2042 }
 0x7ec   : > { %v2075_v48 = vsub.f32 %v14078_v36, %v2045_v55  ;;  %v2074_v47 = vsub.f32 %v14084_v26, %v2043_v60 }
 0x7ee   : > { %v2092_v12 = vmul.f32 1.442695, %v2075_v48  ;;  %v2090_v37 = vmul.f32 1.442695, %v2074_v47 }
 0x7ef   : > { %v2049_v40 = vpop.xlane.xlu0 %2048  ;;  %v2053_v3 = vpop.xlane.xlu1 %2052 }
 0x7f0   : > { %10944 = vpow2.f32 %v2092_v12  ;;  %v2077_v39 = vsub.f32 %v14102_v23, %v2049_v40  ;;  %v2079_v54 = vsub.f32 %v14108_v2, %v2053_v3 }
 0x7f1   : > { %10946 = vpow2.f32 %v2090_v37 }
 0x7f2   : > { %v2096_v11 = vmul.f32 1.442695, %v2077_v39  ;;  %v2100_v47 = vmul.f32 1.442695, %v2079_v54 }
 0x7f3   : > { %v2047_v61 = vpop.xlane.xlu0 %2046  ;;  %v2057_v56 = vpop.xlane.xlu1 %2056 }
 0x7f4   : > { %v2076_v13 = vsub.f32 %v14126_v0, %v2047_v61  ;;  %v2081_v12 = vsub.f32 %v14132_v59, %v2057_v56 }
 0x7f6   : > { %v2094_v33 = vmul.f32 1.442695, %v2076_v13  ;;  %v2104_v3 = vmul.f32 1.442695, %v2081_v12 }
 0x7f7   : > { %v2051_v62 = vpop.xlane.xlu0 %2050  ;;  %v2061_v55 = vpop.xlane.xlu1 %2060 }
 0x7f8   : > { %10948 = vpow2.f32 %v2094_v33  ;;  %v2078_v60 = vsub.f32 %v14150_v31, %v2051_v62  ;;  %v2083_v39 = vsub.f32 %v14156_v27, %v2061_v55 }
 0x7f9   : > { %10950 = vpow2.f32 %v2096_v11 }
 0x7fa   : > { %v14438_v37 = vpop.eup %10944  ;;  %v2098_v40 = vmul.f32 1.442695, %v2078_v60  ;;  %v2108_v56 = vmul.f32 1.442695, %v2083_v39 }
 0x7fb   : > { %v14440_v48 = vpop.eup %10946  ;;  %v2055_v36 = vpop.xlane.xlu0 %2054 }
 0x7fc   : > { %v2065_v61 = vpop.xlane.xlu1 %2064  ;;  %10952 = vpow2.f32 %v2098_v40  ;;  %9616 = vmatprep.mubr.f32.mxu0 %v14440_v48  ;;  %v2080_v13 = vsub.f32 %v14174_v41, %v2055_v36 }
 0x7fd   : > { %10954 = vpow2.f32 %v2100_v47  ;;  %9617 = vmatmul.mubr.f32.vlgmr.msra.gmra.mrb[32].mxu0 %v14438_v37  ;;  %v2085_v26 = vsub.f32 %v14180_v14, %v2065_v61 }
 0x7fe   : > { %v2102_v54 = vmul.f32 1.442695, %v2080_v13 }
 0x7ff   : > { %v2059_v11 = vpop.xlane.xlu0 %2058  ;;  %v2112_v41 = vmul.f32 1.442695, %v2085_v26 }
 0x800   : > { %v2069_v62 = vpop.xlane.xlu1 %2068  ;;  %10956 = vpow2.f32 %v2102_v54  ;;  %v2082_v33 = vsub.f32 %v14198_v8, %v2059_v11 }
 0x801   : > { %10958 = vpow2.f32 %v2104_v3  ;;  %v2087_v8 = vsub.f32 %v14204_v25, %v2069_v62 }
 0x802   : > { %v14448_v23 = vpop.eup %10948  ;;  %v2106_v2 = vmul.f32 1.442695, %v2082_v33 }
 0x803   : > { %v14450_v0 = vpop.eup %10950  ;;  %v2063_v59 = vpop.xlane.xlu0 %2062  ;;  %9619 = vmatprep.mubr.f32.mxu0 %v14448_v23 }
 0x804   : > { %v2073_v31 = vpop.xlane.xlu1 %2072  ;;  %10960 = vpow2.f32 %v2106_v2  ;;  %v2084_v27 = vsub.f32 %v14219_v24, %v2063_v59  ;;  %9620 = vmatmul.mubr.f32.gmra.mrb[34].mxu0 %v14450_v0  ;;  %v2116_v24 = vmul.f32 1.442695, %v2087_v8 }
 0x805   : > { %10962 = vpow2.f32 %v2108_v56  ;;  %v2089_v36 = vsub.f32 %v14225_v46, %v2073_v31  ;;  %v3179_v31 = vmul.f32 0.0625, %v14393_v6 }
 0x806   : > { %v14456_v55 = vpop.eup %10952  ;;  %v2110_v14 = vmul.f32 1.442695, %v2084_v27  ;;  %v3180_v27 = vmul.f32 0.0625, %v14403_v43 }
 0x807   : > { %v14458_v60 = vpop.eup %10954  ;;  %v2067_v47 = vpop.xlane.xlu0 %2066  ;;  %9622 = vmatprep.mubr.f32.mxu0 %v14456_v55 }
 0x808   : > { %v14460_v12 = vpop.permute.xlu1 %3245  ;;  %10964 = vpow2.f32 %v2110_v14  ;;  %v2086_v40 = vsub.f32 %v14238_v53, %v2067_v47  ;;  %9623 = vmatmul.mubr.f32.gmra.mrb[36].mxu0 %v14458_v60  ;;  %v2120_v53 = vmul.f32 1.442695, %v2089_v36  ;;  %v3196_v6 = vadd.f32 1.1920929e-07, %v3180_v27 }
 0x809   : > { %10966 = vpow2.f32 %v2112_v41  ;;  %v3182_v36 = vmul.f32 0.0625, %v14405_v29  ;;  %v3184_v29 = vmul.f32 0.0625, %v14409_v22  ;;  %v3187_v22 = vmul.f32 0.0625, %v14415_v19  ;;  %v19546_v19 = vld [vmem:[#allocation4_spill] sm:$0xff] }
 0x80a   : > { %v14466_v25 = vpop.eup %10956  ;;  %v2114_v61 = vmul.f32 1.442695, %v2086_v40  ;;  %v3195_v40 = vadd.f32 1.1920929e-07, %v3179_v31 }
 0x80b   : > { %v14468_v13 = vpop.eup %10958  ;;  %v2071_v39 = vpop.xlane.xlu0 %2070  ;;  %9625 = vmatprep.mubr.f32.mxu0 %v14466_v25 }
 0x80c   : > { %v14470_v3 = vpop.permute.xlu1 %3247  ;;  %10968 = vpow2.f32 %v2114_v61  ;;  %v2088_v54 = vsub.f32 %v14247_v16, %v2071_v39  ;;  %9626 = vmatmul.mubr.f32.gmra.mrb[38].mxu0 %v14468_v13 }
 0x80d   : > { %19533 = vst [vmem:[#allocation52_spill] sm:$0xff] %v14470_v3  ;;  %10970 = vpow2.f32 %v2116_v24  ;;  %v3181_v24 = vmul.f32 0.0625, %v14399_v32  ;;  %v3198_v32 = vadd.f32 1.1920929e-07, %v3182_v36  ;;  %v19560_v3 = vld [vmem:[#allocation45_spill] sm:$0xff] }
 0x80e   : > { %v14475_v11 = vpop.eup %10960  ;;  %v2118_v46 = vmul.f32 1.442695, %v2088_v54 }
 0x80f   : > { %v14477_v62 = vpop.eup %10962  ;;  %v14481_v56 = vpop.permute.xlu0 %3243  ;;  %9628 = vmatprep.mubr.f32.mxu0 %v14475_v11 }
 0x810   : > { %v14479_v33 = vpop.permute.xlu1 %3249  ;;  %10972 = vpow2.f32 %v2118_v46  ;;  %9629 = vmatmul.mubr.f32.gmra.mrb[40].mxu0 %v14477_v62  ;;  %v3183_v46 = vmul.f32 0.0625, %v14407_v5 }
 0x811   : > { %19534 = vst [vmem:[#allocation107_spill] sm:$0xff] %v14479_v33  ;;  %10974 = vpow2.f32 %v2120_v53  ;;  %v3197_v53 = vadd.f32 1.1920929e-07, %v3181_v24 }
 0x812   : > { %v14485_v16 = vpop.eup %10964  ;;  %10976 = vrsqrt.f32 %v3195_v40  ;;  %v3186_v40 = vmul.f32 0.0625, %v14413_v49  ;;  %v3203_v49 = vadd.f32 1.1920929e-07, %v3187_v22  ;;  %v3192_v22 = vmul.f32 0.0625, %v14425_v17 }
 0x813   : > { %v14487_v26 = vpop.eup %10966  ;;  %v14491_v59 = vpop.permute.xlu0 %3251  ;;  %9631 = vmatprep.mubr.f32.mxu0 %v14485_v16  ;;  %10978 = vrsqrt.f32 %v3196_v6 }
 0x814   : > { %v14489_v2 = vpop.permute.xlu1 %3253  ;;  %19535 = vst [vmem:[#allocation130_spill] sm:$0xff] %v14491_v59  ;;  %9632 = vmatmul.mubr.f32.gmra.mrb[42].mxu0 %v14487_v26  ;;  %10980 = vrsqrt.f32 %v3197_v53  ;;  %v3202_v36 = vadd.f32 1.1920929e-07, %v3186_v40  ;;  %v19547_v40 = vld [vmem:[#allocation2_spill] sm:$0xff] }
 0x815   : > { %10982 = vrsqrt.f32 %v3198_v32  ;;  %v19561_v59 = vld [vmem:[#allocation34_spill] sm:$0xff] }
 0x816   : > { %v14497_v41 = vpop.eup %10968 }
 0x817   : > { %v14499_v8 = vpop.eup %10970  ;;  %v14503_v47 = vpop.permute.xlu0 %3255  ;;  %9634 = vmatprep.mubr.f32.mxu0 %v14497_v41 }
 0x818   : > { %v14501_v14 = vpop.permute.xlu1 %3257  ;;  %19537 = vst [vmem:[#allocation61_spill] sm:$0xff] %v14503_v47  ;;  %9635 = vmatmul.mubr.f32.gmra.mrb[44].mxu0 %v14499_v8  ;;  %v3199_v47 = vadd.f32 1.1920929e-07, %v3183_v46 }
 0x819   : > { %19536 = vst [vmem:[#allocation37_spill] sm:$0xff] %v14501_v14  ;;  %v3185_v14 = vmul.f32 0.0625, %v14411_v52  ;;  %v3189_v52 = vmul.f32 0.0625, %v14419_v28 }
 0x81a   : > { %v14509_v61 = vpop.eup %10972  ;;  %10984 = vrsqrt.f32 %v3199_v47 }
 0x81b   : > { %v14511_v43 = vpop.eup %10974  ;;  %v14515_v54 = vpop.permute.xlu0 %3259  ;;  %9637 = vmatprep.mubr.f32.mxu0 %v14509_v61  ;;  %v3201_v6 = vadd.f32 1.1920929e-07, %v3185_v14  ;;  %v3190_v14 = vmul.f32 0.0625, %v14421_v42 }
 0x81c   : > { %v14513_v39 = vpop.permute.xlu1 %3261  ;;  %19539 = vst [vmem:[#allocation72_spill] sm:$0xff] %v14515_v54  ;;  %9638 = vmatmul.mubr.f32.gmra.mrb[46].mxu0 %v14511_v43  ;;  %v3200_v54 = vadd.f32 1.1920929e-07, %v3184_v29  ;;  %v10977_v53 = vpop.eup %10976 }
 0x81d   : > { %19538 = vst [vmem:[#allocation112_spill] sm:$0xff] %v14513_v39  ;;  %v10979_v46 = vpop.eup %10978  ;;  %v3206_v42 = vadd.f32 1.1920929e-07, %v3190_v14 }
 0x81e   : > { %10986 = vrsqrt.f32 %v3200_v54  ;;  %v10981_v47 = vpop.eup %10980  ;;  %v14540_v54 = vmul.f32 %v10979_v46, %v19546_v19  ;;  %v19548_v46 = vld [vmem:[#allocation7_spill] sm:$0xff] }
 0x81f   : > { %v14523_v27 = vpop.permute.xlu0 %3263  ;;  %10988 = vrsqrt.f32 %v3201_v6  ;;  %v14550_v19 = vmul.f32 %v10981_v47, %v19548_v46  ;;  %v3208_v47 = vadd.f32 1.1920929e-07, %v3192_v22 }
 0x820   : > { %v14521_v31 = vpop.permute.xlu1 %3265  ;;  %19541 = vst [vmem:[#allocation136_spill] sm:$0xff] %v14523_v27  ;;  %v3188_v27 = vmul.f32 0.0625, %v14417_v35  ;;  %10990 = vrsqrt.f32 %v3202_v36  ;;  %v14543_v35 = vmul.f32 %v10977_v53, %v19547_v40  ;;  %v19549_v53 = vld [vmem:[#allocation8_spill] sm:$0xff] }
 0x821   : > { %19540 = vst [vmem:[#allocation111_spill] sm:$0xff] %v14521_v31  ;;  %10992 = vrsqrt.f32 %v3203_v49 }
 0x822   : > { %v3204_v31 = vadd.f32 1.1920929e-07, %v3188_v27 }
 0x823   : > { %v14529_v5 = vpop.permute.xlu0 %3267 }
 0x824   : > { %v14527_v24 = vpop.permute.xlu1 %3269  ;;  %19543 = vst [vmem:[#allocation102_spill] sm:$0xff] %v14529_v5  ;;  %v10983_v5 = vpop.eup %10982  ;;  %10994 = vrsqrt.f32 %v3204_v31  ;;  %v3193_v31 = vmul.f32 0.0625, %v14427_v50 }
 0x825   : > { %19542 = vst [vmem:[#allocation54_spill] sm:$0xff] %v14527_v24  ;;  %v3205_v24 = vadd.f32 1.1920929e-07, %v3189_v52  ;;  %v10985_v36 = vpop.eup %10984  ;;  %v14553_v40 = vmul.f32 %v10983_v5, %v19549_v53  ;;  %v3194_v5 = vmul.f32 0.0625, %v14429_v63  ;;  %v19550_v53 = vld [vmem:[#allocation11_spill] sm:$0xff] }
 0x827   : > { %v14536_v29 = vpop.permute.xlu0 %3271  ;;  %10996 = vrsqrt.f32 %v3205_v24  ;;  %v3210_v22 = vadd.f32 1.1920929e-07, %v3194_v5 }
 0x828   : > { %v14534_v32 = vpop.permute.xlu1 %3273  ;;  %19545 = vst [vmem:[#allocation40_spill] sm:$0xff] %v14536_v29  ;;  %v3191_v29 = vmul.f32 0.0625, %v14423_v21  ;;  %v10987_v21 = vpop.eup %10986  ;;  %10998 = vrsqrt.f32 %v3206_v42 }
 0x829   : > { %19544 = vst [vmem:[#allocation131_spill] sm:$0xff] %v14534_v32 }
 0x82b   : > { %v3308_v39 = vpop.permute.xlu0 %3307 }
 0x82c   : > { %v3310_v28 = vpop.permute.xlu1 %3309  ;;  %v3355_v27 = vmul.f32 %v3308_v39, %v14543_v35  ;;  %v3207_v39 = vadd.f32 1.1920929e-07, %v3191_v29 }
 0x82d   : > { %v3356_v6 = vmul.f32 %v3310_v28, %v14540_v54  ;;  %v10989_v28 = vpop.eup %10988 }
 0x82e   : > { %3387 = vrot.lane.b32.xlu0 %v3355_v27, %s11537_s14  ;;  %v19551_v27 = vld [vmem:[#allocation10_spill] sm:$0xff]  ;;  %v10991_v50 = vpop.eup %10990  ;;  %11000 = vrsqrt.f32 %v3207_v39 }
 0x82f   : > { %3389 = vrot.lane.b32.xlu1 %v3356_v6, %s11537_s14  ;;  %v3312_v49 = vpop.permute.xlu0 %3311  ;;  %v14562_v6 = vmul.f32 %v10987_v21, %v19550_v53  ;;  %v14565_v46 = vmul.f32 %v10985_v36, %v19551_v27  ;;  %11002 = vrsqrt.f32 %v3208_v47  ;;  %v10993_v21 = vpop.eup %10992  ;;  %v19553_v36 = vld [vmem:[#allocation13_spill] sm:$0xff] }
 0x830   : > { %v3314_v52 = vpop.permute.xlu1 %3313  ;;  %v3357_v14 = vmul.f32 %v3312_v49, %v14550_v19  ;;  %v19552_v49 = vld [vmem:[#allocation14_spill] sm:$0xff]  ;;  %v14575_v27 = vmul.f32 %v10989_v28, %v19553_v36  ;;  %v19556_v36 = vld [vmem:[#allocation25_spill] sm:$0xff] }
 0x831   : > { %v3358_v17 = vmul.f32 %v3314_v52, %v14553_v40  ;;  %v3209_v52 = vadd.f32 1.1920929e-07, %v3193_v31  ;;  %v14572_v53 = vmul.f32 %v10991_v50, %v19552_v49 }
 0x832   : > { %3391 = vrot.lane.b32.xlu0 %v3357_v14, %s11537_s14 }
 0x833   : > { %3393 = vrot.lane.b32.xlu1 %v3358_v17, %s11537_s14  ;;  %v3316_v29 = vpop.permute.xlu0 %3315  ;;  %v10995_v17 = vpop.eup %10994  ;;  %11004 = vrsqrt.f32 %v3209_v52 }
 0x834   : > { %v3318_v24 = vpop.permute.xlu1 %3317  ;;  %v3359_v63 = vmul.f32 %v3316_v29, %v14565_v46  ;;  %v10997_v5 = vpop.eup %10996  ;;  %11006 = vrsqrt.f32 %v3210_v22  ;;  %v19555_v29 = vld [vmem:[#allocation17_spill] sm:$0xff] }
 0x835   : > { %v3360_v42 = vmul.f32 %v3318_v24, %v14562_v6  ;;  %v19554_v24 = vld [vmem:[#allocation20_spill] sm:$0xff]  ;;  %v14585_v28 = vmul.f32 %v10993_v21, %v19555_v29 }
 0x836   : > { %3395 = vrot.lane.b32.xlu0 %v3359_v63, %s11537_s14  ;;  %v14582_v50 = vmul.f32 %v10995_v17, %v19554_v24  ;;  %v19557_v17 = vld [vmem:[#allocation22_spill] sm:$0xff] }
 0x837   : > { %3397 = vrot.lane.b32.xlu1 %v3360_v42, %s11537_s14  ;;  %v3320_v31 = vpop.permute.xlu0 %3319  ;;  %v10999_v42 = vpop.eup %10998  ;;  %v14595_v24 = vmul.f32 %v10997_v5, %v19557_v17 }
 0x838   : > { %v3322_v39 = vpop.permute.xlu1 %3321  ;;  %v3361_v47 = vmul.f32 %v3320_v31, %v14575_v27  ;;  %v11001_v31 = vpop.eup %11000  ;;  %v14592_v22 = vmul.f32 %v10999_v42, %v19556_v36  ;;  %v19559_v42 = vld [vmem:[#allocation27_spill] sm:$0xff] }
 0x839   : > { %v3362_v14 = vmul.f32 %v3322_v39, %v14572_v53  ;;  %v11003_v21 = vpop.eup %11002  ;;  %v14605_v36 = vmul.f32 %v11001_v31, %v19559_v42  ;;  %v19599_v42 = vld [vmem:[#allocation72_spill] sm:$0xff] }
 0x83a   : > { %3399 = vrot.lane.b32.xlu0 %v3361_v47, %s11537_s14 }
 0x83b   : > { %3401 = vrot.lane.b32.xlu1 %v3362_v14, %s11537_s14  ;;  %v3324_v49 = vpop.permute.xlu0 %3323 }
 0x83c   : > { %v3326_v63 = vpop.permute.xlu1 %3325  ;;  %v3363_v39 = vmul.f32 %v3324_v49, %v14585_v28  ;;  %v19558_v49 = vld [vmem:[#allocation30_spill] sm:$0xff] }
 0x83d   : > { %v3364_v52 = vmul.f32 %v3326_v63, %v14582_v50  ;;  %v11005_v32 = vpop.eup %11004  ;;  %v14602_v33 = vmul.f32 %v11003_v21, %v19558_v49 }
 0x83e   : > { %3403 = vrot.lane.b32.xlu0 %v3363_v39, %s11537_s14  ;;  %v11007_v5 = vpop.eup %11006  ;;  %v14615_v21 = vmul.f32 %v11005_v32, %v19561_v59  ;;  %v19598_v59 = vld [vmem:[#allocation112_spill] sm:$0xff] }
 0x83f   : > { %3405 = vrot.lane.b32.xlu1 %v3364_v52, %s11537_s14  ;;  %v3328_v47 = vpop.permute.xlu0 %3327 }
 0x840   : > { %v3330_v14 = vpop.permute.xlu1 %3329  ;;  %v3365_v63 = vmul.f32 %v3328_v47, %v14595_v24  ;;  %v14612_v47 = vmul.f32 %v11007_v5, %v19560_v3  ;;  %v19595_v3 = vld [vmem:[#allocation130_spill] sm:$0xff] }
 0x841   : > { %v3366_v29 = vmul.f32 %v3330_v14, %v14592_v22 }
 0x842   : > { %3407 = vrot.lane.b32.xlu0 %v3365_v63, %s11537_s14 }
 0x843   : > { %3409 = vrot.lane.b32.xlu1 %v3366_v29, %s11537_s14  ;;  %v3332_v39 = vpop.permute.xlu0 %3331 }
 0x844   : > { %v3334_v52 = vpop.permute.xlu1 %3333  ;;  %v3367_v14 = vmul.f32 %v3332_v39, %v14605_v36 }
 0x845   : > { %v3368_v17 = vmul.f32 %v3334_v52, %v14602_v33 }
 0x846   : > { %3411 = vrot.lane.b32.xlu0 %v3367_v14, %s11537_s14 }
 0x847   : > { %3413 = vrot.lane.b32.xlu1 %v3368_v17, %s11537_s14  ;;  %v3336_v31 = vpop.permute.xlu0 %3335 }
 0x848   : > { %v3338_v29 = vpop.permute.xlu1 %3337  ;;  %v3369_v49 = vmul.f32 %v3336_v31, %v14615_v21 }
 0x849   : > { %v3370_v63 = vmul.f32 %v3338_v29, %v14612_v47 }
 0x84a   : > { %3415 = vrot.lane.b32.xlu0 %v3369_v49, %s11537_s14 }
 0x84b   : > { %3417 = vrot.lane.b32.xlu1 %v3370_v63, %s11537_s14 }
 0x84e   : > { %3451 = vrot.lane.b32.xlu0 %v14281_v20, %s11542_s26 }
 0x84f   : > { %3453 = vrot.lane.b32.xlu1 %v14253_v4, %s11542_s26  ;;  %v11425_v4 = vld [vmem:[%s18755_s4 + $0x8] sm:$0xff] }
 0x852   : > { %3455 = vrot.lane.b32.xlu0 %v14260_v1, %s11542_s26  ;;  %v11433_v1 = vld [vmem:[%s18755_s4 + $0x48] sm:$0xff] }
 0x853   : > { %3457 = vrot.lane.b32.xlu1 %v14267_v7, %s11542_s26 }
 0x856   : > { %3459 = vrot.lane.b32.xlu0 %v14295_v30, %s11542_s26  ;;  %v11432_v30 = vld [vmem:[%s18755_s4 + $0x40] sm:$0xff] }
 0x857   : > { %3461 = vrot.lane.b32.xlu1 %v14274_v44, %s11542_s26  ;;  %v11426_v44 = vld [vmem:[%s18755_s4 + $0x10] sm:$0xff] }
 0x85a   : > { %3463 = vrot.lane.b32.xlu0 %v14309_v18, %s11542_s26  ;;  %v11430_v18 = vld [vmem:[%s18755_s4 + $0x30] sm:$0xff] }
 0x85b   : > { %3465 = vrot.lane.b32.xlu1 %v14288_v38, %s11542_s26  ;;  %v19562_v38 = vld [vmem:[#allocation135_spill] sm:$0xff] }
 0x85e   : > { %3467 = vrot.lane.b32.xlu0 %v14323_v10, %s11542_s26 }
 0x85f   : > { %3469 = vrot.lane.b32.xlu1 %v14302_v34, %s11542_s26  ;;  %v11431_v34 = vld [vmem:[%s18755_s4 + $0x38] sm:$0xff] }
 0x862   : > { %3471 = vrot.lane.b32.xlu0 %v14337_v15, %s11542_s26 }
 0x863   : > { %3473 = vrot.lane.b32.xlu1 %v14316_v57, %s11542_s26 }
 0x866   : > { %3475 = vrot.lane.b32.xlu0 %v14351_v58, %s11542_s26  ;;  %v11428_v58 = vld [vmem:[%s18755_s4 + $0x20] sm:$0xff] }
 0x885   : > { %2122 = vadd.xlane.f32.xlu0 %v14440_v48  ;;  %v11434_v48 = vld [vmem:[%s18755_s4 + $0x50] sm:$0xff] }
 0x887   : > { %2124 = vadd.xlane.f32.xlu1 %v14438_v37 }
 0x889   : > { %2126 = vadd.xlane.f32.xlu0 %v14448_v23  ;;  %v11435_v23 = vld [vmem:[%s18755_s4 + $0x58] sm:$0xff] }
 0x88b   : > { %2128 = vadd.xlane.f32.xlu1 %v14450_v0 }
 0x88d   : > { %2130 = vadd.xlane.f32.xlu0 %v14456_v55 }
 0x88f   : > { %2132 = vadd.xlane.f32.xlu1 %v14458_v60 }
 0x891   : > { %2134 = vadd.xlane.f32.xlu0 %v14466_v25 }
 0x893   : > { %2136 = vadd.xlane.f32.xlu1 %v14468_v13  ;;  %v11436_v13 = vld [vmem:[%s18755_s4 + $0x60] sm:$0xff] }
 0x895   : > { %2138 = vadd.xlane.f32.xlu0 %v14475_v11  ;;  %v11437_v11 = vld [vmem:[%s18755_s4 + $0x68] sm:$0xff] }
 0x897   : > { %2140 = vadd.xlane.f32.xlu1 %v14477_v62 }
 0x899   : > { %2142 = vadd.xlane.f32.xlu0 %v14485_v16  ;;  %v11438_v16 = vld [vmem:[%s18755_s4 + $0x70] sm:$0xff] }
 0x89b   : > { %2144 = vadd.xlane.f32.xlu1 %v14487_v26  ;;  %v11439_v26 = vld [vmem:[%s18755_s4 + $0x78] sm:$0xff] }
 0x89d   : > { %2146 = vadd.xlane.f32.xlu0 %v14497_v41 }
 0x89f   : > { %2148 = vadd.xlane.f32.xlu1 %v14499_v8 }
 0x8a0   : > { %v14671_v20 = vpop.permute.xlu0 %3387 }
 0x8a1   : > { %2150 = vadd.xlane.f32.xlu0 %v14509_v61 }
 0x8a3   : > { %2152 = vadd.xlane.f32.xlu1 %v14511_v43 }
 0x8a4   : > { %v14687_v15 = vpop.permute.xlu0 %3391 }
 0x8a8   : > { %v14699_v10 = vpop.permute.xlu0 %3395 }
 0x8ac   : > { %v14719_v7 = vpop.permute.xlu0 %3399 }
 0x8b0   : > { %v14735_v60 = vpop.permute.xlu0 %3403 }
 0x8b4   : > { %3477 = vrot.lane.b32.xlu1 %v14330_v51, %s11542_s26  ;;  %v11429_v51 = vld [vmem:[%s18755_s4 + $0x28] sm:$0xff]  ;;  %v14757_v41 = vpop.permute.xlu0 %3407 }
 0x8b7   : > { %3479 = vrot.lane.b32.xlu0 %v14360_v9, %s11542_s26  ;;  %v11427_v9 = vld [vmem:[%s18755_s4 + $0x18] sm:$0xff] }
 0x8b8   : > { %3481 = vrot.lane.b32.xlu1 %v14344_v45, %s11542_s26  ;;  %v14689_v45 = vpop.permute.xlu1 %3389  ;;  %v14767_v17 = vpop.permute.xlu0 %3411 }
 0x8bb   : > { %3515 = vrot.lane.b32.xlu0 %v19562_v38, %s11541_s11 }
 0x8bc   : > { %3517 = vrot.lane.b32.xlu1 %v11425_v4, %s11541_s11  ;;  %v14701_v57 = vpop.permute.xlu1 %3393  ;;  %v14777_v14 = vpop.permute.xlu0 %3415 }
 0x8bf   : > { %3519 = vrot.lane.b32.xlu0 %v11426_v44, %s11541_s11 }
 0x8c0   : > { %3521 = vrot.lane.b32.xlu1 %v11427_v9, %s11541_s11  ;;  %v14721_v37 = vpop.permute.xlu1 %3397  ;;  %v14787_v4 = vpop.permute.xlu0 %3451 }
 0x8c3   : > { %3523 = vrot.lane.b32.xlu0 %v11428_v58, %s11541_s11 }
 0x8c4   : > { %3525 = vrot.lane.b32.xlu1 %v11429_v51, %s11541_s11  ;;  %v14737_v25 = vpop.permute.xlu1 %3401 }
 0x8c7   : > { %3527 = vrot.lane.b32.xlu0 %v11430_v18, %s11541_s11  ;;  %v14797_v18 = vpop.permute.xlu0 %3455 }
 0x8c8   : > { %3529 = vrot.lane.b32.xlu1 %v11431_v34, %s11541_s11  ;;  %v14761_v61 = vpop.permute.xlu1 %3405 }
 0x8cb   : > { %3531 = vrot.lane.b32.xlu0 %v11432_v30, %s11541_s11 }
 0x8cc   : > { %3533 = vrot.lane.b32.xlu1 %v11433_v1, %s11541_s11  ;;  %v14769_v49 = vpop.permute.xlu1 %3409  ;;  %v14803_v1 = vpop.permute.xlu0 %3459 }
 0x8cf   : > { %3535 = vrot.lane.b32.xlu0 %v11434_v48, %s11541_s11 }
 0x8d0   : > { %3537 = vrot.lane.b32.xlu1 %v11435_v23, %s11541_s11  ;;  %v14731_v0 = vpop.f32.mrb[32].mxu0  ;;  %v14781_v31 = vpop.permute.xlu1 %3413 }
 0x8d1   : > { %19563 = vst [vmem:[#allocation74_spill] sm:$0xff] %v14731_v0  ;;  %v14733_v55 = vpop.f32.mrb[33].mxu0  ;;  %v14807_v23 = vpop.permute.xlu0 %3463 }
 0x8d2   : > { %19564 = vst [vmem:[#allocation119_spill] sm:$0xff] %v14733_v55 }
 0x8d3   : > { %3539 = vrot.lane.b32.xlu0 %v11436_v13, %s11541_s11 }
 0x8d4   : > { %3541 = vrot.lane.b32.xlu1 %v11437_v11, %s11541_s11  ;;  %v14789_v44 = vpop.permute.xlu1 %3417 }
 0x8d5   : > { %v14811_v11 = vpop.permute.xlu0 %3467 }
 0x8d7   : > { %v14747_v62 = vpop.f32.mrb[34].mxu0  ;;  %3543 = vrot.lane.b32.xlu0 %v11438_v16, %s11541_s11 }
 0x8d8   : > { %19565 = vst [vmem:[#allocation85_spill] sm:$0xff] %v14747_v62  ;;  %3545 = vrot.lane.b32.xlu1 %v11439_v26, %s11541_s11  ;;  %v14759_v8 = vpop.f32.mrb[35].mxu0  ;;  %v14801_v30 = vpop.permute.xlu1 %3453 }
 0x8d9   : > { %19566 = vst [vmem:[#allocation91_spill] sm:$0xff] %v14759_v8  ;;  %v14815_v26 = vpop.permute.xlu0 %3471 }
 0x8db   : > { %v14763_v43 = vpop.f32.mrb[36].mxu0 }
 0x8dc   : > { %19567 = vst [vmem:[#allocation137_spill] sm:$0xff] %v14763_v43  ;;  %v14765_v32 = vpop.f32.mrb[37].mxu0  ;;  %v14805_v48 = vpop.permute.xlu1 %3457 }
 0x8dd   : > { %19568 = vst [vmem:[#allocation56_spill] sm:$0xff] %v14765_v32 }
 0x8df   : > { %v14771_v5 = vpop.f32.mrb[38].mxu0 }
 0x8e0   : > { %19569 = vst [vmem:[#allocation104_spill] sm:$0xff] %v14771_v5  ;;  %v14773_v52 = vpop.f32.mrb[39].mxu0  ;;  %v14809_v13 = vpop.permute.xlu1 %3461 }
 0x8e1   : > { %19570 = vst [vmem:[#allocation132_spill] sm:$0xff] %v14773_v52 }
 0x8e3   : > { %v14775_v39 = vpop.f32.mrb[40].mxu0 }
 0x8e4   : > { %19571 = vst [vmem:[#allocation42_spill] sm:$0xff] %v14775_v39  ;;  %v14779_v29 = vpop.f32.mrb[41].mxu0  ;;  %v14813_v16 = vpop.permute.xlu1 %3465 }
 0x8e5   : > { %19572 = vst [vmem:[#allocation94_spill] sm:$0xff] %v14779_v29 }
 0x8e7   : > { %v14783_v63 = vpop.f32.mrb[42].mxu0 }
 0x8e8   : > { %19573 = vst [vmem:[#allocation120_spill] sm:$0xff] %v14783_v63  ;;  %v14785_v38 = vpop.f32.mrb[43].mxu0 }
 0x8e9   : > { %19574 = vst [vmem:[#allocation89_spill] sm:$0xff] %v14785_v38 }
 0x8eb   : > { %v14791_v9 = vpop.f32.mrb[44].mxu0 }
 0x8ec   : > { %19575 = vst [vmem:[#allocation113_spill] sm:$0xff] %v14791_v9  ;;  %v14793_v58 = vpop.f32.mrb[45].mxu0  ;;  %v14819_v9 = vpop.permute.xlu0 %3475 }
 0x8ed   : > { %19576 = vst [vmem:[#allocation138_spill] sm:$0xff] %v14793_v58 }
 0x8ef   : > { %v14795_v51 = vpop.f32.mrb[46].mxu0 }
 0x8f0   : > { %19577 = vst [vmem:[#allocation58_spill] sm:$0xff] %v14795_v51  ;;  %v14799_v34 = vpop.f32.mrb[47].mxu0  ;;  %v14817_v51 = vpop.permute.xlu1 %3469 }
 0x8f1   : > { %19578 = vst [vmem:[#allocation87_spill] sm:$0xff] %v14799_v34 }
 0x8f4   : > { %v14821_v34 = vpop.permute.xlu1 %3473 }
 0x912   : > { %v14823_v58 = vpop.xlane.xlu0 %2122 }
 0x913   : > { %19579 = vst [vmem:[#allocation141_spill] sm:$0xff] %v14823_v58 }
 0x914   : > { %v14825_v63 = vpop.xlane.xlu1 %2124 }
 0x915   : > { %19580 = vst [vmem:[#allocation114_spill] sm:$0xff] %v14825_v63 }
 0x916   : > { %v14827_v38 = vpop.xlane.xlu0 %2126 }
 0x917   : > { %19581 = vst [vmem:[#allocation63_spill] sm:$0xff] %v14827_v38 }
 0x918   : > { %v14829_v39 = vpop.xlane.xlu1 %2128 }
 0x919   : > { %19582 = vst [vmem:[#allocation101_spill] sm:$0xff] %v14829_v39 }
 0x91a   : > { %v14831_v29 = vpop.xlane.xlu0 %2130 }
 0x91b   : > { %19583 = vst [vmem:[#allocation53_spill] sm:$0xff] %v14831_v29 }
 0x91c   : > { %v14833_v5 = vpop.xlane.xlu1 %2132 }
 0x91d   : > { %19584 = vst [vmem:[#allocation71_spill] sm:$0xff] %v14833_v5 }
 0x91e   : > { %v14835_v52 = vpop.xlane.xlu0 %2134 }
 0x91f   : > { %19585 = vst [vmem:[#allocation116_spill] sm:$0xff] %v14835_v52 }
 0x920   : > { %v14837_v43 = vpop.xlane.xlu1 %2136 }
 0x921   : > { %19586 = vst [vmem:[#allocation86_spill] sm:$0xff] %v14837_v43 }
 0x922   : > { %v14839_v32 = vpop.xlane.xlu0 %2138 }
 0x923   : > { %19587 = vst [vmem:[#allocation103_spill] sm:$0xff] %v14839_v32 }
 0x924   : > { %v14841_v62 = vpop.xlane.xlu1 %2140 }
 0x925   : > { %19588 = vst [vmem:[#allocation128_spill] sm:$0xff] %v14841_v62 }
 0x926   : > { %v14843_v8 = vpop.xlane.xlu0 %2142 }
 0x927   : > { %19589 = vst [vmem:[#allocation67_spill] sm:$0xff] %v14843_v8 }
 0x928   : > { %v14845_v0 = vpop.xlane.xlu1 %2144 }
 0x929   : > { %19590 = vst [vmem:[#allocation82_spill] sm:$0xff] %v14845_v0 }
 0x92a   : > { %v14847_v55 = vpop.xlane.xlu0 %2146 }
 0x92b   : > { %19591 = vst [vmem:[#allocation99_spill] sm:$0xff] %v14847_v55 }
 0x92c   : > { %v14849_v38 = vpop.xlane.xlu1 %2148 }
 0x92d   : > { %19592 = vst [vmem:[#allocation78_spill] sm:$0xff] %v14849_v38 }
 0x92e   : > { %v14851_v39 = vpop.xlane.xlu0 %2150 }
 0x92f   : > { %19593 = vst [vmem:[#allocation118_spill] sm:$0xff] %v14851_v39 }
 0x930   : > { %v14853_v29 = vpop.xlane.xlu1 %2152 }
 0x931   : > { %19594 = vst [vmem:[#allocation95_spill] sm:$0xff] %v14853_v29 }
 0x932   : > { %v14855_v5 = vpop.permute.xlu0 %3479 }
 0x934   : > { %v14857_v52 = vpop.permute.xlu1 %3477 }
 0x936   : > { %v3516_v43 = vpop.permute.xlu0 %3515 }
 0x937   : > { %v3563_v32 = vmul.f32 %v3516_v43, %v14543_v35 }
 0x938   : > { %v14860_v62 = vpop.permute.xlu1 %3481 }
 0x939   : > { %3595 = vrot.lane.b32.xlu0 %v3563_v32, %s11533_s27 }
 0x93a   : > { %v3520_v0 = vpop.permute.xlu0 %3519 }
 0x93b   : > { %v3565_v55 = vmul.f32 %v3520_v0, %v14550_v19 }
 0x93c   : > { %v3518_v8 = vpop.permute.xlu1 %3517 }
 0x93d   : > { %v3564_v38 = vmul.f32 %v3518_v8, %v14540_v54  ;;  %3599 = vrot.lane.b32.xlu0 %v3565_v55, %s11533_s27 }
 0x93e   : > { %v3524_v29 = vpop.permute.xlu0 %3523 }
 0x93f   : > { %3597 = vrot.lane.b32.xlu1 %v3564_v38, %s11533_s27  ;;  %v3567_v39 = vmul.f32 %v3524_v29, %v14565_v46 }
 0x940   : > { %v3522_v63 = vpop.permute.xlu1 %3521 }
 0x941   : > { %v3566_v43 = vmul.f32 %v3522_v63, %v14553_v40  ;;  %3603 = vrot.lane.b32.xlu0 %v3567_v39, %s11533_s27 }
 0x942   : > { %v3528_v32 = vpop.permute.xlu0 %3527 }
 0x943   : > { %3601 = vrot.lane.b32.xlu1 %v3566_v43, %s11533_s27  ;;  %v3569_v0 = vmul.f32 %v3528_v32, %v14575_v27 }
 0x944   : > { %v3526_v58 = vpop.permute.xlu1 %3525 }
 0x945   : > { %v3568_v8 = vmul.f32 %v3526_v58, %v14562_v6  ;;  %3607 = vrot.lane.b32.xlu0 %v3569_v0, %s11533_s27 }
 0x946   : > { %v3532_v55 = vpop.permute.xlu0 %3531 }
 0x947   : > { %3605 = vrot.lane.b32.xlu1 %v3568_v8, %s11533_s27  ;;  %v3571_v29 = vmul.f32 %v3532_v55, %v14585_v28 }
 0x948   : > { %v3530_v38 = vpop.permute.xlu1 %3529 }
 0x949   : > { %v3570_v63 = vmul.f32 %v3530_v38, %v14572_v53  ;;  %3611 = vrot.lane.b32.xlu0 %v3571_v29, %s11533_s27  ;;  %v3292_v29 = vmul.f32 %v14460_v12, %v14540_v54  ;;  %v3296_v12 = vmul.f32 %v14489_v2, %v14562_v6 }
 0x94a   : > { %v3536_v39 = vpop.permute.xlu0 %3535 }
 0x94b   : > { %3609 = vrot.lane.b32.xlu1 %v3570_v63, %s11533_s27  ;;  %v3573_v43 = vmul.f32 %v3536_v39, %v14595_v24  ;;  %v3291_v63 = vmul.f32 %v14481_v56, %v14543_v35  ;;  %v3295_v56 = vmul.f32 %v19595_v3, %v14565_v46 }
 0x94c   : > { %v3534_v32 = vpop.permute.xlu1 %3533 }
 0x94d   : > { %v3572_v58 = vmul.f32 %v3534_v32, %v14582_v50  ;;  %3615 = vrot.lane.b32.xlu0 %v3573_v43, %s11533_s27  ;;  %v3436_v43 = vadd.f32 %v14689_v45, %v3292_v29  ;;  %v3435_v32 = vadd.f32 %v14671_v20, %v3291_v63  ;;  %v19597_v45 = vld [vmem:[#allocation107_spill] sm:$0xff]  ;;  %v3440_v63 = vadd.f32 %v14721_v37, %v3296_v12 }
 0x94e   : > { %v3540_v0 = vpop.permute.xlu0 %3539  ;;  %v3294_v29 = vmul.f32 %v19597_v45, %v14553_v40  ;;  %v3299_v45 = vmul.f32 %v19599_v42, %v14585_v28 }
 0x94f   : > { %3613 = vrot.lane.b32.xlu1 %v3572_v58, %s11533_s27  ;;  %v3575_v8 = vmul.f32 %v3540_v0, %v14605_v36  ;;  %v10488_v20 = vpack.i.bf16 %v3436_v43, %v3435_v32  ;;  %v19600_v43 = vld [vmem:[#allocation37_spill] sm:$0xff] }
 0x950   : > { %v3538_v55 = vpop.permute.xlu1 %3537  ;;  %v3438_v2 = vadd.f32 %v14701_v57, %v3294_v29  ;;  %v3298_v37 = vmul.f32 %v19600_v43, %v14572_v53  ;;  %v19603_v29 = vld [vmem:[#allocation102_spill] sm:$0xff]  ;;  %v19607_v43 = vld [vmem:[#allocation40_spill] sm:$0xff] }
 0x951   : > { %v3574_v38 = vmul.f32 %v3538_v55, %v14592_v22  ;;  %3619 = vrot.lane.b32.xlu0 %v3575_v8, %s11533_s27  ;;  %v19596_v8 = vld [vmem:[#allocation52_spill] sm:$0xff] }
 0x952   : > { %v3544_v39 = vpop.permute.xlu0 %3543 }
 0x953   : > { %3617 = vrot.lane.b32.xlu1 %v3574_v38, %s11533_s27  ;;  %v3577_v58 = vmul.f32 %v3544_v39, %v14615_v21  ;;  %v3293_v38 = vmul.f32 %v19596_v8, %v14550_v19  ;;  %v3439_v39 = vadd.f32 %v14699_v10, %v3295_v56  ;;  %v3300_v8 = vmul.f32 %v19598_v59, %v14582_v50  ;;  %v19601_v10 = vld [vmem:[#allocation61_spill] sm:$0xff]  ;;  %v19602_v56 = vld [vmem:[#allocation54_spill] sm:$0xff] }
 0x954   : > { %v3542_v0 = vpop.permute.xlu1 %3541  ;;  %v3297_v32 = vmul.f32 %v19601_v10, %v14575_v27  ;;  %v3442_v59 = vadd.f32 %v14737_v25, %v3298_v37  ;;  %v3305_v37 = vmul.f32 %v19607_v43, %v14615_v21 }
 0x955   : > { %v3576_v55 = vmul.f32 %v3542_v0, %v14602_v33  ;;  %3623 = vrot.lane.b32.xlu0 %v3577_v58, %s11533_s27  ;;  %v3437_v3 = vadd.f32 %v14687_v15, %v3293_v38  ;;  %v10498_v57 = vpack.i.bf16 %v3440_v63, %v3439_v39  ;;  %v3444_v15 = vadd.f32 %v14761_v61, %v3300_v8  ;;  %v19605_v61 = vld [vmem:[#allocation136_spill] sm:$0xff]  ;;  %v19606_v8 = vld [vmem:[#allocation131_spill] sm:$0xff] }
 0x956   : > { %v3441_v42 = vadd.f32 %v14719_v7, %v3297_v32  ;;  %v3304_v38 = vmul.f32 %v19602_v56, %v14602_v33  ;;  %v3301_v39 = vmul.f32 %v19605_v61, %v14595_v24 }
 0x957   : > { %3621 = vrot.lane.b32.xlu1 %v3576_v55, %s11533_s27  ;;  %v3443_v55 = vadd.f32 %v14735_v60, %v3299_v45  ;;  %v10493_v12 = vpack.i.bf16 %v3438_v2, %v3437_v3  ;;  %v3306_v45 = vmul.f32 %v19606_v8, %v14612_v47 }
 0x958   : > { %v3546_v0 = vpop.permute.xlu1 %3545  ;;  %v3448_v25 = vadd.f32 %v14781_v31, %v3304_v38  ;;  %v10503_v2 = vpack.i.bf16 %v3442_v59, %v3441_v42  ;;  %v3501_v42 = vmul.f32 %v14797_v18, %v14550_v19  ;;  %v3506_v19 = vmul.f32 %v14813_v16, %v14572_v53 }
 0x959   : > { %v3578_v58 = vmul.f32 %v3546_v0, %v14612_v47  ;;  %10489 = vrot.lane.b32.xlu0 %v10488_v20, %s11540_s29  ;;  %v3303_v20 = vmul.f32 %v19603_v29, %v14605_v36  ;;  %v19604_v0 = vld [vmem:[#allocation111_spill] sm:$0xff]  ;;  %v10508_v60 = vpack.i.bf16 %v3444_v15, %v3443_v55  ;;  %v3450_v31 = vadd.f32 %v14789_v44, %v3306_v45 }
 0x95a   : > { %v3302_v63 = vmul.f32 %v19604_v0, %v14592_v22  ;;  %v3499_v15 = vmul.f32 %v14787_v4, %v14543_v35  ;;  %v3503_v35 = vmul.f32 %v14803_v1, %v14565_v46  ;;  %v3505_v18 = vmul.f32 %v14807_v23, %v14575_v27 }
 0x95b   : > { %3625 = vrot.lane.b32.xlu1 %v3578_v58, %s11533_s27  ;;  %v3447_v7 = vadd.f32 %v14767_v17, %v3303_v20  ;;  %v3445_v58 = vadd.f32 %v14757_v41, %v3301_v39  ;;  %v3449_v17 = vadd.f32 %v14777_v14, %v3305_v37  ;;  %v3502_v14 = vmul.f32 %v14805_v48, %v14553_v40 }
 0x95c   : > { %v3446_v3 = vadd.f32 %v14769_v49, %v3302_v63  ;;  %v3508_v46 = vmul.f32 %v14817_v51, %v14582_v50  ;;  %v3507_v1 = vmul.f32 %v14811_v11, %v14585_v28  ;;  %v3510_v27 = vmul.f32 %v14821_v34, %v14592_v22 }
 0x95d   : > { %10499 = vrot.lane.b32.xlu0 %v10498_v57, %s11540_s29  ;;  %v10518_v10 = vpack.i.bf16 %v3448_v25, %v3447_v7  ;;  %v10523_v41 = vpack.i.bf16 %v3450_v31, %v3449_v17  ;;  %v3500_v57 = vmul.f32 %v14801_v30, %v14540_v54  ;;  %v3504_v54 = vmul.f32 %v14809_v13, %v14562_v6 }
 0x95e   : > { %v10513_v32 = vpack.i.bf16 %v3446_v3, %v3445_v58  ;;  %v3509_v23 = vmul.f32 %v14815_v26, %v14595_v24  ;;  %v3511_v28 = vmul.f32 %v14819_v9, %v14605_v36  ;;  %v3512_v11 = vmul.f32 %v14857_v52, %v14602_v33 }
 0x95f   : > { %10494 = vrot.lane.b32.xlu1 %v10493_v12, %s11540_s29  ;;  %v3513_v34 = vmul.f32 %v14855_v5, %v14615_v21  ;;  %v3514_v26 = vmul.f32 %v14860_v62, %v14612_v47 }
 0x961   : > { %10509 = vrot.lane.b32.xlu0 %v10508_v60, %s11540_s29 }
 0x963   : > { %10504 = vrot.lane.b32.xlu1 %v10503_v2, %s11540_s29 }
 0x965   : > { %10519 = vrot.lane.b32.xlu0 %v10518_v10, %s11540_s29 }
 0x967   : > { %10514 = vrot.lane.b32.xlu1 %v10513_v32, %s11540_s29 }
 0x96b   : > { %10524 = vrot.lane.b32.xlu1 %v10523_v41, %s11540_s29 }
 0x9ab   : > { %v3596_v49 = vpop.permute.xlu0 %3595 }
 0x9ac   : > { %v3643_v59 = vsub.f32 %v3499_v15, %v3596_v49 }
 0x9af   : > { %v3600_v55 = vpop.permute.xlu0 %3599 }
 0x9b0   : > { %v3645_v20 = vsub.f32 %v3501_v42, %v3600_v55 }
 0x9b1   : > { %v3598_v12 = vpop.permute.xlu1 %3597 }
 0x9b2   : > { %v3644_v44 = vsub.f32 %v3500_v57, %v3598_v12 }
 0x9b3   : > { %v3604_v38 = vpop.permute.xlu0 %3603 }
 0x9b4   : > { %v10528_v56 = vpack.i.bf16 %v3644_v44, %v3643_v59  ;;  %v3647_v40 = vsub.f32 %v3503_v35, %v3604_v38 }
 0x9b5   : > { %v3602_v29 = vpop.permute.xlu1 %3601 }
 0x9b6   : > { %v3646_v0 = vsub.f32 %v3502_v14, %v3602_v29  ;;  %10529 = vrot.lane.b32.xlu0 %v10528_v56, %s11540_s29 }
 0x9b7   : > { %v3608_v30 = vpop.permute.xlu0 %3607 }
 0x9b8   : > { %v10533_v4 = vpack.i.bf16 %v3646_v0, %v3645_v20  ;;  %v3649_v6 = vsub.f32 %v3505_v18, %v3608_v30 }
 0x9b9   : > { %v3606_v63 = vpop.permute.xlu1 %3605 }
 0x9ba   : > { %v3648_v48 = vsub.f32 %v3504_v54, %v3606_v63  ;;  %10534 = vrot.lane.b32.xlu1 %v10533_v4, %s11540_s29 }
 0x9bb   : > { %v3612_v39 = vpop.permute.xlu0 %3611 }
 0x9bc   : > { %v10538_v61 = vpack.i.bf16 %v3648_v48, %v3647_v40  ;;  %v3651_v53 = vsub.f32 %v3507_v1, %v3612_v39 }
 0x9bd   : > { %v3610_v60 = vpop.permute.xlu1 %3609 }
 0x9be   : > { %v3650_v13 = vsub.f32 %v3506_v19, %v3610_v60  ;;  %10539 = vrot.lane.b32.xlu0 %v10538_v61, %s11540_s29 }
 0x9bf   : > { %v3616_v7 = vpop.permute.xlu0 %3615 }
 0x9c0   : > { %v10543_v25 = vpack.i.bf16 %v3650_v13, %v3649_v6  ;;  %v3653_v50 = vsub.f32 %v3509_v23, %v3616_v7 }
 0x9c1   : > { %v3614_v2 = vpop.permute.xlu1 %3613 }
 0x9c2   : > { %v3652_v16 = vsub.f32 %v3508_v46, %v3614_v2  ;;  %10544 = vrot.lane.b32.xlu1 %v10543_v25, %s11540_s29 }
 0x9c3   : > { %v3620_v58 = vpop.permute.xlu0 %3619 }
 0x9c4   : > { %v10548_v3 = vpack.i.bf16 %v3652_v16, %v3651_v53  ;;  %v3655_v37 = vsub.f32 %v3511_v28, %v3620_v58 }
 0x9c5   : > { %v3618_v8 = vpop.permute.xlu1 %3617 }
 0x9c6   : > { %v3654_v51 = vsub.f32 %v3510_v27, %v3618_v8  ;;  %10549 = vrot.lane.b32.xlu0 %v10548_v3, %s11540_s29 }
 0x9c7   : > { %v3624_v24 = vpop.permute.xlu0 %3623 }
 0x9c8   : > { %v10553_v45 = vpack.i.bf16 %v3654_v51, %v3653_v50  ;;  %v3657_v31 = vsub.f32 %v3513_v34, %v3624_v24 }
 0x9c9   : > { %v3622_v43 = vpop.permute.xlu1 %3621 }
 0x9ca   : > { %v3656_v22 = vsub.f32 %v3512_v11, %v3622_v43  ;;  %10554 = vrot.lane.b32.xlu1 %v10553_v45, %s11540_s29 }
 0x9cb   : > { %v10490_v52 = vpop.permute.xlu0 %10489 }
 0x9cc   : > { %v10558_v10 = vpack.i.bf16 %v3656_v22, %v3655_v37  ;;  %v10492_v62 = vunpack.i.h.bf16 %v10490_v52  ;;  %v10491_v5 = vunpack.i.l.bf16 %v10490_v52 }
 0x9cd   : > { %v3626_v32 = vpop.permute.xlu1 %3625 }
 0x9ce   : > { %v3658_v36 = vsub.f32 %v3514_v26, %v3626_v32  ;;  %10559 = vrot.lane.b32.xlu0 %v10558_v10, %s11540_s29 }
 0x9cf   : > { %v10500_v17 = vpop.permute.xlu0 %10499 }
 0x9d0   : > { %v10563_v33 = vpack.i.bf16 %v3658_v36, %v3657_v31  ;;  %v10502_v63 = vunpack.i.h.bf16 %v10500_v17  ;;  %v10501_v40 = vunpack.i.l.bf16 %v10500_v17 }
 0x9d1   : > { %v10495_v9 = vpop.permute.xlu1 %10494 }
 0x9d2   : > { %10564 = vrot.lane.b32.xlu1 %v10563_v33, %s11540_s29  ;;  %v10497_v56 = vunpack.i.h.bf16 %v10495_v9  ;;  %v10496_v38 = vunpack.i.l.bf16 %v10495_v9 }
 0x9d3   : > { %v10510_v49 = vpop.permute.xlu0 %10509 }
 0x9d4   : > { %v10512_v23 = vunpack.i.h.bf16 %v10510_v49  ;;  %v10511_v3 = vunpack.i.l.bf16 %v10510_v49 }
 0x9d5   : > { %v10505_v41 = vpop.permute.xlu1 %10504 }
 0x9d6   : > { %v10507_v46 = vunpack.i.h.bf16 %v10505_v41  ;;  %v10506_v1 = vunpack.i.l.bf16 %v10505_v41 }
 0x9d7   : > { %v14989_v15 = vpop.permute.xlu0 %10519 }
 0x9d8   : > { %v10522_v32 = vunpack.i.h.bf16 %v14989_v15  ;;  %v10521_v31 = vunpack.i.l.bf16 %v14989_v15 }
 0x9d9   : > { %v10515_v57 = vpop.permute.xlu1 %10514 }
 0x9da   : > { %v10517_v45 = vunpack.i.h.bf16 %v10515_v57  ;;  %v10516_v43 = vunpack.i.l.bf16 %v10515_v57 }
 0x9dd   : > { %v14991_v21 = vpop.permute.xlu1 %10524 }
 0x9de   : > { %v10527_v49 = vunpack.i.h.bf16 %v14991_v21  ;;  %v10526_v57 = vunpack.i.l.bf16 %v14991_v21  ;;  %v19612_v21 = vld [vmem:[#allocation55_spill] sm:$0xff] }
 0xa28   : > { %v10530_v47 = vpop.permute.xlu0 %10529 }
 0xa29   : > { %v10532_v55 = vunpack.i.h.bf16 %v10530_v47  ;;  %v10531_v12 = vunpack.i.l.bf16 %v10530_v47 }
 0xa2b   : > { %v3787_v59 = vsel %vm1032_vm2, %v10491_v5, %v10531_v12  ;;  %v3788_v44 = vsel %vm1032_vm2, %v10492_v62, %v10532_v55  ;;  %v19609_v5 = vld [vmem:[#allocation121_spill] sm:$0xff]  ;;  %v19610_v55 = vld [vmem:[#allocation76_spill] sm:$0xff] }
 0xa2c   : > { %v10535_v14 = vpop.permute.xlu1 %10534  ;;  %v10112_v42 = vpack.c.bf16 %v3788_v44, %v3787_v59  ;;  %v3068_v12 = vsel %vm1032_vm2, %v19610_v55, %v19609_v5  ;;  %v19611_v59 = vld [vmem:[#allocation123_spill] sm:$0xff] }
 0xa2d   : > { %v10537_v29 = vunpack.i.h.bf16 %v10535_v14  ;;  %v10536_v20 = vunpack.i.l.bf16 %v10535_v14  ;;  %v3069_v44 = vsel %vm1032_vm2, %v19612_v21, %v19611_v59  ;;  %v19613_v14 = vld [vmem:[#allocation44_spill] sm:$0xff] }
 0xa2e   : > { %10114 = vmatprep.subr.msk.bf16.mxu1 %vm13266_vm3, %v10112_v42 }
 0xa2f   : > { %v3790_v54 = vsel %vm1032_vm2, %v10497_v56, %v10537_v29  ;;  %v3789_v35 = vsel %vm1032_vm2, %v10496_v38, %v10536_v20  ;;  %10117 = vmatpush3.bf16.xpose.msk.msra.mxu1 %vm13266_vm3, %v10112_v42  ;;  %v19614_v42 = vld [vmem:[#allocation106_spill] sm:$0xff]  ;;  %v19615_v38 = vld [vmem:[#allocation129_spill] sm:$0xff] }
 0xa30   : > { %v10540_v4 = vpop.permute.xlu0 %10539  ;;  %v10118_v30 = vpack.c.bf16 %v3790_v54, %v3789_v35  ;;  %v3070_v56 = vsel %vm1032_vm2, %v19614_v42, %v19613_v14  ;;  %v19616_v29 = vld [vmem:[#allocation73_spill] sm:$0xff]  ;;  %v19617_v54 = vld [vmem:[#allocation139_spill] sm:$0xff]  ;;  %v19618_v35 = vld [vmem:[#allocation92_spill] sm:$0xff] }
 0xa31   : > { %v10542_v48 = vunpack.i.h.bf16 %v10540_v4  ;;  %v10541_v19 = vunpack.i.l.bf16 %v10540_v4  ;;  %v3071_v20 = vsel %vm1032_vm2, %v19616_v29, %v19615_v38  ;;  %v3072_v4 = vsel %vm1032_vm2, %v19618_v35, %v19617_v54  ;;  %v19649_v54 = vld [vmem:[#allocation68_spill] sm:$0xff] }
 0xa32   : > { %10120 = vmatprep.subr.msk.bf16.mxu1 %vm13266_vm3, %v10118_v30 }
 0xa33   : > { %v3791_v18 = vsel %vm1032_vm2, %v10501_v40, %v10541_v19  ;;  %v3792_v61 = vsel %vm1032_vm2, %v10502_v63, %v10542_v48  ;;  %v19620_v63 = vld [vmem:[#allocation88_spill] sm:$0xff]  ;;  %v19622_v19 = vld [vmem:[#allocation142_spill] sm:$0xff] }
 0xa34   : > { %v10545_v39 = vpop.permute.xlu1 %10544  ;;  %v10124_v60 = vpack.c.bf16 %v3792_v61, %v3791_v18  ;;  %v19621_v48 = vld [vmem:[#allocation124_spill] sm:$0xff]  ;;  %v19623_v61 = vld [vmem:[#allocation39_spill] sm:$0xff] }
 0xa35   : > { %v10547_v6 = vunpack.i.h.bf16 %v10545_v39  ;;  %v10546_v13 = vunpack.i.l.bf16 %v10545_v39  ;;  %v3074_v18 = vsel %vm1032_vm2, %v19622_v19, %v19621_v48  ;;  %v19624_v39 = vld [vmem:[#allocation105_spill] sm:$0xff]  ;;  %v19652_v48 = vld [vmem:[#allocation36_spill] sm:$0xff] }
 0xa37   : > { %10123 = vmatpush3.bf16.xpose.msk.msra.mxu1 %vm13266_vm3, %v10118_v30  ;;  %v3794_v25 = vsel %vm1032_vm2, %v10507_v46, %v10547_v6  ;;  %v3793_v7 = vsel %vm1032_vm2, %v10506_v1, %v10546_v13  ;;  %v19619_v30 = vld [vmem:[#allocation143_spill] sm:$0xff]  ;;  %v19625_v6 = vld [vmem:[#allocation33_spill] sm:$0xff] }
 0xa38   : > { %10126 = vmatprep.subr.msk.bf16.mxu1 %vm13266_vm3, %v10124_v60  ;;  %v10550_v2 = vpop.permute.xlu0 %10549  ;;  %v10130_v53 = vpack.c.bf16 %v3794_v25, %v3793_v7  ;;  %v3073_v40 = vsel %vm1032_vm2, %v19620_v63, %v19619_v30  ;;  %v19626_v13 = vld [vmem:[#allocation115_spill] sm:$0xff]  ;;  %v19627_v1 = vld [vmem:[#allocation117_spill] sm:$0xff]  ;;  %v19628_v25 = vld [vmem:[#allocation122_spill] sm:$0xff] }
 0xa39   : > { %v10552_v16 = vunpack.i.h.bf16 %v10550_v2  ;;  %v10551_v27 = vunpack.i.l.bf16 %v10550_v2  ;;  %v3076_v46 = vsel %vm1032_vm2, %v19626_v13, %v19625_v6  ;;  %v3077_v7 = vsel %vm1032_vm2, %v19628_v25, %v19627_v1  ;;  %v19629_v2 = vld [vmem:[#allocation70_spill] sm:$0xff] }
 0xa3a   : > { %v19655_v6 = vld [vmem:[#allocation110_spill] sm:$0xff] }
 0xa3b   : > { %v3795_v58 = vsel %vm1032_vm2, %v10511_v3, %v10551_v27  ;;  %v3796_v8 = vsel %vm1032_vm2, %v10512_v23, %v10552_v16  ;;  %v19631_v27 = vld [vmem:[#allocation144_spill] sm:$0xff]  ;;  %v19632_v23 = vld [vmem:[#allocation57_spill] sm:$0xff] }
 0xa3c   : > { %v10555_v50 = vpop.permute.xlu1 %10554  ;;  %v10136_v51 = vpack.c.bf16 %v3796_v8, %v3795_v58  ;;  %v3079_v3 = vsel %vm1032_vm2, %v19632_v23, %v19631_v27  ;;  %v19633_v58 = vld [vmem:[#allocation66_spill] sm:$0xff] }
 0xa3d   : > { %v10557_v28 = vunpack.i.h.bf16 %v10555_v50  ;;  %v10556_v11 = vunpack.i.l.bf16 %v10555_v50  ;;  %v19634_v8 = vld [vmem:[#allocation98_spill] sm:$0xff] }
 0xa3e   : > { %v3080_v50 = vsel %vm1032_vm2, %v19634_v8, %v19633_v58 }
 0xa3f   : > { %10129 = vmatpush3.bf16.xpose.msk.msra.mxu1 %vm13266_vm3, %v10124_v60  ;;  %v3798_v37 = vsel %vm1032_vm2, %v10517_v45, %v10557_v28  ;;  %v3797_v22 = vsel %vm1032_vm2, %v10516_v43, %v10556_v11  ;;  %v3075_v60 = vsel %vm1032_vm2, %v19624_v39, %v19623_v61  ;;  %v19636_v28 = vld [vmem:[#allocation90_spill] sm:$0xff]  ;;  %v19637_v45 = vld [vmem:[#allocation100_spill] sm:$0xff] }
 0xa40   : > { %10132 = vmatprep.subr.msk.bf16.mxu1 %vm13266_vm3, %v10130_v53  ;;  %v10560_v24 = vpop.permute.xlu0 %10559  ;;  %v10142_v34 = vpack.c.bf16 %v3798_v37, %v3797_v22  ;;  %v19638_v43 = vld [vmem:[#allocation96_spill] sm:$0xff] }
 0xa41   : > { %v10562_v26 = vunpack.i.h.bf16 %v10560_v24  ;;  %v10561_v10 = vunpack.i.l.bf16 %v10560_v24  ;;  %v3082_v37 = vsel %vm1032_vm2, %v19638_v43, %v19637_v45  ;;  %v19639_v24 = vld [vmem:[#allocation64_spill] sm:$0xff] }
 0xa43   : > { %v3799_v36 = vsel %vm1032_vm2, %v10521_v31, %v10561_v10  ;;  %v3800_v33 = vsel %vm1032_vm2, %v10522_v32, %v10562_v26 }
 0xa44   : > { %v10565_v52 = vpop.permute.xlu1 %10564  ;;  %v10148_v9 = vpack.c.bf16 %v3800_v33, %v3799_v36 }
 0xa45   : > { %v10567_v17 = vunpack.i.h.bf16 %v10565_v52  ;;  %v10566_v41 = vunpack.i.l.bf16 %v10565_v52 }
 0xa47   : > { %10135 = vmatpush3.bf16.xpose.msk.msra.mxu1 %vm13266_vm3, %v10130_v53  ;;  %v3802_v15 = vsel %vm1032_vm2, %v10527_v49, %v10567_v17  ;;  %v3801_v47 = vsel %vm1032_vm2, %v10526_v57, %v10566_v41  ;;  %v19630_v53 = vld [vmem:[#allocation32_spill] sm:$0xff] }
 0xa48   : > { %10138 = vmatprep.subr.msk.bf16.mxu1 %vm13266_vm3, %v10136_v51  ;;  %v10154_v62 = vpack.c.bf16 %v3802_v15, %v3801_v47  ;;  %v3078_v16 = vsel %vm1032_vm2, %v19630_v53, %v19629_v2 }
 0xa4f   : > { %10141 = vmatpush3.bf16.xpose.msk.msra.mxu1 %vm13266_vm3, %v10136_v51  ;;  %v19635_v51 = vld [vmem:[#allocation140_spill] sm:$0xff] }
 0xa50   : > { %10144 = vmatprep.subr.msk.bf16.mxu1 %vm13266_vm3, %v10142_v34  ;;  %v3081_v11 = vsel %vm1032_vm2, %v19636_v28, %v19635_v51 }
 0xa57   : > { %10147 = vmatpush3.bf16.xpose.msk.msra.mxu1 %vm13266_vm3, %v10142_v34 }
 0xa58   : > { %10150 = vmatprep.subr.msk.bf16.mxu1 %vm13266_vm3, %v10148_v9 }
 0xa5f   : > { %10153 = vmatpush3.bf16.xpose.msk.msra.mxu1 %vm13266_vm3, %v10148_v9 }
 0xa60   : > { %10156 = vmatprep.subr.msk.bf16.mxu1 %vm13266_vm3, %v10154_v62 }
 0xa67   : > { %10159 = vmatpush3.bf16.xpose.msk.msra.mxu1 %vm13266_vm3, %v10154_v62 }
 0xa6e   : > { %9673 = vmatmul.mubr.msk.f32.vlgmr.msra.gmra.mrb[16].mxu1 %vm550_vm1, %v3068_v12 }
 0xa6f   : > { %9675 = vmatprep.mubr.msk.f32.mxu1 %vm550_vm1, %v3069_v44 }
 0xa72   : > { %9676 = vmatmul.mubr.msk.f32.gmra.mrb[18].mxu1 %vm550_vm1, %v3070_v56 }
 0xa73   : > { %9678 = vmatprep.mubr.msk.f32.mxu1 %vm550_vm1, %v3071_v20 }
 0xa76   : > { %9679 = vmatmul.mubr.msk.f32.gmra.mrb[20].mxu1 %vm550_vm1, %v3072_v4 }
 0xa77   : > { %9681 = vmatprep.mubr.msk.f32.mxu1 %vm550_vm1, %v3073_v40 }
 0xa7a   : > { %9682 = vmatmul.mubr.msk.f32.gmra.mrb[22].mxu1 %vm550_vm1, %v3074_v18 }
 0xa7b   : > { %9684 = vmatprep.mubr.msk.f32.mxu1 %vm550_vm1, %v3075_v60 }
 0xa7e   : > { %9685 = vmatmul.mubr.msk.f32.gmra.mrb[24].mxu1 %vm550_vm1, %v3076_v46 }
 0xa7f   : > { %9687 = vmatprep.mubr.msk.f32.mxu1 %vm550_vm1, %v3077_v7 }
 0xa82   : > { %9688 = vmatmul.mubr.msk.f32.gmra.mrb[26].mxu1 %vm550_vm1, %v3078_v16 }
 0xa83   : > { %9690 = vmatprep.mubr.msk.f32.mxu1 %vm550_vm1, %v3079_v3 }
 0xa86   : > { %9691 = vmatmul.mubr.msk.f32.gmra.mrb[28].mxu1 %vm550_vm1, %v3080_v50 }
 0xa87   : > { %9693 = vmatprep.mubr.msk.f32.mxu1 %vm550_vm1, %v3081_v11 }
 0xa8a   : > { %9694 = vmatmul.mubr.msk.f32.gmra.mrb[30].mxu1 %vm550_vm1, %v3082_v37 }
 0xb41   : > { %v9674_v22 = vpop.f32.mrb[16].mxu1 }
 0xb42   : > { %v4045_v26 = vsel %vm519_vm4, %v9674_v22, -1e+30  ;;  %v3965_v10 = vpop.f32.mrb[17].mxu1 }
 0xb43   : > { %v4044_v31 = vsel %vm518_vm5, %v3965_v10, -1e+30  ;;  %4062 = vmax.xlane.f32.xlu1 %v4045_v26 }
 0xb44   : > { %4060 = vmax.xlane.f32.xlu0 %v4044_v31 }
 0xb45   : > { %v9677_v36 = vpop.f32.mrb[18].mxu1 }
 0xb46   : > { %v3975_v33 = vpop.f32.mrb[19].mxu1  ;;  %v4047_v47 = vsel %vm521_vm6, %v9677_v36, -1e+30 }
 0xb47   : > { %v4046_v9 = vsel %vm520_vm8, %v3975_v33, -1e+30 }
 0xb48   : > { %4064 = vmax.xlane.f32.xlu0 %v4046_v9 }
 0xb49   : > { %v9680_v17 = vpop.f32.mrb[20].mxu1 }
 0xb4a   : > { %v4049_v49 = vsel %vm523_vm7, %v9680_v17, -1e+30  ;;  %v3985_v57 = vpop.f32.mrb[21].mxu1 }
 0xb4b   : > { %4070 = vmax.xlane.f32.xlu1 %v4049_v49  ;;  %v4048_v21 = vsel %vm522_vm10, %v3985_v57, -1e+30 }
 0xb4c   : > { %4066 = vmax.xlane.f32.xlu0 %v4047_v47 }
 0xb4d   : > { %v9683_v62 = vpop.f32.mrb[22].mxu1 }
 0xb4e   : > { %v4051_v55 = vsel %vm18942_vm9, %v9683_v62, -1e+30  ;;  %v3995_v12 = vpop.f32.mrb[23].mxu1  ;;  %vm19650_vm9 = vcmp.le.s32.totalorder %v19639_v24, %v19649_v54 }
 0xb4f   : > { %4074 = vmax.xlane.f32.xlu1 %v4051_v55  ;;  %v4050_v29 = vsel %vm524_vm12, %v3995_v12, -1e+30 }
 0xb50   : > { %4068 = vmax.xlane.f32.xlu0 %v4048_v21 }
 0xb51   : > { %v9686_v44 = vpop.f32.mrb[24].mxu1 }
 0xb52   : > { %v15129_v42 = vsel %vm18943_vm11, %v9686_v44, -1e+30  ;;  %v4005_v56 = vpop.f32.mrb[25].mxu1  ;;  %vm19653_vm11 = vcmp.le.s32.totalorder %v19639_v24, %v19652_v48 }
 0xb53   : > { %4078 = vmax.xlane.f32.xlu1 %v15129_v42  ;;  %v15143_v63 = vsel %vm526_vm14, %v4005_v56, -1e+30 }
 0xb54   : > { %4072 = vmax.xlane.f32.xlu0 %v4050_v29 }
 0xb55   : > { %v9689_v20 = vpop.f32.mrb[26].mxu1 }
 0xb56   : > { %v15138_v35 = vsel %vm19650_vm9, %v9689_v20, -1e+30  ;;  %v4015_v4 = vpop.f32.mrb[27].mxu1  ;;  %vm19656_vm9 = vcmp.le.s32.totalorder %v19639_v24, %v19655_v6 }
 0xb57   : > { %4082 = vmax.xlane.f32.xlu1 %v15138_v35  ;;  %v15155_v39 = vsel %vm528_vm0, %v4015_v4, -1e+30 }
 0xb58   : > { %4076 = vmax.xlane.f32.xlu0 %v15143_v63 }
 0xb59   : > { %v9692_v40 = vpop.f32.mrb[28].mxu1 }
 0xb5a   : > { %v15150_v19 = vsel %vm19653_vm11, %v9692_v40, -1e+30  ;;  %v4025_v18 = vpop.f32.mrb[29].mxu1 }
 0xb5b   : > { %4086 = vmax.xlane.f32.xlu1 %v15150_v19  ;;  %v15167_v25 = vsel %vm530_vm15, %v4025_v18, -1e+30 }
 0xb5c   : > { %4080 = vmax.xlane.f32.xlu0 %v15155_v39 }
 0xb5d   : > { %v9695_v60 = vpop.f32.mrb[30].mxu1 }
 0xb5e   : > { %v15162_v13 = vsel %vm19656_vm9, %v9695_v60, -1e+30  ;;  %v4035_v46 = vpop.f32.mrb[31].mxu1 }
 0xb5f   : > { %4090 = vmax.xlane.f32.xlu1 %v15162_v13  ;;  %v15174_v2 = vsel %vm532_vm13, %v4035_v46, -1e+30 }
 0xb60   : > { %4084 = vmax.xlane.f32.xlu0 %v15167_v25 }
 0xb64   : > { %4088 = vmax.xlane.f32.xlu0 %v15174_v2 }
 0xbd0   : > { %v4063_v53 = vpop.xlane.xlu1 %4062 }
 0xbd1   : > { %v4093_v16 = vsub.f32 %v4045_v26, %v4063_v53  ;;  %v4061_v27 = vpop.xlane.xlu0 %4060 }
 0xbd2   : > { %v4092_v23 = vsub.f32 %v4044_v31, %v4061_v27 }
 0xbd3   : > { %v4110_v3 = vmul.f32 1.442695, %v4093_v16 }
 0xbd4   : > { %v4108_v58 = vmul.f32 1.442695, %v4092_v23 }
 0xbd5   : > { %11008 = vpow2.f32 %v4110_v3  ;;  %v4065_v8 = vpop.xlane.xlu0 %4064 }
 0xbd6   : > { %11010 = vpow2.f32 %v4108_v58  ;;  %v4094_v50 = vsub.f32 %v4046_v9, %v4065_v8 }
 0xbd8   : > { %v4112_v51 = vmul.f32 1.442695, %v4094_v50  ;;  %v4071_v28 = vpop.xlane.xlu1 %4070 }
 0xbd9   : > { %v4097_v11 = vsub.f32 %v4049_v49, %v4071_v28  ;;  %v4067_v45 = vpop.xlane.xlu0 %4066 }
 0xbda   : > { %11012 = vpow2.f32 %v4112_v51  ;;  %v4095_v43 = vsub.f32 %v4047_v47, %v4067_v45 }
 0xbdb   : > { %v4118_v10 = vmul.f32 1.442695, %v4097_v11 }
 0xbdc   : > { %v4114_v37 = vmul.f32 1.442695, %v4095_v43  ;;  %v4075_v22 = vpop.xlane.xlu1 %4074 }
 0xbdd   : > { %v4099_v36 = vsub.f32 %v4051_v55, %v4075_v22  ;;  %v4069_v33 = vpop.xlane.xlu0 %4068 }
 0xbde   : > { %11014 = vpow2.f32 %v4114_v37  ;;  %v4096_v26 = vsub.f32 %v4048_v21, %v4069_v33 }
 0xbdf   : > { %v15177_v31 = vpop.eup %11008  ;;  %11016 = vpow2.f32 %v4118_v10  ;;  %v4122_v9 = vmul.f32 1.442695, %v4099_v36 }
 0xbe0   : > { %v11011_v17 = vpop.eup %11010  ;;  %v4116_v57 = vmul.f32 1.442695, %v4096_v26  ;;  %v4079_v62 = vpop.xlane.xlu1 %4078  ;;  %4142 = vadd.xlane.f32.xlu1 %v15177_v31  ;;  %v19659_v26 = vld [vmem:[#allocation9_spill] sm:$0xff] }
 0xbe1   : > { %v4101_v49 = vsub.f32 %v15129_v42, %v4079_v62  ;;  %v4073_v12 = vpop.xlane.xlu0 %4072  ;;  %4140 = vadd.xlane.f32.xlu0 %v11011_v17  ;;  %9728 = vmatprep.mubr.f32.mxu0 %v11011_v17  ;;  %v19660_v17 = vld [vmem:[#allocation12_spill] sm:$0xff]  ;;  %v19662_v62 = vld [vmem:[#allocation15_spill] sm:$0xff] }
 0xbe2   : > { %11018 = vpow2.f32 %v4116_v57  ;;  %v4098_v47 = vsub.f32 %v4050_v29, %v4073_v12  ;;  %v19661_v57 = vld [vmem:[#allocation6_spill] sm:$0xff]  ;;  %v19665_v12 = vld [vmem:[#allocation31_spill] sm:$0xff] }
 0xbe3   : > { %11020 = vpow2.f32 %v4122_v9  ;;  %v4126_v56 = vmul.f32 1.442695, %v4101_v49  ;;  %v19663_v9 = vld [vmem:[#allocation21_spill] sm:$0xff]  ;;  %v19664_v49 = vld [vmem:[#allocation26_spill] sm:$0xff] }
 0xbe4   : > { %v15181_v55 = vpop.eup %11012  ;;  %v4120_v44 = vmul.f32 1.442695, %v4098_v47  ;;  %v4083_v21 = vpop.xlane.xlu1 %4082  ;;  %v19666_v47 = vld [vmem:[#allocation46_spill] sm:$0xff] }
 0xbe5   : > { %v4103_v20 = vsub.f32 %v15138_v35, %v4083_v21  ;;  %v4077_v4 = vpop.xlane.xlu0 %4076  ;;  %4144 = vadd.xlane.f32.xlu0 %v15181_v55  ;;  %v19668_v21 = vld [vmem:[#allocation5_spill] sm:$0xff] }
 0xbe6   : > { %11022 = vpow2.f32 %v4120_v44  ;;  %v4100_v40 = vsub.f32 %v15143_v63, %v4077_v4  ;;  %v19667_v44 = vld [vmem:[#allocation3_spill] sm:$0xff] }
 0xbe7   : > { %11024 = vpow2.f32 %v4126_v56  ;;  %v4130_v29 = vmul.f32 1.442695, %v4103_v20  ;;  %v19669_v56 = vld [vmem:[#allocation16_spill] sm:$0xff]  ;;  %v19670_v20 = vld [vmem:[#allocation18_spill] sm:$0xff]  ;;  %v19671_v4 = vld [vmem:[#allocation19_spill] sm:$0xff] }
 0xbe8   : > { %v15186_v42 = vpop.eup %11014  ;;  %v4124_v18 = vmul.f32 1.442695, %v4100_v40  ;;  %v4087_v60 = vpop.xlane.xlu1 %4086  ;;  %v19672_v40 = vld [vmem:[#allocation23_spill] sm:$0xff] }
 0xbe9   : > { %v4105_v46 = vsub.f32 %v15150_v19, %v4087_v60  ;;  %v4081_v53 = vpop.xlane.xlu0 %4080  ;;  %4146 = vadd.xlane.f32.xlu1 %v15186_v42  ;;  %v15191_v16 = vpop.eup %11016  ;;  %v19674_v60 = vld [vmem:[#allocation28_spill] sm:$0xff] }
 0xbea   : > { %11026 = vpow2.f32 %v4124_v18  ;;  %v4102_v35 = vsub.f32 %v15155_v39, %v4081_v53  ;;  %v19673_v18 = vld [vmem:[#allocation24_spill] sm:$0xff]  ;;  %v19677_v53 = vld [vmem:[#allocation41_spill] sm:$0xff] }
 0xbeb   : > { %11028 = vpow2.f32 %v4130_v29  ;;  %v4134_v3 = vmul.f32 1.442695, %v4105_v46  ;;  %v19675_v29 = vld [vmem:[#allocation29_spill] sm:$0xff]  ;;  %v19676_v46 = vld [vmem:[#allocation38_spill] sm:$0xff] }
 0xbec   : > { %v15193_v27 = vpop.eup %11018  ;;  %v4128_v23 = vmul.f32 1.442695, %v4102_v35  ;;  %v4091_v63 = vpop.xlane.xlu1 %4090  ;;  %v19678_v35 = vld [vmem:[#allocation59_spill] sm:$0xff] }
 0xbed   : > { %v4107_v58 = vsub.f32 %v15162_v13, %v4091_v63  ;;  %v4085_v8 = vpop.xlane.xlu0 %4084  ;;  %4150 = vadd.xlane.f32.xlu1 %v15191_v16  ;;  %4148 = vadd.xlane.f32.xlu0 %v15193_v27  ;;  %v15199_v50 = vpop.eup %11020  ;;  %v19680_v63 = vld [vmem:[#allocation75_spill] sm:$0xff] }
 0xbee   : > { %11030 = vpow2.f32 %v4128_v23  ;;  %v4104_v19 = vsub.f32 %v15167_v25, %v4085_v8  ;;  %v19679_v23 = vld [vmem:[#allocation60_spill] sm:$0xff] }
 0xbef   : > { %11032 = vpow2.f32 %v4134_v3  ;;  %v4138_v28 = vmul.f32 1.442695, %v4107_v58  ;;  %v19681_v3 = vld [vmem:[#allocation77_spill] sm:$0xff] }
 0xbf0   : > { %v15201_v39 = vpop.eup %11022  ;;  %v4132_v51 = vmul.f32 1.442695, %v4104_v19  ;;  %v19682_v58 = vld [vmem:[#allocation93_spill] sm:$0xff] }
 0xbf1   : > { %4154 = vadd.xlane.f32.xlu1 %v15199_v50  ;;  %4152 = vadd.xlane.f32.xlu0 %v15201_v39  ;;  %v4089_v13 = vpop.xlane.xlu0 %4088  ;;  %v15206_v45 = vpop.eup %11024 }
 0xbf2   : > { %11034 = vpow2.f32 %v4132_v51  ;;  %v4106_v11 = vsub.f32 %v15174_v2, %v4089_v13 }
 0xbf3   : > { %11036 = vpow2.f32 %v4138_v28 }
 0xbf4   : > { %v15208_v43 = vpop.eup %11026  ;;  %v4136_v25 = vmul.f32 1.442695, %v4106_v11 }
 0xbf5   : > { %4158 = vadd.xlane.f32.xlu1 %v15206_v45  ;;  %4156 = vadd.xlane.f32.xlu0 %v15208_v43  ;;  %v15212_v37 = vpop.eup %11028 }
 0xbf6   : > { %11038 = vpow2.f32 %v4136_v25 }
 0xbf8   : > { %v15214_v22 = vpop.eup %11030 }
 0xbf9   : > { %4162 = vadd.xlane.f32.xlu1 %v15212_v37  ;;  %4160 = vadd.xlane.f32.xlu0 %v15214_v22  ;;  %v15218_v2 = vpop.eup %11032 }
 0xbfc   : > { %v15220_v10 = vpop.eup %11034 }
 0xbfd   : > { %4166 = vadd.xlane.f32.xlu1 %v15218_v2  ;;  %4164 = vadd.xlane.f32.xlu0 %v15220_v10  ;;  %v15224_v36 = vpop.eup %11036 }
 0xc00   : > { %v15226_v33 = vpop.eup %11038 }
 0xc01   : > { %4170 = vadd.xlane.f32.xlu1 %v15224_v36  ;;  %4168 = vadd.xlane.f32.xlu0 %v15226_v33 }
 0xc12   : > { %10574 = vrot.lane.b32.xlu1 %v19659_v26, %s11536_s20 }
 0xc16   : > { %10579 = vrot.lane.b32.xlu1 %v19660_v17, %s11536_s20 }
 0xc17   : > { %10569 = vrot.lane.b32.xlu0 %v19661_v57, %s11536_s20 }
 0xc1a   : > { %10584 = vrot.lane.b32.xlu1 %v19662_v62, %s11536_s20 }
 0xc1b   : > { %10589 = vrot.lane.b32.xlu0 %v19663_v9, %s11536_s20 }
 0xc1e   : > { %10594 = vrot.lane.b32.xlu1 %v19664_v49, %s11536_s20 }
 0xc1f   : > { %10599 = vrot.lane.b32.xlu0 %v19665_v12, %s11536_s20 }
 0xc22   : > { %10604 = vrot.lane.b32.xlu1 %v19666_v47, %s11536_s20 }
 0xc23   : > { %4429 = vrot.lane.b32.xlu0 %v19667_v44, %s11543_s6 }
 0xc26   : > { %4431 = vrot.lane.b32.xlu1 %v19668_v21, %s11543_s6 }
 0xc27   : > { %4433 = vrot.lane.b32.xlu0 %v19669_v56, %s11543_s6 }
 0xc2a   : > { %4435 = vrot.lane.b32.xlu1 %v19670_v20, %s11543_s6 }
 0xc2b   : > { %4437 = vrot.lane.b32.xlu0 %v19671_v4, %s11543_s6 }
 0xc2e   : > { %4439 = vrot.lane.b32.xlu1 %v19672_v40, %s11543_s6 }
 0xc2f   : > { %4441 = vrot.lane.b32.xlu0 %v19673_v18, %s11543_s6 }
 0xc32   : > { %4443 = vrot.lane.b32.xlu1 %v19674_v60, %s11543_s6 }
 0xc33   : > { %4445 = vrot.lane.b32.xlu0 %v19675_v29, %s11543_s6 }
 0xc36   : > { %4447 = vrot.lane.b32.xlu1 %v19676_v46, %s11543_s6 }
 0xc37   : > { %4449 = vrot.lane.b32.xlu0 %v19677_v53, %s11543_s6 }
 0xc3a   : > { %4451 = vrot.lane.b32.xlu1 %v19678_v35, %s11543_s6 }
 0xc3b   : > { %4453 = vrot.lane.b32.xlu0 %v19679_v23, %s11543_s6 }
 0xc3e   : > { %4455 = vrot.lane.b32.xlu1 %v19680_v63, %s11543_s6 }
 0xc3f   : > { %4457 = vrot.lane.b32.xlu0 %v19681_v3, %s11543_s6 }
 0xc42   : > { %4459 = vrot.lane.b32.xlu1 %v19682_v58, %s11543_s6 }
 0xc6d   : > { %v15280_v19 = vpop.xlane.xlu1 %4142 }
 0xc6e   : > { %v15278_v8 = vpop.xlane.xlu0 %4140  ;;  %19684 = vst [vmem:[#allocation47_spill] sm:$0xff] %v15280_v19 }
 0xc6f   : > { %19683 = vst [vmem:[#allocation51_spill] sm:$0xff] %v15278_v8 }
 0xc72   : > { %v15282_v51 = vpop.xlane.xlu0 %4144 }
 0xc73   : > { %19685 = vst [vmem:[#allocation69_spill] sm:$0xff] %v15282_v51 }
 0xc76   : > { %v15284_v28 = vpop.xlane.xlu1 %4146 }
 0xc77   : > { %19686 = vst [vmem:[#allocation65_spill] sm:$0xff] %v15284_v28 }
 0xc7a   : > { %v15286_v13 = vpop.xlane.xlu1 %4150  ;;  %v15288_v11 = vpop.xlane.xlu0 %4148 }
 0xc7b   : > { %19687 = vst [vmem:[#allocation126_spill] sm:$0xff] %v15286_v13  ;;  %19688 = vst [vmem:[#allocation80_spill] sm:$0xff] %v15288_v11 }
 0xc7e   : > { %v15290_v25 = vpop.xlane.xlu1 %4154  ;;  %v15292_v6 = vpop.xlane.xlu0 %4152 }
 0xc7f   : > { %19689 = vst [vmem:[#allocation84_spill] sm:$0xff] %v15290_v25  ;;  %19690 = vst [vmem:[#allocation97_spill] sm:$0xff] %v15292_v6 }
 0xc82   : > { %v15294_v7 = vpop.xlane.xlu1 %4158  ;;  %v15296_v48 = vpop.xlane.xlu0 %4156 }
 0xc83   : > { %19691 = vst [vmem:[#allocation49_spill] sm:$0xff] %v15294_v7  ;;  %19692 = vst [vmem:[#allocation135_spill] sm:$0xff] %v15296_v48 }
 0xc86   : > { %v15298_v1 = vpop.xlane.xlu1 %4162  ;;  %v15300_v8 = vpop.xlane.xlu0 %4160 }
 0xc87   : > { %19693 = vst [vmem:[#allocation130_spill] sm:$0xff] %v15298_v1  ;;  %19694 = vst [vmem:[#allocation52_spill] sm:$0xff] %v15300_v8 }
 0xc8a   : > { %v15302_v19 = vpop.xlane.xlu1 %4166  ;;  %v15304_v51 = vpop.xlane.xlu0 %4164 }
 0xc8b   : > { %19695 = vst [vmem:[#allocation107_spill] sm:$0xff] %v15302_v19  ;;  %19696 = vst [vmem:[#allocation112_spill] sm:$0xff] %v15304_v51 }
 0xc8e   : > { %v15306_v28 = vpop.xlane.xlu1 %4170  ;;  %v15308_v13 = vpop.xlane.xlu0 %4168 }
 0xc8f   : > { %19697 = vst [vmem:[#allocation72_spill] sm:$0xff] %v15306_v28  ;;  %19698 = vst [vmem:[#allocation37_spill] sm:$0xff] %v15308_v13 }
 0xc92   : > { %v10575_v11 = vpop.permute.xlu1 %10574  ;;  %v10570_v25 = vpop.permute.xlu0 %10569 }
 0xc93   : > { %v10577_v54 = vunpack.i.h.bf16 %v10575_v11  ;;  %v10576_v6 = vunpack.i.l.bf16 %v10575_v11  ;;  %v10572_v61 = vunpack.i.h.bf16 %v10570_v25  ;;  %v10571_v7 = vunpack.i.l.bf16 %v10570_v25 }
 0xc95   : > { %v10160_v14 = vpack.c.bf16 %v10572_v61, %v10571_v7  ;;  %v10164_v8 = vpack.c.bf16 %v10577_v54, %v10576_v6 }
 0xc96   : > { %v10580_v48 = vpop.permute.xlu1 %10579  ;;  %v10590_v30 = vpop.permute.xlu0 %10589 }
 0xc97   : > { %v10582_v1 = vunpack.i.h.bf16 %v10580_v48  ;;  %v10581_v5 = vunpack.i.l.bf16 %v10580_v48  ;;  %10161 = vmatprep.subr.bf16.mxu0 %v10160_v14  ;;  %v10592_v59 = vunpack.i.h.bf16 %v10590_v30  ;;  %v10591_v25 = vunpack.i.l.bf16 %v10590_v30 }
 0xc98   : > { %10163 = vmatpush3.bf16.msra.mxu0 %v10160_v14 }
 0xc99   : > { %10165 = vmatprep.subr.bf16.mxu0 %v10164_v8  ;;  %v10168_v13 = vpack.c.bf16 %v10582_v1, %v10581_v5 }
 0xc9a   : > { %v10585_v51 = vpop.permute.xlu1 %10584  ;;  %v10600_v19 = vpop.permute.xlu0 %10599 }
 0xc9b   : > { %v10587_v28 = vunpack.i.h.bf16 %v10585_v51  ;;  %v10586_v38 = vunpack.i.l.bf16 %v10585_v51  ;;  %v10176_v51 = vpack.c.bf16 %v10592_v59, %v10591_v25  ;;  %v10601_v30 = vunpack.i.l.bf16 %v10600_v19 }
 0xc9c   : > { %10167 = vmatpush3.bf16.msra.mxu0 %v10164_v8  ;;  %v10602_v8 = vunpack.i.h.bf16 %v10600_v19 }
 0xc9d   : > { %10169 = vmatprep.subr.bf16.mxu0 %v10168_v13  ;;  %v10172_v7 = vpack.c.bf16 %v10587_v28, %v10586_v38 }
 0xc9e   : > { %v10595_v41 = vpop.permute.xlu1 %10594  ;;  %v4430_v11 = vpop.permute.xlu0 %4429 }
 0xc9f   : > { %v4477_v61 = vsel %vm550_vm1, %v4430_v11, 0.0  ;;  %v10597_v48 = vunpack.i.h.bf16 %v10595_v41  ;;  %v10596_v6 = vunpack.i.l.bf16 %v10595_v41 }
 0xca0   : > { %4478 = vadd.xlane.f32.xlu0 %v4477_v61  ;;  %10171 = vmatpush3.bf16.msra.mxu0 %v10168_v13  ;;  %v10184_v61 = vpack.c.bf16 %v10602_v8, %v10601_v30 }
 0xca1   : > { %10173 = vmatprep.subr.bf16.mxu0 %v10172_v7  ;;  %v10180_v38 = vpack.c.bf16 %v10597_v48, %v10596_v6 }
 0xca2   : > { %v4434_v54 = vpop.permute.xlu0 %4433  ;;  %v10605_v14 = vpop.permute.xlu1 %10604 }
 0xca3   : > { %v4483_v15 = vsel %vm550_vm1, %v4434_v54, 0.0  ;;  %v10607_v54 = vunpack.i.h.bf16 %v10605_v14  ;;  %v10606_v59 = vunpack.i.l.bf16 %v10605_v14 }
 0xca4   : > { %4484 = vadd.xlane.f32.xlu0 %v4483_v15  ;;  %10175 = vmatpush3.bf16.msra.mxu0 %v10172_v7 }
 0xca5   : > { %10177 = vmatprep.subr.bf16.mxu0 %v10176_v51  ;;  %v10188_v48 = vpack.c.bf16 %v10607_v54, %v10606_v59 }
 0xca6   : > { %v4438_v5 = vpop.permute.xlu0 %4437  ;;  %v4432_v1 = vpop.permute.xlu1 %4431 }
 0xca7   : > { %v4480_v11 = vsel %vm550_vm1, %v4432_v1, 0.0  ;;  %v4489_v19 = vsel %vm550_vm1, %v4438_v5, 0.0 }
 0xca8   : > { %4481 = vadd.xlane.f32.xlu1 %v4480_v11  ;;  %10179 = vmatpush3.bf16.msra.mxu0 %v10176_v51 }
 0xca9   : > { %10181 = vmatprep.subr.bf16.mxu0 %v10180_v38 }
 0xcaa   : > { %v4442_v28 = vpop.permute.xlu0 %4441  ;;  %v4436_v13 = vpop.permute.xlu1 %4435 }
 0xcab   : > { %v4486_v41 = vsel %vm550_vm1, %v4436_v13, 0.0  ;;  %v4495_v51 = vsel %vm550_vm1, %v4442_v28, 0.0 }
 0xcac   : > { %4487 = vadd.xlane.f32.xlu0 %v4486_v41  ;;  %10183 = vmatpush3.bf16.msra.mxu0 %v10180_v38 }
 0xcad   : > { %10185 = vmatprep.subr.bf16.mxu0 %v10184_v61 }
 0xcae   : > { %v4446_v15 = vpop.permute.xlu0 %4445  ;;  %v4440_v25 = vpop.permute.xlu1 %4439 }
 0xcaf   : > { %v4492_v7 = vsel %vm550_vm1, %v4440_v25, 0.0  ;;  %v4501_v30 = vsel %vm550_vm1, %v4446_v15, 0.0  ;;  %v15428_v15 = vld [vmem:[%s18754_s3 + $0x58] sm:$0xff]  ;;  %v15435_v25 = vld [vmem:[%s18754_s3 + $0x70] sm:$0xff] }
 0xcb0   : > { %4490 = vadd.xlane.f32.xlu0 %v4489_v19  ;;  %4493 = vadd.xlane.f32.xlu1 %v4492_v7  ;;  %v15442_v19 = vld [vmem:[%s18754_s3 + $0x68] sm:$0xff]  ;;  %v15449_v7 = vld [vmem:[%s18755_s4] sm:$0xff] }
 0xcb1   : > { %10187 = vmatpush3.bf16.msra.mxu0 %v10184_v61 }
 0xcb2   : > { %10189 = vmatprep.subr.bf16.mxu0 %v10188_v48  ;;  %v4444_v6 = vpop.permute.xlu1 %4443  ;;  %v4450_v14 = vpop.permute.xlu0 %4449 }
 0xcb3   : > { %v4498_v1 = vsel %vm550_vm1, %v4444_v6, 0.0  ;;  %v4507_v28 = vsel %vm550_vm1, %v4450_v14, 0.0  ;;  %v15463_v6 = vld [vmem:[%s18755_s4 + $0x10] sm:$0xff]  ;;  %v15484_v14 = vld [vmem:[%s18755_s4 + $0x18] sm:$0xff] }
 0xcb4   : > { %4496 = vadd.xlane.f32.xlu0 %v4495_v51  ;;  %4499 = vadd.xlane.f32.xlu1 %v4498_v1  ;;  %19699 = vst [vmem:[#allocation61_spill] sm:$0xff] %v15463_v6  ;;  %v15470_v51 = vld [vmem:[%s18755_s4 + $0x8] sm:$0xff]  ;;  %v15477_v1 = vld [vmem:[%s18755_s4 + $0x20] sm:$0xff]  ;;  %19701 = vst [vmem:[#allocation102_spill] sm:$0xff] %v15484_v14 }
 0xcb5   : > { %10191 = vmatpush3.bf16.msra.mxu0 %v10188_v48  ;;  %v15456_v48 = vld [vmem:[%s18754_s3 + $0x78] sm:$0xff]  ;;  %19700 = vst [vmem:[#allocation54_spill] sm:$0xff] %v15477_v1 }
 0xcb6   : > { %v4448_v8 = vpop.permute.xlu1 %4447  ;;  %v4454_v11 = vpop.permute.xlu0 %4453 }
 0xcb7   : > { %v4504_v5 = vsel %vm550_vm1, %v4448_v8, 0.0  ;;  %v4513_v61 = vsel %vm550_vm1, %v4454_v11, 0.0  ;;  %v15491_v8 = vld [vmem:[%s18755_s4 + $0x30] sm:$0xff]  ;;  %v15512_v11 = vld [vmem:[%s18755_s4 + $0x38] sm:$0xff] }
 0xcb8   : > { %9729 = vmatmul.mubr.f32.vlgmr.msra.gmra.mrb[48].mxu0 %v15177_v31  ;;  %4502 = vadd.xlane.f32.xlu0 %v4501_v30  ;;  %19702 = vst [vmem:[#allocation111_spill] sm:$0xff] %v15491_v8  ;;  %v15498_v30 = vld [vmem:[%s18755_s4 + $0x28] sm:$0xff]  ;;  %19705 = vst [vmem:[#allocation40_spill] sm:$0xff] %v15512_v11 }
 0xcb9   : > { %4505 = vadd.xlane.f32.xlu1 %v4504_v5  ;;  %9731 = vmatprep.mubr.f32.mxu0 %v15181_v55  ;;  %19703 = vst [vmem:[#allocation136_spill] sm:$0xff] %v15498_v30  ;;  %v15505_v5 = vld [vmem:[%s18755_s4 + $0x40] sm:$0xff] }
 0xcba   : > { %v4452_v38 = vpop.permute.xlu1 %4451  ;;  %v4458_v54 = vpop.permute.xlu0 %4457  ;;  %19704 = vst [vmem:[#allocation131_spill] sm:$0xff] %v15505_v5 }
 0xcbb   : > { %v4510_v13 = vsel %vm550_vm1, %v4452_v38, 0.0  ;;  %v4519_v59 = vsel %vm550_vm1, %v4458_v54, 0.0  ;;  %v15519_v38 = vld [vmem:[%s18755_s4 + $0x50] sm:$0xff]  ;;  %v15561_v54 = vld [vmem:[%s18755_s4 + $0x78] sm:$0xff] }
 0xcbc   : > { %9732 = vmatmul.mubr.f32.gmra.mrb[50].mxu0 %v15186_v42  ;;  %4508 = vadd.xlane.f32.xlu0 %v4507_v28  ;;  %19706 = vst [vmem:[#allocation121_spill] sm:$0xff] %v15519_v38  ;;  %v15526_v28 = vld [vmem:[%s18755_s4 + $0x48] sm:$0xff]  ;;  %19712 = vst [vmem:[#allocation129_spill] sm:$0xff] %v15561_v54 }
 0xcbd   : > { %4511 = vadd.xlane.f32.xlu1 %v4510_v13  ;;  %9734 = vmatprep.mubr.f32.mxu0 %v15193_v27  ;;  %v15351_v27 = vld [vmem:[%s18754_s3] sm:$0xff]  ;;  %19707 = vst [vmem:[#allocation76_spill] sm:$0xff] %v15526_v28 }
 0xcbe   : > { %v4456_v41 = vpop.permute.xlu1 %4455  ;;  %v15533_v13 = vld [vmem:[%s18755_s4 + $0x60] sm:$0xff] }
 0xcbf   : > { %v4516_v31 = vsel %vm550_vm1, %v4456_v41, 0.0  ;;  %19708 = vst [vmem:[#allocation123_spill] sm:$0xff] %v15533_v13  ;;  %v15540_v41 = vld [vmem:[%s18755_s4 + $0x58] sm:$0xff] }
 0xcc0   : > { %9735 = vmatmul.mubr.f32.gmra.mrb[52].mxu0 %v15191_v16  ;;  %4514 = vadd.xlane.f32.xlu0 %v4513_v61  ;;  %v15344_v16 = vld [vmem:[%s18754_s3 + $0x8] sm:$0xff]  ;;  %19709 = vst [vmem:[#allocation55_spill] sm:$0xff] %v15540_v41  ;;  %v15547_v61 = vld [vmem:[%s18755_s4 + $0x70] sm:$0xff] }
 0xcc1   : > { %4517 = vadd.xlane.f32.xlu1 %v4516_v31  ;;  %9737 = vmatprep.mubr.f32.mxu0 %v15201_v39  ;;  %v15365_v39 = vld [vmem:[%s18754_s3 + $0x20] sm:$0xff]  ;;  %19710 = vst [vmem:[#allocation44_spill] sm:$0xff] %v15547_v61  ;;  %v15554_v31 = vld [vmem:[%s18755_s4 + $0x68] sm:$0xff] }
 0xcc2   : > { %v4460_v55 = vpop.permute.xlu1 %4459  ;;  %19711 = vst [vmem:[#allocation106_spill] sm:$0xff] %v15554_v31 }
 0xcc3   : > { %v4522_v42 = vsel %vm550_vm1, %v4460_v55, 0.0 }
 0xcc4   : > { %9738 = vmatmul.mubr.f32.gmra.mrb[54].mxu0 %v15199_v50  ;;  %4520 = vadd.xlane.f32.xlu0 %v4519_v59  ;;  %v15358_v50 = vld [vmem:[%s18754_s3 + $0x10] sm:$0xff] }
 0xcc5   : > { %4523 = vadd.xlane.f32.xlu1 %v4522_v42  ;;  %9740 = vmatprep.mubr.f32.mxu0 %v15208_v43  ;;  %v15379_v43 = vld [vmem:[%s18754_s3 + $0x30] sm:$0xff] }
 0xcc8   : > { %9741 = vmatmul.mubr.f32.gmra.mrb[56].mxu0 %v15206_v45  ;;  %v15372_v45 = vld [vmem:[%s18754_s3 + $0x18] sm:$0xff] }
 0xcc9   : > { %9743 = vmatprep.mubr.f32.mxu0 %v15214_v22  ;;  %v15393_v22 = vld [vmem:[%s18754_s3 + $0x40] sm:$0xff] }
 0xccc   : > { %9744 = vmatmul.mubr.f32.gmra.mrb[58].mxu0 %v15212_v37  ;;  %v15386_v37 = vld [vmem:[%s18754_s3 + $0x28] sm:$0xff] }
 0xccd   : > { %9746 = vmatprep.mubr.f32.mxu0 %v15220_v10  ;;  %v15407_v10 = vld [vmem:[%s18754_s3 + $0x50] sm:$0xff] }
 0xcd0   : > { %9747 = vmatmul.mubr.f32.gmra.mrb[60].mxu0 %v15218_v2  ;;  %v15400_v2 = vld [vmem:[%s18754_s3 + $0x38] sm:$0xff] }
 0xcd1   : > { %9749 = vmatprep.mubr.f32.mxu0 %v15226_v33  ;;  %v15421_v33 = vld [vmem:[%s18754_s3 + $0x60] sm:$0xff] }
 0xcd4   : > { %9750 = vmatmul.mubr.f32.gmra.mrb[62].mxu0 %v15224_v36  ;;  %v15414_v36 = vld [vmem:[%s18754_s3 + $0x48] sm:$0xff] }
 0xcd6   : > { %4607 = vrot.lane.b32.xlu1 %v15344_v16, %s11544_s10 }
 0xcda   : > { %4605 = vrot.lane.b32.xlu0 %v15351_v27, %s11544_s10  ;;  %4609 = vrot.lane.b32.xlu1 %v15358_v50, %s11544_s10 }
 0xcde   : > { %4613 = vrot.lane.b32.xlu0 %v15365_v39, %s11544_s10  ;;  %4611 = vrot.lane.b32.xlu1 %v15372_v45, %s11544_s10 }
 0xce2   : > { %4617 = vrot.lane.b32.xlu0 %v15379_v43, %s11544_s10  ;;  %4615 = vrot.lane.b32.xlu1 %v15386_v37, %s11544_s10 }
 0xce6   : > { %4621 = vrot.lane.b32.xlu0 %v15393_v22, %s11544_s10  ;;  %4619 = vrot.lane.b32.xlu1 %v15400_v2, %s11544_s10 }
 0xcea   : > { %4625 = vrot.lane.b32.xlu0 %v15407_v10, %s11544_s10  ;;  %4623 = vrot.lane.b32.xlu1 %v15414_v36, %s11544_s10 }
 0xcee   : > { %4629 = vrot.lane.b32.xlu0 %v15421_v33, %s11544_s10  ;;  %4627 = vrot.lane.b32.xlu1 %v15428_v15, %s11544_s10 }
 0xcf2   : > { %4633 = vrot.lane.b32.xlu0 %v15435_v25, %s11544_s10  ;;  %4631 = vrot.lane.b32.xlu1 %v15442_v19, %s11544_s10 }
 0xcf6   : > { %4669 = vrot.lane.b32.xlu0 %v15449_v7, %s11545_s15  ;;  %4635 = vrot.lane.b32.xlu1 %v15456_v48, %s11544_s10 }
 0xcfa   : > { %4673 = vrot.lane.b32.xlu0 %v15463_v6, %s11545_s15  ;;  %4671 = vrot.lane.b32.xlu1 %v15470_v51, %s11545_s15 }
 0xcfe   : > { %4677 = vrot.lane.b32.xlu0 %v15477_v1, %s11545_s15  ;;  %4675 = vrot.lane.b32.xlu1 %v15484_v14, %s11545_s15 }
 0xd02   : > { %4681 = vrot.lane.b32.xlu0 %v15491_v8, %s11545_s15  ;;  %4679 = vrot.lane.b32.xlu1 %v15498_v30, %s11545_s15 }
 0xd06   : > { %4685 = vrot.lane.b32.xlu0 %v15505_v5, %s11545_s15  ;;  %4683 = vrot.lane.b32.xlu1 %v15512_v11, %s11545_s15 }
 0xd0a   : > { %4689 = vrot.lane.b32.xlu0 %v15519_v38, %s11545_s15  ;;  %4687 = vrot.lane.b32.xlu1 %v15526_v28, %s11545_s15 }
 0xd0e   : > { %4693 = vrot.lane.b32.xlu0 %v15533_v13, %s11545_s15  ;;  %4691 = vrot.lane.b32.xlu1 %v15540_v41, %s11545_s15 }
 0xd12   : > { %4697 = vrot.lane.b32.xlu0 %v15547_v61, %s11545_s15  ;;  %4695 = vrot.lane.b32.xlu1 %v15554_v31, %s11545_s15 }
 0xd16   : > { %4699 = vrot.lane.b32.xlu1 %v15561_v54, %s11545_s15 }
 0xd2d   : > { %v4479_v55 = vpop.xlane.xlu0 %4478 }
 0xd2e   : > { %v4525_v54 = vmul.f32 0.0625, %v4479_v55 }
 0xd30   : > { %v4541_v38 = vadd.f32 1.1920929e-07, %v4525_v54 }
 0xd31   : > { %v4485_v59 = vpop.xlane.xlu0 %4484 }
 0xd32   : > { %v4527_v28 = vmul.f32 0.0625, %v4485_v59  ;;  %11040 = vrsqrt.f32 %v4541_v38 }
 0xd34   : > { %v4543_v8 = vadd.f32 1.1920929e-07, %v4527_v28 }
 0xd35   : > { %v4482_v42 = vpop.xlane.xlu1 %4481 }
 0xd36   : > { %v4526_v1 = vmul.f32 0.0625, %v4482_v42  ;;  %11042 = vrsqrt.f32 %v4543_v8 }
 0xd39   : > { %v4488_v52 = vpop.xlane.xlu0 %4487 }
 0xd3a   : > { %v4528_v54 = vmul.f32 0.0625, %v4488_v52 }
 0xd3d   : > { %v4491_v47 = vpop.xlane.xlu0 %4490  ;;  %v4494_v49 = vpop.xlane.xlu1 %4493 }
 0xd3e   : > { %v4529_v30 = vmul.f32 0.0625, %v4491_v47  ;;  %v4544_v47 = vadd.f32 1.1920929e-07, %v4528_v54  ;;  %v4530_v28 = vmul.f32 0.0625, %v4494_v49 }
 0xd40   : > { %v4545_v55 = vadd.f32 1.1920929e-07, %v4529_v30  ;;  %v4546_v52 = vadd.f32 1.1920929e-07, %v4530_v28 }
 0xd41   : > { %v4497_v62 = vpop.xlane.xlu0 %4496  ;;  %v4500_v12 = vpop.xlane.xlu1 %4499 }
 0xd42   : > { %11044 = vrsqrt.f32 %v4545_v55  ;;  %v4532_v30 = vmul.f32 0.0625, %v4500_v12 }
 0xd45   : > { %v4503_v32 = vpop.xlane.xlu0 %4502 }
 0xd46   : > { %v4506_v9 = vpop.xlane.xlu1 %4505 }
 0xd49   : > { %v4509_v34 = vpop.xlane.xlu0 %4508 }
 0xd4a   : > { %v4512_v24 = vpop.xlane.xlu1 %4511 }
 0xd4b   : > { %v4536_v28 = vmul.f32 0.0625, %v4512_v24 }
 0xd4d   : > { %v4515_v26 = vpop.xlane.xlu0 %4514  ;;  %v4552_v24 = vadd.f32 1.1920929e-07, %v4536_v28 }
 0xd4e   : > { %v15565_v17 = vpop.xlane.xlu1 %4517  ;;  %v4537_v55 = vmul.f32 0.0625, %v4515_v26 }
 0xd51   : > { %v4521_v57 = vpop.xlane.xlu0 %4520 }
 0xd52   : > { %v15567_v0 = vpop.xlane.xlu1 %4523 }
 0xd55   : > { %v15569_v61 = vpop.permute.xlu0 %4605 }
 0xd56   : > { %19713 = vst [vmem:[#allocation73_spill] sm:$0xff] %v15569_v61  ;;  %v15571_v13 = vpop.permute.xlu1 %4607 }
 0xd57   : > { %19714 = vst [vmem:[#allocation139_spill] sm:$0xff] %v15571_v13  ;;  %v4531_v13 = vmul.f32 0.0625, %v4497_v62 }
 0xd59   : > { %v15573_v31 = vpop.permute.xlu0 %4613  ;;  %v4547_v38 = vadd.f32 1.1920929e-07, %v4531_v13 }
 0xd5a   : > { %19715 = vst [vmem:[#allocation92_spill] sm:$0xff] %v15573_v31  ;;  %v15575_v41 = vpop.permute.xlu1 %4609  ;;  %v4542_v31 = vadd.f32 1.1920929e-07, %v4526_v1  ;;  %v4535_v1 = vmul.f32 0.0625, %v4509_v34 }
 0xd5b   : > { %19716 = vst [vmem:[#allocation143_spill] sm:$0xff] %v15575_v41  ;;  %v19743_v41 = vld [vmem:[#allocation11_spill] sm:$0xff] }
 0xd5c   : > { %11046 = vrsqrt.f32 %v4542_v31  ;;  %v4551_v49 = vadd.f32 1.1920929e-07, %v4535_v1 }
 0xd5d   : > { %v15577_v5 = vpop.permute.xlu0 %4617  ;;  %11048 = vrsqrt.f32 %v4547_v38  ;;  %v4534_v38 = vmul.f32 0.0625, %v4506_v9 }
 0xd5e   : > { %19717 = vst [vmem:[#allocation88_spill] sm:$0xff] %v15577_v5  ;;  %v15579_v11 = vpop.permute.xlu1 %4611  ;;  %v4533_v5 = vmul.f32 0.0625, %v4503_v32  ;;  %11050 = vrsqrt.f32 %v4544_v47  ;;  %v19727_v32 = vld [vmem:[#allocation2_spill] sm:$0xff] }
 0xd5f   : > { %19718 = vst [vmem:[#allocation124_spill] sm:$0xff] %v15579_v11  ;;  %v11041_v11 = vpop.eup %11040  ;;  %v4550_v26 = vadd.f32 1.1920929e-07, %v4534_v38 }
 0xd60   : > { %v4573_v8 = vmul.f32 0.25, %v11041_v11  ;;  %v4549_v62 = vadd.f32 1.1920929e-07, %v4533_v5  ;;  %v4548_v11 = vadd.f32 1.1920929e-07, %v4532_v30 }
 0xd61   : > { %v15581_v14 = vpop.permute.xlu0 %4621 }
 0xd62   : > { %19719 = vst [vmem:[#allocation142_spill] sm:$0xff] %v15581_v14  ;;  %v15583_v61 = vpop.permute.xlu1 %4615  ;;  %v15598_v31 = vmul.f32 %v4573_v8, %v19727_v32  ;;  %11052 = vrsqrt.f32 %v4549_v62  ;;  %v19730_v8 = vld [vmem:[#allocation7_spill] sm:$0xff] }
 0xd63   : > { %19720 = vst [vmem:[#allocation39_spill] sm:$0xff] %v15583_v61  ;;  %11054 = vrsqrt.f32 %v4546_v52 }
 0xd64   : > { %19728 = vst [vmem:[#allocation32_spill] sm:$0xff] %v15598_v31  ;;  %11056 = vrsqrt.f32 %v4551_v49 }
 0xd65   : > { %v15585_v6 = vpop.permute.xlu0 %4625  ;;  %11058 = vrsqrt.f32 %v4548_v11  ;;  %v4538_v11 = vmul.f32 0.0625, %v15565_v17 }
 0xd66   : > { %19721 = vst [vmem:[#allocation105_spill] sm:$0xff] %v15585_v6  ;;  %v15587_v59 = vpop.permute.xlu1 %4619  ;;  %v11043_v6 = vpop.eup %11042 }
 0xd67   : > { %19722 = vst [vmem:[#allocation33_spill] sm:$0xff] %v15587_v59  ;;  %v4575_v54 = vmul.f32 0.25, %v11043_v6  ;;  %v11045_v5 = vpop.eup %11044 }
 0xd68   : > { %v11047_v47 = vpop.eup %11046  ;;  %v4577_v62 = vmul.f32 0.25, %v11045_v5  ;;  %v19735_v5 = vld [vmem:[#allocation4_spill] sm:$0xff] }
 0xd69   : > { %v15589_v42 = vpop.permute.xlu0 %4629  ;;  %v11049_v9 = vpop.eup %11048  ;;  %v4574_v6 = vmul.f32 0.25, %v11047_v47 }
 0xd6a   : > { %19723 = vst [vmem:[#allocation115_spill] sm:$0xff] %v15589_v42  ;;  %v15591_v14 = vpop.permute.xlu1 %4623  ;;  %v11051_v52 = vpop.eup %11050 }
 0xd6b   : > { %19724 = vst [vmem:[#allocation117_spill] sm:$0xff] %v15591_v14  ;;  %v15604_v14 = vmul.f32 %v4575_v54, %v19730_v8  ;;  %v4579_v54 = vmul.f32 0.25, %v11049_v9  ;;  %v15616_v47 = vmul.f32 %v4574_v6, %v19735_v5  ;;  %v4576_v28 = vmul.f32 0.25, %v11051_v52  ;;  %v19737_v9 = vld [vmem:[#allocation13_spill] sm:$0xff]  ;;  %v19739_v52 = vld [vmem:[#allocation8_spill] sm:$0xff] }
 0xd6c   : > { %v11053_v38 = vpop.eup %11052 }
 0xd6d   : > { %v15593_v59 = vpop.permute.xlu0 %4633  ;;  %19731 = vst [vmem:[#allocation57_spill] sm:$0xff] %v15604_v14  ;;  %19736 = vst [vmem:[#allocation140_spill] sm:$0xff] %v15616_v47  ;;  %v4581_v17 = vmul.f32 0.25, %v11053_v38  ;;  %v19741_v38 = vld [vmem:[#allocation17_spill] sm:$0xff] }
 0xd6e   : > { %19725 = vst [vmem:[#allocation122_spill] sm:$0xff] %v15593_v59  ;;  %v15595_v13 = vpop.permute.xlu1 %4627  ;;  %v4553_v59 = vadd.f32 1.1920929e-07, %v4537_v55 }
 0xd6f   : > { %19726 = vst [vmem:[#allocation70_spill] sm:$0xff] %v15595_v13  ;;  %v4539_v13 = vmul.f32 0.0625, %v4521_v57  ;;  %v19733_v57 = vld [vmem:[#allocation10_spill] sm:$0xff] }
 0xd70   : > { %11060 = vrsqrt.f32 %v4553_v59  ;;  %v15611_v55 = vmul.f32 %v4577_v62, %v19733_v57 }
 0xd71   : > { %v4670_v34 = vpop.permute.xlu0 %4669  ;;  %v4555_v49 = vadd.f32 1.1920929e-07, %v4539_v13  ;;  %11062 = vrsqrt.f32 %v4550_v26  ;;  %v15621_v26 = vmul.f32 %v4579_v54, %v19737_v9 }
 0xd72   : > { %v4717_v12 = vmul.f32 %v4670_v34, %v15598_v31  ;;  %v15601_v42 = vpop.permute.xlu1 %4631  ;;  %19734 = vst [vmem:[#allocation98_spill] sm:$0xff] %v15611_v55  ;;  %11064 = vrsqrt.f32 %v4552_v24 }
 0xd73   : > { %19729 = vst [vmem:[#allocation144_spill] sm:$0xff] %v15601_v42  ;;  %11066 = vrsqrt.f32 %v4555_v49  ;;  %19738 = vst [vmem:[#allocation90_spill] sm:$0xff] %v15621_v26  ;;  %v15626_v42 = vmul.f32 %v4576_v28, %v19739_v52 }
 0xd74   : > { %4749 = vrot.lane.b32.xlu0 %v4717_v12, %s11537_s14 }
 0xd75   : > { %v4674_v1 = vpop.permute.xlu0 %4673  ;;  %19740 = vst [vmem:[#allocation100_spill] sm:$0xff] %v15626_v42 }
 0xd76   : > { %v4719_v30 = vmul.f32 %v4674_v1, %v15604_v14  ;;  %v15608_v34 = vpop.permute.xlu1 %4635  ;;  %v11055_v1 = vpop.eup %11054 }
 0xd77   : > { %19732 = vst [vmem:[#allocation66_spill] sm:$0xff] %v15608_v34  ;;  %v4554_v34 = vadd.f32 1.1920929e-07, %v4538_v11  ;;  %v11057_v6 = vpop.eup %11056  ;;  %v4578_v24 = vmul.f32 0.25, %v11055_v1  ;;  %v15632_v11 = vmul.f32 %v4581_v17, %v19741_v38 }
 0xd78   : > { %4753 = vrot.lane.b32.xlu0 %v4719_v30, %s11537_s14  ;;  %v4540_v30 = vmul.f32 0.0625, %v15567_v0  ;;  %v11059_v49 = vpop.eup %11058  ;;  %v4583_v0 = vmul.f32 0.25, %v11057_v6  ;;  %v19745_v6 = vld [vmem:[#allocation22_spill] sm:$0xff] }
 0xd79   : > { %v4678_v12 = vpop.permute.xlu0 %4677  ;;  %19742 = vst [vmem:[#allocation96_spill] sm:$0xff] %v15632_v11  ;;  %11068 = vrsqrt.f32 %v4554_v34  ;;  %v15636_v1 = vmul.f32 %v4578_v24, %v19743_v41 }
 0xd7a   : > { %v4721_v59 = vmul.f32 %v4678_v12, %v15611_v55  ;;  %v4672_v13 = vpop.permute.xlu1 %4671  ;;  %v11061_v28 = vpop.eup %11060  ;;  %v15642_v34 = vmul.f32 %v4583_v0, %v19745_v6 }
 0xd7b   : > { %v4718_v62 = vmul.f32 %v4672_v13, %v15616_v47  ;;  %19744 = vst [vmem:[#allocation145_spill] sm:$0xff] %v15636_v1 }
 0xd7c   : > { %4757 = vrot.lane.b32.xlu0 %v4721_v59, %s11537_s14  ;;  %v4556_v59 = vadd.f32 1.1920929e-07, %v4540_v30  ;;  %19746 = vst [vmem:[#allocation146_spill] sm:$0xff] %v15642_v34  ;;  %v4585_v30 = vmul.f32 0.25, %v11061_v28 }
 0xd7d   : > { %4751 = vrot.lane.b32.xlu1 %v4718_v62, %s11537_s14  ;;  %v4682_v12 = vpop.permute.xlu0 %4681  ;;  %v4580_v62 = vmul.f32 0.25, %v11059_v49 }
 0xd7e   : > { %v4723_v13 = vmul.f32 %v4682_v12, %v15621_v26  ;;  %v4676_v61 = vpop.permute.xlu1 %4675  ;;  %v11063_v12 = vpop.eup %11062  ;;  %11070 = vrsqrt.f32 %v4556_v59 }
 0xd7f   : > { %v4720_v54 = vmul.f32 %v4676_v61, %v15626_v42  ;;  %v11065_v42 = vpop.eup %11064 }
 0xd80   : > { %4761 = vrot.lane.b32.xlu0 %v4723_v13, %s11537_s14  ;;  %v11067_v24 = vpop.eup %11066  ;;  %v19747_v13 = vld [vmem:[#allocation14_spill] sm:$0xff] }
 0xd81   : > { %4755 = vrot.lane.b32.xlu1 %v4720_v54, %s11537_s14  ;;  %v4686_v55 = vpop.permute.xlu0 %4685  ;;  %v15646_v49 = vmul.f32 %v4580_v62, %v19747_v13  ;;  %v4582_v54 = vmul.f32 0.25, %v11063_v12  ;;  %v4587_v28 = vmul.f32 0.25, %v11067_v24  ;;  %v4584_v62 = vmul.f32 0.25, %v11065_v42 }
 0xd82   : > { %v4725_v26 = vmul.f32 %v4686_v55, %v15632_v11  ;;  %v4680_v61 = vpop.permute.xlu1 %4679 }
 0xd83   : > { %v4722_v17 = vmul.f32 %v4680_v61, %v15636_v1  ;;  %19748 = vst [vmem:[#allocation147_spill] sm:$0xff] %v15646_v49  ;;  %v19749_v1 = vld [vmem:[#allocation27_spill] sm:$0xff] }
 0xd84   : > { %4765 = vrot.lane.b32.xlu0 %v4725_v26, %s11537_s14  ;;  %v15652_v0 = vmul.f32 %v4585_v30, %v19749_v1  ;;  %v19751_v26 = vld [vmem:[#allocation20_spill] sm:$0xff]  ;;  %v19754_v30 = vld [vmem:[#allocation34_spill] sm:$0xff] }
 0xd85   : > { %4759 = vrot.lane.b32.xlu1 %v4722_v17, %s11537_s14  ;;  %v4690_v14 = vpop.permute.xlu0 %4689  ;;  %v15656_v59 = vmul.f32 %v4582_v54, %v19751_v26  ;;  %v11069_v17 = vpop.eup %11068  ;;  %v19756_v54 = vld [vmem:[#allocation25_spill] sm:$0xff] }
 0xd86   : > { %v4727_v55 = vmul.f32 %v4690_v14, %v15642_v34  ;;  %v4684_v11 = vpop.permute.xlu1 %4683  ;;  %19750 = vst [vmem:[#allocation148_spill] sm:$0xff] %v15652_v0  ;;  %v15670_v42 = vmul.f32 %v4584_v62, %v19756_v54 }
 0xd87   : > { %v4724_v61 = vmul.f32 %v4684_v11, %v15646_v49  ;;  %19752 = vst [vmem:[#allocation149_spill] sm:$0xff] %v15656_v59  ;;  %v15664_v49 = vmul.f32 %v4587_v28, %v19754_v30 }
 0xd88   : > { %4769 = vrot.lane.b32.xlu0 %v4727_v55, %s11537_s14  ;;  %v4586_v55 = vmul.f32 0.25, %v11069_v17 }
 0xd89   : > { %4763 = vrot.lane.b32.xlu1 %v4724_v61, %s11537_s14  ;;  %v4694_v12 = vpop.permute.xlu0 %4693 }
 0xd8a   : > { %v4729_v47 = vmul.f32 %v4694_v12, %v15652_v0  ;;  %v4688_v14 = vpop.permute.xlu1 %4687  ;;  %v11071_v12 = vpop.eup %11070 }
 0xd8b   : > { %v4726_v34 = vmul.f32 %v4688_v14, %v15656_v59  ;;  %v15661_v11 = vpop.f32.mrb[48].mxu0  ;;  %v4588_v62 = vmul.f32 0.25, %v11071_v12 }
 0xd8c   : > { %19753 = vst [vmem:[#allocation150_spill] sm:$0xff] %v15661_v11  ;;  %v15666_v24 = vpop.f32.mrb[49].mxu0  ;;  %4773 = vrot.lane.b32.xlu0 %v4729_v47, %s11537_s14  ;;  %v19759_v47 = vld [vmem:[#allocation30_spill] sm:$0xff] }
 0xd8d   : > { %19755 = vst [vmem:[#allocation151_spill] sm:$0xff] %v15666_v24  ;;  %4767 = vrot.lane.b32.xlu1 %v4726_v34, %s11537_s14  ;;  %v4698_v61 = vpop.permute.xlu0 %4697  ;;  %v15681_v24 = vmul.f32 %v4586_v55, %v19759_v47 }
 0xd8e   : > { %v4731_v0 = vmul.f32 %v4698_v61, %v15664_v49  ;;  %v4692_v14 = vpop.permute.xlu1 %4691 }
 0xd8f   : > { %v4728_v11 = vmul.f32 %v4692_v14, %v15670_v42  ;;  %v15675_v59 = vpop.f32.mrb[50].mxu0  ;;  %v19762_v14 = vld [vmem:[#allocation45_spill] sm:$0xff] }
 0xd90   : > { %19757 = vst [vmem:[#allocation152_spill] sm:$0xff] %v15675_v59  ;;  %v15677_v28 = vpop.f32.mrb[51].mxu0  ;;  %4777 = vrot.lane.b32.xlu0 %v4731_v0, %s11537_s14 }
 0xd91   : > { %19758 = vst [vmem:[#allocation153_spill] sm:$0xff] %v15677_v28  ;;  %4771 = vrot.lane.b32.xlu1 %v4728_v11, %s11537_s14  ;;  %v15692_v28 = vmul.f32 %v4588_v62, %v19762_v14 }
 0xd92   : > { %v4696_v34 = vpop.permute.xlu1 %4695 }
 0xd93   : > { %v4730_v17 = vmul.f32 %v4696_v34, %v15681_v24  ;;  %v15685_v31 = vpop.f32.mrb[52].mxu0 }
 0xd94   : > { %19760 = vst [vmem:[#allocation154_spill] sm:$0xff] %v15685_v31  ;;  %v15687_v61 = vpop.f32.mrb[53].mxu0  ;;  %4813 = vrot.lane.b32.xlu0 %v15351_v27, %s11545_s15 }
 0xd95   : > { %19761 = vst [vmem:[#allocation155_spill] sm:$0xff] %v15687_v61  ;;  %4775 = vrot.lane.b32.xlu1 %v4730_v17, %s11537_s14 }
 0xd96   : > { %v4700_v0 = vpop.permute.xlu1 %4699 }
 0xd97   : > { %v4732_v55 = vmul.f32 %v4700_v0, %v15692_v28  ;;  %v15696_v12 = vpop.f32.mrb[54].mxu0 }
 0xd98   : > { %19763 = vst [vmem:[#allocation156_spill] sm:$0xff] %v15696_v12  ;;  %v15698_v11 = vpop.f32.mrb[55].mxu0  ;;  %4817 = vrot.lane.b32.xlu0 %v15358_v50, %s11545_s15 }
 0xd99   : > { %19764 = vst [vmem:[#allocation157_spill] sm:$0xff] %v15698_v11  ;;  %4779 = vrot.lane.b32.xlu1 %v4732_v55, %s11537_s14 }
 0xd9b   : > { %v15703_v34 = vpop.f32.mrb[56].mxu0 }
 0xd9c   : > { %19765 = vst [vmem:[#allocation158_spill] sm:$0xff] %v15703_v34  ;;  %v15705_v61 = vpop.f32.mrb[57].mxu0  ;;  %5167 = vrot.lane.b32.xlu0 %v19668_v21, %s11544_s10 }
 0xd9d   : > { %19766 = vst [vmem:[#allocation159_spill] sm:$0xff] %v15705_v61  ;;  %4815 = vrot.lane.b32.xlu1 %v15344_v16, %s11545_s15 }
 0xd9f   : > { %v15711_v62 = vpop.f32.mrb[58].mxu0 }
 0xda0   : > { %19767 = vst [vmem:[#allocation160_spill] sm:$0xff] %v15711_v62  ;;  %v15713_v17 = vpop.f32.mrb[59].mxu0  ;;  %4821 = vrot.lane.b32.xlu0 %v15365_v39, %s11545_s15 }
 0xda1   : > { %19768 = vst [vmem:[#allocation161_spill] sm:$0xff] %v15713_v17  ;;  %5165 = vrot.lane.b32.xlu1 %v19667_v44, %s11544_s10 }
 0xda3   : > { %v15719_v0 = vpop.f32.mrb[60].mxu0 }
 0xda4   : > { %19769 = vst [vmem:[#allocation162_spill] sm:$0xff] %v15719_v0  ;;  %v15721_v55 = vpop.f32.mrb[61].mxu0  ;;  %5171 = vrot.lane.b32.xlu0 %v19670_v20, %s11544_s10 }
 0xda5   : > { %19770 = vst [vmem:[#allocation163_spill] sm:$0xff] %v15721_v55  ;;  %4819 = vrot.lane.b32.xlu1 %v15372_v45, %s11545_s15 }
 0xda7   : > { %v15727_v61 = vpop.f32.mrb[62].mxu0 }
 0xda8   : > { %19771 = vst [vmem:[#allocation164_spill] sm:$0xff] %v15727_v61  ;;  %v15729_v62 = vpop.f32.mrb[63].mxu0  ;;  %4825 = vrot.lane.b32.xlu0 %v15379_v43, %s11545_s15 }
 0xda9   : > { %19772 = vst [vmem:[#allocation165_spill] sm:$0xff] %v15729_v62  ;;  %5169 = vrot.lane.b32.xlu1 %v19669_v56, %s11544_s10 }
 0xdac   : > { %5175 = vrot.lane.b32.xlu0 %v19672_v40, %s11544_s10 }
 0xdad   : > { %4823 = vrot.lane.b32.xlu1 %v15386_v37, %s11545_s15 }
 0xdb0   : > { %4829 = vrot.lane.b32.xlu0 %v15393_v22, %s11545_s15 }
 0xdb1   : > { %5173 = vrot.lane.b32.xlu1 %v19671_v4, %s11544_s10 }
 0xdb4   : > { %5179 = vrot.lane.b32.xlu0 %v19674_v60, %s11544_s10 }
 0xdb5   : > { %4827 = vrot.lane.b32.xlu1 %v15400_v2, %s11545_s15 }
 0xdb8   : > { %4833 = vrot.lane.b32.xlu0 %v15407_v10, %s11545_s15 }
 0xdb9   : > { %5177 = vrot.lane.b32.xlu1 %v19673_v18, %s11544_s10 }
 0xdbc   : > { %5183 = vrot.lane.b32.xlu0 %v19676_v46, %s11544_s10 }
 0xdbd   : > { %4831 = vrot.lane.b32.xlu1 %v15414_v36, %s11545_s15 }
 0xdc0   : > { %4837 = vrot.lane.b32.xlu0 %v15421_v33, %s11545_s15 }
 0xdc1   : > { %5181 = vrot.lane.b32.xlu1 %v19675_v29, %s11544_s10 }
 0xdc4   : > { %5187 = vrot.lane.b32.xlu0 %v19678_v35, %s11544_s10 }
 0xdc5   : > { %4835 = vrot.lane.b32.xlu1 %v15428_v15, %s11545_s15 }
 0xdc8   : > { %4841 = vrot.lane.b32.xlu0 %v15435_v25, %s11545_s15 }
 0xdc9   : > { %5185 = vrot.lane.b32.xlu1 %v19677_v53, %s11544_s10 }
 0xdcc   : > { %5191 = vrot.lane.b32.xlu0 %v19680_v63, %s11544_s10 }
 0xdcd   : > { %4839 = vrot.lane.b32.xlu1 %v15442_v19, %s11545_s15 }
 0xdd0   : > { %4877 = vrot.lane.b32.xlu0 %v15449_v7, %s11544_s10 }
 0xdd1   : > { %5189 = vrot.lane.b32.xlu1 %v19679_v23, %s11544_s10 }
 0xdd4   : > { %5195 = vrot.lane.b32.xlu0 %v19682_v58, %s11544_s10 }
 0xdd5   : > { %4843 = vrot.lane.b32.xlu1 %v15456_v48, %s11545_s15  ;;  %s11546_s15 = smov 104  }
 0xdd9   : > { %5193 = vrot.lane.b32.xlu1 %v19681_v3, %s11544_s10 }
 0xde6   : > { %v15781_v10 = vpop.permute.xlu0 %4749 }
 0xdea   : > { %v15783_v33 = vpop.permute.xlu0 %4753 }
 0xdee   : > { %v15785_v15 = vpop.permute.xlu0 %4757 }
 0xdef   : > { %v15787_v25 = vpop.permute.xlu1 %4751 }
 0xdf2   : > { %v15789_v19 = vpop.permute.xlu0 %4761 }
 0xdf3   : > { %v15791_v62 = vpop.permute.xlu1 %4755 }
 0xdf6   : > { %v15793_v61 = vpop.permute.xlu0 %4765 }
 0xdf7   : > { %v15795_v55 = vpop.permute.xlu1 %4759 }
 0xdfa   : > { %v15797_v48 = vpop.permute.xlu0 %4769 }
 0xdfb   : > { %19773 = vst [vmem:[#allocation166_spill] sm:$0xff] %v15797_v48  ;;  %v15799_v0 = vpop.permute.xlu1 %4763 }
 0xdfe   : > { %v15801_v17 = vpop.permute.xlu0 %4773 }
 0xdff   : > { %19774 = vst [vmem:[#allocation167_spill] sm:$0xff] %v15801_v17  ;;  %v15803_v34 = vpop.permute.xlu1 %4767 }
 0xe00   : > { %19775 = vst [vmem:[#allocation168_spill] sm:$0xff] %v15803_v34 }
 0xe02   : > { %v15805_v11 = vpop.permute.xlu0 %4777 }
 0xe03   : > { %19776 = vst [vmem:[#allocation169_spill] sm:$0xff] %v15805_v11  ;;  %v15807_v12 = vpop.permute.xlu1 %4771 }
 0xe04   : > { %19777 = vst [vmem:[#allocation170_spill] sm:$0xff] %v15807_v12 }
 0xe06   : > { %v15809_v31 = vpop.permute.xlu0 %4813 }
 0xe07   : > { %v15811_v59 = vpop.permute.xlu1 %4775 }
 0xe08   : > { %19778 = vst [vmem:[#allocation171_spill] sm:$0xff] %v15811_v59 }
 0xe0a   : > { %v15813_v58 = vpop.permute.xlu0 %4817 }
 0xe0b   : > { %19779 = vst [vmem:[#allocation172_spill] sm:$0xff] %v15813_v58  ;;  %v15815_v63 = vpop.permute.xlu1 %4779 }
 0xe0c   : > { %19780 = vst [vmem:[#allocation173_spill] sm:$0xff] %v15815_v63 }
 0xe0e   : > { %v5168_v35 = vpop.permute.xlu0 %5167 }
 0xe0f   : > { %v15817_v46 = vpop.permute.xlu1 %4815  ;;  %v5216_v60 = vsel %vm550_vm1, %v5168_v35, 0.0 }
 0xe10   : > { %5217 = vadd.xlane.f32.xlu0 %v5216_v60 }
 0xe12   : > { %v15820_v40 = vpop.permute.xlu0 %4821 }
 0xe13   : > { %19781 = vst [vmem:[#allocation174_spill] sm:$0xff] %v15820_v40  ;;  %v5166_v20 = vpop.permute.xlu1 %5165  ;;  %v19806_v40 = vld [vmem:[#allocation129_spill] sm:$0xff] }
 0xe14   : > { %v5213_v21 = vsel %vm550_vm1, %v5166_v20, 0.0 }
 0xe15   : > { %5214 = vadd.xlane.f32.xlu1 %v5213_v21 }
 0xe16   : > { %v5172_v3 = vpop.permute.xlu0 %5171 }
 0xe17   : > { %v15823_v23 = vpop.permute.xlu1 %4819  ;;  %v5222_v60 = vsel %vm550_vm1, %v5172_v3, 0.0 }
 0xe18   : > { %19782 = vst [vmem:[#allocation175_spill] sm:$0xff] %v15823_v23 }
 0xe1a   : > { %v15825_v53 = vpop.permute.xlu0 %4825 }
 0xe1b   : > { %19783 = vst [vmem:[#allocation176_spill] sm:$0xff] %v15825_v53  ;;  %v5170_v29 = vpop.permute.xlu1 %5169 }
 0xe1c   : > { %v5219_v18 = vsel %vm550_vm1, %v5170_v29, 0.0 }
 0xe1d   : > { %5220 = vadd.xlane.f32.xlu0 %v5219_v18 }
 0xe1e   : > { %v5176_v4 = vpop.permute.xlu0 %5175 }
 0xe1f   : > { %v15828_v56 = vpop.permute.xlu1 %4823  ;;  %v5228_v21 = vsel %vm550_vm1, %v5176_v4, 0.0 }
 0xe20   : > { %19784 = vst [vmem:[#allocation177_spill] sm:$0xff] %v15828_v56 }
 0xe21   : > { %5223 = vadd.xlane.f32.xlu0 %v5222_v60 }
 0xe22   : > { %v15831_v35 = vpop.permute.xlu0 %4829 }
 0xe23   : > { %19785 = vst [vmem:[#allocation178_spill] sm:$0xff] %v15831_v35  ;;  %v5174_v44 = vpop.permute.xlu1 %5173 }
 0xe24   : > { %v5225_v20 = vsel %vm550_vm1, %v5174_v44, 0.0 }
 0xe25   : > { %5229 = vadd.xlane.f32.xlu0 %v5228_v21  ;;  %5226 = vadd.xlane.f32.xlu1 %v5225_v20  ;;  %v19789_v21 = vld [vmem:[#allocation61_spill] sm:$0xff] }
 0xe26   : > { %v5180_v53 = vpop.permute.xlu0 %5179 }
 0xe27   : > { %v15835_v63 = vpop.permute.xlu1 %4827  ;;  %v5234_v18 = vsel %vm550_vm1, %v5180_v53, 0.0 }
 0xe28   : > { %19786 = vst [vmem:[#allocation179_spill] sm:$0xff] %v15835_v63 }
 0xe29   : > { %5235 = vadd.xlane.f32.xlu0 %v5234_v18 }
 0xe2a   : > { %v15847_v44 = vpop.permute.xlu0 %4833 }
 0xe2b   : > { %v5178_v29 = vpop.permute.xlu1 %5177  ;;  %19787 = vst [vmem:[#allocation180_spill] sm:$0xff] %v15847_v44 }
 0xe2c   : > { %v5231_v56 = vsel %vm550_vm1, %v5178_v29, 0.0 }
 0xe2d   : > { %5232 = vadd.xlane.f32.xlu1 %v5231_v56 }
 0xe2e   : > { %v5184_v4 = vpop.permute.xlu0 %5183 }
 0xe2f   : > { %v5240_v53 = vsel %vm550_vm1, %v5184_v4, 0.0  ;;  %v15850_v56 = vpop.permute.xlu1 %4831 }
 0xe30   : > { %19788 = vst [vmem:[#allocation181_spill] sm:$0xff] %v15850_v56 }
 0xe32   : > { %v15861_v20 = vpop.permute.xlu0 %4837 }
 0xe33   : > { %v5182_v3 = vpop.permute.xlu1 %5181  ;;  %19791 = vst [vmem:[#allocation61_spill] sm:$0xff] %v15861_v20 }
 0xe34   : > { %v5237_v60 = vsel %vm550_vm1, %v5182_v3, 0.0 }
 0xe36   : > { %v5188_v18 = vpop.permute.xlu0 %5187 }
 0xe37   : > { %v5246_v29 = vsel %vm550_vm1, %v5188_v18, 0.0  ;;  %v15864_v4 = vpop.permute.xlu1 %4835 }
 0xe3e   : > { %5389 = vrot.lane.b32.xlu1 %v15449_v7, %s11546_s15 }
 0xe3f   : > { %5391 = vrot.lane.b32.xlu0 %v15470_v51, %s11546_s15 }
 0xe42   : > { %5597 = vrot.lane.b32.xlu1 %v15449_v7, %s11543_s6  ;;  %v19790_v7 = vld [vmem:[#allocation102_spill] sm:$0xff] }
 0xe43   : > { %19792 = vst [vmem:[#allocation102_spill] sm:$0xff] %v15864_v4  ;;  %v19797_v4 = vld [vmem:[#allocation111_spill] sm:$0xff] }
 0xe46   : > { %5599 = vrot.lane.b32.xlu1 %v15470_v51, %s11543_s6 }
 0xe5e   : > { %5241 = vadd.xlane.f32.xlu0 %v5240_v53  ;;  %v5186_v53 = vpop.permute.xlu1 %5185 }
 0xe5f   : > { %v5243_v3 = vsel %vm550_vm1, %v5186_v53, 0.0 }
 0xe62   : > { %v15878_v53 = vpop.permute.xlu1 %4839 }
 0xe6a   : > { %5238 = vadd.xlane.f32.xlu1 %v5237_v60  ;;  %v19793_v60 = vld [vmem:[#allocation54_spill] sm:$0xff] }
 0xe74   : > { %5393 = vrot.lane.b32.xlu0 %v19789_v21, %s11546_s15 }
 0xe78   : > { %5603 = vrot.lane.b32.xlu0 %v19790_v7, %s11543_s6 }
 0xe7b   : > { %5395 = vrot.lane.b32.xlu1 %v19790_v7, %s11546_s15  ;;  %v19794_v7 = vld [vmem:[#allocation136_spill] sm:$0xff] }
 0xe7c   : > { %19796 = vst [vmem:[#allocation136_spill] sm:$0xff] %v15878_v53  ;;  %v19800_v53 = vld [vmem:[#allocation131_spill] sm:$0xff] }
 0xe7f   : > { %5601 = vrot.lane.b32.xlu1 %v19789_v21, %s11543_s6  ;;  %v15875_v21 = vpop.permute.xlu0 %4841 }
 0xe80   : > { %19795 = vst [vmem:[#allocation54_spill] sm:$0xff] %v15875_v21 }
 0xe83   : > { %v5192_v18 = vpop.permute.xlu0 %5191 }
 0xe97   : > { %5247 = vadd.xlane.f32.xlu0 %v5246_v29  ;;  %v5252_v29 = vsel %vm550_vm1, %v5192_v18, 0.0 }
 0xea3   : > { %5244 = vadd.xlane.f32.xlu1 %v5243_v3  ;;  %v5190_v3 = vpop.permute.xlu1 %5189 }
 0xea4   : > { %v5249_v20 = vsel %vm550_vm1, %v5190_v3, 0.0 }
 0xea7   : > { %v15892_v3 = vpop.permute.xlu1 %4843 }
 0xea8   : > { %19799 = vst [vmem:[#allocation111_spill] sm:$0xff] %v15892_v3  ;;  %v19804_v3 = vld [vmem:[#allocation106_spill] sm:$0xff] }
 0xead   : > { %5397 = vrot.lane.b32.xlu0 %v19793_v60, %s11546_s15 }
 0xeb1   : > { %5607 = vrot.lane.b32.xlu0 %v19794_v7, %s11543_s6 }
 0xeb4   : > { %5399 = vrot.lane.b32.xlu1 %v19794_v7, %s11546_s15  ;;  %v19798_v7 = vld [vmem:[#allocation40_spill] sm:$0xff] }
 0xeb8   : > { %5605 = vrot.lane.b32.xlu1 %v19793_v60, %s11543_s6  ;;  %v15889_v60 = vpop.permute.xlu0 %4877 }
 0xebc   : > { %v5196_v18 = vpop.permute.xlu0 %5195 }
 0xec0   : > { %v5218_v44 = vpop.xlane.xlu0 %5217 }
 0xed0   : > { %5253 = vadd.xlane.f32.xlu0 %v5252_v29  ;;  %v5258_v29 = vsel %vm550_vm1, %v5196_v18, 0.0  ;;  %v5221_v18 = vpop.xlane.xlu0 %5220 }
 0xed4   : > { %v5224_v56 = vpop.xlane.xlu0 %5223 }
 0xedc   : > { %5250 = vadd.xlane.f32.xlu1 %v5249_v20  ;;  %v5194_v20 = vpop.permute.xlu1 %5193 }
 0xedd   : > { %v5255_v21 = vsel %vm550_vm1, %v5194_v20, 0.0  ;;  %v19803_v20 = vld [vmem:[#allocation121_spill] sm:$0xff] }
 0xee6   : > { %5401 = vrot.lane.b32.xlu0 %v19797_v4, %s11546_s15 }
 0xeea   : > { %5611 = vrot.lane.b32.xlu0 %v19798_v7, %s11543_s6 }
 0xeed   : > { %5403 = vrot.lane.b32.xlu1 %v19798_v7, %s11546_s15  ;;  %v19801_v7 = vld [vmem:[#allocation76_spill] sm:$0xff] }
 0xef1   : > { %5609 = vrot.lane.b32.xlu1 %v19797_v4, %s11543_s6  ;;  %v19802_v4 = vld [vmem:[#allocation55_spill] sm:$0xff] }
 0xf09   : > { %5259 = vadd.xlane.f32.xlu0 %v5258_v29  ;;  %v5262_v29 = vmul.f32 0.0625, %v5218_v44  ;;  %v19805_v44 = vld [vmem:[#allocation123_spill] sm:$0xff] }
 0xf0b   : > { %v5278_v35 = vadd.f32 1.1920929e-07, %v5262_v29 }
 0xf0d   : > { %11072 = vrsqrt.f32 %v5278_v35  ;;  %v19807_v35 = vld [vmem:[#allocation44_spill] sm:$0xff] }
 0xf15   : > { %5256 = vadd.xlane.f32.xlu1 %v5255_v21  ;;  %v5215_v21 = vpop.xlane.xlu1 %5214 }
 0xf16   : > { %v5261_v63 = vmul.f32 0.0625, %v5215_v21 }
 0xf17   : > { %v11073_v21 = vpop.eup %11072 }
 0xf18   : > { %v5277_v11 = vadd.f32 1.1920929e-07, %v5261_v63 }
 0xf1a   : > { %11074 = vrsqrt.f32 %v5277_v11 }
 0xf1f   : > { %5405 = vrot.lane.b32.xlu0 %v19800_v53, %s11546_s15 }
 0xf23   : > { %5615 = vrot.lane.b32.xlu0 %v19801_v7, %s11543_s6 }
 0xf26   : > { %5407 = vrot.lane.b32.xlu1 %v19801_v7, %s11546_s15  ;;  %v5227_v7 = vpop.xlane.xlu1 %5226 }
 0xf27   : > { %5411 = vrot.lane.b32.xlu0 %v19802_v4, %s11546_s15 }
 0xf2a   : > { %5613 = vrot.lane.b32.xlu1 %v19800_v53, %s11543_s6  ;;  %v5233_v53 = vpop.xlane.xlu1 %5232 }
 0xf2b   : > { %5619 = vrot.lane.b32.xlu0 %v19802_v4, %s11543_s6  ;;  %v5230_v4 = vpop.xlane.xlu0 %5229 }
 0xf2e   : > { %5409 = vrot.lane.b32.xlu1 %v19803_v20, %s11546_s15  ;;  %v5390_v23 = vpop.permute.xlu1 %5389 }
 0xf2f   : > { %5415 = vrot.lane.b32.xlu0 %v19804_v3, %s11546_s15  ;;  %v15923_v29 = vpop.xlane.xlu0 %5235 }
 0xf32   : > { %5617 = vrot.lane.b32.xlu1 %v19803_v20, %s11543_s6  ;;  %v5598_v20 = vpop.permute.xlu1 %5597 }
 0xf33   : > { %5623 = vrot.lane.b32.xlu0 %v19804_v3, %s11543_s6  ;;  %v5263_v3 = vmul.f32 0.0625, %v5221_v18  ;;  %v5392_v59 = vpop.permute.xlu0 %5391  ;;  %v11075_v18 = vpop.eup %11074 }
 0xf35   : > { %v5279_v63 = vadd.f32 1.1920929e-07, %v5263_v3  ;;  %v5264_v3 = vmul.f32 0.0625, %v5224_v56 }
 0xf36   : > { %5413 = vrot.lane.b32.xlu1 %v19805_v44, %s11546_s15  ;;  %v5600_v11 = vpop.permute.xlu1 %5599 }
 0xf37   : > { %5419 = vrot.lane.b32.xlu0 %v19806_v40, %s11546_s15  ;;  %11076 = vrsqrt.f32 %v5279_v63  ;;  %v5280_v63 = vadd.f32 1.1920929e-07, %v5264_v3 }
 0xf39   : > { %11078 = vrsqrt.f32 %v5280_v63 }
 0xf3a   : > { %5621 = vrot.lane.b32.xlu1 %v19805_v44, %s11543_s6  ;;  %v15932_v44 = vmul.f32 %v11073_v21, %v19735_v5  ;;  %v15944_v21 = vpop.xlane.xlu1 %5238  ;;  %v5265_v5 = vmul.f32 0.0625, %v5227_v7 }
 0xf3b   : > { %5627 = vrot.lane.b32.xlu0 %v19806_v40, %s11543_s6 }
 0xf3c   : > { %v5438_v40 = vmul.f32 %v5392_v59, %v15932_v44  ;;  %v5646_v17 = vmul.f32 %v5600_v11, %v15932_v44  ;;  %v15950_v59 = vpop.xlane.xlu0 %5241 }
 0xf3e   : > { %5417 = vrot.lane.b32.xlu1 %v19807_v35, %s11546_s15  ;;  %v5396_v11 = vpop.permute.xlu1 %5395 }
 0xf3f   : > { %5327 = vrot.lane.b32.xlu0 %v15344_v16, %s11543_s6 }
 0xf41   : > { %v11077_v56 = vpop.eup %11076 }
 0xf42   : > { %5625 = vrot.lane.b32.xlu1 %v19807_v35, %s11543_s6  ;;  %v15942_v35 = vmul.f32 %v11075_v18, %v19727_v32  ;;  %v5281_v18 = vadd.f32 1.1920929e-07, %v5265_v5  ;;  %v5602_v7 = vpop.permute.xlu1 %5601  ;;  %v5266_v5 = vmul.f32 0.0625, %v5230_v4 }
 0xf43   : > { %5535 = vrot.lane.b32.xlu0 %v15344_v16, %s11546_s15  ;;  %v11079_v63 = vpop.eup %11078 }
 0xf44   : > { %v5437_v16 = vmul.f32 %v5390_v23, %v15942_v35  ;;  %v15958_v23 = vmul.f32 %v11077_v56, %v19730_v8  ;;  %11080 = vrsqrt.f32 %v5281_v18  ;;  %v5282_v56 = vadd.f32 1.1920929e-07, %v5266_v5 }
 0xf46   : > { %5325 = vrot.lane.b32.xlu1 %v15351_v27, %s11543_s6  ;;  %v5647_v3 = vmul.f32 %v5602_v7, %v15958_v23  ;;  %11082 = vrsqrt.f32 %v5282_v56 }
 0xf47   : > { %5471 = vrot.lane.b32.xlu0 %v5438_v40, %s11537_s14  ;;  %v5645_v40 = vmul.f32 %v5598_v20, %v15942_v35 }
 0xf4a   : > { %5533 = vrot.lane.b32.xlu1 %v15351_v27, %s11546_s15  ;;  %v5394_v27 = vpop.permute.xlu0 %5393 }
 0xf4b   : > { %5679 = vrot.lane.b32.xlu0 %v5646_v17, %s11533_s27  ;;  %v5439_v17 = vmul.f32 %v5394_v27, %v15958_v23 }
 0xf4e   : > { %5469 = vrot.lane.b32.xlu1 %v5437_v16, %s11537_s14  ;;  %v5604_v20 = vpop.permute.xlu0 %5603  ;;  %v15967_v16 = vpop.xlane.xlu1 %5244 }
 0xf4f   : > { %5329 = vrot.lane.b32.xlu0 %v15358_v50, %s11543_s6  ;;  %v11081_v4 = vpop.eup %11080 }
 0xf52   : > { %5677 = vrot.lane.b32.xlu1 %v5645_v40, %s11533_s27  ;;  %v5267_v40 = vmul.f32 0.0625, %v5233_v53  ;;  %v5400_v27 = vpop.permute.xlu1 %5399  ;;  %v15984_v53 = vmul.f32 %v11081_v4, %v19733_v57 }
 0xf53   : > { %5537 = vrot.lane.b32.xlu0 %v15358_v50, %s11546_s15  ;;  %v15972_v50 = vpop.xlane.xlu0 %5247 }
 0xf56   : > { %4879 = vrot.lane.b32.xlu1 %v15470_v51, %s11544_s10  ;;  %v15975_v51 = vmul.f32 %v11079_v63, %v19739_v52  ;;  %v5268_v63 = vmul.f32 0.0625, %v15923_v29 }
 0xf57   : > { %5473 = vrot.lane.b32.xlu0 %v5439_v17, %s11537_s14  ;;  %v5283_v17 = vadd.f32 1.1920929e-07, %v5267_v40  ;;  %v5398_v7 = vpop.permute.xlu0 %5397 }
 0xf58   : > { %v5440_v18 = vmul.f32 %v5396_v11, %v15975_v51  ;;  %v5441_v5 = vmul.f32 %v5398_v7, %v15984_v53  ;;  %v5284_v4 = vadd.f32 1.1920929e-07, %v5268_v63 }
 0xf59   : > { %11084 = vrsqrt.f32 %v5283_v17 }
 0xf5a   : > { %5331 = vrot.lane.b32.xlu1 %v15372_v45, %s11543_s6  ;;  %11086 = vrsqrt.f32 %v5284_v4  ;;  %v5269_v4 = vmul.f32 0.0625, %v15944_v21 }
 0xf5b   : > { %5681 = vrot.lane.b32.xlu0 %v5647_v3, %s11533_s27  ;;  %v5606_v3 = vpop.permute.xlu1 %5605  ;;  %v5608_v11 = vpop.permute.xlu0 %5607 }
 0xf5c   : > { %v5649_v56 = vmul.f32 %v5606_v3, %v15984_v53 }
 0xf5e   : > { %5539 = vrot.lane.b32.xlu1 %v15372_v45, %s11546_s15  ;;  %v5648_v45 = vmul.f32 %v5604_v20, %v15975_v51 }
 0xf5f   : > { %5333 = vrot.lane.b32.xlu0 %v15365_v39, %s11543_s6  ;;  %v15999_v20 = vpop.xlane.xlu0 %5253 }
 0xf62   : > { %5475 = vrot.lane.b32.xlu1 %v5440_v18, %s11537_s14 }
 0xf63   : > { %5541 = vrot.lane.b32.xlu0 %v15365_v39, %s11546_s15  ;;  %v11083_v39 = vpop.eup %11082 }
 0xf64   : > { %v16002_v18 = vmul.f32 %v11083_v39, %v19743_v41  ;;  %v11085_v29 = vpop.eup %11084 }
 0xf66   : > { %5683 = vrot.lane.b32.xlu1 %v5648_v45, %s11533_s27  ;;  %v5442_v17 = vmul.f32 %v5400_v27, %v16002_v18  ;;  %v5402_v45 = vpop.permute.xlu0 %5401  ;;  %v5650_v3 = vmul.f32 %v5608_v11, %v16002_v18 }
 0xf67   : > { %5477 = vrot.lane.b32.xlu0 %v5441_v5, %s11537_s14  ;;  %v16011_v5 = vmul.f32 %v11085_v29, %v19737_v9 }
 0xf69   : > { %v15994_v40 = vpop.xlane.xlu1 %5250 }
 0xf6a   : > { %5335 = vrot.lane.b32.xlu1 %v15386_v37, %s11543_s6  ;;  %v5612_v11 = vpop.permute.xlu0 %5611 }
 0xf6b   : > { %5685 = vrot.lane.b32.xlu0 %v5649_v56, %s11533_s27  ;;  %v11087_v56 = vpop.eup %11086 }
 0xf6c   : > { %v16024_v39 = vmul.f32 %v11087_v56, %v19747_v13 }
 0xf6d   : > { %v5404_v7 = vpop.permute.xlu1 %5403 }
 0xf6e   : > { %5543 = vrot.lane.b32.xlu1 %v15386_v37, %s11546_s15  ;;  %v5443_v37 = vmul.f32 %v5402_v45, %v16011_v5  ;;  %v5652_v29 = vmul.f32 %v5612_v11, %v16024_v39 }
 0xf6f   : > { %5337 = vrot.lane.b32.xlu0 %v15379_v43, %s11543_s6 }
 0xf71   : > { %v5610_v63 = vpop.permute.xlu1 %5609 }
 0xf72   : > { %5479 = vrot.lane.b32.xlu1 %v5442_v17, %s11537_s14  ;;  %v5651_v27 = vmul.f32 %v5610_v63, %v16011_v5  ;;  %v5285_v17 = vadd.f32 1.1920929e-07, %v5269_v4 }
 0xf73   : > { %5545 = vrot.lane.b32.xlu0 %v15379_v43, %s11546_s15  ;;  %v5444_v43 = vmul.f32 %v5404_v7, %v16024_v39 }
 0xf74   : > { %11088 = vrsqrt.f32 %v5285_v17 }
 0xf76   : > { %5687 = vrot.lane.b32.xlu1 %v5650_v3, %s11533_s27 }
 0xf77   : > { %5481 = vrot.lane.b32.xlu0 %v5443_v37, %s11537_s14 }
 0xf7a   : > { %5339 = vrot.lane.b32.xlu1 %v15400_v2, %s11543_s6 }
 0xf7b   : > { %5689 = vrot.lane.b32.xlu0 %v5651_v27, %s11533_s27  ;;  %v5271_v27 = vmul.f32 0.0625, %v15967_v16 }
 0xf7d   : > { %v5287_v11 = vadd.f32 1.1920929e-07, %v5271_v27 }
 0xf7e   : > { %5547 = vrot.lane.b32.xlu1 %v15400_v2, %s11546_s15  ;;  %v5270_v2 = vmul.f32 0.0625, %v15950_v59  ;;  %v11089_v45 = vpop.eup %11088  ;;  %v5272_v59 = vmul.f32 0.0625, %v15972_v50 }
 0xf7f   : > { %5341 = vrot.lane.b32.xlu0 %v15393_v22, %s11543_s6 }
 0xf80   : > { %v5286_v7 = vadd.f32 1.1920929e-07, %v5270_v2 }
 0xf82   : > { %5483 = vrot.lane.b32.xlu1 %v5444_v43, %s11537_s14  ;;  %11090 = vrsqrt.f32 %v5286_v7  ;;  %v5288_v7 = vadd.f32 1.1920929e-07, %v5272_v59 }
 0xf83   : > { %5549 = vrot.lane.b32.xlu0 %v15393_v22, %s11546_s15  ;;  %v16045_v22 = vmul.f32 %v11089_v45, %v19741_v38  ;;  %11092 = vrsqrt.f32 %v5287_v11  ;;  %v5273_v38 = vmul.f32 0.0625, %v15994_v40  ;;  %v5274_v40 = vmul.f32 0.0625, %v15999_v20  ;;  %v11476_v20 = vld [vmem:[%s18755_s4 + $0x20] sm:$0xff] }
 0xf84   : > { %11094 = vrsqrt.f32 %v5288_v7 }
 0xf86   : > { %5691 = vrot.lane.b32.xlu1 %v5652_v29, %s11533_s27 }
 0xf8a   : > { %5343 = vrot.lane.b32.xlu1 %v15414_v36, %s11543_s6 }
 0xf8c   : > { %v11091_v56 = vpop.eup %11090 }
 0xf8d   : > { %v16054_v4 = vmul.f32 %v11091_v56, %v19751_v26  ;;  %v11472_v56 = vld [vmem:[%s18754_s3 + $0x58] sm:$0xff]  ;;  %v11093_v59 = vpop.eup %11092  ;;  %v5289_v26 = vadd.f32 1.1920929e-07, %v5273_v38 }
 0xf8e   : > { %5551 = vrot.lane.b32.xlu1 %v15414_v36, %s11546_s15  ;;  %v11095_v7 = vpop.eup %11094 }
 0xf8f   : > { %v16086_v9 = vmul.f32 %v11095_v7, %v19756_v54  ;;  %11096 = vrsqrt.f32 %v5289_v26  ;;  %v11477_v26 = vld [vmem:[%s18755_s4 + $0x28] sm:$0xff] }
 0xf96   : > { %v16042_v3 = vpop.xlane.xlu0 %5259 }
 0xf9a   : > { %v5406_v21 = vpop.permute.xlu0 %5405 }
 0xf9b   : > { %v5445_v37 = vmul.f32 %v5406_v21, %v16045_v22 }
 0xf9d   : > { %5485 = vrot.lane.b32.xlu0 %v5445_v37, %s11537_s14 }
 0xf9e   : > { %v5616_v63 = vpop.permute.xlu0 %5615 }
 0xf9f   : > { %v5654_v21 = vmul.f32 %v5616_v63, %v16054_v4  ;;  %v11473_v63 = vld [vmem:[%s18754_s3 + $0x50] sm:$0xff] }
 0xfa2   : > { %v5412_v36 = vpop.permute.xlu0 %5411  ;;  %v16050_v43 = vpop.xlane.xlu1 %5256 }
 0xfa3   : > { %v5275_v52 = vmul.f32 0.0625, %v16050_v43 }
 0xfa6   : > { %v5620_v29 = vpop.permute.xlu0 %5619  ;;  %v5408_v17 = vpop.permute.xlu1 %5407 }
 0xfa7   : > { %v5446_v2 = vmul.f32 %v5408_v17, %v16054_v4 }
 0xfa9   : > { %5487 = vrot.lane.b32.xlu1 %v5446_v2, %s11537_s14  ;;  %v16077_v2 = vmul.f32 %v11093_v59, %v19745_v6  ;;  %v11474_v59 = vld [vmem:[%s18755_s4 + $0x10] sm:$0xff]  ;;  %v5448_v6 = vmul.f32 %v5412_v36, %v16086_v9  ;;  %v11475_v36 = vld [vmem:[%s18755_s4 + $0x18] sm:$0xff] }
 0xfaa   : > { %v16058_v45 = vpop.permute.xlu0 %5415  ;;  %v5614_v16 = vpop.permute.xlu1 %5613 }
 0xfab   : > { %v5653_v37 = vmul.f32 %v5614_v16, %v16045_v22 }
 0xfad   : > { %5695 = vrot.lane.b32.xlu1 %v5654_v21, %s11533_s27  ;;  %5693 = vrot.lane.b32.xlu0 %v5653_v37, %s11533_s27 }
 0xfae   : > { %v16064_v50 = vpop.permute.xlu0 %5623  ;;  %v5410_v27 = vpop.permute.xlu1 %5409 }
 0xfaf   : > { %v5447_v37 = vmul.f32 %v5410_v27, %v16077_v2 }
 0xfb1   : > { %5347 = vrot.lane.b32.xlu1 %v11472_v56, %s11543_s6  ;;  %5345 = vrot.lane.b32.xlu0 %v11473_v63, %s11543_s6 }
 0xfb2   : > { %v16074_v11 = vpop.permute.xlu0 %5419  ;;  %v5618_v17 = vpop.permute.xlu1 %5617 }
 0xfb3   : > { %v5655_v27 = vmul.f32 %v5618_v17, %v16077_v2 }
 0xfb5   : > { %5555 = vrot.lane.b32.xlu1 %v11472_v56, %s11546_s15  ;;  %5553 = vrot.lane.b32.xlu0 %v11473_v63, %s11546_s15 }
 0xfb6   : > { %v16081_v16 = vpop.permute.xlu0 %5627  ;;  %v5414_v21 = vpop.permute.xlu1 %5413 }
 0xfb9   : > { %4881 = vrot.lane.b32.xlu0 %v11474_v59, %s11544_s10  ;;  %5489 = vrot.lane.b32.xlu1 %v5447_v37, %s11537_s14  ;;  %v5656_v37 = vmul.f32 %v5620_v29, %v16086_v9  ;;  %v5290_v59 = vadd.f32 1.1920929e-07, %v5274_v40  ;;  %v11479_v40 = vld [vmem:[%s18754_s3 + $0x68] sm:$0xff] }
 0xfba   : > { %v16093_v56 = vpop.permute.xlu0 %5327  ;;  %v5622_v63 = vpop.permute.xlu1 %5621 }
 0xfbb   : > { %11098 = vrsqrt.f32 %v5290_v59 }
 0xfbd   : > { %5491 = vrot.lane.b32.xlu0 %v5448_v6, %s11537_s14  ;;  %5697 = vrot.lane.b32.xlu1 %v5655_v27, %s11533_s27  ;;  %v11478_v27 = vld [vmem:[%s18754_s3 + $0x60] sm:$0xff] }
 0xfbe   : > { %v16100_v7 = vpop.permute.xlu0 %5535  ;;  %v16102_v54 = vpop.permute.xlu1 %5417 }
 0xfc1   : > { %5699 = vrot.lane.b32.xlu0 %v5656_v37, %s11533_s27  ;;  %4883 = vrot.lane.b32.xlu1 %v11475_v36, %s11544_s10  ;;  %v11097_v37 = vpop.eup %11096 }
 0xfc2   : > { %v16110_v38 = vpop.permute.xlu0 %5471  ;;  %v16112_v6 = vpop.permute.xlu1 %5625 }
 0xfc5   : > { %4885 = vrot.lane.b32.xlu0 %v11476_v20, %s11544_s10  ;;  %4887 = vrot.lane.b32.xlu1 %v11477_v26, %s11544_s10  ;;  %v16139_v20 = vmul.f32 %v11097_v37, %v19749_v1  ;;  %v11099_v26 = vpop.eup %11098  ;;  %v11480_v37 = vld [vmem:[%s18755_s4 + $0x30] sm:$0xff]  ;;  %v5291_v1 = vadd.f32 1.1920929e-07, %v5275_v52 }
 0xfc6   : > { %v16122_v29 = vpop.permute.xlu0 %5679  ;;  %v16124_v17 = vpop.permute.xlu1 %5325  ;;  %v16148_v8 = vmul.f32 %v11099_v26, %v19759_v47  ;;  %v5276_v26 = vmul.f32 0.0625, %v16042_v3  ;;  %v11481_v3 = vld [vmem:[%s18755_s4 + $0x38] sm:$0xff] }
 0xfc7   : > { %v5449_v57 = vmul.f32 %v5414_v21, %v16139_v20  ;;  %v5657_v43 = vmul.f32 %v5622_v63, %v16139_v20  ;;  %11100 = vrsqrt.f32 %v5291_v1  ;;  %v11482_v63 = vld [vmem:[%s18755_s4 + $0x40] sm:$0xff]  ;;  %v11483_v1 = vld [vmem:[%s18755_s4 + $0x48] sm:$0xff] }
 0xfc8   : > { %v5450_v21 = vmul.f32 %v16058_v45, %v16148_v8  ;;  %v5292_v32 = vadd.f32 1.1920929e-07, %v5276_v26 }
 0xfc9   : > { %5349 = vrot.lane.b32.xlu0 %v11478_v27, %s11543_s6  ;;  %5351 = vrot.lane.b32.xlu1 %v11479_v40, %s11543_s6 }
 0xfca   : > { %v16134_v59 = vpop.permute.xlu0 %5329  ;;  %v16136_v36 = vpop.permute.xlu1 %5533  ;;  %11102 = vrsqrt.f32 %v5292_v32  ;;  %v11485_v32 = vld [vmem:[%s18754_s3 + $0x78] sm:$0xff] }
 0xfcd   : > { %5557 = vrot.lane.b32.xlu0 %v11478_v27, %s11546_s15  ;;  %5559 = vrot.lane.b32.xlu1 %v11479_v40, %s11546_s15 }
 0xfce   : > { %v16143_v41 = vpop.permute.xlu0 %5537  ;;  %v5470_v13 = vpop.permute.xlu1 %5469 }
 0xfd1   : > { %4889 = vrot.lane.b32.xlu0 %v11480_v37, %s11544_s10  ;;  %5493 = vrot.lane.b32.xlu1 %v5449_v57, %s11537_s14  ;;  %v5658_v57 = vmul.f32 %v16064_v50, %v16148_v8 }
 0xfd2   : > { %v16155_v27 = vpop.permute.xlu0 %5473  ;;  %v16157_v40 = vpop.permute.xlu1 %5677 }
 0xfd5   : > { %5495 = vrot.lane.b32.xlu0 %v5450_v21, %s11537_s14  ;;  %5701 = vrot.lane.b32.xlu1 %v5657_v43, %s11533_s27  ;;  %v11484_v21 = vld [vmem:[%s18754_s3 + $0x70] sm:$0xff]  ;;  %v11101_v43 = vpop.eup %11100 }
 0xfd6   : > { %v16165_v47 = vpop.permute.xlu0 %5681  ;;  %v16167_v37 = vpop.permute.xlu1 %4879 }
 0xfd9   : > { %5703 = vrot.lane.b32.xlu0 %v5658_v57, %s11533_s27  ;;  %4891 = vrot.lane.b32.xlu1 %v11481_v3, %s11544_s10  ;;  %v16197_v3 = vmul.f32 %v11101_v43, %v19754_v30  ;;  %v11486_v43 = vld [vmem:[%s18755_s4 + $0x50] sm:$0xff]  ;;  %v5373_v30 = vmul.f32 %v16124_v17, %v15942_v35  ;;  %v11487_v17 = vld [vmem:[%s18755_s4 + $0x58] sm:$0xff] }
 0xfda   : > { %v5332_v52 = vpop.permute.xlu1 %5331  ;;  %v16176_v45 = vpop.permute.xlu0 %5333 }
 0xfdb   : > { %v5451_v12 = vmul.f32 %v16102_v54, %v16197_v3  ;;  %v5659_v54 = vmul.f32 %v16112_v6, %v16197_v3  ;;  %v5581_v6 = vmul.f32 %v16136_v36, %v15942_v35  ;;  %v11488_v35 = vld [vmem:[%s18755_s4 + $0x60] sm:$0xff] }
 0xfdd   : > { %4893 = vrot.lane.b32.xlu0 %v11482_v63, %s11544_s10  ;;  %4895 = vrot.lane.b32.xlu1 %v11483_v1, %s11544_s10  ;;  %v11103_v63 = vpop.eup %11102 }
 0xfde   : > { %v5540_v50 = vpop.permute.xlu1 %5539  ;;  %v16194_v26 = vpop.permute.xlu0 %5541  ;;  %v16208_v48 = vmul.f32 %v11103_v63, %v19762_v14 }
 0xfe1   : > { %5353 = vrot.lane.b32.xlu0 %v11484_v21, %s11543_s6  ;;  %5355 = vrot.lane.b32.xlu1 %v11485_v32, %s11543_s6 }
 0xfe2   : > { %v5476_v57 = vpop.permute.xlu1 %5475  ;;  %v16205_v58 = vpop.permute.xlu0 %5477 }
 0xfe5   : > { %5561 = vrot.lane.b32.xlu0 %v11484_v21, %s11546_s15  ;;  %5563 = vrot.lane.b32.xlu1 %v11485_v32, %s11546_s15  ;;  %v5452_v32 = vmul.f32 %v16074_v11, %v16208_v48  ;;  %v5517_v11 = vadd.f32 %v5470_v13, %v5373_v30  ;;  %v5725_v13 = vsub.f32 %v5581_v6, %v16157_v40 }
 0xfe6   : > { %v16201_v1 = vpop.permute.xlu1 %5683  ;;  %v16223_v63 = vpop.permute.xlu0 %5685  ;;  %v5584_v40 = vmul.f32 %v5540_v50, %v15975_v51  ;;  %v19809_v50 = vld [vmem:[#allocation140_spill] sm:$0xff] }
 0xfe9   : > { %4897 = vrot.lane.b32.xlu0 %v11486_v43, %s11544_s10  ;;  %5497 = vrot.lane.b32.xlu1 %v5451_v12, %s11537_s14  ;;  %v5660_v12 = vmul.f32 %v16081_v16, %v16208_v48  ;;  %v5374_v43 = vmul.f32 %v16093_v56, %v15932_v44  ;;  %v5582_v16 = vmul.f32 %v16100_v7, %v15932_v44  ;;  %v11489_v44 = vld [vmem:[%s18755_s4 + $0x68] sm:$0xff] }
 0xfea   : > { %v5336_v21 = vpop.permute.xlu1 %5335  ;;  %v5338_v30 = vpop.permute.xlu0 %5337 }
 0xfeb   : > { %v5518_v34 = vadd.f32 %v16110_v38, %v5374_v43  ;;  %v5726_v56 = vsub.f32 %v5582_v16, %v16122_v29  ;;  %v5376_v29 = vmul.f32 %v5332_v52, %v15975_v51  ;;  %v11491_v43 = vld [vmem:[%s18755_s4 + $0x70] sm:$0xff]  ;;  %v5375_v52 = vmul.f32 %v16134_v59, %v15958_v23 }
 0xfec   : > { %v5583_v51 = vmul.f32 %v16143_v41, %v15958_v23  ;;  %v4926_v16 = vmul.f32 %v16167_v37, %v19809_v50  ;;  %v5377_v41 = vmul.f32 %v16176_v45, %v15984_v53  ;;  %v5585_v23 = vmul.f32 %v16194_v26, %v15984_v53 }
 0xfed   : > { %5499 = vrot.lane.b32.xlu0 %v5452_v32, %s11537_s14  ;;  %5705 = vrot.lane.b32.xlu1 %v5659_v54, %s11533_s27  ;;  %v10608_v54 = vpack.i.bf16 %v5518_v34, %v5517_v11  ;;  %v10613_v36 = vpack.i.bf16 %v5726_v56, %v5725_v13  ;;  %v19808_v11 = vld [vmem:[#allocation32_spill] sm:$0xff]  ;;  %v5728_v13 = vsub.f32 %v5584_v40, %v16201_v1 }
 0xfee   : > { %v5544_v14 = vpop.permute.xlu1 %5543  ;;  %v5546_v34 = vpop.permute.xlu0 %5545  ;;  %v4925_v6 = vmul.f32 %v15889_v60, %v19808_v11  ;;  %v5519_v56 = vadd.f32 %v16155_v27, %v5375_v52  ;;  %v5378_v60 = vmul.f32 %v5336_v21, %v16002_v18  ;;  %v5729_v21 = vsub.f32 %v5585_v23, %v16223_v63 }
 0xfef   : > { %v5379_v45 = vmul.f32 %v5338_v30, %v16011_v5  ;;  %v5587_v53 = vmul.f32 %v5546_v34, %v16011_v5 }
 0xff1   : > { %5707 = vrot.lane.b32.xlu0 %v5660_v12, %s11533_s27  ;;  %4899 = vrot.lane.b32.xlu1 %v11487_v17, %s11544_s10  ;;  %v11490_v12 = vld [vmem:[%s18755_s4 + $0x78] sm:$0xff] }
 0xff2   : > { %v5480_v32 = vpop.permute.xlu1 %5479 }
 0xff5   : > { %4901 = vrot.lane.b32.xlu0 %v11488_v35, %s11544_s10  ;;  %10609 = vrot.lane.b32.xlu1 %v10608_v54, %s11544_s10  ;;  %v5520_v54 = vadd.f32 %v5476_v57, %v5376_v29  ;;  %v5482_v35 = vpop.permute.xlu0 %5481  ;;  %v5522_v57 = vadd.f32 %v5480_v32, %v5378_v60 }
 0xff6   : > { %v5688_v38 = vpop.permute.xlu1 %5687 }
 0xff7   : > { %v10618_v37 = vpack.i.bf16 %v5520_v54, %v5519_v56 }
 0xff9   : > { %4903 = vrot.lane.b32.xlu1 %v11489_v44, %s11544_s10  ;;  %10614 = vrot.lane.b32.xlu0 %v10613_v36, %s11544_s10  ;;  %v5727_v36 = vsub.f32 %v5583_v51, %v16165_v47  ;;  %v5586_v44 = vmul.f32 %v5544_v14, %v16002_v18  ;;  %v5521_v47 = vadd.f32 %v16205_v58, %v5377_v41  ;;  %v5690_v26 = vpop.permute.xlu0 %5689 }
 0xffa   : > { %v5340_v7 = vpop.permute.xlu1 %5339  ;;  %v5731_v63 = vsub.f32 %v5587_v53, %v5690_v26 }
 0xffb   : > { %v10623_v27 = vpack.i.bf16 %v5728_v13, %v5727_v36  ;;  %v5730_v1 = vsub.f32 %v5586_v44, %v5688_v38  ;;  %v5380_v14 = vmul.f32 %v5340_v7, %v16024_v39  ;;  %v10628_v32 = vpack.i.bf16 %v5522_v57, %v5521_v47 }
 0xffd   : > { %4907 = vrot.lane.b32.xlu1 %v11490_v12, %s11544_s10  ;;  %4905 = vrot.lane.b32.xlu0 %v11491_v43, %s11544_s10  ;;  %v10633_v38 = vpack.i.bf16 %v5730_v1, %v5729_v21  ;;  %v5523_v12 = vadd.f32 %v5482_v35, %v5379_v45  ;;  %v5342_v30 = vpop.permute.xlu0 %5341  ;;  %v19810_v21 = vld [vmem:[#allocation57_spill] sm:$0xff] }
 0xffe   : > { %v5548_v17 = vpop.permute.xlu1 %5547  ;;  %v5381_v52 = vmul.f32 %v5342_v30, %v16045_v22 }
 0xfff   : > { %v5588_v18 = vmul.f32 %v5548_v17, %v16024_v39 }
0x1001   : > { %4957 = vrot.lane.b32.xlu0 %v4925_v6, %s11533_s27  ;;  %4959 = vrot.lane.b32.xlu1 %v4926_v16, %s11533_s27  ;;  %v5550_v34 = vpop.permute.xlu0 %5549 }
0x1002   : > { %v5484_v59 = vpop.permute.xlu1 %5483  ;;  %v5589_v13 = vmul.f32 %v5550_v34, %v16045_v22 }
0x1003   : > { %v5524_v40 = vadd.f32 %v5484_v59, %v5380_v14 }
0x1005   : > { %10619 = vrot.lane.b32.xlu0 %v10618_v37, %s11544_s10  ;;  %10624 = vrot.lane.b32.xlu1 %v10623_v27, %s11544_s10  ;;  %v10638_v39 = vpack.i.bf16 %v5524_v40, %v5523_v12 }
0x1006   : > { %v5692_v29 = vpop.permute.xlu1 %5691 }
0x1007   : > { %v5732_v58 = vsub.f32 %v5588_v18, %v5692_v29 }
0x1009   : > { %10629 = vrot.lane.b32.xlu0 %v10628_v32, %s11544_s10  ;;  %10634 = vrot.lane.b32.xlu1 %v10633_v38, %s11544_s10  ;;  %v10643_v7 = vpack.i.bf16 %v5732_v58, %v5731_v63 }
0x100a   : > { %v5344_v5 = vpop.permute.xlu1 %5343 }
0x100b   : > { %v5382_v17 = vmul.f32 %v5344_v5, %v16054_v4 }
0x100d   : > { %10639 = vrot.lane.b32.xlu0 %v10638_v39, %s11544_s10  ;;  %10644 = vrot.lane.b32.xlu1 %v10643_v7, %s11544_s10  ;;  %v19811_v7 = vld [vmem:[#allocation100_spill] sm:$0xff] }
0x100e   : > { %v5552_v43 = vpop.permute.xlu1 %5551 }
0x100f   : > { %v5486_v6 = vpop.permute.xlu0 %5485  ;;  %v5590_v56 = vmul.f32 %v5552_v43, %v16054_v4  ;;  %v19812_v43 = vld [vmem:[#allocation98_spill] sm:$0xff] }
0x1010   : > { %v5525_v16 = vadd.f32 %v5486_v6, %v5381_v52  ;;  %v19813_v6 = vld [vmem:[#allocation145_spill] sm:$0xff] }
0x101b   : > { %v5488_v51 = vpop.permute.xlu1 %5487 }
0x101c   : > { %v5526_v54 = vadd.f32 %v5488_v51, %v5382_v17 }
0x101e   : > { %v10648_v35 = vpack.i.bf16 %v5526_v54, %v5525_v16 }
0x101f   : > { %v5694_v36 = vpop.permute.xlu0 %5693  ;;  %v5696_v60 = vpop.permute.xlu1 %5695 }
0x1020   : > { %v5733_v44 = vsub.f32 %v5589_v13, %v5694_v36  ;;  %v5734_v41 = vsub.f32 %v5590_v56, %v5696_v60  ;;  %10649 = vrot.lane.b32.xlu0 %v10648_v35, %s11544_s10  ;;  %v19814_v56 = vld [vmem:[#allocation90_spill] sm:$0xff] }
0x1022   : > { %v10653_v23 = vpack.i.bf16 %v5734_v41, %v5733_v44 }
0x1023   : > { %v5346_v59 = vpop.permute.xlu0 %5345  ;;  %v5348_v37 = vpop.permute.xlu1 %5347 }
0x1024   : > { %10654 = vrot.lane.b32.xlu1 %v10653_v23, %s11544_s10  ;;  %v5383_v4 = vmul.f32 %v5346_v59, %v16077_v2  ;;  %v5384_v14 = vmul.f32 %v5348_v37, %v16086_v9 }
0x1027   : > { %v5554_v27 = vpop.permute.xlu0 %5553  ;;  %v5556_v57 = vpop.permute.xlu1 %5555 }
0x1028   : > { %v5591_v29 = vmul.f32 %v5554_v27, %v16077_v2  ;;  %v5592_v32 = vmul.f32 %v5556_v57, %v16086_v9 }
0x102b   : > { %v4882_v1 = vpop.permute.xlu0 %4881  ;;  %v5490_v47 = vpop.permute.xlu1 %5489 }
0x102c   : > { %v4927_v22 = vmul.f32 %v4882_v1, %v19810_v21  ;;  %v5527_v53 = vadd.f32 %v5490_v47, %v5383_v4 }
0x102e   : > { %4961 = vrot.lane.b32.xlu0 %v4927_v22, %s11533_s27 }
0x102f   : > { %v5492_v18 = vpop.permute.xlu0 %5491  ;;  %v5698_v45 = vpop.permute.xlu1 %5697 }
0x1030   : > { %v5528_v26 = vadd.f32 %v5492_v18, %v5384_v14  ;;  %v5735_v12 = vsub.f32 %v5591_v29, %v5698_v45  ;;  %v19815_v18 = vld [vmem:[#allocation147_spill] sm:$0xff]  ;;  %v19816_v29 = vld [vmem:[#allocation96_spill] sm:$0xff] }
0x1032   : > { %v10658_v38 = vpack.i.bf16 %v5528_v26, %v5527_v53 }
0x1033   : > { %v5700_v40 = vpop.permute.xlu0 %5699  ;;  %v4884_v58 = vpop.permute.xlu1 %4883 }
0x1034   : > { %v5736_v63 = vsub.f32 %v5592_v32, %v5700_v40  ;;  %10659 = vrot.lane.b32.xlu1 %v10658_v38, %s11544_s10  ;;  %v4928_v30 = vmul.f32 %v4884_v58, %v19811_v7  ;;  %v19817_v32 = vld [vmem:[#allocation149_spill] sm:$0xff] }
0x1036   : > { %v10663_v39 = vpack.i.bf16 %v5736_v63, %v5735_v12 }
0x1037   : > { %v4886_v5 = vpop.permute.xlu0 %4885  ;;  %v4888_v34 = vpop.permute.xlu1 %4887 }
0x1038   : > { %10664 = vrot.lane.b32.xlu0 %v10663_v39, %s11544_s10  ;;  %4963 = vrot.lane.b32.xlu1 %v4928_v30, %s11533_s27  ;;  %v4929_v2 = vmul.f32 %v4886_v5, %v19812_v43  ;;  %v4930_v9 = vmul.f32 %v4888_v34, %v19813_v6  ;;  %v19818_v30 = vld [vmem:[#allocation146_spill] sm:$0xff] }
0x103b   : > { %v5350_v52 = vpop.permute.xlu0 %5349  ;;  %v5352_v17 = vpop.permute.xlu1 %5351 }
0x103c   : > { %4965 = vrot.lane.b32.xlu0 %v4929_v2, %s11533_s27  ;;  %4967 = vrot.lane.b32.xlu1 %v4930_v9, %s11533_s27  ;;  %v5385_v36 = vmul.f32 %v5350_v52, %v16139_v20  ;;  %v5386_v60 = vmul.f32 %v5352_v17, %v16148_v8 }
0x103f   : > { %v5558_v51 = vpop.permute.xlu0 %5557  ;;  %v5560_v16 = vpop.permute.xlu1 %5559 }
0x1040   : > { %v5593_v37 = vmul.f32 %v5558_v51, %v16139_v20  ;;  %v5594_v27 = vmul.f32 %v5560_v16, %v16148_v8 }
0x1043   : > { %v4890_v54 = vpop.permute.xlu0 %4889  ;;  %v5494_v13 = vpop.permute.xlu1 %5493 }
0x1044   : > { %v4931_v35 = vmul.f32 %v4890_v54, %v19814_v56  ;;  %v5529_v23 = vadd.f32 %v5494_v13, %v5385_v36 }
0x1046   : > { %4969 = vrot.lane.b32.xlu0 %v4931_v35, %s11533_s27 }
0x1047   : > { %v5496_v44 = vpop.permute.xlu0 %5495  ;;  %v5702_v41 = vpop.permute.xlu1 %5701 }
0x1048   : > { %v5530_v59 = vadd.f32 %v5496_v44, %v5386_v60  ;;  %v5737_v22 = vsub.f32 %v5593_v37, %v5702_v41 }
0x104a   : > { %v10668_v57 = vpack.i.bf16 %v5530_v59, %v5529_v23 }
0x104b   : > { %v5704_v1 = vpop.permute.xlu0 %5703  ;;  %v4892_v47 = vpop.permute.xlu1 %4891 }
0x104c   : > { %v5738_v4 = vsub.f32 %v5594_v27, %v5704_v1  ;;  %10669 = vrot.lane.b32.xlu1 %v10668_v57, %s11544_s10  ;;  %v4932_v45 = vmul.f32 %v4892_v47, %v19815_v18  ;;  %v19819_v27 = vld [vmem:[#allocation148_spill] sm:$0xff] }
0x104e   : > { %v10673_v14 = vpack.i.bf16 %v5738_v4, %v5737_v22 }
0x104f   : > { %v4894_v53 = vpop.permute.xlu0 %4893  ;;  %v4896_v26 = vpop.permute.xlu1 %4895 }
0x1050   : > { %10674 = vrot.lane.b32.xlu0 %v10673_v14, %s11544_s10  ;;  %4971 = vrot.lane.b32.xlu1 %v4932_v45, %s11533_s27  ;;  %v4933_v20 = vmul.f32 %v4894_v53, %v19816_v29  ;;  %v4934_v8 = vmul.f32 %v4896_v26, %v19817_v32 }
0x1053   : > { %v5354_v38 = vpop.permute.xlu0 %5353  ;;  %v5356_v40 = vpop.permute.xlu1 %5355 }
0x1054   : > { %4973 = vrot.lane.b32.xlu0 %v4933_v20, %s11533_s27  ;;  %4975 = vrot.lane.b32.xlu1 %v4934_v8, %s11533_s27  ;;  %v5387_v34 = vmul.f32 %v5354_v38, %v16197_v3  ;;  %v5388_v2 = vmul.f32 %v5356_v40, %v16208_v48 }
0x1057   : > { %v5562_v58 = vpop.permute.xlu0 %5561  ;;  %v5564_v12 = vpop.permute.xlu1 %5563 }
0x1058   : > { %v5595_v16 = vmul.f32 %v5562_v58, %v16197_v3  ;;  %v5596_v54 = vmul.f32 %v5564_v12, %v16208_v48  ;;  %v19821_v12 = vld [vmem:[#allocation73_spill] sm:$0xff] }
0x105b   : > { %v4898_v63 = vpop.permute.xlu0 %4897  ;;  %v5498_v39 = vpop.permute.xlu1 %5497 }
0x105c   : > { %v4935_v5 = vmul.f32 %v4898_v63, %v19818_v30  ;;  %v5531_v17 = vadd.f32 %v5498_v39, %v5387_v34  ;;  %v4653_v63 = vmul.f32 %v19821_v12, %v19808_v11  ;;  %v4861_v39 = vmul.f32 %v15809_v31, %v19808_v11 }
0x105e   : > { %4977 = vrot.lane.b32.xlu0 %v4935_v5, %s11533_s27 }
0x105f   : > { %v5500_v9 = vpop.permute.xlu0 %5499  ;;  %v5706_v52 = vpop.permute.xlu1 %5705 }
0x1060   : > { %v5532_v51 = vadd.f32 %v5500_v9, %v5388_v2  ;;  %v5739_v60 = vsub.f32 %v5595_v16, %v5706_v52  ;;  %v4797_v2 = vadd.f32 %v15781_v10, %v4653_v63  ;;  %v19822_v52 = vld [vmem:[#allocation139_spill] sm:$0xff] }
0x1062   : > { %v10678_v13 = vpack.i.bf16 %v5532_v51, %v5531_v17  ;;  %v4654_v17 = vmul.f32 %v19822_v52, %v19809_v50  ;;  %v4862_v51 = vmul.f32 %v15817_v46, %v19809_v50  ;;  %v19827_v52 = vld [vmem:[#allocation88_spill] sm:$0xff] }
0x1063   : > { %v5708_v35 = vpop.permute.xlu0 %5707  ;;  %v4900_v36 = vpop.permute.xlu1 %4899 }
0x1064   : > { %v5740_v44 = vsub.f32 %v5596_v54, %v5708_v35  ;;  %10679 = vrot.lane.b32.xlu1 %v10678_v13, %s11544_s10  ;;  %v4936_v23 = vmul.f32 %v4900_v36, %v15670_v42  ;;  %v4798_v31 = vadd.f32 %v15787_v25, %v4654_v17  ;;  %v4659_v17 = vmul.f32 %v19827_v52, %v19814_v56 }
0x1066   : > { %v10683_v41 = vpack.i.bf16 %v5740_v44, %v5739_v60  ;;  %v19823_v60 = vld [vmem:[#allocation143_spill] sm:$0xff] }
0x1067   : > { %v4902_v59 = vpop.permute.xlu0 %4901  ;;  %v10610_v37 = vpop.permute.xlu1 %10609  ;;  %v4655_v44 = vmul.f32 %v19823_v60, %v19810_v21 }
0x1068   : > { %10684 = vrot.lane.b32.xlu0 %v10683_v41, %s11544_s10  ;;  %4979 = vrot.lane.b32.xlu1 %v4936_v23, %s11533_s27  ;;  %v4937_v3 = vmul.f32 %v4902_v59, %v19819_v27  ;;  %v10612_v57 = vunpack.i.h.bf16 %v10610_v37  ;;  %v10611_v47 = vunpack.i.l.bf16 %v10610_v37 }
0x1069   : > { %v4799_v25 = vadd.f32 %v15783_v33, %v4655_v44 }
0x106b   : > { %v10615_v48 = vpop.permute.xlu0 %10614  ;;  %v4904_v1 = vpop.permute.xlu1 %4903 }
0x106c   : > { %v10617_v22 = vunpack.i.h.bf16 %v10615_v48  ;;  %v10616_v4 = vunpack.i.l.bf16 %v10615_v48  ;;  %v4938_v14 = vmul.f32 %v4904_v1, %v15681_v24  ;;  %4981 = vrot.lane.b32.xlu0 %v4937_v3, %s11533_s27  ;;  %v19824_v1 = vld [vmem:[#allocation124_spill] sm:$0xff] }
0x106e   : > { %v5869_v45 = vsel %vm1032_vm2, %v10611_v47, %v10616_v4  ;;  %v5870_v53 = vsel %vm1032_vm2, %v10612_v57, %v10617_v22  ;;  %4983 = vrot.lane.b32.xlu1 %v4938_v14, %s11533_s27  ;;  %v4656_v47 = vmul.f32 %v19824_v1, %v19811_v7  ;;  %v19835_v1 = vld [vmem:[#allocation172_spill] sm:$0xff] }
0x106f   : > { %v4906_v26 = vpop.permute.xlu0 %4905  ;;  %v4908_v20 = vpop.permute.xlu1 %4907  ;;  %v10192_v8 = vpack.c.bf16 %v5870_v53, %v5869_v45 }
0x1070   : > { %v4939_v38 = vmul.f32 %v4906_v26, %v15664_v49  ;;  %v4940_v40 = vmul.f32 %v4908_v20, %v15692_v28  ;;  %v4800_v33 = vadd.f32 %v15791_v62, %v4656_v47  ;;  %v4863_v47 = vmul.f32 %v19835_v1, %v19810_v21  ;;  %v19840_v21 = vld [vmem:[#allocation171_spill] sm:$0xff] }
0x1071   : > { %10194 = vmatprep.subr.msk.bf16.mxu0 %vm13266_vm3, %v10192_v8 }
0x1072   : > { %4985 = vrot.lane.b32.xlu0 %v4939_v38, %s11533_s27  ;;  %4987 = vrot.lane.b32.xlu1 %v4940_v40, %s11533_s27  ;;  %v19825_v40 = vld [vmem:[#allocation92_spill] sm:$0xff] }
0x1073   : > { %10197 = vmatpush3.bf16.xpose.msk.msra.mxu0 %vm13266_vm3, %v10192_v8  ;;  %v4958_v5 = vpop.permute.xlu0 %4957  ;;  %v4960_v34 = vpop.permute.xlu1 %4959  ;;  %v4657_v12 = vmul.f32 %v19825_v40, %v19812_v43 }
0x1074   : > { %v5005_v9 = vsub.f32 %v4861_v39, %v4958_v5  ;;  %v5006_v11 = vsub.f32 %v4862_v51, %v4960_v34  ;;  %v19826_v34 = vld [vmem:[#allocation39_spill] sm:$0xff]  ;;  %v19828_v51 = vld [vmem:[#allocation33_spill] sm:$0xff] }
0x1075   : > { %v4801_v62 = vadd.f32 %v15785_v15, %v4657_v12  ;;  %v4803_v15 = vadd.f32 %v15789_v19, %v4659_v17  ;;  %v19830_v19 = vld [vmem:[#allocation117_spill] sm:$0xff] }
0x1076   : > { %5037 = vrot.lane.b32.xlu0 %v4797_v2, %s11543_s6  ;;  %5101 = vrot.lane.b32.xlu1 %v5005_v9, %s11543_s6  ;;  %v4658_v2 = vmul.f32 %v19826_v34, %v19813_v6 }
0x1077   : > { %v10620_v16 = vpop.permute.xlu0 %10619  ;;  %v10625_v54 = vpop.permute.xlu1 %10624 }
0x1078   : > { %v10622_v13 = vunpack.i.h.bf16 %v10620_v16  ;;  %v10621_v35 = vunpack.i.l.bf16 %v10620_v16  ;;  %v10627_v36 = vunpack.i.h.bf16 %v10625_v54  ;;  %v10626_v10 = vunpack.i.l.bf16 %v10625_v54  ;;  %v19829_v16 = vld [vmem:[#allocation142_spill] sm:$0xff] }
0x1079   : > { %v4802_v9 = vadd.f32 %v15795_v55, %v4658_v2  ;;  %v4661_v55 = vmul.f32 %v19829_v16, %v19816_v29  ;;  %v19844_v16 = vld [vmem:[#allocation174_spill] sm:$0xff] }
0x107a   : > { %v5872_v41 = vsel %vm1032_vm2, %v10622_v13, %v10627_v36  ;;  %v5871_v46 = vsel %vm1032_vm2, %v10621_v35, %v10626_v10  ;;  %5039 = vrot.lane.b32.xlu0 %v4798_v31, %s11543_s6  ;;  %5103 = vrot.lane.b32.xlu1 %v5006_v11, %s11543_s6  ;;  %v4660_v31 = vmul.f32 %v19828_v51, %v19815_v18 }
0x107b   : > { %v10630_v50 = vpop.permute.xlu0 %10629  ;;  %v10635_v23 = vpop.permute.xlu1 %10634  ;;  %v10198_v59 = vpack.c.bf16 %v5872_v41, %v5871_v46  ;;  %v4805_v54 = vadd.f32 %v15793_v61, %v4661_v55  ;;  %v4662_v35 = vmul.f32 %v19830_v19, %v19817_v32  ;;  %v19831_v46 = vld [vmem:[#allocation168_spill] sm:$0xff]  ;;  %v4865_v55 = vmul.f32 %v19844_v16, %v19812_v43  ;;  %v19847_v43 = vld [vmem:[#allocation177_spill] sm:$0xff] }
0x107c   : > { %v10632_v37 = vunpack.i.h.bf16 %v10630_v50  ;;  %v10631_v3 = vunpack.i.l.bf16 %v10630_v50  ;;  %v10637_v57 = vunpack.i.h.bf16 %v10635_v23  ;;  %v10636_v48 = vunpack.i.l.bf16 %v10635_v23  ;;  %v19832_v23 = vld [vmem:[#allocation105_spill] sm:$0xff] }
0x107d   : > { %10200 = vmatprep.subr.msk.bf16.mxu0 %vm13266_vm3, %v10198_v59  ;;  %v4804_v11 = vadd.f32 %v15799_v0, %v4660_v31  ;;  %v4806_v0 = vadd.f32 %v19831_v46, %v4662_v35  ;;  %v4663_v61 = vmul.f32 %v19832_v23, %v19818_v30  ;;  %v19843_v31 = vld [vmem:[#allocation169_spill] sm:$0xff]  ;;  %v4866_v46 = vmul.f32 %v19847_v43, %v19813_v6  ;;  %v19850_v6 = vld [vmem:[#allocation16_spill] sm:$0xff] }
0x107e   : > { %v5874_v22 = vsel %vm1032_vm2, %v10632_v37, %v10637_v57  ;;  %v5873_v4 = vsel %vm1032_vm2, %v10631_v3, %v10636_v48  ;;  %5041 = vrot.lane.b32.xlu0 %v4799_v25, %s11543_s6  ;;  %10203 = vmatpush3.bf16.xpose.msk.msra.mxu0 %vm13266_vm3, %v10198_v59  ;;  %v19833_v37 = vld [vmem:[#allocation166_spill] sm:$0xff] }
0x107f   : > { %v10640_v14 = vpop.permute.xlu0 %10639  ;;  %v10645_v45 = vpop.permute.xlu1 %10644  ;;  %v10204_v53 = vpack.c.bf16 %v5874_v22, %v5873_v4  ;;  %v4807_v3 = vadd.f32 %v19833_v37, %v4663_v61  ;;  %v19834_v57 = vld [vmem:[#allocation70_spill] sm:$0xff]  ;;  %v19851_v37 = vld [vmem:[#allocation19_spill] sm:$0xff] }
0x1080   : > { %v10642_v26 = vunpack.i.h.bf16 %v10640_v14  ;;  %v10641_v20 = vunpack.i.l.bf16 %v10640_v14  ;;  %v10647_v8 = vunpack.i.h.bf16 %v10645_v45  ;;  %v10646_v38 = vunpack.i.l.bf16 %v10645_v45  ;;  %v19836_v22 = vld [vmem:[#allocation170_spill] sm:$0xff]  ;;  %v19837_v45 = vld [vmem:[#allocation115_spill] sm:$0xff] }
0x1081   : > { %10206 = vmatprep.subr.msk.bf16.mxu0 %vm13266_vm3, %v10204_v53  ;;  %v4664_v48 = vmul.f32 %v19834_v57, %v15670_v42  ;;  %v19852_v57 = vld [vmem:[#allocation179_spill] sm:$0xff] }
0x1082   : > { %v5876_v63 = vsel %vm1032_vm2, %v10642_v26, %v10647_v8  ;;  %v5875_v39 = vsel %vm1032_vm2, %v10641_v20, %v10646_v38  ;;  %5043 = vrot.lane.b32.xlu0 %v4800_v33, %s11543_s6  ;;  %v19838_v26 = vld [vmem:[#allocation167_spill] sm:$0xff]  ;;  %v19839_v8 = vld [vmem:[#allocation144_spill] sm:$0xff] }
0x1083   : > { %v10210_v5 = vpack.c.bf16 %v5876_v63, %v5875_v39  ;;  %v4808_v4 = vadd.f32 %v19836_v22, %v4664_v48  ;;  %v4666_v38 = vmul.f32 %v19839_v8, %v15681_v24  ;;  %v19841_v63 = vld [vmem:[#allocation175_spill] sm:$0xff]  ;;  %v4868_v48 = vmul.f32 %v19852_v57, %v19815_v18  ;;  %v19853_v22 = vld [vmem:[#allocation24_spill] sm:$0xff] }
0x1084   : > { %v4864_v39 = vmul.f32 %v19841_v63, %v19811_v7  ;;  %v19856_v63 = vld [vmem:[#allocation181_spill] sm:$0xff]  ;;  %v19865_v57 = vld [vmem:[#allocation111_spill] sm:$0xff] }
0x1085   : > { %v4810_v12 = vadd.f32 %v19840_v21, %v4666_v38  ;;  %v19855_v38 = vld [vmem:[#allocation29_spill] sm:$0xff] }
0x1086   : > { %5045 = vrot.lane.b32.xlu0 %v4801_v62, %s11543_s6  ;;  %10209 = vmatpush3.bf16.xpose.msk.msra.mxu0 %vm13266_vm3, %v10204_v53  ;;  %v4665_v53 = vmul.f32 %v19837_v45, %v19819_v27  ;;  %v19842_v62 = vld [vmem:[#allocation122_spill] sm:$0xff] }
0x1087   : > { %10212 = vmatprep.subr.msk.bf16.mxu0 %vm13266_vm3, %v10210_v5 }
0x1088   : > { %v4809_v20 = vadd.f32 %v19838_v26, %v4665_v53  ;;  %v19854_v53 = vld [vmem:[#allocation178_spill] sm:$0xff] }
0x1089   : > { %v4869_v26 = vmul.f32 %v19854_v53, %v19816_v29  ;;  %v19857_v29 = vld [vmem:[#allocation41_spill] sm:$0xff]  ;;  %v19868_v53 = vld [vmem:[#allocation23_spill] sm:$0xff] }
0x108a   : > { %5047 = vrot.lane.b32.xlu0 %v4802_v9, %s11543_s6 }
0x108e   : > { %5049 = vrot.lane.b32.xlu0 %v4803_v15, %s11543_s6  ;;  %10215 = vmatpush3.bf16.xpose.msk.msra.mxu0 %vm13266_vm3, %v10210_v5  ;;  %v4667_v5 = vmul.f32 %v19842_v62, %v15664_v49 }
0x1092   : > { %5051 = vrot.lane.b32.xlu0 %v4804_v11, %s11543_s6  ;;  %v10650_v13 = vpop.permute.xlu0 %10649  ;;  %v4811_v11 = vadd.f32 %v19843_v31, %v4667_v5  ;;  %v19858_v5 = vld [vmem:[#allocation60_spill] sm:$0xff] }
0x1093   : > { %v10652_v10 = vunpack.i.h.bf16 %v10650_v13  ;;  %v10651_v60 = vunpack.i.l.bf16 %v10650_v13  ;;  %v19845_v13 = vld [vmem:[#allocation66_spill] sm:$0xff] }
0x1094   : > { %v4668_v19 = vmul.f32 %v19845_v13, %v15692_v28 }
0x1096   : > { %5053 = vrot.lane.b32.xlu0 %v4805_v54, %s11543_s6  ;;  %v10655_v36 = vpop.permute.xlu1 %10654 }
0x1097   : > { %v10657_v44 = vunpack.i.h.bf16 %v10655_v36  ;;  %v10656_v41 = vunpack.i.l.bf16 %v10655_v36 }
0x1099   : > { %v5878_v25 = vsel %vm1032_vm2, %v10652_v10, %v10657_v44  ;;  %v5877_v50 = vsel %vm1032_vm2, %v10651_v60, %v10656_v41  ;;  %v19846_v60 = vld [vmem:[#allocation173_spill] sm:$0xff] }
0x109a   : > { %5055 = vrot.lane.b32.xlu0 %v4806_v0, %s11543_s6  ;;  %v10216_v59 = vpack.c.bf16 %v5878_v25, %v5877_v50  ;;  %v4812_v44 = vadd.f32 %v19846_v60, %v4668_v19  ;;  %v19848_v25 = vld [vmem:[#allocation3_spill] sm:$0xff]  ;;  %v19849_v50 = vld [vmem:[#allocation176_spill] sm:$0xff] }
0x109b   : > { %v4867_v23 = vmul.f32 %v19849_v50, %v19814_v56  ;;  %v19864_v50 = vld [vmem:[#allocation54_spill] sm:$0xff] }
0x109c   : > { %10218 = vmatprep.subr.msk.bf16.mxu0 %vm13266_vm3, %v10216_v59 }
0x109d   : > { %10221 = vmatpush3.bf16.xpose.msk.msra.mxu0 %vm13266_vm3, %v10216_v59 }
0x109e   : > { %5057 = vrot.lane.b32.xlu0 %v4807_v3, %s11543_s6 }
0x10a0   : > { %v4962_v33 = vpop.permute.xlu0 %4961 }
0x10a1   : > { %v5007_v14 = vsub.f32 %v4863_v47, %v4962_v33 }
0x10a2   : > { %5059 = vrot.lane.b32.xlu0 %v4808_v4, %s11543_s6 }
0x10a3   : > { %5105 = vrot.lane.b32.xlu1 %v5007_v14, %s11543_s6 }
0x10a6   : > { %5061 = vrot.lane.b32.xlu0 %v4809_v20, %s11543_s6  ;;  %v10660_v40 = vpop.permute.xlu1 %10659 }
0x10a7   : > { %v10662_v34 = vunpack.i.h.bf16 %v10660_v40  ;;  %v10661_v52 = vunpack.i.l.bf16 %v10660_v40 }
0x10aa   : > { %v10665_v2 = vpop.permute.xlu0 %10664  ;;  %5063 = vrot.lane.b32.xlu0 %v4810_v12, %s11543_s6  ;;  %v4964_v9 = vpop.permute.xlu1 %4963 }
0x10ab   : > { %v10667_v17 = vunpack.i.h.bf16 %v10665_v2  ;;  %v10666_v15 = vunpack.i.l.bf16 %v10665_v2  ;;  %v5008_v51 = vsub.f32 %v4864_v39, %v4964_v9  ;;  %v4870_v39 = vmul.f32 %v19856_v63, %v19817_v32  ;;  %v19860_v32 = vld [vmem:[#allocation77_spill] sm:$0xff]  ;;  %v19872_v63 = vld [vmem:[#allocation75_spill] sm:$0xff] }
0x10ad   : > { %v5879_v54 = vsel %vm1032_vm2, %v10661_v52, %v10666_v15  ;;  %v5880_v7 = vsel %vm1032_vm2, %v10662_v34, %v10667_v17  ;;  %5107 = vrot.lane.b32.xlu1 %v5008_v51, %s11543_s6  ;;  %v19859_v34 = vld [vmem:[#allocation180_spill] sm:$0xff]  ;;  %v19861_v15 = vld [vmem:[#allocation102_spill] sm:$0xff] }
0x10ae   : > { %v4966_v35 = vpop.permute.xlu0 %4965  ;;  %5065 = vrot.lane.b32.xlu0 %v4811_v11, %s11543_s6  ;;  %v10222_v36 = vpack.c.bf16 %v5880_v7, %v5879_v54  ;;  %v4968_v41 = vpop.permute.xlu1 %4967  ;;  %v4871_v2 = vmul.f32 %v19859_v34, %v19818_v30  ;;  %v4872_v51 = vmul.f32 %v19861_v15, %v15670_v42  ;;  %v19862_v30 = vld [vmem:[#allocation61_spill] sm:$0xff] }
0x10af   : > { %v5009_v10 = vsub.f32 %v4865_v55, %v4966_v35  ;;  %v5010_v0 = vsub.f32 %v4866_v46, %v4968_v41  ;;  %v4873_v19 = vmul.f32 %v19862_v30, %v19819_v27  ;;  %v19863_v41 = vld [vmem:[#allocation136_spill] sm:$0xff] }
0x10b0   : > { %10224 = vmatprep.subr.msk.bf16.mxu0 %vm13266_vm3, %v10222_v36  ;;  %v4874_v43 = vmul.f32 %v19863_v41, %v15681_v24 }
0x10b1   : > { %5109 = vrot.lane.b32.xlu1 %v5009_v10, %s11543_s6  ;;  %10227 = vmatpush3.bf16.xpose.msk.msra.mxu0 %vm13266_vm3, %v10222_v36 }
0x10b2   : > { %5067 = vrot.lane.b32.xlu0 %v4812_v44, %s11543_s6 }
0x10b5   : > { %5111 = vrot.lane.b32.xlu1 %v5010_v0, %s11543_s6 }
0x10b6   : > { %7231 = vrot.lane.b32.xlu0 %v19848_v25, %s11538_s8 }
0x10b8   : > { %v4970_v61 = vpop.permute.xlu0 %4969 }
0x10b9   : > { %v5011_v59 = vsub.f32 %v4867_v23, %v4970_v61  ;;  %v4875_v23 = vmul.f32 %v19864_v50, %v15664_v49 }
0x10ba   : > { %7235 = vrot.lane.b32.xlu0 %v19850_v6, %s11538_s8 }
0x10bb   : > { %5113 = vrot.lane.b32.xlu1 %v5011_v59, %s11543_s6 }
0x10be   : > { %7239 = vrot.lane.b32.xlu0 %v19851_v37, %s11538_s8  ;;  %v10670_v3 = vpop.permute.xlu1 %10669 }
0x10bf   : > { %v10672_v1 = vunpack.i.h.bf16 %v10670_v3  ;;  %v10671_v4 = vunpack.i.l.bf16 %v10670_v3 }
0x10c2   : > { %v10675_v47 = vpop.permute.xlu0 %10674  ;;  %7243 = vrot.lane.b32.xlu0 %v19853_v22, %s11538_s8  ;;  %v4972_v56 = vpop.permute.xlu1 %4971 }
0x10c3   : > { %v10677_v33 = vunpack.i.h.bf16 %v10675_v47  ;;  %v10676_v14 = vunpack.i.l.bf16 %v10675_v47  ;;  %v5012_v45 = vsub.f32 %v4868_v48, %v4972_v56  ;;  %v4876_v48 = vmul.f32 %v19865_v57, %v15692_v28 }
0x10c5   : > { %v5881_v20 = vsel %vm1032_vm2, %v10671_v4, %v10676_v14  ;;  %v5882_v8 = vsel %vm1032_vm2, %v10672_v1, %v10677_v33  ;;  %5115 = vrot.lane.b32.xlu1 %v5012_v45, %s11543_s6  ;;  %v19866_v33 = vld [vmem:[#allocation5_spill] sm:$0xff]  ;;  %v19867_v14 = vld [vmem:[#allocation18_spill] sm:$0xff] }
0x10c6   : > { %v4974_v18 = vpop.permute.xlu0 %4973  ;;  %7247 = vrot.lane.b32.xlu0 %v19855_v38, %s11538_s8  ;;  %v10228_v40 = vpack.c.bf16 %v5882_v8, %v5881_v20  ;;  %v4976_v12 = vpop.permute.xlu1 %4975  ;;  %v19869_v20 = vld [vmem:[#allocation28_spill] sm:$0xff] }
0x10c7   : > { %v5013_v21 = vsub.f32 %v4869_v26, %v4974_v18  ;;  %v5014_v62 = vsub.f32 %v4870_v39, %v4976_v12  ;;  %v19870_v18 = vld [vmem:[#allocation38_spill] sm:$0xff] }
0x10c8   : > { %10230 = vmatprep.subr.msk.bf16.mxu0 %vm13266_vm3, %v10228_v40 }
0x10c9   : > { %5117 = vrot.lane.b32.xlu1 %v5013_v21, %s11543_s6  ;;  %10233 = vmatpush3.bf16.xpose.msk.msra.mxu0 %vm13266_vm3, %v10228_v40  ;;  %v19871_v21 = vld [vmem:[#allocation59_spill] sm:$0xff] }
0x10ca   : > { %7251 = vrot.lane.b32.xlu0 %v19857_v29, %s11538_s8 }
0x10cd   : > { %5119 = vrot.lane.b32.xlu1 %v5014_v62, %s11543_s6  ;;  %v19873_v62 = vld [vmem:[#allocation93_spill] sm:$0xff] }
0x10ce   : > { %7255 = vrot.lane.b32.xlu0 %v19858_v5, %s11538_s8 }
0x10d0   : > { %v4978_v9 = vpop.permute.xlu0 %4977 }
0x10d1   : > { %v5015_v52 = vsub.f32 %v4871_v2, %v4978_v9 }
0x10d2   : > { %7259 = vrot.lane.b32.xlu0 %v19860_v32, %s11538_s8 }
0x10d3   : > { %5121 = vrot.lane.b32.xlu1 %v5015_v52, %s11543_s6 }
0x10d6   : > { %v10680_v17 = vpop.permute.xlu1 %10679 }
0x10d7   : > { %v10682_v31 = vunpack.i.h.bf16 %v10680_v17  ;;  %v10681_v55 = vunpack.i.l.bf16 %v10680_v17 }
0x10da   : > { %v10685_v11 = vpop.permute.xlu0 %10684  ;;  %v4980_v16 = vpop.permute.xlu1 %4979 }
0x10db   : > { %v10687_v54 = vunpack.i.h.bf16 %v10685_v11  ;;  %v10686_v7 = vunpack.i.l.bf16 %v10685_v11  ;;  %v5016_v13 = vsub.f32 %v4872_v51, %v4980_v16 }
0x10dd   : > { %v5883_v35 = vsel %vm1032_vm2, %v10681_v55, %v10686_v7  ;;  %v5884_v36 = vsel %vm1032_vm2, %v10682_v31, %v10687_v54  ;;  %5123 = vrot.lane.b32.xlu1 %v5016_v13, %s11543_s6 }
0x10de   : > { %v4982_v10 = vpop.permute.xlu0 %4981  ;;  %v10234_v60 = vpack.c.bf16 %v5884_v36, %v5883_v35 }
0x10df   : > { %v5017_v44 = vsub.f32 %v4873_v19, %v4982_v10 }
0x10e0   : > { %v4984_v42 = vpop.permute.xlu1 %4983  ;;  %10236 = vmatprep.subr.msk.bf16.mxu0 %vm13266_vm3, %v10234_v60 }
0x10e1   : > { %5125 = vrot.lane.b32.xlu1 %v5017_v44, %s11543_s6  ;;  %10239 = vmatpush3.bf16.xpose.msk.msra.mxu0 %vm13266_vm3, %v10234_v60  ;;  %v5018_v27 = vsub.f32 %v4874_v43, %v4984_v42 }
0x10e4   : > { %v4986_v46 = vpop.permute.xlu0 %4985  ;;  %v4988_v0 = vpop.permute.xlu1 %4987 }
0x10e5   : > { %5127 = vrot.lane.b32.xlu1 %v5018_v27, %s11543_s6  ;;  %v5019_v61 = vsub.f32 %v4875_v23, %v4986_v46  ;;  %v5020_v1 = vsub.f32 %v4876_v48, %v4988_v0 }
0x10e8   : > { %v5038_v59 = vpop.permute.xlu0 %5037  ;;  %v5102_v3 = vpop.permute.xlu1 %5101 }
0x10e9   : > { %v5149_v24 = vsel %vm1032_vm2, %v5038_v59, %v5102_v3  ;;  %5129 = vrot.lane.b32.xlu1 %v5019_v61, %s11543_s6 }
0x10ea   : > { %9784 = vmatprep.mubr.msk.f32.mxu0 %vm550_vm1, %v5149_v24 }
0x10ec   : > { %v5040_v47 = vpop.permute.xlu0 %5039  ;;  %v5104_v56 = vpop.permute.xlu1 %5103 }
0x10ed   : > { %v5150_v4 = vsel %vm1032_vm2, %v5040_v47, %v5104_v56  ;;  %5131 = vrot.lane.b32.xlu1 %v5020_v1, %s11543_s6 }
0x10ee   : > { %9785 = vmatmul.mubr.msk.f32.vlgmr.msra.gmra.mrb[64].mxu0 %vm550_vm1, %v5150_v4 }
0x10f0   : > { %v5042_v49 = vpop.permute.xlu0 %5041 }
0x10f1   : > { %7233 = vrot.lane.b32.xlu1 %v19866_v33, %s11538_s8 }
0x10f4   : > { %v5044_v28 = vpop.permute.xlu0 %5043 }
0x10f5   : > { %7237 = vrot.lane.b32.xlu1 %v19867_v14, %s11538_s8 }
0x10f8   : > { %v5046_v45 = vpop.permute.xlu0 %5045 }
0x10f9   : > { %7241 = vrot.lane.b32.xlu1 %v19868_v53, %s11538_s8 }
0x10fc   : > { %v5048_v26 = vpop.permute.xlu0 %5047 }
0x10fd   : > { %7245 = vrot.lane.b32.xlu1 %v19869_v20, %s11538_s8 }
0x1100   : > { %v5050_v8 = vpop.permute.xlu0 %5049 }
0x1101   : > { %7249 = vrot.lane.b32.xlu1 %v19870_v18, %s11538_s8 }
0x1104   : > { %v5052_v40 = vpop.permute.xlu0 %5051 }
0x1105   : > { %7253 = vrot.lane.b32.xlu1 %v19871_v21, %s11538_s8 }
0x1108   : > { %v5054_v12 = vpop.permute.xlu0 %5053 }
0x1109   : > { %7257 = vrot.lane.b32.xlu1 %v19872_v63, %s11538_s8 }
0x110c   : > { %v5056_v39 = vpop.permute.xlu0 %5055 }
0x110d   : > { %7261 = vrot.lane.b32.xlu1 %v19873_v62, %s11538_s8 }
0x1110   : > { %v5058_v34 = vpop.permute.xlu0 %5057 }
0x1114   : > { %v5060_v2 = vpop.permute.xlu0 %5059 }
0x1115   : > { %v5106_v9 = vpop.permute.xlu1 %5105 }
0x1116   : > { %v5151_v52 = vsel %vm1032_vm2, %v5042_v49, %v5106_v9 }
0x1117   : > { %9787 = vmatprep.mubr.msk.f32.mxu0 %vm550_vm1, %v5151_v52 }
0x1118   : > { %v5062_v17 = vpop.permute.xlu0 %5061 }
0x111c   : > { %v5064_v15 = vpop.permute.xlu0 %5063 }
0x111f   : > { %v5108_v51 = vpop.permute.xlu1 %5107 }
0x1120   : > { %v5152_v31 = vsel %vm1032_vm2, %v5044_v28, %v5108_v51  ;;  %v5066_v11 = vpop.permute.xlu0 %5065 }
0x1121   : > { %9788 = vmatmul.mubr.msk.f32.gmra.mrb[66].mxu0 %vm550_vm1, %v5152_v31 }
0x1123   : > { %v5110_v16 = vpop.permute.xlu1 %5109 }
0x1124   : > { %v5153_v55 = vsel %vm1032_vm2, %v5046_v45, %v5110_v16  ;;  %v5068_v54 = vpop.permute.xlu0 %5067 }
0x1125   : > { %9790 = vmatprep.mubr.msk.f32.mxu0 %vm550_vm1, %v5153_v55 }
0x1127   : > { %v5112_v7 = vpop.permute.xlu1 %5111 }
0x1128   : > { %v5154_v13 = vsel %vm1032_vm2, %v5048_v26, %v5112_v7  ;;  %v7232_v30 = vpop.permute.xlu0 %7231 }
0x1129   : > { %9791 = vmatmul.mubr.msk.f32.gmra.mrb[68].mxu0 %vm550_vm1, %v5154_v13  ;;  %v7279_v19 = vsel %vm550_vm1, %v7232_v30, 0.0  ;;  %v16682_v13 = vld [vmem:[%s18755_s4 + $0x20] sm:$0xff] }
0x112a   : > { %7280 = vadd.xlane.f32.xlu0 %v7279_v19 }
0x112c   : > { %v7236_v4 = vpop.permute.xlu0 %7235 }
0x112d   : > { %v5114_v35 = vpop.permute.xlu1 %5113  ;;  %v7285_v49 = vsel %vm550_vm1, %v7236_v4, 0.0 }
0x112e   : > { %v5155_v36 = vsel %vm1032_vm2, %v5050_v8, %v5114_v35 }
0x112f   : > { %9793 = vmatprep.mubr.msk.f32.mxu0 %vm550_vm1, %v5155_v36 }
0x1137   : > { %v5116_v10 = vpop.permute.xlu1 %5115 }
0x1138   : > { %v5156_v60 = vsel %vm1032_vm2, %v5052_v40, %v5116_v10  ;;  %v16693_v10 = vld [vmem:[%s18755_s4 + $0x28] sm:$0xff] }
0x1139   : > { %9794 = vmatmul.mubr.msk.f32.gmra.mrb[70].mxu0 %vm550_vm1, %v5156_v60  ;;  %v16702_v60 = vld [vmem:[%s18755_s4 + $0x30] sm:$0xff] }
0x113b   : > { %v5118_v44 = vpop.permute.xlu1 %5117 }
0x113c   : > { %v5157_v42 = vsel %vm1032_vm2, %v5054_v12, %v5118_v44 }
0x113d   : > { %9796 = vmatprep.mubr.msk.f32.mxu0 %vm550_vm1, %v5157_v42 }
0x113f   : > { %v5120_v41 = vpop.permute.xlu1 %5119 }
0x1140   : > { %v5158_v43 = vsel %vm1032_vm2, %v5056_v39, %v5120_v41  ;;  %6495 = vrot.lane.b32.xlu0 %v19848_v25, %s11541_s11 }
0x1141   : > { %9797 = vmatmul.mubr.msk.f32.gmra.mrb[72].mxu0 %vm550_vm1, %v5158_v43 }
0x1144   : > { %6499 = vrot.lane.b32.xlu0 %v19850_v6, %s11541_s11 }
0x1145   : > { %v5122_v27 = vpop.permute.xlu1 %5121 }
0x1146   : > { %v5159_v46 = vsel %vm1032_vm2, %v5058_v34, %v5122_v27 }
0x1147   : > { %9799 = vmatprep.mubr.msk.f32.mxu0 %vm550_vm1, %v5159_v46 }
0x114f   : > { %v5124_v0 = vpop.permute.xlu1 %5123 }
0x1150   : > { %v5160_v50 = vsel %vm1032_vm2, %v5060_v2, %v5124_v0 }
0x1151   : > { %9800 = vmatmul.mubr.msk.f32.gmra.mrb[74].mxu0 %vm550_vm1, %v5160_v50  ;;  %v16716_v50 = vld [vmem:[%s18755_s4 + $0x38] sm:$0xff] }
0x1153   : > { %v5126_v23 = vpop.permute.xlu1 %5125 }
0x1154   : > { %v5161_v61 = vsel %vm1032_vm2, %v5062_v17, %v5126_v23  ;;  %v16641_v17 = vld [vmem:[%s18755_s4 + $0x8] sm:$0xff]  ;;  %v16725_v23 = vld [vmem:[%s18755_s4 + $0x40] sm:$0xff] }
0x1155   : > { %9802 = vmatprep.mubr.msk.f32.mxu0 %vm550_vm1, %v5161_v61  ;;  %v16732_v61 = vld [vmem:[%s18755_s4 + $0x48] sm:$0xff] }
0x1157   : > { %v5128_v25 = vpop.permute.xlu1 %5127 }
0x1158   : > { %v5162_v59 = vsel %vm1032_vm2, %v5064_v15, %v5128_v25 }
0x1159   : > { %9803 = vmatmul.mubr.msk.f32.gmra.mrb[76].mxu0 %vm550_vm1, %v5162_v59 }
0x115b   : > { %v5130_v6 = vpop.permute.xlu1 %5129 }
0x115c   : > { %v5163_v3 = vsel %vm1032_vm2, %v5066_v11, %v5130_v6  ;;  %v16662_v11 = vld [vmem:[%s18755_s4 + $0x10] sm:$0xff] }
0x115d   : > { %9805 = vmatprep.mubr.msk.f32.mxu0 %vm550_vm1, %v5163_v3 }
0x115f   : > { %v5132_v57 = vpop.permute.xlu1 %5131 }
0x1160   : > { %v5164_v48 = vsel %vm1032_vm2, %v5068_v54, %v5132_v57 }
0x1161   : > { %9806 = vmatmul.mubr.msk.f32.gmra.mrb[78].mxu0 %vm550_vm1, %v5164_v48 }
0x1163   : > { %v7234_v24 = vpop.permute.xlu1 %7233 }
0x1164   : > { %v7282_v1 = vsel %vm550_vm1, %v7234_v24, 0.0 }
0x1165   : > { %7283 = vadd.xlane.f32.xlu1 %v7282_v1 }
0x1167   : > { %v7238_v47 = vpop.permute.xlu1 %7237 }
0x1168   : > { %v7288_v56 = vsel %vm550_vm1, %v7238_v47, 0.0 }
0x1169   : > { %7289 = vadd.xlane.f32.xlu0 %v7288_v56 }
0x116b   : > { %v7242_v28 = vpop.permute.xlu1 %7241 }
0x116c   : > { %v7294_v45 = vsel %vm550_vm1, %v7242_v28, 0.0  ;;  %v16753_v28 = vld [vmem:[%s18755_s4 + $0x58] sm:$0xff] }
0x116f   : > { %v7246_v8 = vpop.permute.xlu1 %7245 }
0x1173   : > { %v7250_v9 = vpop.permute.xlu1 %7249 }
0x1174   : > { %v7306_v52 = vsel %vm550_vm1, %v7250_v9, 0.0 }
0x1176   : > { %6497 = vrot.lane.b32.xlu1 %v19866_v33, %s11541_s11 }
0x1177   : > { %v7254_v30 = vpop.permute.xlu1 %7253 }
0x1178   : > { %v7312_v19 = vsel %vm550_vm1, %v7254_v30, 0.0 }
0x117b   : > { %v7258_v42 = vpop.permute.xlu1 %7257 }
0x117c   : > { %v7318_v43 = vsel %vm550_vm1, %v7258_v42, 0.0 }
0x117f   : > { %6501 = vrot.lane.b32.xlu0 %v19867_v14, %s11541_s11  ;;  %v7240_v14 = vpop.permute.xlu0 %7239  ;;  %v7262_v25 = vpop.permute.xlu1 %7261 }
0x1180   : > { %v7291_v26 = vsel %vm550_vm1, %v7240_v14, 0.0  ;;  %v7324_v3 = vsel %vm550_vm1, %v7262_v25, 0.0  ;;  %v16805_v25 = vld [vmem:[%s18755_s4 + $0x78] sm:$0xff] }
0x1183   : > { %6507 = vrot.lane.b32.xlu0 %v19853_v22, %s11541_s11  ;;  %v7244_v40 = vpop.permute.xlu0 %7243 }
0x1187   : > { %v7248_v16 = vpop.permute.xlu0 %7247 }
0x1188   : > { %v7303_v55 = vsel %vm550_vm1, %v7248_v16, 0.0  ;;  %v16767_v16 = vld [vmem:[%s18755_s4 + $0x50] sm:$0xff] }
0x118b   : > { %v7252_v54 = vpop.permute.xlu0 %7251 }
0x118c   : > { %v7309_v7 = vsel %vm550_vm1, %v7252_v54, 0.0  ;;  %v16779_v54 = vld [vmem:[%s18755_s4 + $0x68] sm:$0xff] }
0x118f   : > { %v7256_v35 = vpop.permute.xlu0 %7255 }
0x1190   : > { %v7315_v36 = vsel %vm550_vm1, %v7256_v35, 0.0 }
0x1193   : > { %v7260_v44 = vpop.permute.xlu0 %7259 }
0x1194   : > { %v7321_v27 = vsel %vm550_vm1, %v7260_v44, 0.0 }
0x119a   : > { %7286 = vadd.xlane.f32.xlu1 %v7285_v49 }
0x11a2   : > { %7295 = vadd.xlane.f32.xlu0 %v7294_v45 }
0x11ab   : > { %6503 = vrot.lane.b32.xlu1 %v19851_v37, %s11541_s11  ;;  %v7300_v37 = vsel %vm550_vm1, %v7246_v8, 0.0 }
0x11af   : > { %6505 = vrot.lane.b32.xlu1 %v19868_v53, %s11541_s11  ;;  %v16608_v53 = vld [vmem:[%s18755_s4] sm:$0xff] }
0x11b7   : > { %v16708_v41 = vpop.xlane.xlu0 %7280 }
0x11b8   : > { %6509 = vrot.lane.b32.xlu0 %v19869_v20, %s11541_s11 }
0x11bb   : > { %v6496_v46 = vpop.permute.xlu0 %6495 }
0x11bc   : > { %6515 = vrot.lane.b32.xlu0 %v19857_v29, %s11541_s11  ;;  %v6543_v0 = vsel %vm550_vm1, %v6496_v46, 0.0  ;;  %v16793_v46 = vld [vmem:[%s18755_s4 + $0x60] sm:$0xff] }
0x11bf   : > { %v6500_v6 = vpop.permute.xlu0 %6499 }
0x11c0   : > { %v6549_v1 = vsel %vm550_vm1, %v6500_v6, 0.0  ;;  %v16812_v6 = vld [vmem:[%s18754_s3] sm:$0xff] }
0x11c1   : > { %v16591_v22 = vpop.f32.mrb[64].mxu0 }
0x11c2   : > { %v16593_v33 = vpop.f32.mrb[65].mxu0 }
0x11d3   : > { %7292 = vadd.xlane.f32.xlu1 %v7291_v26 }
0x11db   : > { %7301 = vadd.xlane.f32.xlu0 %v7300_v37 }
0x11e4   : > { %6511 = vrot.lane.b32.xlu1 %v19855_v38, %s11541_s11 }
0x11e8   : > { %6513 = vrot.lane.b32.xlu1 %v19870_v18, %s11541_s11 }
0x11f1   : > { %6517 = vrot.lane.b32.xlu0 %v19871_v21, %s11541_s11  ;;  %v7297_v21 = vsel %vm550_vm1, %v7244_v40, 0.0 }
0x11f2   : > { %v16736_v59 = vpop.xlane.xlu1 %7283 }
0x11f4   : > { %v16603_v29 = vpop.f32.mrb[66].mxu0 }
0x11f5   : > { %19874 = vst [vmem:[#allocation40_spill] sm:$0xff] %v16603_v29  ;;  %7455 = vrot.lane.b32.xlu0 %v16608_v53, %s11537_s14  ;;  %v16612_v20 = vpop.f32.mrb[67].mxu0 }
0x11f6   : > { %v16739_v57 = vpop.xlane.xlu0 %7289  ;;  %v6498_v48 = vpop.permute.xlu1 %6497 }
0x11f7   : > { %v6546_v45 = vsel %vm550_vm1, %v6498_v48, 0.0 }
0x11f9   : > { %7663 = vrot.lane.b32.xlu0 %v16608_v53, %s11536_s20 }
0x11fa   : > { %v6502_v47 = vpop.permute.xlu0 %6501 }
0x11fb   : > { %v6552_v56 = vsel %vm550_vm1, %v6502_v47, 0.0 }
0x11fc   : > { %v16616_v38 = vpop.f32.mrb[68].mxu0 }
0x11fd   : > { %19875 = vst [vmem:[#allocation131_spill] sm:$0xff] %v16616_v38  ;;  %6523 = vrot.lane.b32.xlu0 %v19860_v32, %s11541_s11  ;;  %v16620_v18 = vpop.f32.mrb[69].mxu0  ;;  %v19904_v38 = vld [vmem:[#allocation6_spill] sm:$0xff] }
0x11fe   : > { %19876 = vst [vmem:[#allocation76_spill] sm:$0xff] %v16620_v18  ;;  %v6508_v14 = vpop.permute.xlu0 %6507 }
0x11ff   : > { %v6561_v40 = vsel %vm550_vm1, %v6508_v14, 0.0 }
0x120c   : > { %7298 = vadd.xlane.f32.xlu1 %v7297_v21  ;;  %v16623_v12 = vpop.f32.mrb[70].mxu0 }
0x120d   : > { %19877 = vst [vmem:[#allocation55_spill] sm:$0xff] %v16623_v12  ;;  %v16625_v39 = vpop.f32.mrb[71].mxu0 }
0x120e   : > { %19878 = vst [vmem:[#allocation121_spill] sm:$0xff] %v16625_v39 }
0x1214   : > { %v16627_v34 = vpop.f32.mrb[72].mxu0 }
0x1215   : > { %19879 = vst [vmem:[#allocation106_spill] sm:$0xff] %v16627_v34  ;;  %v16629_v2 = vpop.f32.mrb[73].mxu0  ;;  %v19890_v34 = vld [vmem:[#allocation8_spill] sm:$0xff] }
0x1216   : > { %19880 = vst [vmem:[#allocation123_spill] sm:$0xff] %v16629_v2 }
0x121c   : > { %7307 = vadd.xlane.f32.xlu0 %v7306_v52 }
0x121d   : > { %6519 = vrot.lane.b32.xlu1 %v19858_v5, %s11541_s11 }
0x1221   : > { %6521 = vrot.lane.b32.xlu1 %v19872_v63, %s11541_s11 }
0x1224   : > { %v16636_v32 = vpop.f32.mrb[74].mxu0 }
0x1225   : > { %19881 = vst [vmem:[#allocation129_spill] sm:$0xff] %v16636_v32  ;;  %7457 = vrot.lane.b32.xlu1 %v16641_v17, %s11537_s14  ;;  %v16645_v15 = vpop.f32.mrb[75].mxu0 }
0x1226   : > { %19882 = vst [vmem:[#allocation44_spill] sm:$0xff] %v16645_v15 }
0x1227   : > { %v16741_v24 = vpop.xlane.xlu1 %7286 }
0x1229   : > { %7665 = vrot.lane.b32.xlu1 %v16641_v17, %s11536_s20 }
0x122b   : > { %v6504_v4 = vpop.permute.xlu1 %6503 }
0x122c   : > { %v16649_v51 = vpop.f32.mrb[76].mxu0  ;;  %v6555_v49 = vsel %vm550_vm1, %v6504_v4, 0.0 }
0x122d   : > { %19883 = vst [vmem:[#allocation32_spill] sm:$0xff] %v16649_v51  ;;  %v16651_v5 = vpop.f32.mrb[77].mxu0 }
0x122e   : > { %19884 = vst [vmem:[#allocation140_spill] sm:$0xff] %v16651_v5 }
0x122f   : > { %v16758_v26 = vpop.xlane.xlu0 %7295  ;;  %v6506_v8 = vpop.permute.xlu1 %6505 }
0x1232   : > { %6525 = vrot.lane.b32.xlu0 %v19873_v62, %s11541_s11  ;;  %v16673_v62 = vld [vmem:[%s18755_s4 + $0x18] sm:$0xff] }
0x1233   : > { %v6510_v21 = vpop.permute.xlu0 %6509 }
0x1234   : > { %v16655_v63 = vpop.f32.mrb[78].mxu0  ;;  %v6564_v9 = vsel %vm550_vm1, %v6510_v21, 0.0 }
0x1235   : > { %19885 = vst [vmem:[#allocation57_spill] sm:$0xff] %v16655_v63  ;;  %v16657_v31 = vpop.f32.mrb[79].mxu0  ;;  %v19889_v63 = vld [vmem:[#allocation7_spill] sm:$0xff] }
0x1236   : > { %19886 = vst [vmem:[#allocation100_spill] sm:$0xff] %v16657_v31  ;;  %7667 = vrot.lane.b32.xlu0 %v16662_v11, %s11536_s20 }
0x1237   : > { %v6516_v30 = vpop.permute.xlu0 %6515 }
0x1238   : > { %v6573_v44 = vsel %vm550_vm1, %v6516_v30, 0.0 }
0x124d   : > { %7304 = vadd.xlane.f32.xlu1 %v7303_v55 }
0x1255   : > { %7310 = vadd.xlane.f32.xlu0 %v7309_v7  ;;  %v6558_v7 = vsel %vm550_vm1, %v6506_v8, 0.0  ;;  %v7328_v8 = vmul.f32 0.0625, %v16736_v59  ;;  %v19887_v59 = vld [vmem:[#allocation4_spill] sm:$0xff] }
0x125e   : > { %7459 = vrot.lane.b32.xlu1 %v16662_v11, %s11537_s14 }
0x1260   : > { %v16760_v37 = vpop.xlane.xlu1 %7292 }
0x1262   : > { %7461 = vrot.lane.b32.xlu1 %v16673_v62, %s11537_s14 }
0x1264   : > { %v6512_v52 = vpop.permute.xlu1 %6511 }
0x1265   : > { %v6567_v55 = vsel %vm550_vm1, %v6512_v52, 0.0 }
0x1266   : > { %7669 = vrot.lane.b32.xlu1 %v16673_v62, %s11536_s20 }
0x1268   : > { %v6514_v35 = vpop.permute.xlu1 %6513 }
0x1269   : > { %v6570_v47 = vsel %vm550_vm1, %v6514_v35, 0.0 }
0x126b   : > { %7463 = vrot.lane.b32.xlu0 %v16682_v13, %s11537_s14 }
0x126f   : > { %7671 = vrot.lane.b32.xlu0 %v16682_v13, %s11536_s20 }
0x128a   : > { %7313 = vadd.xlane.f32.xlu1 %v7312_v19  ;;  %v16784_v19 = vpop.xlane.xlu0 %7301 }
0x128e   : > { %7316 = vadd.xlane.f32.xlu0 %v7315_v36  ;;  %v6518_v42 = vpop.permute.xlu0 %6517 }
0x1292   : > { %v7456_v48 = vpop.permute.xlu0 %7455 }
0x1299   : > { %v16786_v36 = vpop.xlane.xlu1 %7298 }
0x129b   : > { %7465 = vrot.lane.b32.xlu1 %v16693_v10, %s11537_s14 }
0x129f   : > { %7673 = vrot.lane.b32.xlu1 %v16693_v10, %s11536_s20 }
0x12a4   : > { %7467 = vrot.lane.b32.xlu0 %v16702_v60, %s11537_s14 }
0x12a8   : > { %7675 = vrot.lane.b32.xlu0 %v16702_v60, %s11536_s20 }
0x12c3   : > { %7319 = vadd.xlane.f32.xlu1 %v7318_v43  ;;  %v6576_v43 = vsel %vm550_vm1, %v6518_v42, 0.0 }
0x12c7   : > { %7322 = vadd.xlane.f32.xlu0 %v7321_v27  ;;  %v6520_v27 = vpop.permute.xlu1 %6519 }
0x12cb   : > { %6544 = vadd.xlane.f32.xlu0 %v6543_v0  ;;  %v6579_v0 = vsel %vm550_vm1, %v6520_v27, 0.0 }
0x12d4   : > { %7469 = vrot.lane.b32.xlu1 %v16716_v50, %s11537_s14 }
0x12d8   : > { %7677 = vrot.lane.b32.xlu1 %v16716_v50, %s11536_s20 }
0x12e1   : > { %7471 = vrot.lane.b32.xlu0 %v16725_v23, %s11537_s14 }
0x12e5   : > { %7681 = vrot.lane.b32.xlu0 %v16732_v61, %s11536_s20 }
0x12fc   : > { %7325 = vadd.xlane.f32.xlu1 %v7324_v3  ;;  %v16819_v3 = vld [vmem:[%s18754_s3 + $0x8] sm:$0xff] }
0x1304   : > { %6550 = vadd.xlane.f32.xlu0 %v6549_v1  ;;  %v16827_v1 = vpop.permute.xlu0 %7663 }
0x1308   : > { %6553 = vadd.xlane.f32.xlu0 %v6552_v56  ;;  %v6524_v56 = vpop.permute.xlu0 %6523 }
0x1309   : > { %v6585_v21 = vsel %vm550_vm1, %v6524_v56, 0.0 }
0x130c   : > { %6556 = vadd.xlane.f32.xlu0 %v6555_v49  ;;  %v16830_v4 = vpop.xlane.xlu0 %7307 }
0x130d   : > { %7473 = vrot.lane.b32.xlu1 %v16732_v61, %s11537_s14 }
0x1310   : > { %v16832_v49 = vpop.permute.xlu0 %6525 }
0x1311   : > { %7679 = vrot.lane.b32.xlu1 %v16725_v23, %s11536_s20  ;;  %v6588_v12 = vsel %vm550_vm1, %v16832_v49, 0.0 }
0x1314   : > { %v16841_v14 = vpop.permute.xlu0 %7667 }
0x1322   : > { %7477 = vrot.lane.b32.xlu0 %v16753_v28, %s11537_s14 }
0x1335   : > { %6547 = vadd.xlane.f32.xlu1 %v6546_v45  ;;  %v16837_v45 = vld [vmem:[%s18755_s4 + $0x70] sm:$0xff] }
0x1341   : > { %6562 = vadd.xlane.f32.xlu0 %v6561_v40  ;;  %v16846_v40 = vpop.xlane.xlu0 %7310 }
0x1345   : > { %6565 = vadd.xlane.f32.xlu0 %v6564_v9  ;;  %v7344_v9 = vadd.f32 1.1920929e-07, %v7328_v8  ;;  %v16851_v52 = vpop.permute.xlu0 %7463  ;;  %v7329_v8 = vmul.f32 0.0625, %v16741_v24 }
0x1346   : > { %7475 = vrot.lane.b32.xlu1 %v16767_v16, %s11537_s14 }
0x1347   : > { %11104 = vrsqrt.f32 %v7344_v9 }
0x1349   : > { %6568 = vadd.xlane.f32.xlu0 %v6567_v55  ;;  %v16853_v55 = vpop.permute.xlu0 %7671 }
0x134a   : > { %7683 = vrot.lane.b32.xlu1 %v16767_v16, %s11536_s20 }
0x134d   : > { %v16855_v30 = vpop.xlane.xlu0 %7316 }
0x134e   : > { %7685 = vrot.lane.b32.xlu1 %v16753_v28, %s11536_s20 }
0x1351   : > { %v11105_v35 = vpop.eup %11104 }
0x1352   : > { %v16858_v42 = vmul.f32 %v11105_v35, %v19887_v59  ;;  %v7330_v35 = vmul.f32 0.0625, %v16739_v57  ;;  %v16889_v57 = vld [vmem:[%s18754_s3 + $0x10] sm:$0xff] }
0x135f   : > { %7481 = vrot.lane.b32.xlu0 %v16779_v54, %s11537_s14 }
0x1372   : > { %6559 = vadd.xlane.f32.xlu1 %v6558_v7  ;;  %v6522_v7 = vpop.permute.xlu1 %6521 }
0x1373   : > { %v6582_v9 = vsel %vm550_vm1, %v6522_v7, 0.0 }
0x137e   : > { %6574 = vadd.xlane.f32.xlu0 %v6573_v44  ;;  %v7458_v44 = vpop.permute.xlu1 %7457 }
0x137f   : > { %v7504_v27 = vmul.f32 %v7458_v44, %v16858_v42 }
0x1382   : > { %6577 = vadd.xlane.f32.xlu0 %v6576_v43  ;;  %v16860_v43 = vpop.permute.xlu0 %7467  ;;  %v7666_v24 = vpop.permute.xlu1 %7665 }
0x1383   : > { %7479 = vrot.lane.b32.xlu1 %v16793_v46, %s11537_s14 }
0x1386   : > { %6580 = vadd.xlane.f32.xlu0 %v6579_v0  ;;  %v7327_v0 = vmul.f32 0.0625, %v16708_v41  ;;  %v7345_v41 = vadd.f32 1.1920929e-07, %v7329_v8 }
0x1387   : > { %7687 = vrot.lane.b32.xlu1 %v16793_v46, %s11536_s20 }
0x1388   : > { %v7343_v56 = vadd.f32 1.1920929e-07, %v7327_v0 }
0x138a   : > { %11106 = vrsqrt.f32 %v7343_v56  ;;  %v19888_v56 = vld [vmem:[#allocation2_spill] sm:$0xff] }
0x138b   : > { %7689 = vrot.lane.b32.xlu1 %v16779_v54, %s11536_s20  ;;  %11108 = vrsqrt.f32 %v7345_v41 }
0x1394   : > { %v11107_v0 = vpop.eup %11106 }
0x1395   : > { %v16894_v8 = vmul.f32 %v11107_v0, %v19888_v56 }
0x1397   : > { %v7711_v5 = vmul.f32 %v16827_v1, %v16894_v8 }
0x139c   : > { %7485 = vrot.lane.b32.xlu0 %v16805_v25, %s11537_s14 }
0x13a0   : > { %7391 = vrot.lane.b32.xlu0 %v16812_v6, %s11536_s20 }
0x13a4   : > { %7393 = vrot.lane.b32.xlu0 %v16819_v3, %s11536_s20 }
0x13a8   : > { %7599 = vrot.lane.b32.xlu0 %v16812_v6, %s11537_s14 }
0x13ac   : > { %7601 = vrot.lane.b32.xlu0 %v16819_v3, %s11537_s14 }
0x13af   : > { %6571 = vadd.xlane.f32.xlu1 %v6570_v47  ;;  %v16865_v47 = vpop.permute.xlu0 %7675 }
0x13c0   : > { %7483 = vrot.lane.b32.xlu1 %v16837_v45, %s11537_s14 }
0x13c4   : > { %7691 = vrot.lane.b32.xlu1 %v16837_v45, %s11536_s20 }
0x13c8   : > { %7693 = vrot.lane.b32.xlu1 %v16805_v25, %s11536_s20 }
0x13cb   : > { %6586 = vadd.xlane.f32.xlu0 %v6585_v21  ;;  %v16870_v21 = vpop.xlane.xlu0 %7322 }
0x13cf   : > { %v16878_v44 = vpop.xlane.xlu0 %6544 }
0x13d3   : > { %v16884_v7 = vpop.permute.xlu0 %7471 }
0x13d7   : > { %v16903_v41 = vpop.permute.xlu0 %7681 }
0x13db   : > { %v16912_v51 = vpop.xlane.xlu0 %6550 }
0x13e1   : > { %7537 = vrot.lane.b32.xlu0 %v7504_v27, %s11537_s14  ;;  %v7346_v27 = vadd.f32 1.1920929e-07, %v7330_v35 }
0x13e3   : > { %11110 = vrsqrt.f32 %v7346_v27  ;;  %v7503_v27 = vmul.f32 %v7456_v48, %v16894_v8  ;;  %v7712_v48 = vmul.f32 %v7666_v24, %v16858_v42 }
0x13e5   : > { %6735 = vrot.lane.b32.xlu0 %v16608_v53, %s11547_s16 }
0x13e9   : > { %6943 = vrot.lane.b32.xlu0 %v16608_v53, %s11540_s29  ;;  %v16882_v53 = vpop.xlane.xlu1 %7304 }
0x13ec   : > { %6583 = vadd.xlane.f32.xlu1 %v6582_v9  ;;  %v11109_v9 = vpop.eup %11108 }
0x13ed   : > { %6737 = vrot.lane.b32.xlu0 %v16641_v17, %s11547_s16  ;;  %v7460_v35 = vpop.permute.xlu1 %7459  ;;  %v16907_v31 = vmul.f32 %v11109_v9, %v19889_v63  ;;  %v11111_v0 = vpop.eup %11110 }
0x13ee   : > { %v16918_v2 = vmul.f32 %v11111_v0, %v19890_v34 }
0x13ef   : > { %v7505_v32 = vmul.f32 %v7460_v35, %v16907_v31  ;;  %v7713_v1 = vmul.f32 %v16841_v14, %v16907_v31 }
0x13f1   : > { %6945 = vrot.lane.b32.xlu0 %v16641_v17, %s11540_s29  ;;  %v16899_v17 = vld [vmem:[%s18754_s3 + $0x18] sm:$0xff]  ;;  %v7462_v15 = vpop.permute.xlu1 %7461 }
0x13f2   : > { %v7506_v9 = vmul.f32 %v7462_v15, %v16918_v2  ;;  %v7331_v15 = vmul.f32 0.0625, %v16760_v37 }
0x13f4   : > { %v7347_v24 = vadd.f32 1.1920929e-07, %v7331_v15 }
0x13f5   : > { %7395 = vrot.lane.b32.xlu0 %v16889_v57, %s11536_s20  ;;  %v7670_v35 = vpop.permute.xlu1 %7669 }
0x13f6   : > { %11112 = vrsqrt.f32 %v7347_v24 }
0x13f9   : > { %7397 = vrot.lane.b32.xlu0 %v16899_v17, %s11536_s20  ;;  %v16976_v39 = vpop.xlane.xlu1 %7313 }
0x13fd   : > { %7535 = vrot.lane.b32.xlu1 %v7503_v27, %s11537_s14  ;;  %7603 = vrot.lane.b32.xlu0 %v16889_v57, %s11537_s14  ;;  %v16924_v27 = vpop.xlane.xlu0 %6553  ;;  %v7466_v49 = vpop.permute.xlu1 %7465 }
0x1401   : > { %7743 = vrot.lane.b32.xlu1 %v7711_v5, %s11533_s27  ;;  %7539 = vrot.lane.b32.xlu0 %v7505_v32, %s11537_s14  ;;  %v16931_v0 = vpop.xlane.xlu0 %6556  ;;  %v7714_v32 = vmul.f32 %v7670_v35, %v16918_v2  ;;  %v19896_v35 = vld [vmem:[#allocation10_spill] sm:$0xff] }
0x1402   : > { %19891 = vst [vmem:[#allocation98_spill] sm:$0xff] %v16931_v0 }
0x1405   : > { %7745 = vrot.lane.b32.xlu1 %v7712_v48, %s11533_s27  ;;  %7541 = vrot.lane.b32.xlu0 %v7506_v9, %s11537_s14  ;;  %v16936_v5 = vpop.permute.xlu0 %7477  ;;  %v16955_v9 = vld [vmem:[%s18754_s3 + $0x20] sm:$0xff] }
0x1406   : > { %19895 = vst [vmem:[#allocation96_spill] sm:$0xff] %v16955_v9 }
0x1409   : > { %7747 = vrot.lane.b32.xlu0 %v7713_v1, %s11533_s27  ;;  %v16940_v48 = vpop.xlane.xlu0 %6562  ;;  %v11113_v1 = vpop.eup %11112 }
0x140a   : > { %19892 = vst [vmem:[#allocation145_spill] sm:$0xff] %v16940_v48 }
0x140d   : > { %7749 = vrot.lane.b32.xlu0 %v7714_v32, %s11533_s27  ;;  %v16946_v14 = vpop.xlane.xlu0 %6565  ;;  %v16960_v32 = vmul.f32 %v11113_v1, %v19896_v35  ;;  %v7333_v35 = vmul.f32 0.0625, %v16786_v36 }
0x140e   : > { %19893 = vst [vmem:[#allocation90_spill] sm:$0xff] %v16946_v14 }
0x140f   : > { %19897 = vst [vmem:[#allocation149_spill] sm:$0xff] %v16960_v32  ;;  %v7507_v24 = vmul.f32 %v16851_v52, %v16960_v32  ;;  %v7715_v1 = vmul.f32 %v16853_v55, %v16960_v32  ;;  %v7334_v52 = vmul.f32 0.0625, %v16784_v19  ;;  %v7674_v55 = vpop.permute.xlu1 %7673 }
0x1411   : > { %6739 = vrot.lane.b32.xlu0 %v16662_v11, %s11547_s16  ;;  %v16950_v37 = vpop.xlane.xlu0 %6568 }
0x1412   : > { %19894 = vst [vmem:[#allocation147_spill] sm:$0xff] %v16950_v37 }
0x1413   : > { %v16996_v19 = vpop.xlane.xlu1 %7319 }
0x1415   : > { %6741 = vrot.lane.b32.xlu0 %v16673_v62, %s11547_s16  ;;  %v16964_v15 = vpop.permute.xlu0 %7481 }
0x1419   : > { %6743 = vrot.lane.b32.xlu0 %v16682_v13, %s11547_s16  ;;  %v16971_v37 = vpop.xlane.xlu0 %6574 }
0x141a   : > { %19898 = vst [vmem:[#allocation146_spill] sm:$0xff] %v16971_v37  ;;  %v19902_v37 = vld [vmem:[#allocation14_spill] sm:$0xff] }
0x141d   : > { %6745 = vrot.lane.b32.xlu0 %v16693_v10, %s11547_s16  ;;  %v16978_v14 = vpop.xlane.xlu0 %6577 }
0x141e   : > { %19899 = vst [vmem:[#allocation148_spill] sm:$0xff] %v16978_v14  ;;  %v7332_v14 = vmul.f32 0.0625, %v16758_v26  ;;  %v7470_v26 = vpop.permute.xlu1 %7469 }
0x1421   : > { %7399 = vrot.lane.b32.xlu0 %v16955_v9, %s11536_s20 }
0x1422   : > { %v7678_v58 = vpop.permute.xlu1 %7677 }
0x1425   : > { %7607 = vrot.lane.b32.xlu0 %v16955_v9, %s11537_s14 }
0x1429   : > { %6589 = vadd.xlane.f32.xlu1 %v6588_v12  ;;  %7543 = vrot.lane.b32.xlu0 %v7507_v24, %s11537_s14  ;;  %v16985_v12 = vpop.xlane.xlu0 %6580  ;;  %v7350_v24 = vadd.f32 1.1920929e-07, %v7334_v52  ;;  %v7348_v52 = vadd.f32 1.1920929e-07, %v7332_v14 }
0x142a   : > { %19900 = vst [vmem:[#allocation73_spill] sm:$0xff] %v16985_v12  ;;  %v17003_v12 = vld [vmem:[%s18754_s3 + $0x30] sm:$0xff] }
0x142b   : > { %11114 = vrsqrt.f32 %v7350_v24  ;;  %19901 = vst [vmem:[#allocation139_spill] sm:$0xff] %v17003_v12 }
0x142c   : > { %11116 = vrsqrt.f32 %v7348_v52  ;;  %v17026_v52 = vpop.xlane.xlu1 %7325 }
0x142d   : > { %7751 = vrot.lane.b32.xlu0 %v7715_v1, %s11533_s27  ;;  %v16991_v1 = vpop.permute.xlu0 %7485 }
0x1431   : > { %6747 = vrot.lane.b32.xlu0 %v16702_v60, %s11547_s16  ;;  %v17007_v24 = vpop.permute.xlu0 %7391 }
0x1435   : > { %6749 = vrot.lane.b32.xlu0 %v16716_v50, %s11547_s16  ;;  %v17015_v14 = vpop.permute.xlu0 %7393 }
0x1439   : > { %6751 = vrot.lane.b32.xlu0 %v16725_v23, %s11547_s16  ;;  %v17028_v32 = vpop.permute.xlu0 %7599 }
0x143a   : > { %7605 = vrot.lane.b32.xlu1 %v16899_v17, %s11537_s14 }
0x143d   : > { %6753 = vrot.lane.b32.xlu0 %v16732_v61, %s11547_s16 }
0x143e   : > { %6947 = vrot.lane.b32.xlu1 %v16662_v11, %s11540_s29  ;;  %v11115_v11 = vpop.eup %11114 }
0x143f   : > { %v17018_v48 = vmul.f32 %v11115_v11, %v19902_v37  ;;  %v11117_v11 = vpop.eup %11116  ;;  %v7474_v37 = vpop.permute.xlu1 %7473 }
0x1441   : > { %7403 = vrot.lane.b32.xlu0 %v17003_v12, %s11536_s20  ;;  %19903 = vst [vmem:[#allocation143_spill] sm:$0xff] %v17018_v48 }
0x1442   : > { %6949 = vrot.lane.b32.xlu1 %v16673_v62, %s11540_s29  ;;  %v7510_v62 = vmul.f32 %v7470_v26, %v17018_v48 }
0x1445   : > { %7611 = vrot.lane.b32.xlu0 %v17003_v12, %s11537_s14  ;;  %v17045_v12 = vpop.permute.xlu0 %7601 }
0x1446   : > { %6951 = vrot.lane.b32.xlu1 %v16682_v13, %s11540_s29  ;;  %v17033_v13 = vld [vmem:[%s18754_s3 + $0x28] sm:$0xff] }
0x1447   : > { %19905 = vst [vmem:[#allocation124_spill] sm:$0xff] %v17033_v13 }
0x1449   : > { %10689 = vrot.lane.b32.xlu0 %v19904_v38, %s11543_s6  ;;  %v7718_v38 = vmul.f32 %v7678_v58, %v17018_v48  ;;  %v7336_v58 = vmul.f32 0.0625, %v16830_v4 }
0x144a   : > { %6953 = vrot.lane.b32.xlu1 %v16693_v10, %s11540_s29  ;;  %v19906_v10 = vld [vmem:[#allocation11_spill] sm:$0xff] }
0x144b   : > { %v17040_v26 = vmul.f32 %v11117_v11, %v19906_v10  ;;  %v17056_v11 = vpop.permute.xlu1 %7679 }
0x144d   : > { %7549 = vrot.lane.b32.xlu0 %v7510_v62, %s11537_s14  ;;  %19907 = vst [vmem:[#allocation92_spill] sm:$0xff] %v17040_v26  ;;  %v7508_v62 = vmul.f32 %v7466_v49, %v17040_v26  ;;  %v7352_v49 = vadd.f32 1.1920929e-07, %v7336_v58 }
0x144e   : > { %7401 = vrot.lane.b32.xlu1 %v17033_v13, %s11536_s20 }
0x144f   : > { %v17064_v4 = vpop.xlane.xlu1 %6547  ;;  %11118 = vrsqrt.f32 %v7352_v49 }
0x1451   : > { %7757 = vrot.lane.b32.xlu0 %v7718_v38, %s11533_s27  ;;  %v7716_v38 = vmul.f32 %v7674_v55, %v17040_v26  ;;  %v19912_v26 = vld [vmem:[#allocation12_spill] sm:$0xff] }
0x1452   : > { %7609 = vrot.lane.b32.xlu1 %v17033_v13, %s11537_s14 }
0x1453   : > { %v17074_v58 = vpop.permute.xlu1 %7475 }
0x1455   : > { %6963 = vrot.lane.b32.xlu0 %v16767_v16, %s11540_s29 }
0x1456   : > { %7545 = vrot.lane.b32.xlu1 %v7508_v62, %s11537_s14  ;;  %v7349_v62 = vadd.f32 1.1920929e-07, %v7333_v35 }
0x1457   : > { %v17091_v35 = vpop.permute.xlu1 %7683 }
0x1458   : > { %v17052_v48 = vpop.xlane.xlu0 %6586  ;;  %11120 = vrsqrt.f32 %v7349_v62  ;;  %v19910_v62 = vld [vmem:[#allocation20_spill] sm:$0xff] }
0x1459   : > { %19908 = vst [vmem:[#allocation39_spill] sm:$0xff] %v17052_v48  ;;  %6965 = vrot.lane.b32.xlu0 %v16753_v28, %s11540_s29 }
0x145a   : > { %7753 = vrot.lane.b32.xlu1 %v7716_v38, %s11533_s27  ;;  %v17081_v38 = vld [vmem:[%s18754_s3 + $0x40] sm:$0xff] }
0x145b   : > { %19909 = vst [vmem:[#allocation88_spill] sm:$0xff] %v17081_v38 }
0x145c   : > { %v17059_v10 = vpop.permute.xlu0 %7537 }
0x145d   : > { %6759 = vrot.lane.b32.xlu0 %v16793_v46, %s11547_s16 }
0x145e   : > { %6955 = vrot.lane.b32.xlu1 %v16702_v60, %s11540_s29 }
0x1460   : > { %v17068_v55 = vpop.permute.xlu0 %6735 }
0x1461   : > { %6761 = vrot.lane.b32.xlu0 %v16779_v54, %s11547_s16 }
0x1462   : > { %6957 = vrot.lane.b32.xlu1 %v16716_v50, %s11540_s29  ;;  %v11119_v50 = vpop.eup %11118 }
0x1463   : > { %v17098_v48 = vmul.f32 %v11119_v50, %v19910_v62  ;;  %v19914_v50 = vld [vmem:[#allocation13_spill] sm:$0xff] }
0x1464   : > { %v17076_v36 = vpop.permute.xlu0 %6943 }
0x1465   : > { %7407 = vrot.lane.b32.xlu0 %v17081_v38, %s11536_s20  ;;  %19911 = vst [vmem:[#allocation33_spill] sm:$0xff] %v17098_v48  ;;  %v7512_v18 = vmul.f32 %v7474_v37, %v17098_v48 }
0x1466   : > { %6959 = vrot.lane.b32.xlu1 %v16725_v23, %s11540_s29  ;;  %v17105_v23 = vld [vmem:[%s18754_s3 + $0x38] sm:$0xff] }
0x1467   : > { %19913 = vst [vmem:[#allocation142_spill] sm:$0xff] %v17105_v23 }
0x1468   : > { %v17087_v60 = vpop.permute.xlu0 %6737 }
0x1469   : > { %7615 = vrot.lane.b32.xlu0 %v17081_v38, %s11537_s14  ;;  %v11121_v38 = vpop.eup %11120 }
0x146a   : > { %6961 = vrot.lane.b32.xlu1 %v16732_v61, %s11540_s29  ;;  %v17110_v61 = vpop.permute.xlu1 %7685  ;;  %v17116_v62 = vmul.f32 %v11121_v38, %v19914_v50  ;;  %v19918_v50 = vld [vmem:[#allocation9_spill] sm:$0xff] }
0x146c   : > { %v17095_v49 = vpop.permute.xlu0 %6945  ;;  %19915 = vst [vmem:[#allocation117_spill] sm:$0xff] %v17116_v62  ;;  %v7509_v0 = vmul.f32 %v16860_v43, %v17116_v62 }
0x146d   : > { %10699 = vrot.lane.b32.xlu0 %v19912_v26, %s11543_s6  ;;  %v7720_v26 = vmul.f32 %v16903_v41, %v17098_v48 }
0x146e   : > { %7405 = vrot.lane.b32.xlu1 %v17105_v23, %s11536_s20  ;;  %v17124_v13 = vpop.xlane.xlu1 %6559 }
0x146f   : > { %19916 = vst [vmem:[#allocation168_spill] sm:$0xff] %v17124_v13 }
0x1470   : > { %v17112_v29 = vpop.permute.xlu0 %7395 }
0x1471   : > { %7553 = vrot.lane.b32.xlu0 %v7512_v18, %s11537_s14  ;;  %v7717_v18 = vmul.f32 %v16865_v47, %v17116_v62 }
0x1472   : > { %7613 = vrot.lane.b32.xlu1 %v17105_v23, %s11537_s14  ;;  %v17136_v41 = vpop.permute.xlu1 %7479 }
0x1474   : > { %v17126_v37 = vpop.permute.xlu0 %7397 }
0x1475   : > { %7761 = vrot.lane.b32.xlu0 %v7720_v26, %s11533_s27  ;;  %v7335_v26 = vmul.f32 0.0625, %v16882_v53 }
0x1476   : > { %7547 = vrot.lane.b32.xlu1 %v7509_v0, %s11537_s14  ;;  %v17145_v0 = vpop.permute.xlu1 %7687 }
0x1477   : > { %v7351_v48 = vadd.f32 1.1920929e-07, %v7335_v26  ;;  %v17177_v26 = vld [vmem:[%s18754_s3 + $0x48] sm:$0xff] }
0x1478   : > { %v17132_v38 = vpop.permute.xlu0 %7603  ;;  %19922 = vst [vmem:[#allocation170_spill] sm:$0xff] %v17177_v26 }
0x1479   : > { %6971 = vrot.lane.b32.xlu0 %v16837_v45, %s11540_s29  ;;  %11122 = vrsqrt.f32 %v7351_v48 }
0x147a   : > { %7755 = vrot.lane.b32.xlu1 %v7717_v18, %s11533_s27  ;;  %v17156_v62 = vpop.permute.xlu1 %7689 }
0x147c   : > { %v17139_v43 = vpop.permute.xlu0 %7539 }
0x147d   : > { %6765 = vrot.lane.b32.xlu0 %v16805_v25, %s11547_s16 }
0x147e   : > { %6755 = vrot.lane.b32.xlu1 %v16767_v16, %s11547_s16  ;;  %v17162_v23 = vpop.xlane.xlu1 %6571 }
0x147f   : > { %19919 = vst [vmem:[#allocation166_spill] sm:$0xff] %v17162_v23 }
0x1480   : > { %v17147_v47 = vpop.permute.xlu0 %7541 }
0x1481   : > { %6973 = vrot.lane.b32.xlu0 %v16805_v25, %s11540_s29 }
0x1482   : > { %6757 = vrot.lane.b32.xlu1 %v16753_v28, %s11547_s16  ;;  %v17170_v28 = vpop.permute.xlu1 %7483 }
0x1483   : > { %v11123_v48 = vpop.eup %11122 }
0x1484   : > { %v17154_v18 = vpop.permute.xlu0 %7747 }
0x1485   : > { %19917 = vst [vmem:[#allocation105_spill] sm:$0xff] %v17154_v18 }
0x1486   : > { %10694 = vrot.lane.b32.xlu1 %v19918_v50, %s11543_s6  ;;  %v17186_v13 = vpop.permute.xlu1 %7691 }
0x1488   : > { %v17160_v16 = vpop.permute.xlu0 %7749 }
0x148a   : > { %6967 = vrot.lane.b32.xlu1 %v16793_v46, %s11540_s29  ;;  %v19924_v46 = vld [vmem:[#allocation17_spill] sm:$0xff]  ;;  %v17197_v34 = vpop.permute.xlu1 %7693 }
0x148b   : > { %v17184_v23 = vmul.f32 %v11123_v48, %v19924_v46  ;;  %v19928_v48 = vld [vmem:[#allocation64_spill] sm:$0xff] }
0x148c   : > { %v17166_v25 = vpop.permute.xlu0 %6739 }
0x148d   : > { %19920 = vst [vmem:[#allocation70_spill] sm:$0xff] %v17166_v25  ;;  %19925 = vst [vmem:[#allocation167_spill] sm:$0xff] %v17184_v23 }
0x148e   : > { %6969 = vrot.lane.b32.xlu1 %v16779_v54, %s11540_s29  ;;  %v7511_v54 = vmul.f32 %v16884_v7, %v17184_v23  ;;  %v17208_v7 = vpop.xlane.xlu1 %6583 }
0x148f   : > { %19931 = vst [vmem:[#allocation122_spill] sm:$0xff] %v17208_v7 }
0x1490   : > { %v17172_v53 = vpop.permute.xlu0 %6741 }
0x1491   : > { %19921 = vst [vmem:[#allocation172_spill] sm:$0xff] %v17172_v53  ;;  %v7719_v53 = vmul.f32 %v17056_v11, %v17184_v23 }
0x1492   : > { %7409 = vrot.lane.b32.xlu1 %v17177_v26, %s11536_s20 }
0x1494   : > { %v17181_v50 = vpop.permute.xlu0 %6743 }
0x1495   : > { %19923 = vst [vmem:[#allocation115_spill] sm:$0xff] %v17181_v50 }
0x1496   : > { %7617 = vrot.lane.b32.xlu1 %v17177_v26, %s11537_s14  ;;  %v17206_v26 = vsel %vm519_vm4, %v16591_v22, -1e+30 }
0x1497   : > { %19930 = vst [vmem:[#allocation175_spill] sm:$0xff] %v17206_v26 }
0x1498   : > { %v17192_v9 = vpop.permute.xlu0 %6745 }
0x1499   : > { %19926 = vst [vmem:[#allocation144_spill] sm:$0xff] %v17192_v9 }
0x149a   : > { %7551 = vrot.lane.b32.xlu1 %v7511_v54, %s11537_s14  ;;  %v7338_v54 = vmul.f32 0.0625, %v16976_v39  ;;  %v17237_v39 = vld [vmem:[%s18754_s3 + $0x50] sm:$0xff] }
0x149c   : > { %v17199_v50 = vpop.permute.xlu0 %7399  ;;  %v7354_v46 = vadd.f32 1.1920929e-07, %v7338_v54 }
0x149d   : > { %19927 = vst [vmem:[#allocation171_spill] sm:$0xff] %v17199_v50 }
0x149e   : > { %7759 = vrot.lane.b32.xlu1 %v7719_v53, %s11533_s27  ;;  %v17218_v53 = vpop.permute.xlu1 %7535  ;;  %11124 = vrsqrt.f32 %v7354_v46  ;;  %v7340_v46 = vmul.f32 0.0625, %v16996_v19 }
0x14a0   : > { %v17210_v9 = vpop.permute.xlu0 %7607  ;;  %6144 = vmax.xlane.f32.xlu0 %v17206_v26  ;;  %v7356_v63 = vadd.f32 1.1920929e-07, %v7340_v46  ;;  %v17269_v46 = vsel %vm518_vm5, %v16593_v33, -1e+30 }
0x14a1   : > { %19932 = vst [vmem:[#allocation169_spill] sm:$0xff] %v17210_v9 }
0x14a2   : > { %6763 = vrot.lane.b32.xlu1 %v16837_v45, %s11547_s16  ;;  %v17222_v22 = vpop.permute.xlu1 %7743  ;;  %11126 = vrsqrt.f32 %v7356_v63 }
0x14a4   : > { %v17215_v11 = vpop.permute.xlu0 %7543 }
0x14a5   : > { %19933 = vst [vmem:[#allocation174_spill] sm:$0xff] %v17215_v11 }
0x14a6   : > { %v17228_v9 = vpop.permute.xlu1 %7745 }
0x14a8   : > { %v17220_v23 = vpop.permute.xlu0 %7751  ;;  %v11125_v54 = vpop.eup %11124 }
0x14a9   : > { %19934 = vst [vmem:[#allocation66_spill] sm:$0xff] %v17220_v23 }
0x14ac   : > { %v17224_v50 = vpop.permute.xlu0 %6747 }
0x14ad   : > { %19935 = vst [vmem:[#allocation173_spill] sm:$0xff] %v17224_v50 }
0x14b0   : > { %v17226_v7 = vpop.permute.xlu0 %6749 }
0x14b1   : > { %19936 = vst [vmem:[#allocation177_spill] sm:$0xff] %v17226_v7  ;;  %v19940_v7 = vld [vmem:[#allocation25_spill] sm:$0xff] }
0x14b2   : > { %v17245_v50 = vmul.f32 %v11125_v54, %v19940_v7 }
0x14b4   : > { %v17230_v26 = vpop.permute.xlu0 %6751  ;;  %19941 = vst [vmem:[#allocation19_spill] sm:$0xff] %v17245_v50  ;;  %v7722_v19 = vmul.f32 %v17110_v61, %v17245_v50  ;;  %v17276_v61 = vld [vmem:[%s18754_s3 + $0x60] sm:$0xff] }
0x14b5   : > { %19937 = vst [vmem:[#allocation3_spill] sm:$0xff] %v17230_v26  ;;  %v7514_v26 = vmul.f32 %v16936_v5, %v17245_v50  ;;  %19948 = vst [vmem:[#allocation181_spill] sm:$0xff] %v17276_v61  ;;  %v7337_v50 = vmul.f32 0.0625, %v16846_v40 }
0x14b6   : > { %v17232_v45 = vpop.xlane.xlu1 %6589  ;;  %7411 = vrot.lane.b32.xlu0 %v17237_v39, %s11536_s20 }
0x14b7   : > { %19938 = vst [vmem:[#allocation176_spill] sm:$0xff] %v17232_v45  ;;  %v19942_v45 = vld [vmem:[#allocation21_spill] sm:$0xff] }
0x14b8   : > { %v17241_v23 = vpop.permute.xlu0 %6753 }
0x14b9   : > { %19939 = vst [vmem:[#allocation16_spill] sm:$0xff] %v17241_v23 }
0x14ba   : > { %v17247_v11 = vpop.permute.xlu1 %7605  ;;  %10709 = vrot.lane.b32.xlu0 %v19942_v45, %s11543_s6 }
0x14bc   : > { %v17253_v25 = vpop.permute.xlu0 %7403 }
0x14bd   : > { %19943 = vst [vmem:[#allocation179_spill] sm:$0xff] %v17253_v25 }
0x14be   : > { %v17255_v18 = vpop.permute.xlu1 %6947  ;;  %7557 = vrot.lane.b32.xlu0 %v7514_v26, %s11537_s14 }
0x14c0   : > { %v17260_v54 = vpop.permute.xlu0 %7611 }
0x14c1   : > { %19944 = vst [vmem:[#allocation24_spill] sm:$0xff] %v17260_v54  ;;  %v19949_v54 = vld [vmem:[#allocation30_spill] sm:$0xff] }
0x14c2   : > { %v17262_v7 = vpop.permute.xlu1 %6949  ;;  %7765 = vrot.lane.b32.xlu0 %v7722_v19, %s11533_s27  ;;  %v7341_v19 = vmul.f32 0.0625, %v16870_v21 }
0x14c3   : > { %19945 = vst [vmem:[#allocation178_spill] sm:$0xff] %v17262_v7 }
0x14c4   : > { %v10690_v45 = vpop.permute.xlu0 %10689  ;;  %v7357_v5 = vadd.f32 1.1920929e-07, %v7341_v19 }
0x14c5   : > { %v10692_v25 = vunpack.i.h.bf16 %v10690_v45  ;;  %v10691_v23 = vunpack.i.l.bf16 %v10690_v45  ;;  %v11127_v45 = vpop.eup %11126 }
0x14c6   : > { %v17271_v26 = vpop.permute.xlu1 %6951  ;;  %7415 = vrot.lane.b32.xlu0 %v17276_v61, %s11536_s20  ;;  %6142 = vmax.xlane.f32.xlu1 %v17269_v46  ;;  %11128 = vrsqrt.f32 %v7357_v5 }
0x14c7   : > { %19947 = vst [vmem:[#allocation29_spill] sm:$0xff] %v17271_v26  ;;  %v10240_v63 = vpack.c.bf16 %v10692_v25, %v10691_v23  ;;  %v17288_v26 = vmul.f32 %v11127_v45, %v19949_v54  ;;  %v19951_v23 = vld [vmem:[#allocation31_spill] sm:$0xff]  ;;  %v7353_v25 = vadd.f32 1.1920929e-07, %v7337_v50 }
0x14c8   : > { %v17301_v19 = vpop.permute.xlu0 %7549 }
0x14c9   : > { %10241 = vmatprep.subr.bf16.mxu1 %v10240_v63  ;;  %19950 = vst [vmem:[#allocation41_spill] sm:$0xff] %v17288_v26  ;;  %v7516_v21 = vmul.f32 %v16964_v15, %v17288_v26  ;;  %v7724_v40 = vmul.f32 %v17156_v62, %v17288_v26  ;;  %19952 = vst [vmem:[#allocation60_spill] sm:$0xff] %v17301_v19  ;;  %11130 = vrsqrt.f32 %v7353_v25  ;;  %v6591_v15 = vmul.f32 0.0625, %v16878_v44  ;;  %v17316_v62 = vld [vmem:[%s18754_s3 + $0x70] sm:$0xff]  ;;  %v17323_v25 = vld [vmem:[%s18754_s3 + $0x58] sm:$0xff] }
0x14ca   : > { %10243 = vmatpush3.bf16.msra.mxu1 %v10240_v63  ;;  %v17282_v33 = vpop.permute.xlu1 %6953  ;;  %7623 = vrot.lane.b32.xlu0 %v17276_v61, %s11537_s14  ;;  %19955 = vst [vmem:[#allocation77_spill] sm:$0xff] %v17316_v62 }
0x14cb   : > { %v6607_v44 = vadd.f32 1.1920929e-07, %v6591_v15 }
0x14cc   : > { %v17309_v50 = vpop.permute.xlu0 %7757 }
0x14cd   : > { %19954 = vst [vmem:[#allocation180_spill] sm:$0xff] %v17309_v50  ;;  %11132 = vrsqrt.f32 %v6607_v44 }
0x14ce   : > { %v17290_v7 = vpop.permute.xlu1 %7401  ;;  %10719 = vrot.lane.b32.xlu0 %v19951_v23, %s11543_s6  ;;  %v19953_v23 = vld [vmem:[#allocation15_spill] sm:$0xff] }
0x14d0   : > { %v17339_v19 = vpop.permute.xlu0 %6963 }
0x14d1   : > { %19959 = vst [vmem:[#allocation136_spill] sm:$0xff] %v17339_v19 }
0x14d2   : > { %v17296_v63 = vpop.permute.xlu1 %7609  ;;  %7561 = vrot.lane.b32.xlu0 %v7516_v21, %s11537_s14  ;;  %v11129_v21 = vpop.eup %11128 }
0x14d3   : > { %v11131_v61 = vpop.eup %11130 }
0x14d6   : > { %v17303_v45 = vpop.permute.xlu1 %7545  ;;  %7769 = vrot.lane.b32.xlu0 %v7724_v40, %s11533_s27  ;;  %v6592_v40 = vmul.f32 0.0625, %v17064_v4  ;;  %v7339_v4 = vmul.f32 0.0625, %v16855_v30 }
0x14d7   : > { %10704 = vrot.lane.b32.xlu1 %v19953_v23, %s11543_s6  ;;  %v19956_v23 = vld [vmem:[#allocation34_spill] sm:$0xff] }
0x14d8   : > { %v17329_v26 = vmul.f32 %v11129_v21, %v19956_v23  ;;  %v6608_v15 = vadd.f32 1.1920929e-07, %v6592_v40  ;;  %v7439_v21 = vmul.f32 %v17007_v24, %v16894_v8  ;;  %v7355_v40 = vadd.f32 1.1920929e-07, %v7339_v4 }
0x14da   : > { %v17311_v5 = vpop.permute.xlu1 %7753  ;;  %7419 = vrot.lane.b32.xlu0 %v17316_v62, %s11536_s20  ;;  %19957 = vst [vmem:[#allocation102_spill] sm:$0xff] %v17329_v26  ;;  %v7517_v50 = vmul.f32 %v17170_v28, %v17329_v26  ;;  %v7440_v28 = vmul.f32 %v17015_v14, %v16858_v42  ;;  %v7725_v44 = vmul.f32 %v17186_v13, %v17329_v26  ;;  %11134 = vrsqrt.f32 %v6608_v15 }
0x14db   : > { %7413 = vrot.lane.b32.xlu1 %v17323_v25, %s11536_s20  ;;  %v7583_v30 = vadd.f32 %v17218_v53, %v7439_v21  ;;  %11136 = vrsqrt.f32 %v7355_v40  ;;  %v17392_v40 = vld [vmem:[%s18754_s3 + $0x68] sm:$0xff] }
0x14de   : > { %v17331_v54 = vpop.permute.xlu1 %6955  ;;  %7627 = vrot.lane.b32.xlu0 %v17316_v62, %s11537_s14  ;;  %v19960_v62 = vld [vmem:[#allocation22_spill] sm:$0xff] }
0x14df   : > { %19958 = vst [vmem:[#allocation61_spill] sm:$0xff] %v17331_v54  ;;  %7619 = vrot.lane.b32.xlu1 %v17237_v39, %s11537_s14  ;;  %v17348_v54 = vmul.f32 %v11131_v61, %v19960_v62  ;;  %v17360_v61 = vpop.permute.xlu0 %6965 }
0x14e1   : > { %19961 = vst [vmem:[#allocation54_spill] sm:$0xff] %v17348_v54  ;;  %v7513_v24 = vmul.f32 %v17074_v58, %v17348_v54  ;;  %v7721_v13 = vmul.f32 %v17091_v35, %v17348_v54  ;;  %v11133_v58 = vpop.eup %11132 }
0x14e2   : > { %v17344_v23 = vpop.permute.xlu1 %6957  ;;  %7563 = vrot.lane.b32.xlu0 %v7517_v50, %s11537_s14  ;;  %v7584_v50 = vadd.f32 %v17059_v10, %v7440_v28  ;;  %v6639_v15 = vmul.f32 0.25, %v11133_v58  ;;  %v19962_v28 = vld [vmem:[#allocation26_spill] sm:$0xff] }
0x14e3   : > { %7621 = vrot.lane.b32.xlu1 %v17323_v25, %s11537_s14  ;;  %v17372_v10 = vpop.permute.xlu0 %6759 }
0x14e4   : > { %v10728_v14 = vpack.i.bf16 %v7584_v50, %v7583_v30  ;;  %v11135_v21 = vpop.eup %11134  ;;  %v17381_v35 = vmul.f32 %v6639_v15, %v19888_v56  ;;  %v19965_v15 = vld [vmem:[#allocation27_spill] sm:$0xff] }
0x14e5   : > { %v11137_v50 = vpop.eup %11136 }
0x14e6   : > { %v17362_v19 = vpop.permute.xlu1 %6959  ;;  %7771 = vrot.lane.b32.xlu0 %v7725_v44, %s11533_s27  ;;  %19963 = vst [vmem:[#allocation111_spill] sm:$0xff] %v17381_v35  ;;  %v6640_v44 = vmul.f32 0.25, %v11135_v21  ;;  %v6783_v56 = vmul.f32 %v17068_v55, %v17381_v35  ;;  %v17406_v21 = vmul.f32 %v11137_v50, %v19965_v15  ;;  %v7442_v50 = vmul.f32 %v17126_v37, %v16918_v2  ;;  %v19968_v37 = vld [vmem:[#allocation46_spill] sm:$0xff] }
0x14e7   : > { %7555 = vrot.lane.b32.xlu1 %v7513_v24, %s11537_s14  ;;  %v17383_v30 = vpop.permute.xlu0 %6761 }
0x14e8   : > { %19966 = vst [vmem:[#allocation18_spill] sm:$0xff] %v17406_v21 }
0x14ea   : > { %v17368_v53 = vpop.permute.xlu1 %6961  ;;  %10729 = vrot.lane.b32.xlu0 %v10728_v14, %s11538_s8  ;;  %v7342_v14 = vmul.f32 0.0625, %v17026_v52  ;;  %v7515_v52 = vmul.f32 %v17136_v41, %v17406_v21  ;;  %v7441_v41 = vmul.f32 %v17112_v29, %v16907_v31 }
0x14eb   : > { %7763 = vrot.lane.b32.xlu1 %v7721_v13, %s11533_s27  ;;  %v17400_v13 = vmul.f32 %v6640_v44, %v19887_v59  ;;  %v17412_v26 = vpop.permute.xlu0 %7407  ;;  %v7723_v44 = vmul.f32 %v17145_v0, %v17406_v21 }
0x14ec   : > { %v7358_v59 = vadd.f32 1.1920929e-07, %v7342_v14  ;;  %v7585_v0 = vadd.f32 %v17139_v43, %v7441_v41  ;;  %v17445_v43 = vld [vmem:[%s18754_s3 + $0x78] sm:$0xff] }
0x14ed   : > { %19964 = vst [vmem:[#allocation5_spill] sm:$0xff] %v17400_v13  ;;  %v19969_v41 = vld [vmem:[#allocation45_spill] sm:$0xff] }
0x14ee   : > { %v17374_v4 = vpop.permute.xlu1 %7405  ;;  %6671 = vrot.lane.b32.xlu0 %v16812_v6, %s11540_s29  ;;  %11138 = vrsqrt.f32 %v7358_v59 }
0x14ef   : > { %10714 = vrot.lane.b32.xlu1 %v19962_v28, %s11543_s6  ;;  %v6784_v28 = vmul.f32 %v17087_v60, %v17400_v13  ;;  %v17424_v60 = vpop.permute.xlu0 %7615 }
0x14f0   : > { %19967 = vst [vmem:[#allocation23_spill] sm:$0xff] %v17424_v60 }
0x14f2   : > { %v17385_v24 = vpop.permute.xlu1 %7613  ;;  %6673 = vrot.lane.b32.xlu0 %v16819_v3, %s11540_s29 }
0x14f3   : > { %7417 = vrot.lane.b32.xlu1 %v17392_v40, %s11536_s20  ;;  %v10700_v59 = vpop.permute.xlu0 %10699 }
0x14f4   : > { %v10701_v54 = vunpack.i.l.bf16 %v10700_v59 }
0x14f6   : > { %v17402_v58 = vpop.permute.xlu1 %7547  ;;  %6815 = vrot.lane.b32.xlu0 %v6783_v56, %s11537_s14 }
0x14f7   : > { %7625 = vrot.lane.b32.xlu1 %v17392_v40, %s11537_s14 }
0x14fa   : > { %v17416_v55 = vpop.permute.xlu1 %7755  ;;  %6817 = vrot.lane.b32.xlu0 %v6784_v28, %s11537_s14  ;;  %v7586_v28 = vadd.f32 %v17147_v47, %v7442_v50  ;;  %v11139_v47 = vpop.eup %11138 }
0x14fb   : > { %7559 = vrot.lane.b32.xlu1 %v7515_v52, %s11537_s14 }
0x14fc   : > { %v10738_v52 = vpack.i.bf16 %v7586_v28, %v7585_v0  ;;  %v17450_v28 = vmul.f32 %v11139_v47, %v19969_v41 }
0x14fe   : > { %v17426_v56 = vpop.permute.xlu1 %6755  ;;  %6675 = vrot.lane.b32.xlu0 %v16889_v57, %s11540_s29  ;;  %19970 = vst [vmem:[#allocation28_spill] sm:$0xff] %v17450_v28 }
0x14ff   : > { %7767 = vrot.lane.b32.xlu1 %v7723_v44, %s11533_s27  ;;  %v10702_v44 = vunpack.i.h.bf16 %v10700_v59  ;;  %v7726_v59 = vmul.f32 %v17197_v34, %v17450_v28  ;;  %v6594_v34 = vmul.f32 0.0625, %v16924_v27  ;;  %v6992_v27 = vmul.f32 %v17095_v49, %v17400_v13 }
0x1500   : > { %v7649_v49 = vmul.f32 %v17132_v38, %v16907_v31  ;;  %v19976_v31 = vld [vmem:[#allocation70_spill] sm:$0xff] }
0x1501   : > { %v10248_v0 = vpack.c.bf16 %v10702_v44, %v10701_v54 }
0x1502   : > { %v17435_v14 = vpop.permute.xlu1 %6757  ;;  %6677 = vrot.lane.b32.xlu0 %v16899_v17, %s11540_s29 }
0x1503   : > { %10724 = vrot.lane.b32.xlu1 %v19968_v37, %s11543_s6 }
0x1506   : > { %v10695_v21 = vpop.permute.xlu1 %10694  ;;  %10739 = vrot.lane.b32.xlu0 %v10738_v52, %s11538_s8  ;;  %v7648_v52 = vmul.f32 %v17045_v12, %v16858_v42  ;;  %v6593_v42 = vmul.f32 0.0625, %v16912_v51 }
0x1507   : > { %v10697_v29 = vunpack.i.h.bf16 %v10695_v21  ;;  %v10696_v60 = vunpack.i.l.bf16 %v10695_v21  ;;  %7421 = vrot.lane.b32.xlu1 %v17445_v43, %s11536_s20  ;;  %v7518_v21 = vmul.f32 %v16991_v1, %v17450_v28  ;;  %v17466_v1 = vpop.permute.xlu0 %7553 }
0x1509   : > { %v10244_v50 = vpack.c.bf16 %v10697_v29, %v10696_v60  ;;  %v7647_v60 = vmul.f32 %v17028_v32, %v16894_v8  ;;  %v7792_v29 = vsub.f32 %v7648_v52, %v17228_v9  ;;  %v6609_v8 = vadd.f32 1.1920929e-07, %v6593_v42  ;;  %v19973_v52 = vld [vmem:[#allocation105_spill] sm:$0xff]  ;;  %v19977_v42 = vld [vmem:[#allocation8_spill] sm:$0xff] }
0x150a   : > { %v6991_v32 = vmul.f32 %v17076_v36, %v17381_v35  ;;  %v7650_v36 = vmul.f32 %v17247_v11, %v16918_v2  ;;  %v17496_v47 = vpop.permute.xlu1 %6967  ;;  %v19986_v35 = vld [vmem:[#allocation40_spill] sm:$0xff] }
0x150b   : > { %10245 = vmatprep.subr.bf16.mxu1 %v10244_v50  ;;  %7629 = vrot.lane.b32.xlu1 %v17445_v43, %s11537_s14  ;;  %v7791_v54 = vsub.f32 %v7647_v60, %v17222_v22  ;;  %v17470_v12 = vpop.permute.xlu0 %7761  ;;  %11140 = vrsqrt.f32 %v6609_v8  ;;  %v6610_v22 = vadd.f32 1.1920929e-07, %v6594_v34  ;;  %v7793_v60 = vsub.f32 %v7649_v49, %v19973_v52  ;;  %v19979_v34 = vld [vmem:[#allocation172_spill] sm:$0xff] }
0x150c   : > { %10247 = vmatpush3.bf16.msra.mxu1 %v10244_v50 }
0x150d   : > { %10249 = vmatprep.subr.bf16.mxu1 %v10248_v0  ;;  %v10733_v44 = vpack.i.bf16 %v7792_v29, %v7791_v54  ;;  %11142 = vrsqrt.f32 %v6610_v22 }
0x150e   : > { %v17510_v29 = vpop.permute.xlu1 %6969 }
0x150f   : > { %7565 = vrot.lane.b32.xlu1 %v7518_v21, %s11537_s14  ;;  %v17477_v9 = vpop.permute.xlu0 %6971 }
0x1510   : > { %10251 = vmatpush3.bf16.msra.mxu1 %v10248_v0  ;;  %v7794_v0 = vsub.f32 %v7650_v36, %v17160_v16 }
0x1513   : > { %7773 = vrot.lane.b32.xlu1 %v7726_v59, %s11533_s27  ;;  %v10743_v59 = vpack.i.bf16 %v7794_v0, %v7793_v60 }
0x1517   : > { %10734 = vrot.lane.b32.xlu1 %v10733_v44, %s11538_s8 }
0x151b   : > { %6879 = vrot.lane.b32.xlu1 %v16812_v6, %s11547_s16  ;;  %v17486_v6 = vsel %vm520_vm8, %v16612_v20, -1e+30  ;;  %v11141_v20 = vpop.eup %11140 }
0x151c   : > { %v6641_v21 = vmul.f32 0.25, %v11141_v20  ;;  %v11143_v2 = vpop.eup %11142  ;;  %v19980_v20 = vld [vmem:[#allocation96_spill] sm:$0xff] }
0x151d   : > { %v6642_v44 = vmul.f32 0.25, %v11143_v2 }
0x151f   : > { %6881 = vrot.lane.b32.xlu1 %v16819_v3, %s11547_s16  ;;  %v17491_v3 = vpop.permute.xlu0 %6765  ;;  %v17521_v8 = vmul.f32 %v6642_v44, %v19977_v42 }
0x1521   : > { %19978 = vst [vmem:[#allocation75_spill] sm:$0xff] %v17521_v8 }
0x1523   : > { %7023 = vrot.lane.b32.xlu1 %v6991_v32, %s11533_s27  ;;  %v17500_v50 = vpop.permute.xlu0 %6973  ;;  %v6786_v32 = vmul.f32 %v19979_v34, %v17521_v8 }
0x1524   : > { %19972 = vst [vmem:[#allocation38_spill] sm:$0xff] %v17500_v50 }
0x1525   : > { %6146 = vmax.xlane.f32.xlu0 %v17486_v6 }
0x1527   : > { %7025 = vrot.lane.b32.xlu1 %v6992_v27, %s11533_s27 }
0x152b   : > { %6883 = vrot.lane.b32.xlu1 %v16889_v57, %s11547_s16  ;;  %v19974_v57 = vld [vmem:[#allocation7_spill] sm:$0xff] }
0x152c   : > { %v17513_v54 = vmul.f32 %v6641_v21, %v19974_v57  ;;  %v19981_v21 = vld [vmem:[#allocation124_spill] sm:$0xff] }
0x152d   : > { %v17508_v11 = vpop.xlane.xlu0 %6144 }
0x152e   : > { %19975 = vst [vmem:[#allocation59_spill] sm:$0xff] %v17513_v54  ;;  %v6785_v38 = vmul.f32 %v19976_v31, %v17513_v54  ;;  %v6993_v22 = vmul.f32 %v17255_v18, %v17513_v54 }
0x152f   : > { %6885 = vrot.lane.b32.xlu1 %v16899_v17, %s11547_s16  ;;  %v17523_v17 = vpop.permute.xlu1 %7409 }
0x1531   : > { %v17518_v16 = vpop.permute.xlu0 %7411 }
0x1533   : > { %10744 = vrot.lane.b32.xlu1 %v10743_v59, %s11538_s8  ;;  %v17532_v36 = vpop.permute.xlu1 %7617 }
0x1535   : > { %v10710_v27 = vpop.permute.xlu0 %10709 }
0x1536   : > { %v10711_v34 = vunpack.i.l.bf16 %v10710_v27 }
0x1537   : > { %6819 = vrot.lane.b32.xlu1 %v6785_v38, %s11537_s14  ;;  %v17538_v0 = vpop.permute.xlu1 %7551  ;;  %v10712_v38 = vunpack.i.h.bf16 %v10710_v27  ;;  %v19988_v27 = vld [vmem:[#allocation168_spill] sm:$0xff] }
0x1539   : > { %v17536_v49 = vpop.permute.xlu0 %7557  ;;  %v10256_v13 = vpack.c.bf16 %v10712_v38, %v10711_v34 }
0x153b   : > { %7027 = vrot.lane.b32.xlu1 %v6993_v22, %s11533_s27  ;;  %6821 = vrot.lane.b32.xlu0 %v6786_v32, %s11537_s14  ;;  %v17546_v52 = vpop.permute.xlu1 %7759 }
0x153d   : > { %v17544_v18 = vpop.permute.xlu0 %7765 }
0x153e   : > { %19982 = vst [vmem:[#allocation93_spill] sm:$0xff] %v17544_v18 }
0x153f   : > { %6679 = vrot.lane.b32.xlu0 %v19980_v20, %s11540_s29  ;;  %v17550_v2 = vpop.permute.xlu1 %6763 }
0x1541   : > { %v17548_v60 = vpop.permute.xlu0 %7415 }
0x1542   : > { %19983 = vst [vmem:[#allocation4_spill] sm:$0xff] %v17548_v60 }
0x1543   : > { %6887 = vrot.lane.b32.xlu0 %v19980_v20, %s11547_s16  ;;  %v19985_v20 = vld [vmem:[#allocation98_spill] sm:$0xff] }
0x1544   : > { %v6595_v37 = vmul.f32 0.0625, %v19985_v20 }
0x1545   : > { %v17552_v57 = vpop.permute.xlu0 %7623 }
0x1546   : > { %19984 = vst [vmem:[#allocation2_spill] sm:$0xff] %v17552_v57 }
0x1547   : > { %6681 = vrot.lane.b32.xlu0 %v19981_v21, %s11540_s29 }
0x1549   : > { %v10720_v51 = vpop.permute.xlu0 %10719 }
0x1553   : > { %v6143_v59 = vpop.xlane.xlu1 %6142 }
0x1554   : > { %v6174_v44 = vsub.f32 %v17269_v46, %v6143_v59  ;;  %v17562_v46 = vsel %vm521_vm6, %v19986_v35, -1e+30  ;;  %v6611_v59 = vadd.f32 1.1920929e-07, %v6595_v37  ;;  %v19993_v35 = vld [vmem:[#allocation76_spill] sm:$0xff]  ;;  %v10722_v37 = vunpack.i.h.bf16 %v10720_v51 }
0x1555   : > { %v17579_v34 = vsel %vm522_vm10, %v19993_v35, -1e+30  ;;  %v10721_v35 = vunpack.i.l.bf16 %v10720_v51 }
0x1556   : > { %v6190_v31 = vmul.f32 1.442695, %v6174_v44  ;;  %v6596_v44 = vmul.f32 0.0625, %v19988_v27 }
0x1557   : > { %v10705_v42 = vpop.permute.xlu1 %10704 }
0x1558   : > { %11144 = vpow2.f32 %v6190_v31  ;;  %v10707_v32 = vunpack.i.h.bf16 %v10705_v42  ;;  %v10706_v22 = vunpack.i.l.bf16 %v10705_v42  ;;  %v17568_v42 = vpop.permute.xlu0 %7561 }
0x1559   : > { %19990 = vst [vmem:[#allocation22_spill] sm:$0xff] %v17568_v42  ;;  %11146 = vrsqrt.f32 %v6611_v59 }
0x155a   : > { %v10252_v50 = vpack.c.bf16 %v10707_v32, %v10706_v22 }
0x155b   : > { %v17556_v54 = vpop.permute.xlu1 %7413 }
0x155c   : > { %10253 = vmatprep.subr.bf16.mxu1 %v10252_v50  ;;  %v17581_v22 = vpop.permute.xlu0 %7769 }
0x155d   : > { %10255 = vmatpush3.bf16.msra.mxu1 %v10252_v50  ;;  %v6612_v50 = vadd.f32 1.1920929e-07, %v6596_v44  ;;  %19995 = vst [vmem:[#allocation105_spill] sm:$0xff] %v17581_v22  ;;  %v19998_v44 = vld [vmem:[#allocation178_spill] sm:$0xff] }
0x155e   : > { %10257 = vmatprep.subr.bf16.mxu1 %v10256_v13 }
0x155f   : > { %v17565_v31 = vpop.permute.xlu1 %7619  ;;  %6148 = vmax.xlane.f32.xlu1 %v17562_v46  ;;  %11148 = vrsqrt.f32 %v6612_v50 }
0x1560   : > { %19989 = vst [vmem:[#allocation64_spill] sm:$0xff] %v17565_v31  ;;  %v17588_v27 = vpop.permute.xlu0 %7419 }
0x1561   : > { %10259 = vmatpush3.bf16.msra.mxu1 %v10256_v13  ;;  %19997 = vst [vmem:[#allocation70_spill] sm:$0xff] %v17588_v27 }
0x1562   : > { %v17570_v32 = vpop.eup %11144 }
0x1563   : > { %19991 = vst [vmem:[#allocation27_spill] sm:$0xff] %v17570_v32  ;;  %9840 = vmatprep.mubr.f32.mxu1 %v17570_v32  ;;  %v17573_v38 = vpop.permute.xlu1 %7621  ;;  %v11147_v59 = vpop.eup %11146  ;;  %v6994_v32 = vmul.f32 %v19998_v44, %v17521_v8  ;;  %v20005_v44 = vld [vmem:[#allocation11_spill] sm:$0xff]  ;;  %v20020_v8 = vld [vmem:[#allocation142_spill] sm:$0xff] }
0x1564   : > { %19992 = vst [vmem:[#allocation45_spill] sm:$0xff] %v17573_v38  ;;  %v6643_v57 = vmul.f32 0.25, %v11147_v59  ;;  %v17593_v50 = vpop.permute.xlu0 %7627  ;;  %v10264_v59 = vpack.c.bf16 %v10722_v37, %v10721_v35  ;;  %v20010_v37 = vld [vmem:[#allocation29_spill] sm:$0xff] }
0x1565   : > { %19999 = vst [vmem:[#allocation8_spill] sm:$0xff] %v17593_v50 }
0x1566   : > { %6150 = vmax.xlane.f32.xlu0 %v17579_v34 }
0x1567   : > { %v17584_v13 = vpop.permute.xlu1 %7555 }
0x1569   : > { %v11149_v22 = vpop.eup %11148 }
0x156a   : > { %v6644_v27 = vmul.f32 0.25, %v11149_v22 }
0x156b   : > { %v17586_v20 = vpop.permute.xlu1 %7763 }
0x156c   : > { %19996 = vst [vmem:[#allocation7_spill] sm:$0xff] %v17586_v20  ;;  %v20001_v20 = vld [vmem:[#allocation10_spill] sm:$0xff] }
0x156d   : > { %v17598_v31 = vmul.f32 %v6643_v57, %v20001_v20  ;;  %v20008_v57 = vld [vmem:[#allocation175_spill] sm:$0xff] }
0x156e   : > { %v6175_v22 = vsub.f32 %v20008_v57, %v17508_v11  ;;  %v20014_v11 = vld [vmem:[#allocation139_spill] sm:$0xff] }
0x156f   : > { %v10715_v28 = vpop.permute.xlu1 %10714  ;;  %20002 = vst [vmem:[#allocation96_spill] sm:$0xff] %v17598_v31  ;;  %v6995_v20 = vmul.f32 %v20010_v37, %v17598_v31 }
0x1570   : > { %v10717_v42 = vunpack.i.h.bf16 %v10715_v28  ;;  %v10716_v18 = vunpack.i.l.bf16 %v10715_v28  ;;  %7029 = vrot.lane.b32.xlu1 %v6994_v32, %s11533_s27  ;;  %v20003_v28 = vld [vmem:[#allocation115_spill] sm:$0xff] }
0x1571   : > { %v6787_v51 = vmul.f32 %v20003_v28, %v17598_v31  ;;  %v20019_v31 = vld [vmem:[#allocation174_spill] sm:$0xff] }
0x1572   : > { %v10260_v60 = vpack.c.bf16 %v10717_v42, %v10716_v18  ;;  %v17607_v18 = vmul.f32 %v6644_v27, %v20005_v44  ;;  %v17609_v42 = vpop.permute.xlu0 %7563  ;;  %v6192_v27 = vmul.f32 1.442695, %v6175_v22  ;;  %v20015_v44 = vld [vmem:[#allocation92_spill] sm:$0xff]  ;;  %v20017_v22 = vld [vmem:[#allocation171_spill] sm:$0xff] }
0x1573   : > { %v17595_v38 = vpop.permute.xlu1 %7417  ;;  %20007 = vst [vmem:[#allocation40_spill] sm:$0xff] %v17609_v42  ;;  %v7444_v57 = vmul.f32 %v17290_v7, %v20015_v44 }
0x1574   : > { %20000 = vst [vmem:[#allocation172_spill] sm:$0xff] %v17595_v38  ;;  %10261 = vmatprep.subr.bf16.mxu1 %v10260_v60  ;;  %6889 = vrot.lane.b32.xlu1 %v19981_v21, %s11547_s16  ;;  %20006 = vst [vmem:[#allocation98_spill] sm:$0xff] %v17607_v18  ;;  %v20009_v21 = vld [vmem:[#allocation144_spill] sm:$0xff]  ;;  %11150 = vpow2.f32 %v6192_v27 }
0x1575   : > { %10263 = vmatpush3.bf16.msra.mxu1 %v10260_v60  ;;  %v6788_v60 = vmul.f32 %v20009_v21, %v17607_v18 }
0x1576   : > { %10265 = vmatprep.subr.bf16.mxu1 %v10264_v59  ;;  %v17622_v28 = vpop.permute.xlu0 %7771 }
0x1577   : > { %v17604_v32 = vpop.permute.xlu1 %7625  ;;  %20012 = vst [vmem:[#allocation76_spill] sm:$0xff] %v17622_v28  ;;  %v7588_v28 = vadd.f32 %v17303_v45, %v7444_v57 }
0x1578   : > { %20004 = vst [vmem:[#allocation124_spill] sm:$0xff] %v17604_v32  ;;  %6823 = vrot.lane.b32.xlu1 %v6787_v51, %s11537_s14 }
0x1579   : > { %10267 = vmatpush3.bf16.msra.mxu1 %v10264_v59 }
0x157a   : > { %v10730_v21 = vpop.permute.xlu0 %10729 }
0x157b   : > { %v17618_v35 = vpop.permute.xlu1 %7559 }
0x157c   : > { %20011 = vst [vmem:[#allocation168_spill] sm:$0xff] %v17618_v35  ;;  %7031 = vrot.lane.b32.xlu1 %v6995_v20, %s11533_s27  ;;  %6825 = vrot.lane.b32.xlu0 %v6788_v60, %s11537_s14  ;;  %v20016_v60 = vld [vmem:[#allocation149_spill] sm:$0xff]  ;;  %v20045_v35 = vld [vmem:[#allocation66_spill] sm:$0xff] }
0x157d   : > { %v7443_v20 = vmul.f32 %v20017_v22, %v20016_v60 }
0x157e   : > { %v17642_v42 = vpop.eup %11150 }
0x157f   : > { %v17624_v51 = vpop.permute.xlu1 %7767  ;;  %v7587_v27 = vadd.f32 %v20019_v31, %v7443_v20  ;;  %20022 = vst [vmem:[#allocation11_spill] sm:$0xff] %v17642_v42 }
0x1580   : > { %20013 = vst [vmem:[#allocation178_spill] sm:$0xff] %v17624_v51  ;;  %6683 = vrot.lane.b32.xlu0 %v20014_v11, %s11540_s29 }
0x1581   : > { %v10748_v7 = vpack.i.bf16 %v7588_v28, %v7587_v27  ;;  %v10732_v28 = vunpack.i.h.bf16 %v10730_v21 }
0x1583   : > { %v10725_v59 = vpop.permute.xlu1 %10724 }
0x1584   : > { %v10727_v37 = vunpack.i.h.bf16 %v10725_v59  ;;  %v10726_v50 = vunpack.i.l.bf16 %v10725_v59  ;;  %6891 = vrot.lane.b32.xlu0 %v20014_v11, %s11547_s16  ;;  %v17640_v59 = vpop.permute.xlu0 %6671 }
0x1585   : > { %20021 = vst [vmem:[#allocation115_spill] sm:$0xff] %v17640_v59 }
0x1586   : > { %v10268_v51 = vpack.c.bf16 %v10727_v37, %v10726_v50  ;;  %v10731_v37 = vunpack.i.l.bf16 %v10730_v21 }
0x1587   : > { %v17635_v32 = vpop.permute.xlu1 %7421 }
0x1588   : > { %20018 = vst [vmem:[#allocation10_spill] sm:$0xff] %v17635_v32  ;;  %10269 = vmatprep.subr.bf16.mxu1 %v10268_v51  ;;  %6685 = vrot.lane.b32.xlu0 %v20020_v8, %s11540_s29  ;;  %v17650_v50 = vpop.permute.xlu0 %6673 }
0x1589   : > { %10271 = vmatpush3.bf16.msra.mxu1 %v10268_v51  ;;  %20025 = vst [vmem:[#allocation29_spill] sm:$0xff] %v17650_v50 }
0x158b   : > { %v17644_v11 = vpop.permute.xlu1 %7629 }
0x158c   : > { %20023 = vst [vmem:[#allocation175_spill] sm:$0xff] %v17644_v11  ;;  %9841 = vmatmul.mubr.f32.vlgmr.msra.gmra.mrb[32].mxu1 %v17642_v42  ;;  %10749 = vrot.lane.b32.xlu0 %v10748_v7, %s11538_s8  ;;  %v17654_v57 = vpop.permute.xlu0 %6815 }
0x158d   : > { %20027 = vst [vmem:[#allocation92_spill] sm:$0xff] %v17654_v57 }
0x158f   : > { %v17648_v45 = vpop.permute.xlu1 %7565 }
0x1590   : > { %20024 = vst [vmem:[#allocation144_spill] sm:$0xff] %v17648_v45  ;;  %v17660_v59 = vpop.permute.xlu0 %6817 }
0x1591   : > { %20029 = vst [vmem:[#allocation171_spill] sm:$0xff] %v17660_v59 }
0x1593   : > { %v17652_v31 = vpop.permute.xlu1 %7773 }
0x1594   : > { %20026 = vst [vmem:[#allocation139_spill] sm:$0xff] %v17652_v31  ;;  %v20031_v31 = vld [vmem:[#allocation131_spill] sm:$0xff] }
0x1597   : > { %v10735_v51 = vpop.permute.xlu1 %10734 }
0x1598   : > { %v10737_v22 = vunpack.i.h.bf16 %v10735_v51  ;;  %v10736_v20 = vunpack.i.l.bf16 %v10735_v51  ;;  %v17670_v51 = vsel %vm523_vm7, %v20031_v31, -1e+30  ;;  %v20040_v31 = vld [vmem:[#allocation121_spill] sm:$0xff] }
0x159a   : > { %v7936_v27 = vsel %vm1032_vm2, %v10732_v28, %v10737_v22  ;;  %v7935_v11 = vsel %vm1032_vm2, %v10731_v37, %v10736_v20  ;;  %v20034_v37 = vld [vmem:[#allocation145_spill] sm:$0xff] }
0x159b   : > { %v17658_v42 = vpop.permute.xlu1 %6879  ;;  %v10272_v7 = vpack.c.bf16 %v7936_v27, %v7935_v11  ;;  %v6597_v22 = vmul.f32 0.0625, %v20034_v37  ;;  %v17676_v11 = vpop.permute.xlu0 %6675  ;;  %v17689_v37 = vsel %vm524_vm12, %v20040_v31, -1e+30  ;;  %v20044_v31 = vld [vmem:[#allocation169_spill] sm:$0xff] }
0x159c   : > { %20028 = vst [vmem:[#allocation149_spill] sm:$0xff] %v17658_v42  ;;  %20035 = vst [vmem:[#allocation142_spill] sm:$0xff] %v17676_v11  ;;  %v20037_v42 = vld [vmem:[#allocation90_spill] sm:$0xff] }
0x159d   : > { %10274 = vmatprep.subr.msk.bf16.mxu1 %vm13266_vm3, %v10272_v7  ;;  %v6613_v27 = vadd.f32 1.1920929e-07, %v6597_v22  ;;  %v6598_v59 = vmul.f32 0.0625, %v20037_v42  ;;  %v6996_v42 = vmul.f32 %v17282_v33, %v17607_v18 }
0x159e   : > { %10277 = vmatpush3.bf16.xpose.msk.msra.mxu1 %vm13266_vm3, %v10272_v7 }
0x159f   : > { %v17672_v28 = vpop.permute.xlu1 %6881  ;;  %11152 = vrsqrt.f32 %v6613_v27  ;;  %v6614_v50 = vadd.f32 1.1920929e-07, %v6598_v59  ;;  %v17683_v21 = vpop.permute.xlu0 %6677  ;;  %v7652_v59 = vmul.f32 %v17296_v63, %v20015_v44 }
0x15a0   : > { %20033 = vst [vmem:[#allocation174_spill] sm:$0xff] %v17672_v28  ;;  %6152 = vmax.xlane.f32.xlu1 %v17670_v51  ;;  %20039 = vst [vmem:[#allocation145_spill] sm:$0xff] %v17683_v21 }
0x15a1   : > { %11154 = vrsqrt.f32 %v6614_v50 }
0x15a3   : > { %v17678_v20 = vpop.permute.xlu1 %7023  ;;  %v10740_v22 = vpop.permute.xlu0 %10739 }
0x15a4   : > { %20036 = vst [vmem:[#allocation62_spill] sm:$0xff] %v17678_v20  ;;  %v7651_v20 = vmul.f32 %v20044_v31, %v20016_v60  ;;  %v10742_v11 = vunpack.i.h.bf16 %v10740_v22  ;;  %v10741_v32 = vunpack.i.l.bf16 %v10740_v22 }
0x15a6   : > { %v7795_v38 = vsub.f32 %v7651_v20, %v20045_v35 }
0x15a7   : > { %v17681_v7 = vpop.permute.xlu1 %7025 }
0x15a8   : > { %20038 = vst [vmem:[#allocation131_spill] sm:$0xff] %v17681_v7 }
0x15a9   : > { %v11153_v27 = vpop.eup %11152 }
0x15ab   : > { %v17691_v57 = vpop.permute.xlu1 %6883  ;;  %6154 = vmax.xlane.f32.xlu0 %v17689_v37  ;;  %v11155_v44 = vpop.eup %11154 }
0x15ac   : > { %20042 = vst [vmem:[#allocation90_spill] sm:$0xff] %v17691_v57  ;;  %v7796_v57 = vsub.f32 %v7652_v59, %v17311_v5  ;;  %v6646_v22 = vmul.f32 0.25, %v11155_v44 }
0x15ae   : > { %v10753_v5 = vpack.i.bf16 %v7796_v57, %v7795_v38  ;;  %v20049_v38 = vld [vmem:[#allocation177_spill] sm:$0xff] }
0x15af   : > { %v17696_v7 = vpop.permute.xlu1 %6885  ;;  %v20050_v57 = vld [vmem:[#allocation61_spill] sm:$0xff] }
0x15b0   : > { %20043 = vst [vmem:[#allocation121_spill] sm:$0xff] %v17696_v7  ;;  %v6645_v7 = vmul.f32 0.25, %v11153_v27  ;;  %v20053_v27 = vld [vmem:[#allocation170_spill] sm:$0xff] }
0x15b1   : > { %7033 = vrot.lane.b32.xlu1 %v6996_v42, %s11533_s27 }
0x15b2   : > { %v6147_v28 = vpop.xlane.xlu0 %6146 }
0x15b3   : > { %v6176_v50 = vsub.f32 %v17486_v6, %v6147_v28  ;;  %v10745_v21 = vpop.permute.xlu1 %10744  ;;  %v20046_v28 = vld [vmem:[#allocation13_spill] sm:$0xff] }
0x15b4   : > { %v10747_v33 = vunpack.i.h.bf16 %v10745_v21  ;;  %v10746_v18 = vunpack.i.l.bf16 %v10745_v21  ;;  %v17711_v59 = vmul.f32 %v6645_v7, %v20046_v28  ;;  %v20048_v21 = vld [vmem:[#allocation14_spill] sm:$0xff]  ;;  %v20052_v7 = vld [vmem:[#allocation88_spill] sm:$0xff] }
0x15b5   : > { %v6194_v63 = vmul.f32 1.442695, %v6176_v50  ;;  %6893 = vrot.lane.b32.xlu1 %v20020_v8, %s11547_s16  ;;  %v20047_v8 = vld [vmem:[#allocation173_spill] sm:$0xff]  ;;  %v20054_v50 = vld [vmem:[#allocation147_spill] sm:$0xff]  ;;  %v20058_v28 = vld [vmem:[#allocation166_spill] sm:$0xff] }
0x15b6   : > { %v7938_v42 = vsel %vm1032_vm2, %v10742_v11, %v10747_v33  ;;  %v7937_v60 = vsel %vm1032_vm2, %v10741_v32, %v10746_v18  ;;  %v6789_v35 = vmul.f32 %v20047_v8, %v17711_v59  ;;  %v17721_v32 = vmul.f32 %v6646_v22, %v20048_v21  ;;  %v17739_v31 = vpop.permute.xlu0 %6821 }
0x15b7   : > { %11156 = vpow2.f32 %v6194_v63  ;;  %v10278_v6 = vpack.c.bf16 %v7938_v42, %v7937_v60  ;;  %v6997_v11 = vmul.f32 %v20050_v57, %v17711_v59  ;;  %v6599_v33 = vmul.f32 0.0625, %v20054_v50  ;;  %v17742_v63 = vpop.permute.xlu1 %6819  ;;  %v20055_v42 = vld [vmem:[#allocation55_spill] sm:$0xff] }
0x15b8   : > { %v6790_v18 = vmul.f32 %v20049_v38, %v17721_v32  ;;  %v20056_v60 = vld [vmem:[#allocation79_spill] sm:$0xff]  ;;  %v6600_v22 = vmul.f32 0.0625, %v20058_v28  ;;  %v6998_v28 = vmul.f32 %v17344_v23, %v17721_v32 }
0x15b9   : > { %10280 = vmatprep.subr.msk.bf16.mxu1 %vm13266_vm3, %v10278_v6  ;;  %10754 = vrot.lane.b32.xlu1 %v10753_v5, %s11538_s8  ;;  %vm20057_vm11 = vcmp.le.s32.totalorder %v19928_v48, %v20056_v60  ;;  %v20061_v38 = vld [vmem:[#allocation123_spill] sm:$0xff] }
0x15ba   : > { %10283 = vmatpush3.bf16.xpose.msk.msra.mxu1 %vm13266_vm3, %v10278_v6  ;;  %v17744_v44 = vpop.permute.xlu0 %6679  ;;  %v17750_v5 = vsel %vm20057_vm11, %v20055_v42, -1e+30  ;;  %v6615_v6 = vadd.f32 1.1920929e-07, %v6599_v33  ;;  %v17762_v57 = vsel %vm526_vm14, %v20061_v38, -1e+30 }
0x15bb   : > { %v17754_v8 = vpop.permute.xlu1 %7027 }
0x15bc   : > { %20059 = vst [vmem:[#allocation66_spill] sm:$0xff] %v17754_v8  ;;  %11158 = vrsqrt.f32 %v6615_v6 }
0x15bd   : > { %6827 = vrot.lane.b32.xlu1 %v6789_v35, %s11537_s14  ;;  %v6616_v35 = vadd.f32 1.1920929e-07, %v6600_v22 }
0x15be   : > { %v17756_v21 = vpop.permute.xlu0 %6887 }
0x15bf   : > { %20060 = vst [vmem:[#allocation13_spill] sm:$0xff] %v17756_v21  ;;  %11160 = vrsqrt.f32 %v6616_v35  ;;  %v20063_v35 = vld [vmem:[#allocation17_spill] sm:$0xff] }
0x15c1   : > { %v17728_v20 = vpop.eup %11156  ;;  %7035 = vrot.lane.b32.xlu1 %v6997_v11, %s11533_s27  ;;  %6829 = vrot.lane.b32.xlu0 %v6790_v18, %s11537_s14 }
0x15c2   : > { %20051 = vst [vmem:[#allocation169_spill] sm:$0xff] %v17728_v20  ;;  %9843 = vmatprep.mubr.f32.mxu1 %v17728_v20  ;;  %v17766_v50 = vpop.permute.xlu0 %6681 }
0x15c5   : > { %6687 = vrot.lane.b32.xlu0 %v20052_v7, %s11540_s29 }
0x15c6   : > { %v11159_v42 = vpop.eup %11158 }
0x15c7   : > { %v6647_v20 = vmul.f32 0.25, %v11159_v42  ;;  %v20069_v42 = vld [vmem:[#allocation16_spill] sm:$0xff] }
0x15c9   : > { %6895 = vrot.lane.b32.xlu0 %v20052_v7, %s11547_s16  ;;  %v11161_v18 = vpop.eup %11160  ;;  %v17773_v60 = vmul.f32 %v6647_v20, %v20063_v35 }
0x15cb   : > { %20064 = vst [vmem:[#allocation173_spill] sm:$0xff] %v17773_v60 }
0x15cd   : > { %6689 = vrot.lane.b32.xlu0 %v20053_v27, %s11540_s29 }
0x15e5   : > { %6156 = vmax.xlane.f32.xlu1 %v17750_v5 }
0x15ec   : > { %v6149_v11 = vpop.xlane.xlu1 %6148  ;;  %6158 = vmax.xlane.f32.xlu0 %v17762_v57 }
0x15ed   : > { %v6177_v7 = vsub.f32 %v17562_v46, %v6149_v11  ;;  %v6648_v46 = vmul.f32 0.25, %v11161_v18  ;;  %v6999_v18 = vmul.f32 %v17362_v19, %v17773_v60 }
0x15ef   : > { %v6196_v33 = vmul.f32 1.442695, %v6177_v7  ;;  %v20066_v7 = vld [vmem:[#allocation3_spill] sm:$0xff] }
0x15f0   : > { %v6791_v23 = vmul.f32 %v20066_v7, %v17773_v60 }
0x15f1   : > { %11162 = vpow2.f32 %v6196_v33 }
0x15f3   : > { %v6151_v6 = vpop.xlane.xlu0 %6150 }
0x15f4   : > { %v6178_v22 = vsub.f32 %v17579_v34, %v6151_v6  ;;  %v20067_v34 = vld [vmem:[#allocation20_spill] sm:$0xff] }
0x15f5   : > { %v17783_v33 = vmul.f32 %v6648_v46, %v20067_v34  ;;  %v20074_v46 = vld [vmem:[#allocation60_spill] sm:$0xff]  ;;  %v17808_v34 = vpop.permute.xlu1 %7029 }
0x15f6   : > { %v6198_v38 = vmul.f32 1.442695, %v6178_v22  ;;  %7037 = vrot.lane.b32.xlu1 %v6998_v28, %s11533_s27  ;;  %v20072_v28 = vld [vmem:[#allocation179_spill] sm:$0xff]  ;;  %20075 = vst [vmem:[#allocation88_spill] sm:$0xff] %v17808_v34 }
0x15f7   : > { %20068 = vst [vmem:[#allocation177_spill] sm:$0xff] %v17783_v33  ;;  %v6792_v20 = vmul.f32 %v20069_v42, %v17783_v33  ;;  %v17810_v42 = vpop.permute.xlu0 %6825 }
0x15f8   : > { %11164 = vpow2.f32 %v6198_v38  ;;  %v20073_v38 = vld [vmem:[#allocation143_spill] sm:$0xff] }
0x15f9   : > { %v7446_v35 = vmul.f32 %v17374_v4, %v20073_v38 }
0x15fa   : > { %6897 = vrot.lane.b32.xlu1 %v20053_v27, %s11547_s16  ;;  %v20071_v27 = vld [vmem:[#allocation117_spill] sm:$0xff] }
0x15fb   : > { %v17777_v11 = vpop.eup %11162  ;;  %v7445_v22 = vmul.f32 %v20072_v28, %v20071_v27  ;;  %v7590_v7 = vadd.f32 %v20074_v46, %v7446_v35  ;;  %v17814_v4 = vpop.permute.xlu0 %6683  ;;  %v20082_v46 = vld [vmem:[#allocation148_spill] sm:$0xff] }
0x15fc   : > { %20065 = vst [vmem:[#allocation14_spill] sm:$0xff] %v17777_v11  ;;  %9844 = vmatmul.mubr.f32.gmra.mrb[34].mxu1 %v17777_v11 }
0x15fd   : > { %v7589_v19 = vadd.f32 %v17402_v58, %v7445_v22  ;;  %v20078_v58 = vld [vmem:[#allocation134_spill] sm:$0xff] }
0x15fe   : > { %6831 = vrot.lane.b32.xlu1 %v6791_v23, %s11537_s14  ;;  %vm20079_vm9 = vcmp.le.s32.totalorder %v19928_v48, %v20078_v58  ;;  %v20080_v22 = vld [vmem:[#allocation146_spill] sm:$0xff] }
0x15ff   : > { %v10758_v23 = vpack.i.bf16 %v7590_v7, %v7589_v19  ;;  %v6601_v35 = vmul.f32 0.0625, %v20080_v22  ;;  %v17826_v19 = vpop.permute.xlu0 %6891  ;;  %v6602_v7 = vmul.f32 0.0625, %v20082_v46 }
0x1600   : > { %20081 = vst [vmem:[#allocation147_spill] sm:$0xff] %v17826_v19 }
0x1601   : > { %v6618_v11 = vadd.f32 1.1920929e-07, %v6602_v7  ;;  %v7654_v7 = vmul.f32 %v17385_v24, %v20073_v38 }
0x1602   : > { %v17790_v6 = vpop.eup %11164  ;;  %7039 = vrot.lane.b32.xlu1 %v6999_v18, %s11533_s27  ;;  %6833 = vrot.lane.b32.xlu0 %v6792_v20, %s11537_s14  ;;  %v17812_v20 = vpop.permute.xlu1 %6889 }
0x1603   : > { %20070 = vst [vmem:[#allocation61_spill] sm:$0xff] %v17790_v6  ;;  %9846 = vmatprep.mubr.f32.mxu1 %v17790_v6  ;;  %20076 = vst [vmem:[#allocation170_spill] sm:$0xff] %v17812_v20  ;;  %v6617_v6 = vadd.f32 1.1920929e-07, %v6601_v35  ;;  %v17831_v21 = vpop.permute.xlu0 %6685 }
0x1604   : > { %20084 = vst [vmem:[#allocation166_spill] sm:$0xff] %v17831_v21  ;;  %v20090_v21 = vld [vmem:[#allocation180_spill] sm:$0xff] }
0x1605   : > { %11166 = vrsqrt.f32 %v6617_v6  ;;  %v7000_v6 = vmul.f32 %v17368_v53, %v17783_v33 }
0x1606   : > { %6691 = vrot.lane.b32.xlu0 %v17237_v39, %s11540_s29  ;;  %v17816_v18 = vpop.permute.xlu1 %6823  ;;  %11168 = vrsqrt.f32 %v6618_v11 }
0x1607   : > { %v10750_v35 = vpop.permute.xlu0 %10749 }
0x160a   : > { %6899 = vrot.lane.b32.xlu0 %v17237_v39, %s11547_s16  ;;  %v20077_v39 = vld [vmem:[#allocation106_spill] sm:$0xff] }
0x160b   : > { %v17822_v28 = vsel %vm20079_vm9, %v20077_v39, -1e+30  ;;  %v20085_v39 = vld [vmem:[#allocation44_spill] sm:$0xff] }
0x160c   : > { %v17838_v22 = vsel %vm528_vm0, %v20085_v39, -1e+30 }
0x160e   : > { %6693 = vrot.lane.b32.xlu0 %v17323_v25, %s11540_s29 }
0x160f   : > { %v11167_v11 = vpop.eup %11166 }
0x1610   : > { %v6649_v60 = vmul.f32 0.25, %v11167_v11 }
0x1612   : > { %10759 = vrot.lane.b32.xlu0 %v10758_v23, %s11538_s8  ;;  %v17829_v23 = vpop.permute.xlu1 %7031 }
0x1613   : > { %20083 = vst [vmem:[#allocation55_spill] sm:$0xff] %v17829_v23  ;;  %v10751_v23 = vunpack.i.l.bf16 %v10750_v35 }
0x1626   : > { %6160 = vmax.xlane.f32.xlu1 %v17822_v28 }
0x162d   : > { %v6153_v20 = vpop.xlane.xlu1 %6152 }
0x162e   : > { %v6179_v58 = vsub.f32 %v17670_v51, %v6153_v20  ;;  %v20089_v51 = vld [vmem:[#allocation24_spill] sm:$0xff] }
0x162f   : > { %v7653_v20 = vmul.f32 %v20089_v51, %v20071_v27  ;;  %v7798_v27 = vsub.f32 %v7654_v7, %v20090_v21  ;;  %v20092_v21 = vld [vmem:[#allocation25_spill] sm:$0xff] }
0x1630   : > { %v6200_v8 = vmul.f32 1.442695, %v6179_v58  ;;  %v20098_v7 = vld [vmem:[#allocation73_spill] sm:$0xff] }
0x1631   : > { %v17840_v19 = vpop.permute.xlu1 %7033  ;;  %6162 = vmax.xlane.f32.xlu0 %v17838_v22  ;;  %v7797_v39 = vsub.f32 %v7653_v20, %v17416_v55  ;;  %v6603_v11 = vmul.f32 0.0625, %v20098_v7 }
0x1632   : > { %20087 = vst [vmem:[#allocation123_spill] sm:$0xff] %v17840_v19  ;;  %11170 = vpow2.f32 %v6200_v8  ;;  %v10752_v19 = vunpack.i.h.bf16 %v10750_v35 }
0x1635   : > { %v17845_v46 = vpop.permute.xlu1 %6893 }
0x1636   : > { %20088 = vst [vmem:[#allocation17_spill] sm:$0xff] %v17845_v46  ;;  %v11169_v46 = vpop.eup %11168 }
0x1637   : > { %7041 = vrot.lane.b32.xlu1 %v7000_v6, %s11533_s27  ;;  %v6650_v6 = vmul.f32 0.25, %v11169_v46 }
0x1638   : > { %v6155_v58 = vpop.xlane.xlu0 %6154 }
0x1639   : > { %v6180_v8 = vsub.f32 %v17689_v37, %v6155_v58  ;;  %v10755_v34 = vpop.permute.xlu1 %10754  ;;  %v10763_v37 = vpack.i.bf16 %v7798_v27, %v7797_v39 }
0x163a   : > { %v10757_v53 = vunpack.i.h.bf16 %v10755_v34  ;;  %v10756_v33 = vunpack.i.l.bf16 %v10755_v34  ;;  %v17863_v34 = vmul.f32 %v6649_v60, %v19960_v62  ;;  %v20093_v62 = vld [vmem:[#allocation136_spill] sm:$0xff] }
0x163b   : > { %v6202_v51 = vmul.f32 1.442695, %v6180_v8  ;;  %6901 = vrot.lane.b32.xlu1 %v17323_v25, %s11547_s16  ;;  %v20099_v8 = vld [vmem:[#allocation129_spill] sm:$0xff] }
0x163c   : > { %v17857_v24 = vpop.eup %11170  ;;  %v7939_v38 = vsel %vm1032_vm2, %v10751_v23, %v10756_v33  ;;  %v7940_v55 = vsel %vm1032_vm2, %v10752_v19, %v10757_v53  ;;  %v6793_v25 = vmul.f32 %v17426_v56, %v17863_v34  ;;  %v17873_v33 = vmul.f32 %v6650_v6, %v20092_v21  ;;  %v20095_v56 = vld [vmem:[#allocation181_spill] sm:$0xff]  ;;  %v17895_v20 = vpop.permute.xlu0 %6829  ;;  %v20100_v53 = vld [vmem:[#allocation68_spill] sm:$0xff] }
0x163d   : > { %20091 = vst [vmem:[#allocation3_spill] sm:$0xff] %v17857_v24  ;;  %11172 = vpow2.f32 %v6202_v51  ;;  %9847 = vmatmul.mubr.f32.gmra.mrb[36].mxu1 %v17857_v24  ;;  %v10284_v35 = vpack.c.bf16 %v7940_v55, %v7939_v38  ;;  %v7001_v60 = vmul.f32 %v20093_v62, %v17863_v34  ;;  %v17898_v58 = vpop.permute.xlu1 %6827  ;;  %vm20101_vm11 = vcmp.le.s32.totalorder %v19928_v48, %v20100_v53  ;;  %v20102_v38 = vld [vmem:[#allocation122_spill] sm:$0xff] }
0x163e   : > { %v6794_v19 = vmul.f32 %v17435_v14, %v17873_v33  ;;  %v17906_v27 = vsel %vm20101_vm11, %v20099_v8, -1e+30  ;;  %v6619_v51 = vadd.f32 1.1920929e-07, %v6603_v11  ;;  %v6604_v55 = vmul.f32 0.0625, %v20102_v38 }
0x163f   : > { %10286 = vmatprep.subr.msk.bf16.mxu1 %vm13266_vm3, %v10284_v35  ;;  %10764 = vrot.lane.b32.xlu1 %v10763_v37, %s11538_s8 }
0x1640   : > { %10289 = vmatpush3.bf16.xpose.msk.msra.mxu1 %vm13266_vm3, %v10284_v35  ;;  %v17900_v39 = vpop.permute.xlu0 %6687  ;;  %11174 = vrsqrt.f32 %v6619_v51  ;;  %v6620_v35 = vadd.f32 1.1920929e-07, %v6604_v55  ;;  %v7002_v51 = vmul.f32 %v17360_v61, %v17873_v33 }
0x1641   : > { %v17910_v37 = vpop.permute.xlu1 %7035 }
0x1642   : > { %11176 = vrsqrt.f32 %v6620_v35 }
0x1643   : > { %6835 = vrot.lane.b32.xlu1 %v6793_v25, %s11537_s14  ;;  %v20103_v25 = vld [vmem:[#allocation140_spill] sm:$0xff] }
0x1644   : > { %v17912_v6 = vpop.permute.xlu0 %6895  ;;  %v17918_v62 = vsel %vm530_vm15, %v20103_v25, -1e+30 }
0x1647   : > { %v17880_v23 = vpop.eup %11172  ;;  %7043 = vrot.lane.b32.xlu1 %v7001_v60, %s11533_s27  ;;  %6837 = vrot.lane.b32.xlu0 %v6794_v19, %s11537_s14 }
0x1648   : > { %20094 = vst [vmem:[#allocation20_spill] sm:$0xff] %v17880_v23  ;;  %9849 = vmatprep.mubr.f32.mxu1 %v17880_v23 }
0x164a   : > { %v11175_v11 = vpop.eup %11174 }
0x164b   : > { %6695 = vrot.lane.b32.xlu0 %v20095_v56, %s11540_s29  ;;  %v6651_v55 = vmul.f32 0.25, %v11175_v11 }
0x164d   : > { %v17929_v35 = vmul.f32 %v6651_v55, %v19965_v15 }
0x164f   : > { %6903 = vrot.lane.b32.xlu0 %v20095_v56, %s11547_s16  ;;  %v17922_v56 = vpop.permute.xlu0 %6689  ;;  %v6795_v61 = vmul.f32 %v17372_v10, %v17929_v35  ;;  %v20108_v10 = vld [vmem:[#allocation77_spill] sm:$0xff] }
0x1653   : > { %6697 = vrot.lane.b32.xlu0 %v17392_v40, %s11540_s29 }
0x165f   : > { %v17891_v46 = vpop.f32.mrb[32].mxu1 }
0x1660   : > { %20096 = vst [vmem:[#allocation16_spill] sm:$0xff] %v17891_v46  ;;  %v17893_v14 = vpop.f32.mrb[33].mxu1  ;;  %v11177_v46 = vpop.eup %11176 }
0x1661   : > { %20097 = vst [vmem:[#allocation117_spill] sm:$0xff] %v17893_v14 }
0x166b   : > { %6164 = vmax.xlane.f32.xlu1 %v17906_v27 }
0x1672   : > { %v6157_v60 = vpop.xlane.xlu1 %6156  ;;  %6166 = vmax.xlane.f32.xlu0 %v17918_v62 }
0x1673   : > { %v6181_v19 = vsub.f32 %v17750_v5, %v6157_v60  ;;  %v6652_v5 = vmul.f32 0.25, %v11177_v46  ;;  %v7003_v46 = vmul.f32 %v17496_v47, %v17929_v35 }
0x1675   : > { %v6204_v7 = vmul.f32 1.442695, %v6181_v19 }
0x1676   : > { %v17964_v55 = vpop.permute.xlu1 %7037 }
0x1677   : > { %11178 = vpow2.f32 %v6204_v7 }
0x1679   : > { %v6159_v8 = vpop.xlane.xlu0 %6158 }
0x167a   : > { %v6182_v38 = vsub.f32 %v17762_v57, %v6159_v8  ;;  %v20106_v57 = vld [vmem:[#allocation30_spill] sm:$0xff]  ;;  %v20110_v8 = vld [vmem:[#allocation33_spill] sm:$0xff] }
0x167b   : > { %v17939_v19 = vmul.f32 %v6652_v5, %v20106_v57  ;;  %v20115_v57 = vld [vmem:[#allocation39_spill] sm:$0xff] }
0x167c   : > { %v6206_v25 = vmul.f32 1.442695, %v6182_v38  ;;  %7045 = vrot.lane.b32.xlu1 %v7002_v51, %s11533_s27 }
0x167d   : > { %v6796_v15 = vmul.f32 %v17383_v30, %v17939_v19  ;;  %v7448_v30 = vmul.f32 %v17523_v17, %v20110_v8 }
0x167e   : > { %11180 = vpow2.f32 %v6206_v25  ;;  %v17966_v25 = vpop.permute.xlu0 %6833 }
0x167f   : > { %v7592_v51 = vadd.f32 %v17466_v1, %v7448_v30 }
0x1680   : > { %6905 = vrot.lane.b32.xlu1 %v17392_v40, %s11547_s16  ;;  %v20109_v40 = vld [vmem:[#allocation167_spill] sm:$0xff] }
0x1681   : > { %v17933_v60 = vpop.eup %11178  ;;  %v7447_v11 = vmul.f32 %v17412_v26, %v20109_v40  ;;  %v17968_v26 = vpop.permute.xlu1 %6897 }
0x1682   : > { %20105 = vst [vmem:[#allocation179_spill] sm:$0xff] %v17933_v60  ;;  %9850 = vmatmul.mubr.f32.gmra.mrb[38].mxu1 %v17933_v60  ;;  %v17970_v17 = vpop.permute.xlu0 %6691 }
0x1683   : > { %v7591_v47 = vadd.f32 %v17538_v0, %v7447_v11  ;;  %v20112_v0 = vld [vmem:[#allocation36_spill] sm:$0xff] }
0x1684   : > { %6839 = vrot.lane.b32.xlu1 %v6795_v61, %s11537_s14  ;;  %v20111_v61 = vld [vmem:[#allocation32_spill] sm:$0xff]  ;;  %vm20113_vm9 = vcmp.le.s32.totalorder %v19928_v48, %v20112_v0 }
0x1685   : > { %v10768_v38 = vpack.i.bf16 %v7592_v51, %v7591_v47  ;;  %v17972_v5 = vpop.permute.xlu1 %6831  ;;  %v17978_v1 = vsel %vm20113_vm9, %v20111_v61, -1e+30  ;;  %v20117_v61 = vld [vmem:[#allocation100_spill] sm:$0xff] }
0x1686   : > { %20114 = vst [vmem:[#allocation60_spill] sm:$0xff] %v17978_v1 }
0x1688   : > { %v17946_v7 = vpop.eup %11180  ;;  %7047 = vrot.lane.b32.xlu1 %v7003_v46, %s11533_s27  ;;  %6841 = vrot.lane.b32.xlu0 %v6796_v15, %s11537_s14  ;;  %v6605_v15 = vmul.f32 0.0625, %v20115_v57  ;;  %v17982_v46 = vpop.permute.xlu0 %6899  ;;  %v17994_v57 = vsel %vm532_vm13, %v20117_v61, -1e+30 }
0x1689   : > { %20107 = vst [vmem:[#allocation143_spill] sm:$0xff] %v17946_v7  ;;  %9852 = vmatprep.mubr.f32.mxu1 %v17946_v7  ;;  %v17985_v30 = vpop.permute.xlu1 %7039  ;;  %20119 = vst [vmem:[#allocation106_spill] sm:$0xff] %v17994_v57 }
0x168a   : > { %v6621_v47 = vadd.f32 1.1920929e-07, %v6605_v15 }
0x168c   : > { %6699 = vrot.lane.b32.xlu0 %v20108_v10, %s11540_s29  ;;  %11182 = vrsqrt.f32 %v6621_v47  ;;  %v17987_v14 = vpop.permute.xlu0 %6693 }
0x1690   : > { %6907 = vrot.lane.b32.xlu0 %v20108_v10, %s11547_s16  ;;  %v20116_v10 = vld [vmem:[#allocation176_spill] sm:$0xff]  ;;  %v10760_v15 = vpop.permute.xlu0 %10759 }
0x1691   : > { %v6606_v11 = vmul.f32 0.0625, %v20116_v10  ;;  %v7004_v10 = vmul.f32 %v17510_v29, %v17939_v19  ;;  %v10762_v0 = vunpack.i.h.bf16 %v10760_v15  ;;  %v10761_v21 = vunpack.i.l.bf16 %v10760_v15 }
0x1693   : > { %v6622_v51 = vadd.f32 1.1920929e-07, %v6606_v11 }
0x1694   : > { %6701 = vrot.lane.b32.xlu0 %v17445_v43, %s11540_s29 }
0x1695   : > { %11184 = vrsqrt.f32 %v6622_v51 }
0x1698   : > { %10769 = vrot.lane.b32.xlu0 %v10768_v38, %s11538_s8 }
0x16ac   : > { %6168 = vmax.xlane.f32.xlu1 %v17978_v1 }
0x16b3   : > { %v6161_v38 = vpop.xlane.xlu1 %6160 }
0x16b4   : > { %v6183_v7 = vsub.f32 %v17822_v28, %v6161_v38  ;;  %v20120_v28 = vld [vmem:[#allocation23_spill] sm:$0xff]  ;;  %v7656_v38 = vmul.f32 %v17532_v36, %v20110_v8 }
0x16b5   : > { %v7655_v47 = vmul.f32 %v20120_v28, %v20109_v40 }
0x16b6   : > { %v6208_v23 = vmul.f32 1.442695, %v6183_v7  ;;  %v11183_v7 = vpop.eup %11182  ;;  %v7800_v40 = vsub.f32 %v7656_v38, %v17470_v12 }
0x16b7   : > { %v17996_v24 = vpop.permute.xlu1 %7041  ;;  %6170 = vmax.xlane.f32.xlu0 %v17994_v57  ;;  %v7799_v61 = vsub.f32 %v7655_v47, %v17546_v52  ;;  %v11185_v57 = vpop.eup %11184  ;;  %v6653_v1 = vmul.f32 0.25, %v11183_v7 }
0x16b8   : > { %11186 = vpow2.f32 %v6208_v23  ;;  %v6654_v47 = vmul.f32 0.25, %v11185_v57 }
0x16ba   : > { %v18029_v12 = vmul.f32 %v6654_v47, %v19969_v41 }
0x16bb   : > { %v18001_v11 = vpop.permute.xlu1 %6901 }
0x16bc   : > { %v6798_v38 = vmul.f32 %v17491_v3, %v18029_v12  ;;  %v20126_v3 = vld [vmem:[#allocation7_spill] sm:$0xff] }
0x16bd   : > { %7049 = vrot.lane.b32.xlu1 %v7004_v10, %s11533_s27 }
0x16be   : > { %v6163_v51 = vpop.xlane.xlu0 %6162 }
0x16bf   : > { %v6184_v23 = vsub.f32 %v17838_v22, %v6163_v51  ;;  %v10765_v60 = vpop.permute.xlu1 %10764  ;;  %v10773_v22 = vpack.i.bf16 %v7800_v40, %v7799_v61  ;;  %v20124_v51 = vld [vmem:[#allocation64_spill] sm:$0xff]  ;;  %v20125_v61 = vld [vmem:[#allocation45_spill] sm:$0xff] }
0x16c0   : > { %v10767_v29 = vunpack.i.h.bf16 %v10765_v60  ;;  %v10766_v53 = vunpack.i.l.bf16 %v10765_v60  ;;  %v20121_v60 = vld [vmem:[#allocation34_spill] sm:$0xff]  ;;  %v20128_v40 = vld [vmem:[#allocation4_spill] sm:$0xff] }
0x16c1   : > { %v6210_v28 = vmul.f32 1.442695, %v6184_v23  ;;  %6909 = vrot.lane.b32.xlu1 %v17445_v43, %s11547_s16  ;;  %v18019_v10 = vmul.f32 %v6653_v1, %v20121_v60 }
0x16c2   : > { %v18013_v36 = vpop.eup %11186  ;;  %v7941_v8 = vsel %vm1032_vm2, %v10761_v21, %v10766_v53  ;;  %v7942_v52 = vsel %vm1032_vm2, %v10762_v0, %v10767_v29  ;;  %v20122_v53 = vld [vmem:[#allocation54_spill] sm:$0xff]  ;;  %v20123_v0 = vld [vmem:[#allocation19_spill] sm:$0xff] }
0x16c3   : > { %11188 = vpow2.f32 %v6210_v28  ;;  %9853 = vmatmul.mubr.f32.gmra.mrb[40].mxu1 %v18013_v36  ;;  %v10290_v15 = vpack.c.bf16 %v7942_v52, %v7941_v8  ;;  %v6797_v43 = vmul.f32 %v17550_v2, %v18019_v10  ;;  %v7449_v21 = vmul.f32 %v17518_v16, %v20122_v53  ;;  %v20129_v8 = vld [vmem:[#allocation93_spill] sm:$0xff] }
0x16c4   : > { %v7450_v1 = vmul.f32 %v17556_v54, %v20123_v0  ;;  %v7005_v57 = vmul.f32 %v17477_v9, %v18019_v10  ;;  %v7657_v16 = vmul.f32 %v20124_v51, %v20122_v53  ;;  %v7658_v54 = vmul.f32 %v20125_v61, %v20123_v0  ;;  %v20138_v61 = vld [vmem:[#allocation144_spill] sm:$0xff] }
0x16c5   : > { %10292 = vmatprep.subr.msk.bf16.mxu1 %vm13266_vm3, %v10290_v15  ;;  %10774 = vrot.lane.b32.xlu1 %v10773_v22, %s11538_s8  ;;  %v7593_v7 = vadd.f32 %v17584_v13, %v7449_v21  ;;  %v20130_v22 = vld [vmem:[#allocation41_spill] sm:$0xff]  ;;  %v20133_v21 = vld [vmem:[#allocation22_spill] sm:$0xff] }
0x16c6   : > { %10295 = vmatpush3.bf16.xpose.msk.msra.mxu1 %vm13266_vm3, %v10290_v15  ;;  %v7594_v41 = vadd.f32 %v17536_v49, %v7450_v1  ;;  %v7801_v23 = vsub.f32 %v7657_v16, %v20126_v3  ;;  %v20127_v49 = vld [vmem:[#allocation18_spill] sm:$0xff]  ;;  %v7802_v52 = vsub.f32 %v7658_v54, %v20129_v8  ;;  %v20131_v15 = vld [vmem:[#allocation172_spill] sm:$0xff] }
0x16c7   : > { %v7451_v28 = vmul.f32 %v20128_v40, %v20127_v49  ;;  %v7452_v60 = vmul.f32 %v20131_v15, %v20130_v22  ;;  %v20134_v1 = vld [vmem:[#allocation28_spill] sm:$0xff] }
0x16c8   : > { %v10778_v9 = vpack.i.bf16 %v7594_v41, %v7593_v7  ;;  %v10783_v47 = vpack.i.bf16 %v7802_v52, %v7801_v23  ;;  %v20136_v7 = vld [vmem:[#allocation102_spill] sm:$0xff]  ;;  %v20139_v3 = vld [vmem:[#allocation40_spill] sm:$0xff]  ;;  %v20140_v23 = vld [vmem:[#allocation111_spill] sm:$0xff] }
0x16c9   : > { %6843 = vrot.lane.b32.xlu1 %v6797_v43, %s11537_s14  ;;  %v20132_v43 = vld [vmem:[#allocation168_spill] sm:$0xff]  ;;  %v7596_v0 = vadd.f32 %v20133_v21, %v7452_v60  ;;  %v20137_v41 = vld [vmem:[#allocation70_spill] sm:$0xff]  ;;  %v20143_v60 = vld [vmem:[#allocation5_spill] sm:$0xff] }
0x16ca   : > { %v7595_v53 = vadd.f32 %v20132_v43, %v7451_v28  ;;  %v7453_v51 = vmul.f32 %v20137_v41, %v20136_v7  ;;  %v20141_v28 = vld [vmem:[#allocation115_spill] sm:$0xff]  ;;  %v20142_v52 = vld [vmem:[#allocation92_spill] sm:$0xff] }
0x16cb   : > { %v6719_v8 = vmul.f32 %v20141_v28, %v20140_v23  ;;  %v6836_v28 = vpop.permute.xlu1 %6835 }
0x16cc   : > { %v10788_v16 = vpack.i.bf16 %v7596_v0, %v7595_v53  ;;  %v7597_v40 = vadd.f32 %v20139_v3, %v7453_v51  ;;  %v20145_v53 = vld [vmem:[#allocation171_spill] sm:$0xff] }
0x16cd   : > { %v18041_v2 = vpop.eup %11188  ;;  %7051 = vrot.lane.b32.xlu1 %v7005_v57, %s11533_s27  ;;  %6845 = vrot.lane.b32.xlu0 %v6798_v38, %s11537_s14  ;;  %v20135_v57 = vld [vmem:[#allocation10_spill] sm:$0xff]  ;;  %v6863_v15 = vadd.f32 %v20142_v52, %v6719_v8  ;;  %v20146_v0 = vld [vmem:[#allocation59_spill] sm:$0xff] }
0x16ce   : > { %9855 = vmatprep.mubr.f32.mxu1 %v18041_v2  ;;  %v7454_v38 = vmul.f32 %v20135_v57, %v20134_v1  ;;  %v20147_v57 = vld [vmem:[#allocation142_spill] sm:$0xff]  ;;  %v20148_v51 = vld [vmem:[#allocation75_spill] sm:$0xff] }
0x16cf   : > { %v18052_v13 = vpop.f32.mrb[34].mxu1 }
0x16d0   : > { %v18054_v29 = vpop.f32.mrb[35].mxu1  ;;  %v7598_v54 = vadd.f32 %v20138_v61, %v7454_v38  ;;  %v6721_v38 = vmul.f32 %v20147_v57, %v20146_v0 }
0x16d1   : > { %10779 = vrot.lane.b32.xlu0 %v10778_v9, %s11538_s8 }
0x16d2   : > { %v10798_v9 = vpack.i.bf16 %v7598_v54, %v7597_v40  ;;  %v6865_v41 = vadd.f32 %v17742_v63, %v6721_v38  ;;  %v6838_v54 = vpop.permute.xlu0 %6837  ;;  %v20150_v40 = vld [vmem:[#allocation96_spill] sm:$0xff]  ;;  %v20152_v63 = vld [vmem:[#allocation110_spill] sm:$0xff] }
0x16d3   : > { %vm20153_vm11 = vcmp.le.s32.totalorder %v19928_v48, %v20152_v63 }
0x16d5   : > { %10784 = vrot.lane.b32.xlu0 %v10783_v47, %s11538_s8  ;;  %v20144_v47 = vld [vmem:[#allocation29_spill] sm:$0xff] }
0x16d6   : > { %v6720_v43 = vmul.f32 %v20144_v47, %v20143_v60  ;;  %v6696_v52 = vpop.permute.xlu0 %6695 }
0x16d8   : > { %v6864_v21 = vadd.f32 %v20145_v53, %v6720_v43  ;;  %v20154_v43 = vld [vmem:[#allocation98_spill] sm:$0xff] }
0x16d9   : > { %10789 = vrot.lane.b32.xlu0 %v10788_v16, %s11538_s8  ;;  %v20149_v16 = vld [vmem:[#allocation145_spill] sm:$0xff]  ;;  %v6724_v53 = vmul.f32 %v17766_v50, %v20154_v43  ;;  %v20155_v50 = vld [vmem:[#allocation166_spill] sm:$0xff] }
0x16da   : > { %v6722_v61 = vmul.f32 %v20149_v16, %v20148_v51 }
0x16dc   : > { %v6866_v3 = vadd.f32 %v17739_v31, %v6722_v61  ;;  %v6868_v31 = vadd.f32 %v17810_v42, %v6724_v53 }
0x16dd   : > { %10799 = vrot.lane.b32.xlu0 %v10798_v9, %s11538_s8  ;;  %v6723_v9 = vmul.f32 %v17744_v44, %v20150_v40  ;;  %v18103_v44 = vpop.permute.xlu1 %7043 }
0x16df   : > { %v6867_v8 = vadd.f32 %v17816_v18, %v6723_v9  ;;  %v6725_v18 = vmul.f32 %v17814_v4, %v17711_v59  ;;  %v20156_v9 = vld [vmem:[#allocation173_spill] sm:$0xff] }
0x16e0   : > { %v6727_v4 = vmul.f32 %v17900_v39, %v20156_v9 }
0x16e1   : > { %7103 = vrot.lane.b32.xlu0 %v6863_v15, %s11541_s11  ;;  %v20151_v15 = vld [vmem:[#allocation57_spill] sm:$0xff]  ;;  %v6869_v57 = vadd.f32 %v17898_v58, %v6725_v18  ;;  %v20157_v58 = vld [vmem:[#allocation2_spill] sm:$0xff] }
0x16e2   : > { %v18096_v47 = vsel %vm20153_vm11, %v20151_v15, -1e+30  ;;  %v20158_v15 = vld [vmem:[#allocation124_spill] sm:$0xff]  ;;  %v20159_v18 = vld [vmem:[#allocation38_spill] sm:$0xff] }
0x16e3   : > { %v7660_v53 = vmul.f32 %v20158_v15, %v20130_v22  ;;  %v20163_v22 = vld [vmem:[#allocation175_spill] sm:$0xff] }
0x16e5   : > { %7105 = vrot.lane.b32.xlu0 %v6864_v21, %s11541_s11  ;;  %v18107_v21 = vpop.permute.xlu0 %6903 }
0x16e9   : > { %7107 = vrot.lane.b32.xlu0 %v6865_v41, %s11541_s11  ;;  %v6726_v41 = vmul.f32 %v20155_v50, %v17721_v32  ;;  %v6698_v61 = vpop.permute.xlu0 %6697 }
0x16eb   : > { %v6870_v42 = vadd.f32 %v17895_v20, %v6726_v41  ;;  %v7006_v20 = vmul.f32 %v20159_v18, %v18029_v12  ;;  %v20161_v41 = vld [vmem:[#allocation177_spill] sm:$0xff] }
0x16ed   : > { %7109 = vrot.lane.b32.xlu0 %v6866_v3, %s11541_s11 }
0x16f1   : > { %6172 = vmax.xlane.f32.xlu1 %v18096_v47  ;;  %7111 = vrot.lane.b32.xlu0 %v6867_v8, %s11541_s11  ;;  %v7659_v8 = vmul.f32 %v20157_v58, %v20127_v49  ;;  %v20162_v49 = vld [vmem:[#allocation105_spill] sm:$0xff]  ;;  %v20164_v58 = vld [vmem:[#allocation8_spill] sm:$0xff] }
0x16f5   : > { %7113 = vrot.lane.b32.xlu0 %v6868_v31, %s11541_s11 }
0x16f8   : > { %v6165_v38 = vpop.xlane.xlu1 %6164 }
0x16f9   : > { %v6185_v16 = vsub.f32 %v17906_v27, %v6165_v38  ;;  %7115 = vrot.lane.b32.xlu0 %v6869_v57, %s11541_s11  ;;  %v6871_v27 = vadd.f32 %v17972_v5, %v6727_v4  ;;  %v20160_v57 = vld [vmem:[#allocation178_spill] sm:$0xff]  ;;  %v7662_v5 = vmul.f32 %v20163_v22, %v20134_v1 }
0x16fa   : > { %v7803_v38 = vsub.f32 %v7659_v8, %v20160_v57  ;;  %v7661_v8 = vmul.f32 %v20164_v58, %v20136_v7  ;;  %v6730_v7 = vmul.f32 %v17987_v14, %v17873_v33  ;;  %v20169_v22 = vld [vmem:[#allocation174_spill] sm:$0xff]  ;;  %v6732_v58 = vmul.f32 %v6698_v61, %v17939_v19  ;;  %v20174_v61 = vld [vmem:[#allocation88_spill] sm:$0xff] }
0x16fb   : > { %v6212_v3 = vmul.f32 1.442695, %v6185_v16  ;;  %v6728_v16 = vmul.f32 %v17922_v56, %v20161_v41  ;;  %v6729_v56 = vmul.f32 %v17970_v17, %v17863_v34  ;;  %v20167_v17 = vld [vmem:[#allocation149_spill] sm:$0xff]  ;;  %v6928_v14 = vmul.f32 %v20169_v22, %v20143_v60 }
0x16fc   : > { %v18127_v50 = vpop.permute.xlu1 %7045  ;;  %v6927_v57 = vmul.f32 %v20167_v17, %v20140_v23  ;;  %v20170_v23 = vld [vmem:[#allocation131_spill] sm:$0xff]  ;;  %v20177_v17 = vld [vmem:[#allocation170_spill] sm:$0xff] }
0x16fd   : > { %11190 = vpow2.f32 %v6212_v3  ;;  %7117 = vrot.lane.b32.xlu0 %v6870_v42, %s11541_s11  ;;  %v7804_v42 = vsub.f32 %v7660_v53, %v20162_v49  ;;  %v6872_v4 = vadd.f32 %v17966_v25, %v6728_v16  ;;  %v20166_v53 = vld [vmem:[#allocation76_spill] sm:$0xff]  ;;  %v6873_v25 = vadd.f32 %v6836_v28, %v6729_v56  ;;  %v20173_v56 = vld [vmem:[#allocation121_spill] sm:$0xff] }
0x16ff   : > { %v6167_v31 = vpop.xlane.xlu0 %6166  ;;  %v10793_v15 = vpack.i.bf16 %v7804_v42, %v7803_v38  ;;  %v6874_v38 = vadd.f32 %v6838_v54, %v6730_v7  ;;  %v6731_v42 = vmul.f32 %v6696_v52, %v17929_v35 }
0x1700   : > { %v6186_v39 = vsub.f32 %v17918_v62, %v6167_v31  ;;  %v20165_v62 = vld [vmem:[#allocation139_spill] sm:$0xff]  ;;  %v18145_v1 = vpop.permute.xlu1 %6905 }
0x1701   : > { %7119 = vrot.lane.b32.xlu0 %v6871_v27, %s11541_s11  ;;  %v7806_v31 = vsub.f32 %v7662_v5, %v20165_v62  ;;  %v7805_v27 = vsub.f32 %v7661_v8, %v20166_v53  ;;  %v20171_v8 = vld [vmem:[#allocation90_spill] sm:$0xff]  ;;  %v6930_v53 = vmul.f32 %v20173_v56, %v20148_v51  ;;  %v20179_v51 = vld [vmem:[#allocation147_spill] sm:$0xff] }
0x1702   : > { %v6214_v3 = vmul.f32 1.442695, %v6186_v39  ;;  %7053 = vrot.lane.b32.xlu1 %v7006_v20, %s11533_s27  ;;  %v20168_v39 = vld [vmem:[#allocation62_spill] sm:$0xff] }
0x1703   : > { %v10803_v20 = vpack.i.bf16 %v7806_v31, %v7805_v27  ;;  %v7071_v16 = vsub.f32 %v6927_v57, %v20168_v39  ;;  %v6842_v54 = vpop.permute.xlu0 %6841  ;;  %v20172_v62 = vld [vmem:[#allocation66_spill] sm:$0xff]  ;;  %v7074_v27 = vsub.f32 %v6930_v53, %v20174_v61  ;;  %v6932_v57 = vmul.f32 %v20177_v17, %v20154_v43 }
0x1704   : > { %11192 = vpow2.f32 %v6214_v3  ;;  %v6840_v49 = vpop.permute.xlu1 %6839  ;;  %v7072_v3 = vsub.f32 %v6928_v14, %v20170_v23  ;;  %v6876_v60 = vadd.f32 %v6842_v54, %v6732_v58  ;;  %v6935_v43 = vmul.f32 %v17912_v6, %v20156_v9 }
0x1705   : > { %7121 = vrot.lane.b32.xlu0 %v6872_v4, %s11541_s11  ;;  %v6875_v5 = vadd.f32 %v6840_v49, %v6731_v42  ;;  %v6940_v58 = vmul.f32 %v18145_v1, %v17939_v19 }
0x1706   : > { %10794 = vrot.lane.b32.xlu1 %v10793_v15, %s11538_s8  ;;  %v6929_v15 = vmul.f32 %v20171_v8, %v20146_v0  ;;  %v20176_v0 = vld [vmem:[#allocation55_spill] sm:$0xff]  ;;  %v7079_v14 = vsub.f32 %v6935_v43, %v17985_v30  ;;  %v6938_v30 = vmul.f32 %v18001_v11, %v17873_v33 }
0x1707   : > { %v18148_v18 = vpop.eup %11190 }
0x1708   : > { %9856 = vmatmul.mubr.f32.gmra.mrb[42].mxu1 %v18148_v18  ;;  %v7073_v31 = vsub.f32 %v6929_v15, %v20172_v62  ;;  %v7048_v9 = vpop.permute.xlu1 %7047 }
0x1709   : > { %7123 = vrot.lane.b32.xlu0 %v6873_v25, %s11541_s11  ;;  %v20175_v25 = vld [vmem:[#allocation13_spill] sm:$0xff] }
0x170a   : > { %10804 = vrot.lane.b32.xlu1 %v10803_v20, %s11538_s8  ;;  %v6931_v20 = vmul.f32 %v20175_v25, %v20150_v40  ;;  %v20180_v40 = vld [vmem:[#allocation17_spill] sm:$0xff] }
0x170b   : > { %v6934_v42 = vmul.f32 %v20180_v40, %v17721_v32  ;;  %v6937_v32 = vmul.f32 %v17982_v46, %v17863_v34 }
0x170c   : > { %v7075_v7 = vsub.f32 %v6931_v20, %v20176_v0 }
0x170d   : > { %7125 = vrot.lane.b32.xlu0 %v6874_v38, %s11541_s11  ;;  %v20178_v38 = vld [vmem:[#allocation123_spill] sm:$0xff]  ;;  %v7078_v22 = vsub.f32 %v6934_v42, %v17964_v55  ;;  %v7081_v55 = vsub.f32 %v6937_v32, %v18103_v44 }
0x170e   : > { %v18160_v28 = vpop.eup %11192  ;;  %7167 = vrot.lane.b32.xlu1 %v7071_v16, %s11541_s11  ;;  %v7076_v39 = vsub.f32 %v6932_v57, %v20178_v38  ;;  %v6933_v16 = vmul.f32 %v20179_v51, %v17711_v59  ;;  %v6936_v59 = vmul.f32 %v17968_v26, %v20161_v41  ;;  %v7082_v26 = vsub.f32 %v6938_v30, %v18127_v50 }
0x170f   : > { %9858 = vmatprep.mubr.f32.mxu1 %v18160_v28 }
0x1710   : > { %v18167_v4 = vpop.f32.mrb[36].mxu1  ;;  %v7077_v49 = vsub.f32 %v6933_v16, %v17910_v37  ;;  %v7080_v37 = vsub.f32 %v6936_v59, %v17996_v24  ;;  %v6939_v24 = vmul.f32 %v18107_v21, %v17929_v35  ;;  %v20182_v21 = vld [vmem:[#allocation106_spill] sm:$0xff] }
0x1711   : > { %v18170_v52 = vpop.f32.mrb[37].mxu1  ;;  %7127 = vrot.lane.b32.xlu0 %v6875_v5, %s11541_s11  ;;  %v6700_v5 = vpop.permute.xlu0 %6699 }
0x1712   : > { %7169 = vrot.lane.b32.xlu1 %v7072_v3, %s11541_s11  ;;  %v20181_v3 = vld [vmem:[#allocation60_spill] sm:$0xff]  ;;  %v7083_v46 = vsub.f32 %v6939_v24, %v7048_v9  ;;  %v6733_v19 = vmul.f32 %v6700_v5, %v18019_v10  ;;  %v20183_v5 = vld [vmem:[#allocation6_spill] sm:$0xff] }
0x1715   : > { %7129 = vrot.lane.b32.xlu0 %v6876_v60, %s11541_s11  ;;  %v6908_v6 = vpop.permute.xlu0 %6907 }
0x1716   : > { %7171 = vrot.lane.b32.xlu1 %v7073_v31, %s11541_s11  ;;  %v6941_v17 = vmul.f32 %v6908_v6, %v18019_v10  ;;  %v20184_v6 = vld [vmem:[#allocation9_spill] sm:$0xff] }
0x1719   : > { %v6702_v23 = vpop.permute.xlu0 %6701 }
0x171a   : > { %7173 = vrot.lane.b32.xlu1 %v7074_v27, %s11541_s11  ;;  %v6734_v57 = vmul.f32 %v6702_v23, %v18029_v12 }
0x171d   : > { %v10770_v33 = vpop.permute.xlu0 %10769 }
0x171e   : > { %7175 = vrot.lane.b32.xlu1 %v7075_v7, %s11541_s11  ;;  %v10772_v60 = vunpack.i.h.bf16 %v10770_v33  ;;  %v10771_v62 = vunpack.i.l.bf16 %v10770_v33 }
0x1722   : > { %7177 = vrot.lane.b32.xlu1 %v7076_v39, %s11541_s11 }
0x1726   : > { %7179 = vrot.lane.b32.xlu1 %v7077_v49, %s11541_s11 }
0x172a   : > { %7181 = vrot.lane.b32.xlu1 %v7078_v22, %s11541_s11 }
0x172e   : > { %7183 = vrot.lane.b32.xlu1 %v7079_v14, %s11541_s11 }
0x1732   : > { %7185 = vrot.lane.b32.xlu1 %v7080_v37, %s11541_s11 }
0x1736   : > { %7187 = vrot.lane.b32.xlu1 %v7081_v55, %s11541_s11 }
0x1739   : > { %v6169_v41 = vpop.xlane.xlu1 %6168 }
0x173a   : > { %v6187_v34 = vsub.f32 %v20181_v3, %v6169_v41  ;;  %7189 = vrot.lane.b32.xlu1 %v7082_v26, %s11541_s11 }
0x173c   : > { %v6216_v44 = vmul.f32 1.442695, %v6187_v34 }
0x173d   : > { %v7050_v54 = vpop.permute.xlu1 %7049 }
0x173e   : > { %11194 = vpow2.f32 %v6216_v44  ;;  %7191 = vrot.lane.b32.xlu1 %v7083_v46, %s11541_s11  ;;  %v7084_v11 = vsub.f32 %v6940_v58, %v7050_v54 }
0x1741   : > { %v6910_v50 = vpop.permute.xlu1 %6909 }
0x1742   : > { %7193 = vrot.lane.b32.xlu1 %v7084_v11, %s11541_s11  ;;  %v6942_v46 = vmul.f32 %v6910_v50, %v18029_v12 }
0x1744   : > { %v6171_v35 = vpop.xlane.xlu0 %6170 }
0x1745   : > { %v6188_v8 = vsub.f32 %v20182_v21, %v6171_v35  ;;  %v10775_v15 = vpop.permute.xlu1 %10774 }
0x1746   : > { %v10777_v31 = vunpack.i.h.bf16 %v10775_v15  ;;  %v10776_v56 = vunpack.i.l.bf16 %v10775_v15 }
0x1747   : > { %v6218_v53 = vmul.f32 1.442695, %v6188_v8 }
0x1748   : > { %v18223_v61 = vpop.eup %11194  ;;  %v7943_v1 = vsel %vm1032_vm2, %v10771_v62, %v10776_v56  ;;  %v7944_v27 = vsel %vm1032_vm2, %v10772_v60, %v10777_v31  ;;  %v6846_v25 = vpop.permute.xlu0 %6845 }
0x1749   : > { %11196 = vpow2.f32 %v6218_v53  ;;  %v6844_v20 = vpop.permute.xlu1 %6843  ;;  %9859 = vmatmul.mubr.f32.gmra.mrb[44].mxu1 %v18223_v61  ;;  %v10296_v0 = vpack.c.bf16 %v7944_v27, %v7943_v1  ;;  %v6878_v51 = vadd.f32 %v6846_v25, %v6734_v57 }
0x174a   : > { %v6877_v7 = vadd.f32 %v6844_v20, %v6733_v19 }
0x174b   : > { %10298 = vmatprep.subr.msk.bf16.mxu1 %vm13266_vm3, %v10296_v0 }
0x174c   : > { %10301 = vmatpush3.bf16.xpose.msk.msra.mxu1 %vm13266_vm3, %v10296_v0  ;;  %7131 = vrot.lane.b32.xlu0 %v6877_v7, %s11541_s11  ;;  %v10780_v38 = vpop.permute.xlu0 %10779 }
0x174d   : > { %v7052_v39 = vpop.permute.xlu1 %7051  ;;  %v10782_v40 = vunpack.i.h.bf16 %v10780_v38  ;;  %v10781_v42 = vunpack.i.l.bf16 %v10780_v38 }
0x174e   : > { %v7085_v16 = vsub.f32 %v6941_v17, %v7052_v39 }
0x1750   : > { %7195 = vrot.lane.b32.xlu1 %v7085_v16, %s11541_s11  ;;  %7133 = vrot.lane.b32.xlu0 %v6878_v51, %s11541_s11  ;;  %v10785_v49 = vpop.permute.xlu0 %10784 }
0x1751   : > { %v10787_v22 = vunpack.i.h.bf16 %v10785_v49  ;;  %v10786_v10 = vunpack.i.l.bf16 %v10785_v49 }
0x1753   : > { %v18238_v43 = vpop.eup %11196  ;;  %v7945_v14 = vsel %vm1032_vm2, %v10781_v42, %v10786_v10  ;;  %v7946_v59 = vsel %vm1032_vm2, %v10782_v40, %v10787_v22 }
0x1754   : > { %9861 = vmatprep.mubr.f32.mxu1 %v18238_v43  ;;  %10809 = vrot.lane.b32.xlu0 %v20183_v5, %s11541_s11  ;;  %v10302_v37 = vpack.c.bf16 %v7946_v59, %v7945_v14  ;;  %v10790_v9 = vpop.permute.xlu0 %10789 }
0x1755   : > { %v18245_v32 = vpop.f32.mrb[38].mxu1  ;;  %v10792_v35 = vunpack.i.h.bf16 %v10790_v9  ;;  %v10791_v21 = vunpack.i.l.bf16 %v10790_v9 }
0x1756   : > { %v18247_v55 = vpop.f32.mrb[39].mxu1  ;;  %10304 = vmatprep.subr.msk.bf16.mxu1 %vm13266_vm3, %v10302_v37 }
0x1757   : > { %10307 = vmatpush3.bf16.xpose.msk.msra.mxu1 %vm13266_vm3, %v10302_v37 }
0x1758   : > { %10814 = vrot.lane.b32.xlu0 %v20184_v6, %s11541_s11  ;;  %v10800_v30 = vpop.permute.xlu0 %10799 }
0x1759   : > { %v10802_v12 = vunpack.i.h.bf16 %v10800_v30  ;;  %v10801_v50 = vunpack.i.l.bf16 %v10800_v30 }
0x175c   : > { %v7104_v26 = vpop.permute.xlu0 %7103 }
0x1760   : > { %v7106_v41 = vpop.permute.xlu0 %7105 }
0x1764   : > { %v7108_v24 = vpop.permute.xlu0 %7107 }
0x1768   : > { %v7110_v23 = vpop.permute.xlu0 %7109 }
0x176c   : > { %v7112_v58 = vpop.permute.xlu0 %7111 }
0x1770   : > { %v7114_v60 = vpop.permute.xlu0 %7113 }
0x1774   : > { %v7116_v7 = vpop.permute.xlu0 %7115 }
0x1778   : > { %v7118_v38 = vpop.permute.xlu0 %7117 }
0x177c   : > { %v7120_v42 = vpop.permute.xlu0 %7119 }
0x177e   : > { %v6173_v3 = vpop.xlane.xlu1 %6172 }
0x177f   : > { %v6189_v34 = vsub.f32 %v18096_v47, %v6173_v3 }
0x1780   : > { %v7122_v59 = vpop.permute.xlu0 %7121 }
0x1781   : > { %v6220_v44 = vmul.f32 1.442695, %v6189_v34 }
0x1782   : > { %v7054_v54 = vpop.permute.xlu1 %7053 }
0x1783   : > { %11198 = vpow2.f32 %v6220_v44  ;;  %v7086_v33 = vsub.f32 %v6942_v46, %v7054_v54 }
0x1784   : > { %v7124_v30 = vpop.permute.xlu0 %7123 }
0x1785   : > { %7197 = vrot.lane.b32.xlu1 %v7086_v33, %s11541_s11 }
0x1786   : > { %v10795_v11 = vpop.permute.xlu1 %10794 }
0x1787   : > { %v10797_v8 = vunpack.i.h.bf16 %v10795_v11  ;;  %v10796_v15 = vunpack.i.l.bf16 %v10795_v11 }
0x1789   : > { %v7947_v62 = vsel %vm1032_vm2, %v10791_v21, %v10796_v15  ;;  %v7948_v31 = vsel %vm1032_vm2, %v10792_v35, %v10797_v8 }
0x178a   : > { %v10805_v47 = vpop.permute.xlu1 %10804  ;;  %v10308_v56 = vpack.c.bf16 %v7948_v31, %v7947_v62 }
0x178b   : > { %v10807_v53 = vunpack.i.h.bf16 %v10805_v47  ;;  %v10806_v19 = vunpack.i.l.bf16 %v10805_v47 }
0x178c   : > { %10310 = vmatprep.subr.msk.bf16.mxu1 %vm13266_vm3, %v10308_v56 }
0x178d   : > { %v18262_v1 = vpop.eup %11198  ;;  %v7949_v27 = vsel %vm1032_vm2, %v10801_v50, %v10806_v19  ;;  %v7950_v25 = vsel %vm1032_vm2, %v10802_v12, %v10807_v53  ;;  %10313 = vmatpush3.bf16.xpose.msk.msra.mxu1 %vm13266_vm3, %v10308_v56 }
0x178e   : > { %v7168_v20 = vpop.permute.xlu1 %7167  ;;  %9862 = vmatmul.mubr.f32.gmra.mrb[46].mxu1 %v18262_v1  ;;  %v10314_v0 = vpack.c.bf16 %v7950_v25, %v7949_v27 }
0x178f   : > { %v7215_v17 = vsel %vm1032_vm2, %v7104_v26, %v7168_v20 }
0x1790   : > { %9896 = vmatprep.mubr.msk.f32.mxu1 %vm550_vm1, %v7215_v17  ;;  %10316 = vmatprep.subr.msk.bf16.mxu1 %vm13266_vm3, %v10314_v0 }
0x1792   : > { %v7170_v57 = vpop.permute.xlu1 %7169 }
0x1793   : > { %v7216_v40 = vsel %vm1032_vm2, %v7106_v41, %v7170_v57 }
0x1795   : > { %10319 = vmatpush3.bf16.xpose.msk.msra.mxu1 %vm13266_vm3, %v10314_v0 }
0x1796   : > { %v18275_v39 = vpop.f32.mrb[40].mxu1  ;;  %v7172_v51 = vpop.permute.xlu1 %7171 }
0x1797   : > { %v18277_v16 = vpop.f32.mrb[41].mxu1  ;;  %v7217_v22 = vsel %vm1032_vm2, %v7108_v24, %v7172_v51  ;;  %v7126_v24 = vpop.permute.xlu0 %7125 }
0x179a   : > { %v7174_v49 = vpop.permute.xlu1 %7173 }
0x179b   : > { %v7218_v14 = vsel %vm1032_vm2, %v7110_v23, %v7174_v49  ;;  %v7128_v44 = vpop.permute.xlu0 %7127 }
0x179c   : > { %9897 = vmatmul.mubr.msk.f32.vlgmr.msra.gmra.mrb[48].mxu1 %vm550_vm1, %v7216_v40 }
0x179d   : > { %9899 = vmatprep.mubr.msk.f32.mxu1 %vm550_vm1, %v7217_v22 }
0x179e   : > { %v7176_v10 = vpop.permute.xlu1 %7175 }
0x179f   : > { %v7219_v45 = vsel %vm1032_vm2, %v7112_v58, %v7176_v10  ;;  %v7130_v33 = vpop.permute.xlu0 %7129  ;;  %v20202_v10 = vld [vmem:[#allocation31_spill] sm:$0xff] }
0x17a0   : > { %9900 = vmatmul.mubr.msk.f32.gmra.mrb[50].mxu1 %vm550_vm1, %v7218_v14 }
0x17a1   : > { %9902 = vmatprep.mubr.msk.f32.mxu1 %vm550_vm1, %v7219_v45 }
0x17a2   : > { %v7178_v5 = vpop.permute.xlu1 %7177 }
0x17a3   : > { %v7220_v37 = vsel %vm1032_vm2, %v7114_v60, %v7178_v5 }
0x17a4   : > { %9903 = vmatmul.mubr.msk.f32.gmra.mrb[52].mxu1 %vm550_vm1, %v7220_v37 }
0x17a6   : > { %v7180_v6 = vpop.permute.xlu1 %7179 }
0x17a7   : > { %v7221_v9 = vsel %vm1032_vm2, %v7116_v7, %v7180_v6 }
0x17a8   : > { %9905 = vmatprep.mubr.msk.f32.mxu1 %vm550_vm1, %v7221_v9 }
0x17aa   : > { %v7182_v26 = vpop.permute.xlu1 %7181 }
0x17ab   : > { %v7222_v41 = vsel %vm1032_vm2, %v7118_v38, %v7182_v26 }
0x17ac   : > { %9906 = vmatmul.mubr.msk.f32.gmra.mrb[54].mxu1 %vm550_vm1, %v7222_v41 }
0x17ae   : > { %v7184_v23 = vpop.permute.xlu1 %7183 }
0x17af   : > { %v7223_v3 = vsel %vm1032_vm2, %v7120_v42, %v7184_v23 }
0x17b0   : > { %9908 = vmatprep.mubr.msk.f32.mxu1 %vm550_vm1, %v7223_v3 }
0x17b2   : > { %v7186_v34 = vpop.permute.xlu1 %7185 }
0x17b3   : > { %v7224_v46 = vsel %vm1032_vm2, %v7122_v59, %v7186_v34 }
0x17b4   : > { %9909 = vmatmul.mubr.msk.f32.gmra.mrb[56].mxu1 %vm550_vm1, %v7224_v46 }
0x17b6   : > { %v7188_v54 = vpop.permute.xlu1 %7187 }
0x17b7   : > { %v7225_v58 = vsel %vm1032_vm2, %v7124_v30, %v7188_v54  ;;  %v20190_v54 = vld [vmem:[#allocation12_spill] sm:$0xff] }
0x17b8   : > { %9911 = vmatprep.mubr.msk.f32.mxu1 %vm550_vm1, %v7225_v58 }
0x17ba   : > { %v7190_v11 = vpop.permute.xlu1 %7189 }
0x17bb   : > { %v7226_v35 = vsel %vm1032_vm2, %v7126_v24, %v7190_v11  ;;  %v20191_v11 = vld [vmem:[#allocation15_spill] sm:$0xff] }
0x17bc   : > { %9912 = vmatmul.mubr.msk.f32.gmra.mrb[58].mxu1 %vm550_vm1, %v7226_v35 }
0x17be   : > { %v7192_v21 = vpop.permute.xlu1 %7191  ;;  %v7132_v8 = vpop.permute.xlu0 %7131 }
0x17bf   : > { %v7227_v15 = vsel %vm1032_vm2, %v7128_v44, %v7192_v21 }
0x17c0   : > { %9914 = vmatprep.mubr.msk.f32.mxu1 %vm550_vm1, %v7227_v15 }
0x17c2   : > { %v7194_v60 = vpop.permute.xlu1 %7193  ;;  %v7134_v62 = vpop.permute.xlu0 %7133 }
0x17c3   : > { %v7228_v31 = vsel %vm1032_vm2, %v7130_v33, %v7194_v60 }
0x17c4   : > { %9915 = vmatmul.mubr.msk.f32.gmra.mrb[60].mxu1 %vm550_vm1, %v7228_v31 }
0x17c6   : > { %v7196_v47 = vpop.permute.xlu1 %7195  ;;  %v10810_v56 = vpop.permute.xlu0 %10809 }
0x17c7   : > { %v7229_v12 = vsel %vm1032_vm2, %v7132_v8, %v7196_v47  ;;  %v10812_v50 = vunpack.i.h.bf16 %v10810_v56  ;;  %v10811_v53 = vunpack.i.l.bf16 %v10810_v56  ;;  %v20194_v56 = vld [vmem:[#allocation79_spill] sm:$0xff] }
0x17c8   : > { %9917 = vmatprep.mubr.msk.f32.mxu1 %vm550_vm1, %v7229_v12 }
0x17c9   : > { %v10320_v19 = vpack.c.bf16 %v10812_v50, %v10811_v53 }
0x17ca   : > { %v10815_v27 = vpop.permute.xlu0 %10814 }
0x17cb   : > { %v10817_v25 = vunpack.i.h.bf16 %v10815_v27  ;;  %v10816_v20 = vunpack.i.l.bf16 %v10815_v27  ;;  %10321 = vmatprep.subr.bf16.mxu0 %v10320_v19  ;;  %10368 = vmatprep.subr.bf16.mxu1 %v10320_v19  ;;  %v20198_v27 = vld [vmem:[#allocation26_spill] sm:$0xff] }
0x17cc   : > { %10323 = vmatpush3.bf16.msra.mxu0 %v10320_v19  ;;  %10376 = vmatpush3.bf16.msra.mxu1 %v10320_v19  ;;  %v20197_v19 = vld [vmem:[#allocation21_spill] sm:$0xff] }
0x17cd   : > { %v10324_v0 = vpack.c.bf16 %v10817_v25, %v10816_v20 }
0x17cf   : > { %10325 = vmatprep.subr.bf16.mxu0 %v10324_v0  ;;  %10369 = vmatprep.subr.bf16.mxu1 %v10324_v0 }
0x17d0   : > { %10327 = vmatpush3.bf16.msra.mxu0 %v10324_v0  ;;  %10377 = vmatpush3.bf16.msra.mxu1 %v10324_v0  ;;  %v20199_v0 = vld [vmem:[#allocation134_spill] sm:$0xff] }
0x17d1   : > { %vm20200_vm3 = vcmp.le.s32.totalorder %v19928_v48, %v20199_v0 }
0x17db   : > { %v18307_v7 = vpop.f32.mrb[42].mxu1 }
0x17dc   : > { %v18309_v17 = vpop.f32.mrb[43].mxu1 }
0x17f7   : > { %v7198_v57 = vpop.permute.xlu1 %7197 }
0x17f8   : > { %v7230_v38 = vsel %vm1032_vm2, %v7134_v62, %v7198_v57  ;;  %vm20195_vm2 = vcmp.le.s32.totalorder %v19928_v48, %v20194_v56 }
0x17f9   : > { %9918 = vmatmul.mubr.msk.f32.gmra.mrb[62].mxu1 %vm550_vm1, %v7230_v38 }
0x181c   : > { %v18313_v51 = vpop.f32.mrb[44].mxu1 }
0x181d   : > { %v18315_v49 = vpop.f32.mrb[45].mxu1 }
0x1861   : > { %v18317_v40 = vpop.f32.mrb[46].mxu1 }
0x1862   : > { %v18319_v42 = vpop.f32.mrb[47].mxu1 }
0x186f   : > { %v9898_v22 = vpop.f32.mrb[48].mxu1 }
0x1870   : > { %v8193_v14 = vsel %vm519_vm4, %v9898_v22, -1e+30  ;;  %v8113_v45 = vpop.f32.mrb[49].mxu1 }
0x1871   : > { %v8192_v5 = vsel %vm518_vm5, %v8113_v45, -1e+30  ;;  %8210 = vmax.xlane.f32.xlu0 %v8193_v14  ;;  %v20203_v45 = vld [vmem:[#allocation68_spill] sm:$0xff]  ;;  %vm20209_vm5 = vmmov %vm20153_vm11 }
0x1872   : > { %8208 = vmax.xlane.f32.xlu1 %v8192_v5  ;;  %vm20204_vm4 = vcmp.le.s32.totalorder %v19928_v48, %v20203_v45 }
0x1873   : > { %v9901_v37 = vpop.f32.mrb[50].mxu1 }
0x1874   : > { %v8123_v6 = vpop.f32.mrb[51].mxu1  ;;  %v18336_v23 = vsel %vm521_vm6, %v9901_v37, -1e+30  ;;  %v20205_v37 = vld [vmem:[#allocation46_spill] sm:$0xff]  ;;  %vm8769_vm6 = vcmask 261120  }
0x1875   : > { %v18330_v30 = vsel %vm520_vm8, %v8123_v6, -1e+30  ;;  %vm20260_vm8 = vcmask 523264  }
0x1876   : > { %8212 = vmax.xlane.f32.xlu1 %v18330_v30  ;;  %vm20279_vm11 = vmmov %vm20260_vm8 }
0x1877   : > { %v9904_v26 = vpop.f32.mrb[52].mxu1 }
0x1878   : > { %v8133_v41 = vpop.f32.mrb[53].mxu1  ;;  %v18352_v62 = vsel %vm523_vm7, %v9904_v26, -1e+30  ;;  %vm8786_vm7 = vcmask 392192  }
0x1879   : > { %v18342_v34 = vsel %vm522_vm10, %v8133_v41, -1e+30  ;;  %vm20261_vm10 = vmmov %vm20260_vm8 }
0x187a   : > { %8214 = vmax.xlane.f32.xlu1 %v18336_v23 }
0x187e   : > { %8216 = vmax.xlane.f32.xlu1 %v18342_v34 }
0x187f   : > { %v9907_v46 = vpop.f32.mrb[54].mxu1 }
0x1880   : > { %v8143_v44 = vpop.f32.mrb[55].mxu1  ;;  %v18364_v12 = vsel %vm20195_vm2, %v9907_v46, -1e+30  ;;  %vm20284_vm2 = vmmov %vm20260_vm8 }
0x1881   : > { %v18358_v47 = vsel %vm524_vm12, %v8143_v44, -1e+30  ;;  %vm20266_vm12 = vmmov %vm20260_vm8 }
0x1887   : > { %10819 = vrot.lane.b32.xlu0 %v20190_v54, %s11541_s11  ;;  %v9910_v58 = vpop.f32.mrb[56].mxu1 }
0x1888   : > { %v8153_v33 = vpop.f32.mrb[57].mxu1  ;;  %v18380_v57 = vsel %vm20200_vm3, %v9910_v58, -1e+30  ;;  %vm20285_vm3 = vmmov %vm20284_vm2 }
0x1889   : > { %v18370_v53 = vsel %vm526_vm14, %v8153_v33, -1e+30  ;;  %vm20272_vm14 = vmmov %vm20260_vm8 }
0x188f   : > { %10824 = vrot.lane.b32.xlu1 %v20191_v11, %s11541_s11  ;;  %v9913_v35 = vpop.f32.mrb[58].mxu1 }
0x1890   : > { %v8163_v21 = vpop.f32.mrb[59].mxu1  ;;  %v18394_v59 = vsel %vm20204_vm4, %v9913_v35, -1e+30  ;;  %vm20290_vm4 = vmmov %vm20284_vm2 }
0x1891   : > { %v18386_v22 = vsel %vm528_vm0, %v8163_v21, -1e+30  ;;  %vm20208_vm0 = vmmov %vm20113_vm9 }
0x1892   : > { %vm20278_vm9 = vmmov %vm20260_vm8 }
0x1897   : > { %v9916_v8 = vpop.f32.mrb[60].mxu1 }
0x1898   : > { %v8173_v15 = vpop.f32.mrb[61].mxu1  ;;  %v18408_v41 = vsel %vm20208_vm0, %v9916_v8, -1e+30  ;;  %vm20291_vm0 = vmmov %vm20284_vm2 }
0x1899   : > { %v18402_v9 = vsel %vm530_vm15, %v8173_v15, -1e+30  ;;  %v20210_v15 = vld [vmem:[#allocation27_spill] sm:$0xff]  ;;  %vm20273_vm15 = vmmov %vm20260_vm8 }
0x18a6   : > { %8218 = vmax.xlane.f32.xlu0 %v18352_v62 }
0x18b3   : > { %8220 = vmax.xlane.f32.xlu1 %v18358_v47 }
0x18b7   : > { %8222 = vmax.xlane.f32.xlu1 %v18364_v12 }
0x18bb   : > { %8224 = vmax.xlane.f32.xlu1 %v18370_v53 }
0x18bc   : > { %10829 = vrot.lane.b32.xlu0 %v20197_v19, %s11541_s11 }
0x18cc   : > { %10834 = vrot.lane.b32.xlu1 %v20198_v27, %s11541_s11  ;;  %v9919_v25 = vpop.f32.mrb[62].mxu1 }
0x18cd   : > { %v8183_v20 = vpop.f32.mrb[63].mxu1  ;;  %v18414_v3 = vsel %vm20209_vm5, %v9919_v25, -1e+30  ;;  %vm20296_vm5 = vmmov %vm20291_vm0 }
0x18db   : > { %8226 = vmax.xlane.f32.xlu0 %v18380_v57 }
0x18f0   : > { %8228 = vmax.xlane.f32.xlu1 %v18386_v22 }
0x18f1   : > { %10839 = vrot.lane.b32.xlu0 %v20202_v10, %s11541_s11 }
0x18f4   : > { %8230 = vmax.xlane.f32.xlu1 %v18394_v59 }
0x18f5   : > { %10844 = vrot.lane.b32.xlu0 %v20205_v37, %s11541_s11 }
0x18f8   : > { %8232 = vmax.xlane.f32.xlu1 %v18402_v9 }
0x18fc   : > { %8234 = vmax.xlane.f32.xlu1 %v18408_v41 }
0x18fe   : > { %v8211_v24 = vpop.xlane.xlu0 %8210 }
0x18ff   : > { %v8209_v46 = vpop.xlane.xlu1 %8208  ;;  %v8241_v44 = vsub.f32 %v8193_v14, %v8211_v24  ;;  %v20211_v14 = vld [vmem:[#allocation11_spill] sm:$0xff]  ;;  %v20214_v24 = vld [vmem:[#allocation14_spill] sm:$0xff] }
0x1900   : > { %v8240_v54 = vsub.f32 %v8192_v5, %v8209_v46  ;;  %8238 = vmax.xlane.f32.xlu1 %v18414_v3  ;;  %v20215_v46 = vld [vmem:[#allocation61_spill] sm:$0xff] }
0x1901   : > { %v8258_v8 = vmul.f32 1.442695, %v8241_v44  ;;  %v20216_v44 = vld [vmem:[#allocation3_spill] sm:$0xff] }
0x1902   : > { %v8256_v58 = vmul.f32 1.442695, %v8240_v54  ;;  %v10820_v33 = vpop.permute.xlu0 %10819  ;;  %v20217_v54 = vld [vmem:[#allocation20_spill] sm:$0xff] }
0x1903   : > { %v10822_v11 = vunpack.i.h.bf16 %v10820_v33  ;;  %v10821_v35 = vunpack.i.l.bf16 %v10820_v33  ;;  %v8213_v21 = vpop.xlane.xlu1 %8212 }
0x1904   : > { %11200 = vpow2.f32 %v8256_v58  ;;  %6222 = vadd.xlane.f32.xlu1 %v20210_v15  ;;  %v8242_v31 = vsub.f32 %v18330_v30, %v8213_v21 }
0x1905   : > { %v10328_v60 = vpack.c.bf16 %v10822_v11, %v10821_v35  ;;  %11202 = vpow2.f32 %v8258_v8 }
0x1906   : > { %v8260_v5 = vmul.f32 1.442695, %v8242_v31 }
0x1907   : > { %10329 = vmatprep.subr.bf16.mxu0 %v10328_v60  ;;  %10370 = vmatprep.subr.bf16.mxu1 %v10328_v60  ;;  %v8215_v63 = vpop.xlane.xlu1 %8214 }
0x1908   : > { %10331 = vmatpush3.bf16.msra.mxu0 %v10328_v60  ;;  %10378 = vmatpush3.bf16.msra.mxu1 %v10328_v60  ;;  %v8243_v50 = vsub.f32 %v18336_v23, %v8215_v63  ;;  %11204 = vpow2.f32 %v8260_v5  ;;  %v18428_v23 = vsel %vm532_vm13, %v8183_v20, -1e+30  ;;  %vm20267_vm13 = vmmov %vm20260_vm8 }
0x1909   : > { %6224 = vadd.xlane.f32.xlu1 %v20211_v14 }
0x190a   : > { %v8262_v30 = vmul.f32 1.442695, %v8243_v50  ;;  %v20218_v50 = vld [vmem:[#allocation179_spill] sm:$0xff] }
0x190b   : > { %v8217_v56 = vpop.xlane.xlu1 %8216 }
0x190c   : > { %v8244_v27 = vsub.f32 %v18342_v34, %v8217_v56  ;;  %11206 = vpow2.f32 %v8262_v30  ;;  %v20213_v34 = vld [vmem:[#allocation169_spill] sm:$0xff] }
0x190e   : > { %v11201_v19 = vpop.eup %11200  ;;  %v8264_v45 = vmul.f32 1.442695, %v8244_v27 }
0x190f   : > { %9952 = vmatprep.mubr.f32.mxu0 %v11201_v19  ;;  %v10825_v25 = vpop.permute.xlu1 %10824  ;;  %8288 = vadd.xlane.f32.xlu1 %v11201_v19  ;;  %v18422_v10 = vpop.eup %11202 }
0x1910   : > { %v10827_v0 = vunpack.i.h.bf16 %v10825_v25  ;;  %v10826_v38 = vunpack.i.l.bf16 %v10825_v25  ;;  %11208 = vpow2.f32 %v8264_v45 }
0x1912   : > { %v10332_v37 = vpack.c.bf16 %v10827_v0, %v10826_v38  ;;  %v18432_v26 = vpop.eup %11204 }
0x1913   : > { %8290 = vadd.xlane.f32.xlu1 %v18422_v10 }
0x1914   : > { %10333 = vmatprep.subr.bf16.mxu0 %v10332_v37  ;;  %10371 = vmatprep.subr.bf16.mxu1 %v10332_v37 }
0x1915   : > { %8236 = vmax.xlane.f32.xlu0 %v18428_v23  ;;  %10335 = vmatpush3.bf16.msra.mxu0 %v10332_v37 }
0x1916   : > { %10379 = vmatpush3.bf16.msra.mxu1 %v10332_v37  ;;  %v18437_v48 = vpop.eup %11206  ;;  %v20219_v37 = vld [vmem:[#allocation143_spill] sm:$0xff] }
0x1917   : > { %6226 = vadd.xlane.f32.xlu1 %v20213_v34 }
0x1919   : > { %8292 = vadd.xlane.f32.xlu0 %v18432_v26 }
0x191a   : > { %v18440_v20 = vpop.eup %11208 }
0x191b   : > { %6228 = vadd.xlane.f32.xlu1 %v20214_v24 }
0x191d   : > { %6230 = vadd.xlane.f32.xlu0 %v20215_v46 }
0x191f   : > { %8294 = vadd.xlane.f32.xlu1 %v18437_v48 }
0x1921   : > { %8296 = vadd.xlane.f32.xlu0 %v18440_v20 }
0x1923   : > { %6232 = vadd.xlane.f32.xlu1 %v20216_v44 }
0x1925   : > { %6234 = vadd.xlane.f32.xlu0 %v20217_v54 }
0x1933   : > { %v8219_v58 = vpop.xlane.xlu0 %8218 }
0x1934   : > { %v8245_v33 = vsub.f32 %v18352_v62, %v8219_v58 }
0x1936   : > { %v8266_v11 = vmul.f32 1.442695, %v8245_v33 }
0x1937   : > { %v10830_v35 = vpop.permute.xlu0 %10829 }
0x1938   : > { %11210 = vpow2.f32 %v8266_v11  ;;  %v10832_v21 = vunpack.i.h.bf16 %v10830_v35  ;;  %v10831_v8 = vunpack.i.l.bf16 %v10830_v35 }
0x193a   : > { %v10336_v15 = vpack.c.bf16 %v10832_v21, %v10831_v8 }
0x193c   : > { %10337 = vmatprep.subr.bf16.mxu0 %v10336_v15  ;;  %10372 = vmatprep.subr.bf16.mxu1 %v10336_v15 }
0x193d   : > { %10339 = vmatpush3.bf16.msra.mxu0 %v10336_v15  ;;  %10380 = vmatpush3.bf16.msra.mxu1 %v10336_v15 }
0x1940   : > { %v8221_v60 = vpop.xlane.xlu1 %8220 }
0x1941   : > { %v8246_v31 = vsub.f32 %v18358_v47, %v8221_v60 }
0x1942   : > { %v11211_v63 = vpop.eup %11210 }
0x1943   : > { %v8268_v14 = vmul.f32 1.442695, %v8246_v31  ;;  %8298 = vadd.xlane.f32.xlu1 %v11211_v63 }
0x1944   : > { %v8223_v5 = vpop.xlane.xlu1 %8222 }
0x1945   : > { %11212 = vpow2.f32 %v8268_v14  ;;  %v8247_v62 = vsub.f32 %v18364_v12, %v8223_v5 }
0x1947   : > { %v8270_v56 = vmul.f32 1.442695, %v8247_v62  ;;  %6236 = vadd.xlane.f32.xlu1 %v20218_v50 }
0x1948   : > { %v8225_v19 = vpop.xlane.xlu1 %8224 }
0x1949   : > { %11214 = vpow2.f32 %v8270_v56  ;;  %v8248_v27 = vsub.f32 %v18370_v53, %v8225_v19 }
0x194b   : > { %v8272_v25 = vmul.f32 1.442695, %v8248_v27  ;;  %v20220_v27 = vld [vmem:[#allocation47_spill] sm:$0xff] }
0x194c   : > { %v10835_v30 = vpop.permute.xlu1 %10834 }
0x194d   : > { %11216 = vpow2.f32 %v8272_v25  ;;  %v10837_v0 = vunpack.i.h.bf16 %v10835_v30  ;;  %v10836_v38 = vunpack.i.l.bf16 %v10835_v30 }
0x194f   : > { %v11213_v47 = vpop.eup %11212  ;;  %v10340_v45 = vpack.c.bf16 %v10837_v0, %v10836_v38  ;;  %v20221_v0 = vld [vmem:[#allocation150_spill] sm:$0xff] }
0x1950   : > { %8300 = vadd.xlane.f32.xlu0 %v11213_v47 }
0x1951   : > { %10341 = vmatprep.subr.bf16.mxu0 %v10340_v45  ;;  %10373 = vmatprep.subr.bf16.mxu1 %v10340_v45 }
0x1952   : > { %10343 = vmatpush3.bf16.msra.mxu0 %v10340_v45  ;;  %10381 = vmatpush3.bf16.msra.mxu1 %v10340_v45  ;;  %v20223_v45 = vld [vmem:[#allocation16_spill] sm:$0xff] }
0x1953   : > { %v11215_v12 = vpop.eup %11214 }
0x1954   : > { %8302 = vadd.xlane.f32.xlu1 %v11215_v12  ;;  %6238 = vadd.xlane.f32.xlu0 %v20219_v37  ;;  %v20224_v37 = vld [vmem:[#allocation51_spill] sm:$0xff] }
0x1957   : > { %v11217_v6 = vpop.eup %11216 }
0x1958   : > { %6240 = vadd.xlane.f32.xlu1 %v18013_v36  ;;  %8304 = vadd.xlane.f32.xlu0 %v11217_v6 }
0x195c   : > { %6242 = vadd.xlane.f32.xlu0 %v18041_v2 }
0x1968   : > { %v8227_v53 = vpop.xlane.xlu0 %8226 }
0x1969   : > { %v8249_v34 = vsub.f32 %v18380_v57, %v8227_v53  ;;  %v20225_v53 = vld [vmem:[#allocation151_spill] sm:$0xff] }
0x196b   : > { %v8274_v24 = vmul.f32 1.442695, %v8249_v34 }
0x196c   : > { %v10840_v46 = vpop.permute.xlu0 %10839 }
0x196d   : > { %11218 = vpow2.f32 %v8274_v24  ;;  %v10842_v44 = vunpack.i.h.bf16 %v10840_v46  ;;  %v10841_v54 = vunpack.i.l.bf16 %v10840_v46  ;;  %v8803_v24 = vld [vmem:[%s18753_s2] sm:$0xff]  ;;  %v8804_v46 = vld [vmem:[%s18753_s2 + $0x8] sm:$0xff] }
0x196f   : > { %v10344_v58 = vpack.c.bf16 %v10842_v44, %v10841_v54  ;;  %v8805_v44 = vld [vmem:[%s18753_s2 + $0x10] sm:$0xff]  ;;  %v10352_v54 = vpack.c.bf16 %v8804_v46, %v8803_v24 }
0x1970   : > { %v10845_v33 = vpop.permute.xlu0 %10844 }
0x1971   : > { %v10847_v11 = vunpack.i.h.bf16 %v10845_v33  ;;  %v10846_v35 = vunpack.i.l.bf16 %v10845_v33  ;;  %10345 = vmatprep.subr.bf16.mxu0 %v10344_v58  ;;  %10374 = vmatprep.subr.bf16.mxu1 %v10344_v58 }
0x1972   : > { %10347 = vmatpush3.bf16.msra.mxu0 %v10344_v58  ;;  %10382 = vmatpush3.bf16.msra.mxu1 %v10344_v58  ;;  %v8806_v58 = vld [vmem:[%s18753_s2 + $0x18] sm:$0xff] }
0x1973   : > { %v10348_v36 = vpack.c.bf16 %v10847_v11, %v10846_v35  ;;  %v10356_v33 = vpack.c.bf16 %v8806_v58, %v8805_v44  ;;  %v8807_v11 = vld [vmem:[%s18753_s2 + $0x20] sm:$0xff]  ;;  %v8808_v35 = vld [vmem:[%s18753_s2 + $0x28] sm:$0xff] }
0x1975   : > { %10349 = vmatprep.subr.bf16.mxu0 %v10348_v36  ;;  %10375 = vmatprep.subr.bf16.mxu1 %v10348_v36 }
0x1976   : > { %10351 = vmatpush3.bf16.msra.mxu0 %v10348_v36  ;;  %10383 = vmatpush3.bf16.msra.mxu1 %v10348_v36  ;;  %v10360_v36 = vpack.c.bf16 %v8808_v35, %v8807_v11 }
0x1977   : > { %v11219_v2 = vpop.eup %11218  ;;  %10353 = vmatprep.subr.bf16.mxu0 %v10352_v54 }
0x1978   : > { %8306 = vadd.xlane.f32.xlu1 %v11219_v2 }
0x1979   : > { %9953 = vmatmul.mubr.f32.vlgmr.msra.gmra.mrb[80].mxu0 %v18422_v10 }
0x197a   : > { %9955 = vmatprep.mubr.f32.mxu0 %v18432_v26  ;;  %10355 = vmatpush3.bf16.msra.mxu0 %v10352_v54  ;;  %v20232_v54 = vld [vmem:[#allocation154_spill] sm:$0xff] }
0x197b   : > { %10357 = vmatprep.subr.bf16.mxu0 %v10356_v33 }
0x197c   : > { %6244 = vadd.xlane.f32.xlu1 %v18148_v18 }
0x197d   : > { %9956 = vmatmul.mubr.f32.gmra.mrb[82].mxu0 %v18437_v48  ;;  %v8229_v57 = vpop.xlane.xlu1 %8228 }
0x197e   : > { %v8250_v21 = vsub.f32 %v18386_v22, %v8229_v57  ;;  %9958 = vmatprep.mubr.f32.mxu0 %v18440_v20  ;;  %v8810_v57 = vld [vmem:[%s18753_s2 + $0x38] sm:$0xff]  ;;  %10359 = vmatpush3.bf16.msra.mxu0 %v10356_v33 }
0x197f   : > { %10361 = vmatprep.subr.bf16.mxu0 %v10360_v36 }
0x1980   : > { %v8276_v8 = vmul.f32 1.442695, %v8250_v21 }
0x1981   : > { %9959 = vmatmul.mubr.f32.gmra.mrb[84].mxu0 %v11211_v63  ;;  %v8231_v15 = vpop.xlane.xlu1 %8230 }
0x1982   : > { %11220 = vpow2.f32 %v8276_v8  ;;  %v8251_v60 = vsub.f32 %v18394_v59, %v8231_v15  ;;  %9961 = vmatprep.mubr.f32.mxu0 %v11213_v47  ;;  %10363 = vmatpush3.bf16.msra.mxu0 %v10360_v36  ;;  %v20233_v36 = vld [vmem:[#allocation84_spill] sm:$0xff] }
0x1984   : > { %v8278_v31 = vmul.f32 1.442695, %v8251_v60 }
0x1985   : > { %9962 = vmatmul.mubr.f32.gmra.mrb[86].mxu0 %v11215_v12  ;;  %v8233_v10 = vpop.xlane.xlu1 %8232 }
0x1986   : > { %11222 = vpow2.f32 %v8278_v31  ;;  %v8252_v18 = vsub.f32 %v18402_v9, %v8233_v10  ;;  %9964 = vmatprep.mubr.f32.mxu0 %v11217_v6  ;;  %v20226_v10 = vld [vmem:[#allocation65_spill] sm:$0xff] }
0x1988   : > { %v8280_v26 = vmul.f32 1.442695, %v8252_v18  ;;  %v20227_v18 = vld [vmem:[#allocation69_spill] sm:$0xff] }
0x1989   : > { %9965 = vmatmul.mubr.f32.gmra.mrb[88].mxu0 %v11219_v2  ;;  %v8235_v48 = vpop.xlane.xlu1 %8234  ;;  %v8809_v2 = vld [vmem:[%s18753_s2 + $0x30] sm:$0xff] }
0x198a   : > { %11224 = vpow2.f32 %v8280_v26  ;;  %v8253_v22 = vsub.f32 %v18408_v41, %v8235_v48  ;;  %v10364_v21 = vpack.c.bf16 %v8810_v57, %v8809_v2  ;;  %v20234_v2 = vld [vmem:[#allocation155_spill] sm:$0xff] }
0x198c   : > { %v11221_v20 = vpop.eup %11220  ;;  %v8282_v63 = vmul.f32 1.442695, %v8253_v22  ;;  %10365 = vmatprep.subr.bf16.mxu0 %v10364_v21 }
0x198d   : > { %9967 = vmatprep.mubr.f32.mxu0 %v11221_v20  ;;  %v8239_v14 = vpop.xlane.xlu1 %8238  ;;  %8308 = vadd.xlane.f32.xlu0 %v11221_v20 }
0x198e   : > { %11226 = vpow2.f32 %v8282_v63  ;;  %v8255_v59 = vsub.f32 %v18414_v3, %v8239_v14  ;;  %10367 = vmatpush3.bf16.msra.mxu0 %v10364_v21 }
0x1990   : > { %v11223_v5 = vpop.eup %11222  ;;  %v8286_v62 = vmul.f32 1.442695, %v8255_v59 }
0x1991   : > { %9968 = vmatmul.mubr.f32.gmra.mrb[90].mxu0 %v11223_v5  ;;  %8310 = vadd.xlane.f32.xlu1 %v11223_v5  ;;  %v6223_v50 = vpop.xlane.xlu1 %6222 }
0x1992   : > { %6246 = vadd.xlane.f32.xlu0 %v18160_v28  ;;  %11228 = vpow2.f32 %v8286_v62 }
0x1993   : > { %11230 = vrcp.f32 %v20220_v27  ;;  %v20229_v27 = vld [vmem:[#allocation126_spill] sm:$0xff] }
0x1994   : > { %v11225_v9 = vpop.eup %11224 }
0x1995   : > { %9970 = vmatprep.mubr.f32.mxu1 %v11225_v9  ;;  %6248 = vadd.xlane.f32.xlu1 %v18223_v61 }
0x1996   : > { %8312 = vadd.xlane.f32.xlu0 %v11225_v9  ;;  %v6225_v61 = vpop.xlane.xlu1 %6224 }
0x1998   : > { %v11227_v41 = vpop.eup %11226 }
0x1999   : > { %9971 = vmatmul.mubr.f32.vlgmr.msra.gmra.mrb[64].mxu1 %v11227_v41  ;;  %8314 = vadd.xlane.f32.xlu1 %v11227_v41 }
0x199a   : > { %6250 = vadd.xlane.f32.xlu0 %v18238_v43 }
0x199c   : > { %v11229_v3 = vpop.eup %11228  ;;  %v8289_v8 = vpop.xlane.xlu1 %8288 }
0x199d   : > { %6252 = vadd.xlane.f32.xlu1 %v18262_v1  ;;  %v11231_v25 = vpop.eup %11230  ;;  %v20222_v1 = vld [vmem:[#allocation117_spill] sm:$0xff] }
0x199e   : > { %v4414_v38 = vmul.f32 %v11231_v25, %v20221_v0 }
0x19a0   : > { %v8291_v15 = vpop.xlane.xlu1 %8290 }
0x19a1   : > { %8318 = vadd.xlane.f32.xlu1 %v11229_v3 }
0x19a2   : > { %v8237_v56 = vpop.xlane.xlu0 %8236 }
0x19a3   : > { %v8254_v19 = vsub.f32 %v18428_v23, %v8237_v56 }
0x19a4   : > { %v6227_v60 = vpop.xlane.xlu1 %6226 }
0x19a5   : > { %v8284_v28 = vmul.f32 1.442695, %v8254_v19 }
0x19a6   : > { %v8293_v22 = vpop.xlane.xlu0 %8292 }
0x19a7   : > { %11232 = vpow2.f32 %v8284_v28 }
0x19a8   : > { %11234 = vrcp.f32 %v6223_v50  ;;  %v6229_v31 = vpop.xlane.xlu1 %6228 }
0x19a9   : > { %11236 = vrcp.f32 %v6225_v61  ;;  %v20230_v61 = vld [vmem:[#allocation153_spill] sm:$0xff] }
0x19aa   : > { %11238 = vrcp.f32 %v20224_v37 }
0x19ab   : > { %11240 = vrcp.f32 %v8291_v15  ;;  %v20235_v15 = vld [vmem:[#allocation97_spill] sm:$0xff] }
0x19ac   : > { %11242 = vrcp.f32 %v8289_v8  ;;  %v8295_v26 = vpop.xlane.xlu1 %8294 }
0x19ad   : > { %11244 = vrcp.f32 %v20226_v10 }
0x19ae   : > { %11246 = vrcp.f32 %v20227_v18 }
0x19af   : > { %11248 = vrcp.f32 %v6229_v31 }
0x19b0   : > { %11250 = vrcp.f32 %v6227_v60  ;;  %v6233_v50 = vpop.xlane.xlu1 %6232 }
0x19b1   : > { %v11233_v30 = vpop.eup %11232  ;;  %11252 = vrcp.f32 %v8295_v26 }
0x19b2   : > { %v11235_v43 = vpop.eup %11234  ;;  %8316 = vadd.xlane.f32.xlu0 %v11233_v30  ;;  %9973 = vmatprep.mubr.f32.mxu1 %v11233_v30  ;;  %11254 = vrcp.f32 %v8293_v22  ;;  %v6231_v30 = vpop.xlane.xlu0 %6230 }
0x19b3   : > { %8579 = vrot.lane.b32.xlu1 %v4414_v38, %s11538_s8  ;;  %9974 = vmatmul.mubr.f32.gmra.mrb[66].mxu1 %v11229_v3  ;;  %v6479_v47 = vmul.f32 %v11235_v43, %v20222_v1  ;;  %v11237_v23 = vpop.eup %11236  ;;  %v20228_v3 = vld [vmem:[#allocation152_spill] sm:$0xff]  ;;  %11256 = vrcp.f32 %v20229_v27 }
0x19b4   : > { %v6480_v12 = vmul.f32 %v11237_v23, %v20223_v45  ;;  %v11239_v6 = vpop.eup %11238  ;;  %v20231_v38 = vld [vmem:[#allocation80_spill] sm:$0xff] }
0x19b5   : > { %v4413_v34 = vmul.f32 %v11239_v6, %v20225_v53  ;;  %v11241_v48 = vpop.eup %11240  ;;  %11258 = vrcp.f32 %v20231_v38 }
0x19b6   : > { %v11243_v63 = vpop.eup %11242  ;;  %11260 = vrcp.f32 %v6233_v50  ;;  %v8297_v37 = vpop.xlane.xlu0 %8296 }
0x19b7   : > { %8641 = vrot.lane.b32.xlu1 %v6479_v47, %s11544_s10  ;;  %v11245_v62 = vpop.eup %11244  ;;  %11262 = vrcp.f32 %v6231_v30 }
0x19b8   : > { %v11247_v41 = vpop.eup %11246  ;;  %v4416_v56 = vmul.f32 %v11245_v62, %v20228_v3  ;;  %v20238_v3 = vld [vmem:[#allocation157_spill] sm:$0xff] }
0x19b9   : > { %v11249_v28 = vpop.eup %11248  ;;  %v4415_v25 = vmul.f32 %v11247_v41, %v20230_v61  ;;  %v20237_v41 = vld [vmem:[#allocation49_spill] sm:$0xff] }
0x19ba   : > { %v11251_v0 = vpop.eup %11250  ;;  %v6482_v47 = vmul.f32 %v11249_v28, %v18052_v13  ;;  %v6235_v21 = vpop.xlane.xlu0 %6234  ;;  %v20239_v28 = vld [vmem:[#allocation135_spill] sm:$0xff] }
0x19bb   : > { %8643 = vrot.lane.b32.xlu1 %v6480_v12, %s11544_s10  ;;  %v6481_v23 = vmul.f32 %v11251_v0, %v18054_v29  ;;  %v11253_v12 = vpop.eup %11252 }
0x19bc   : > { %v11255_v53 = vpop.eup %11254 }
0x19bd   : > { %v11257_v13 = vpop.eup %11256 }
0x19be   : > { %v4418_v58 = vmul.f32 %v11257_v13, %v20232_v54  ;;  %v20243_v54 = vld [vmem:[#allocation52_spill] sm:$0xff] }
0x19bf   : > { %v11259_v44 = vpop.eup %11258 }
0x19c0   : > { %v11261_v35 = vpop.eup %11260  ;;  %v4417_v57 = vmul.f32 %v11259_v44, %v20234_v2 }
0x19c1   : > { %v11263_v8 = vpop.eup %11262  ;;  %v6484_v60 = vmul.f32 %v11261_v35, %v18167_v4 }
0x19c2   : > { %v6483_v31 = vmul.f32 %v11263_v8, %v18170_v52 }
0x19c8   : > { %8577 = vrot.lane.b32.xlu0 %v4413_v34, %s11538_s8 }
0x19d0   : > { %v8299_v45 = vpop.xlane.xlu1 %8298 }
0x19d1   : > { %11264 = vrcp.f32 %v8299_v45 }
0x19d2   : > { %11266 = vrcp.f32 %v8297_v37 }
0x19d3   : > { %11268 = vrcp.f32 %v20233_v36 }
0x19d4   : > { %v6237_v33 = vpop.xlane.xlu1 %6236  ;;  %11270 = vrcp.f32 %v20235_v15 }
0x19d5   : > { %11272 = vrcp.f32 %v6237_v33 }
0x19d6   : > { %11274 = vrcp.f32 %v6235_v21 }
0x19db   : > { %v11265_v18 = vpop.eup %11264 }
0x19dc   : > { %v11267_v22 = vpop.eup %11266 }
0x19dd   : > { %v8301_v26 = vpop.xlane.xlu0 %8300  ;;  %v11269_v4 = vpop.eup %11268 }
0x19de   : > { %v11271_v52 = vpop.eup %11270 }
0x19e1   : > { %v8303_v10 = vpop.xlane.xlu1 %8302  ;;  %v6239_v50 = vpop.xlane.xlu0 %6238 }
0x19e2   : > { %11276 = vrcp.f32 %v8303_v10  ;;  %v20245_v10 = vld [vmem:[#allocation107_spill] sm:$0xff] }
0x19e3   : > { %11278 = vrcp.f32 %v8301_v26 }
0x19e4   : > { %11280 = vrcp.f32 %v20237_v41 }
0x19e5   : > { %v6241_v62 = vpop.xlane.xlu1 %6240  ;;  %11282 = vrcp.f32 %v20239_v28 }
0x19e6   : > { %11284 = vrcp.f32 %v6241_v62 }
0x19e7   : > { %11286 = vrcp.f32 %v6239_v50 }
0x1a05   : > { %v8307_v0 = vpop.xlane.xlu1 %8306 }
0x1a06   : > { %11288 = vrcp.f32 %v8307_v0 }
0x1a09   : > { %v6245_v37 = vpop.xlane.xlu1 %6244 }
0x1a1e   : > { %v8311_v33 = vpop.xlane.xlu1 %8310 }
0x1a4c   : > { %v9954_v20 = vpop.f32.mrb[80].mxu0 }
0x1a4d   : > { %v8546_v14 = vmul.f32 %v11241_v48, %v9954_v20  ;;  %v8434_v59 = vpop.f32.mrb[81].mxu0 }
0x1a4e   : > { %v8545_v5 = vmul.f32 %v11243_v63, %v8434_v59  ;;  %v20236_v59 = vld [vmem:[#allocation156_spill] sm:$0xff] }
0x1a4f   : > { %8707 = vrot.lane.b32.xlu1 %v8546_v14, %s11540_s29 }
0x1a50   : > { %v9957_v9 = vpop.f32.mrb[82].mxu0  ;;  %8705 = vrot.lane.b32.xlu0 %v8545_v5, %s11540_s29  ;;  %v4420_v5 = vmul.f32 %v11269_v4, %v20236_v59 }
0x1a51   : > { %v8444_v19 = vpop.f32.mrb[83].mxu0  ;;  %v8548_v34 = vmul.f32 %v11253_v12, %v9957_v9  ;;  %v11273_v9 = vpop.eup %11272 }
0x1a52   : > { %v8547_v46 = vmul.f32 %v11255_v53, %v8444_v19  ;;  %v11275_v19 = vpop.eup %11274 }
0x1a53   : > { %8583 = vrot.lane.b32.xlu1 %v4416_v56, %s11538_s8  ;;  %v4419_v56 = vmul.f32 %v11271_v52, %v20238_v3  ;;  %v6485_v30 = vmul.f32 %v11275_v19, %v18247_v55  ;;  %v11277_v38 = vpop.eup %11276  ;;  %v20240_v55 = vld [vmem:[#allocation158_spill] sm:$0xff] }
0x1a54   : > { %v9960_v43 = vpop.f32.mrb[84].mxu0  ;;  %8581 = vrot.lane.b32.xlu0 %v4415_v25, %s11538_s8  ;;  %v6486_v25 = vmul.f32 %v11273_v9, %v18245_v32 }
0x1a55   : > { %v8454_v1 = vpop.f32.mrb[85].mxu0  ;;  %v8550_v20 = vmul.f32 %v11265_v18, %v9960_v43  ;;  %v8305_v43 = vpop.xlane.xlu0 %8304  ;;  %v20246_v18 = vld [vmem:[#allocation161_spill] sm:$0xff] }
0x1a56   : > { %v8549_v14 = vmul.f32 %v11267_v22, %v8454_v1  ;;  %v11279_v1 = vpop.eup %11278  ;;  %11290 = vrcp.f32 %v8305_v43  ;;  %v20251_v43 = vld [vmem:[#allocation37_spill] sm:$0xff] }
0x1a57   : > { %8647 = vrot.lane.b32.xlu1 %v6482_v47, %s11544_s10  ;;  %v11281_v45 = vpop.eup %11280 }
0x1a58   : > { %v18516_v6 = vpop.f32.mrb[86].mxu0  ;;  %8645 = vrot.lane.b32.xlu0 %v6481_v23, %s11544_s10  ;;  %v11283_v32 = vpop.eup %11282  ;;  %v4422_v12 = vmul.f32 %v11281_v45, %v20240_v55 }
0x1a59   : > { %v18519_v24 = vpop.f32.mrb[87].mxu0  ;;  %v8552_v47 = vmul.f32 %v11277_v38, %v18516_v6  ;;  %v11285_v53 = vpop.eup %11284 }
0x1a5a   : > { %v8551_v23 = vmul.f32 %v11279_v1, %v18519_v24  ;;  %v6243_v44 = vpop.xlane.xlu0 %6242  ;;  %v11287_v6 = vpop.eup %11286  ;;  %v6488_v24 = vmul.f32 %v11285_v53, %v18275_v39 }
0x1a5b   : > { %8711 = vrot.lane.b32.xlu1 %v8548_v34, %s11540_s29  ;;  %v20241_v34 = vld [vmem:[#allocation130_spill] sm:$0xff]  ;;  %v11289_v35 = vpop.eup %11288 }
0x1a5c   : > { %v18522_v29 = vpop.f32.mrb[88].mxu0  ;;  %8709 = vrot.lane.b32.xlu0 %v8547_v46, %s11540_s29  ;;  %11292 = vrcp.f32 %v20241_v34  ;;  %v20242_v46 = vld [vmem:[#allocation159_spill] sm:$0xff] }
0x1a5d   : > { %v18526_v11 = vpop.f32.mrb[89].mxu0  ;;  %v4421_v13 = vmul.f32 %v11283_v32, %v20242_v46  ;;  %11294 = vrcp.f32 %v20243_v54  ;;  %v20253_v46 = vld [vmem:[#allocation165_spill] sm:$0xff] }
0x1a5e   : > { %11296 = vrcp.f32 %v6245_v37  ;;  %v8309_v36 = vpop.xlane.xlu0 %8308 }
0x1a5f   : > { %8587 = vrot.lane.b32.xlu1 %v4418_v58, %s11538_s8  ;;  %11298 = vrcp.f32 %v6243_v44  ;;  %v6487_v58 = vmul.f32 %v11287_v6, %v18277_v16  ;;  %v20244_v16 = vld [vmem:[#allocation160_spill] sm:$0xff] }
0x1a60   : > { %8585 = vrot.lane.b32.xlu0 %v4417_v57, %s11538_s8  ;;  %v11291_v2 = vpop.eup %11290  ;;  %v8554_v57 = vmul.f32 %v11289_v35, %v18522_v29  ;;  %11300 = vrcp.f32 %v8311_v33  ;;  %v20254_v33 = vld [vmem:[#allocation141_spill] sm:$0xff] }
0x1a61   : > { %v8553_v21 = vmul.f32 %v11291_v2, %v18526_v11  ;;  %11302 = vrcp.f32 %v8309_v36  ;;  %v20255_v36 = vld [vmem:[#allocation114_spill] sm:$0xff] }
0x1a62   : > { %11304 = vrcp.f32 %v20245_v10  ;;  %v6247_v22 = vpop.xlane.xlu0 %6246 }
0x1a63   : > { %8651 = vrot.lane.b32.xlu1 %v6484_v60, %s11544_s10  ;;  %v6249_v60 = vpop.xlane.xlu1 %6248 }
0x1a64   : > { %v18536_v48 = vpop.f32.mrb[90].mxu0  ;;  %8649 = vrot.lane.b32.xlu0 %v6483_v31, %s11544_s10 }
0x1a65   : > { %v18539_v63 = vpop.f32.mrb[91].mxu0 }
0x1a66   : > { %v11293_v8 = vpop.eup %11292  ;;  %v8313_v62 = vpop.xlane.xlu0 %8312 }
0x1a67   : > { %8715 = vrot.lane.b32.xlu1 %v8550_v20, %s11540_s29  ;;  %v11295_v39 = vpop.eup %11294  ;;  %v4424_v15 = vmul.f32 %v11293_v8, %v20244_v16  ;;  %v20247_v20 = vld [vmem:[#allocation112_spill] sm:$0xff]  ;;  %v8315_v52 = vpop.xlane.xlu1 %8314  ;;  %v20256_v8 = vld [vmem:[#allocation119_spill] sm:$0xff] }
0x1a68   : > { %8713 = vrot.lane.b32.xlu0 %v8549_v14, %s11540_s29  ;;  %v11297_v31 = vpop.eup %11296  ;;  %v4423_v26 = vmul.f32 %v11295_v39, %v20246_v18  ;;  %11306 = vrcp.f32 %v20247_v20  ;;  %v20257_v16 = vld [vmem:[#allocation63_spill] sm:$0xff] }
0x1a69   : > { %v11299_v29 = vpop.eup %11298  ;;  %11308 = vrcp.f32 %v6249_v60  ;;  %v6490_v11 = vmul.f32 %v11297_v31, %v18307_v7  ;;  %v20259_v31 = vld [vmem:[#allocation74_spill] sm:$0xff] }
0x1a6a   : > { %11310 = vrcp.f32 %v6247_v22  ;;  %v6489_v4 = vmul.f32 %v11299_v29, %v18309_v17  ;;  %v6251_v38 = vpop.xlane.xlu0 %6250 }
0x1a6b   : > { %8591 = vrot.lane.b32.xlu1 %v4420_v5, %s11538_s8  ;;  %v11301_v5 = vpop.eup %11300  ;;  %11312 = vrcp.f32 %v8315_v52  ;;  %v6253_v19 = vpop.xlane.xlu1 %6252 }
0x1a6c   : > { %v18548_v27 = vpop.f32.mrb[64].mxu1  ;;  %8589 = vrot.lane.b32.xlu0 %v4419_v56, %s11538_s8  ;;  %v11303_v9 = vpop.eup %11302  ;;  %v8556_v41 = vmul.f32 %v11301_v5, %v18536_v48  ;;  %11314 = vrcp.f32 %v8313_v62  ;;  %v20248_v56 = vld [vmem:[#allocation162_spill] sm:$0xff] }
0x1a6d   : > { %v18551_v61 = vpop.f32.mrb[65].mxu1  ;;  %v8555_v3 = vmul.f32 %v11303_v9, %v18539_v63  ;;  %v11305_v7 = vpop.eup %11304  ;;  %v20262_v9 = vld [vmem:[#allocation53_spill] sm:$0xff] }
0x1a6e   : > { %v4426_v50 = vmul.f32 %v11305_v7, %v20248_v56  ;;  %v8317_v45 = vpop.xlane.xlu0 %8316  ;;  %v20264_v7 = vld [vmem:[#allocation91_spill] sm:$0xff]  ;;  %v20265_v56 = vld [vmem:[#allocation85_spill] sm:$0xff] }
0x1a6f   : > { %8655 = vrot.lane.b32.xlu1 %v6486_v25, %s11544_s10  ;;  %v20249_v25 = vld [vmem:[#allocation72_spill] sm:$0xff] }
0x1a70   : > { %8653 = vrot.lane.b32.xlu0 %v6485_v30, %s11544_s10  ;;  %11316 = vrcp.f32 %v20249_v25  ;;  %v20250_v30 = vld [vmem:[#allocation163_spill] sm:$0xff] }
0x1a71   : > { %11318 = vrcp.f32 %v20251_v43 }
0x1a72   : > { %v11307_v17 = vpop.eup %11306  ;;  %11320 = vrcp.f32 %v6253_v19 }
0x1a73   : > { %8719 = vrot.lane.b32.xlu1 %v8552_v47, %s11540_s29  ;;  %v11309_v28 = vpop.eup %11308  ;;  %v4425_v0 = vmul.f32 %v11307_v17, %v20250_v30  ;;  %11322 = vrcp.f32 %v6251_v38  ;;  %v8319_v47 = vpop.xlane.xlu1 %8318 }
0x1a74   : > { %8717 = vrot.lane.b32.xlu0 %v8551_v23, %s11540_s29  ;;  %v11311_v48 = vpop.eup %11310  ;;  %v6492_v63 = vmul.f32 %v11309_v28, %v18313_v51  ;;  %11324 = vrcp.f32 %v8319_v47 }
0x1a75   : > { %v6491_v1 = vmul.f32 %v11311_v48, %v18315_v49  ;;  %v11313_v23 = vpop.eup %11312  ;;  %11326 = vrcp.f32 %v8317_v45  ;;  %v20252_v49 = vld [vmem:[#allocation164_spill] sm:$0xff] }
0x1a76   : > { %v11315_v32 = vpop.eup %11314  ;;  %v8558_v55 = vmul.f32 %v11313_v23, %v18548_v27  ;;  %11328 = vrcp.f32 %v20254_v33 }
0x1a77   : > { %8595 = vrot.lane.b32.xlu1 %v4422_v12, %s11538_s8  ;;  %v8557_v12 = vmul.f32 %v11315_v32, %v18551_v61  ;;  %v8580_v35 = vpop.permute.xlu1 %8579  ;;  %11330 = vrcp.f32 %v20255_v36  ;;  %v20268_v32 = vld [vmem:[#allocation116_spill] sm:$0xff] }
0x1a78   : > { %8593 = vrot.lane.b32.xlu0 %v4421_v13, %s11538_s8  ;;  %11332 = vrcp.f32 %v20257_v16 }
0x1a7a   : > { %v11317_v37 = vpop.eup %11316 }
0x1a7b   : > { %8659 = vrot.lane.b32.xlu1 %v6488_v24, %s11544_s10  ;;  %v11319_v51 = vpop.eup %11318  ;;  %v4428_v53 = vmul.f32 %v11317_v37, %v20252_v49  ;;  %v20270_v37 = vld [vmem:[#allocation56_spill] sm:$0xff]  ;;  %v20271_v49 = vld [vmem:[#allocation137_spill] sm:$0xff] }
0x1a7c   : > { %8657 = vrot.lane.b32.xlu0 %v6487_v58, %s11544_s10  ;;  %v11321_v34 = vpop.eup %11320  ;;  %v4427_v13 = vmul.f32 %v11319_v51, %v20253_v46 }
0x1a7d   : > { %v11323_v44 = vpop.eup %11322  ;;  %v6494_v27 = vmul.f32 %v11321_v34, %v18317_v40  ;;  %v8642_v40 = vpop.permute.xlu1 %8641 }
0x1a7e   : > { %v6493_v61 = vmul.f32 %v11323_v44, %v18319_v42  ;;  %v11325_v6 = vpop.eup %11324  ;;  %v8578_v42 = vpop.permute.xlu0 %8577 }
0x1a7f   : > { %8723 = vrot.lane.b32.xlu1 %v8554_v57, %s11540_s29  ;;  %v11327_v54 = vpop.eup %11326 }
0x1a80   : > { %8721 = vrot.lane.b32.xlu0 %v8553_v21, %s11540_s29  ;;  %v11329_v2 = vpop.eup %11328 }
0x1a81   : > { %v11331_v57 = vpop.eup %11330  ;;  %v8644_v21 = vpop.permute.xlu1 %8643  ;;  %v2331_v39 = vmul.f32 %v11329_v2, %v20256_v8  ;;  %v20277_v8 = vld [vmem:[#allocation104_spill] sm:$0xff] }
0x1a82   : > { %v2332_v10 = vmul.f32 %v11331_v57, %v20259_v31  ;;  %v20276_v57 = vld [vmem:[#allocation132_spill] sm:$0xff] }
0x1a83   : > { %8599 = vrot.lane.b32.xlu1 %v4424_v15, %s11538_s8  ;;  %v20258_v15 = vld [vmem:[#allocation101_spill] sm:$0xff]  ;;  %v8753_v60 = vsel %vm550_vm1, %v2331_v39, %v8578_v42  ;;  %v20275_v42 = vld [vmem:[#allocation128_spill] sm:$0xff] }
0x1a84   : > { %8597 = vrot.lane.b32.xlu0 %v4423_v26, %s11538_s8  ;;  %11334 = vrcp.f32 %v20258_v15  ;;  %v8754_v26 = vsel %vm550_vm1, %v2332_v10, %v8580_v35  ;;  %v8770_v22 = vsel %vm8769_vm6, %v8753_v60, %v8642_v40  ;;  %v20274_v40 = vld [vmem:[#allocation103_spill] sm:$0xff] }
0x1a85   : > { %v8771_v20 = vsel %vm8769_vm6, %v8754_v26, %v8644_v21  ;;  %11336 = vrcp.f32 %v20262_v9 }
0x1a86   : > { %v9975_v14 = vpop.f32.mrb[66].mxu1 }
0x1a87   : > { %v8504_v59 = vpop.f32.mrb[67].mxu1  ;;  %8663 = vrot.lane.b32.xlu1 %v6490_v11, %s11544_s10  ;;  %v8560_v24 = vmul.f32 %v11325_v6, %v9975_v14 }
0x1a88   : > { %8661 = vrot.lane.b32.xlu0 %v6489_v4, %s11544_s10  ;;  %v8559_v58 = vmul.f32 %v11327_v54, %v8504_v59  ;;  %v11333_v59 = vpop.eup %11332 }
0x1a89   : > { %v2333_v17 = vmul.f32 %v11333_v59, %v20264_v7 }
0x1a8b   : > { %8727 = vrot.lane.b32.xlu1 %v8556_v41, %s11540_s29 }
0x1a8c   : > { %8725 = vrot.lane.b32.xlu0 %v8555_v3, %s11540_s29  ;;  %v20263_v3 = vld [vmem:[#allocation71_spill] sm:$0xff] }
0x1a8d   : > { %11338 = vrcp.f32 %v20263_v3 }
0x1a8e   : > { %v11335_v5 = vpop.eup %11334  ;;  %11340 = vrcp.f32 %v20268_v32 }
0x1a8f   : > { %8603 = vrot.lane.b32.xlu1 %v4426_v50, %s11538_s8  ;;  %v2334_v50 = vmul.f32 %v11335_v5, %v20265_v56  ;;  %v11337_v47 = vpop.eup %11336  ;;  %v20281_v5 = vld [vmem:[#allocation82_spill] sm:$0xff] }
0x1a90   : > { %8601 = vrot.lane.b32.xlu0 %v4425_v0, %s11538_s8  ;;  %v2335_v51 = vmul.f32 %v11337_v47, %v20270_v37 }
0x1a93   : > { %8667 = vrot.lane.b32.xlu1 %v6492_v63, %s11544_s10 }
0x1a94   : > { %8665 = vrot.lane.b32.xlu0 %v6491_v1, %s11544_s10 }
0x1a97   : > { %8731 = vrot.lane.b32.xlu1 %v8558_v55, %s11540_s29  ;;  %v11339_v23 = vpop.eup %11338 }
0x1a98   : > { %8729 = vrot.lane.b32.xlu0 %v8557_v12, %s11540_s29  ;;  %v20269_v12 = vld [vmem:[#allocation86_spill] sm:$0xff]  ;;  %v11341_v33 = vpop.eup %11340 }
0x1a99   : > { %11342 = vrcp.f32 %v20269_v12  ;;  %v2337_v21 = vmul.f32 %v11341_v33, %v20276_v57 }
0x1a9a   : > { %11344 = vrcp.f32 %v20274_v40 }
0x1a9b   : > { %8607 = vrot.lane.b32.xlu1 %v4428_v53, %s11538_s8  ;;  %v2336_v53 = vmul.f32 %v11339_v23, %v20271_v49  ;;  %11346 = vrcp.f32 %v20275_v42  ;;  %v20287_v23 = vld [vmem:[#allocation78_spill] sm:$0xff] }
0x1a9c   : > { %8605 = vrot.lane.b32.xlu0 %v4427_v13, %s11538_s8 }
0x1a9f   : > { %8671 = vrot.lane.b32.xlu1 %v6494_v27, %s11544_s10 }
0x1aa0   : > { %8669 = vrot.lane.b32.xlu0 %v6493_v61, %s11544_s10  ;;  %s18714_s10 = scalar_lea.vmem %s18756_s5, %s9246_s13 }
0x1aa3   : > { %8735 = vrot.lane.b32.xlu1 %v8560_v24, %s11540_s29  ;;  %v11343_v35 = vpop.eup %11342 }
0x1aa4   : > { %8733 = vrot.lane.b32.xlu0 %v8559_v58, %s11540_s29  ;;  %v2338_v39 = vmul.f32 %v11343_v35, %v20277_v8  ;;  %v20293_v35 = vld [vmem:[#allocation95_spill] sm:$0xff] }
0x1ac1   : > { %v8708_v18 = vpop.permute.xlu1 %8707 }
0x1ac2   : > { %v8706_v29 = vpop.permute.xlu0 %8705  ;;  %v8788_v14 = vsel %vm8786_vm7, %v8771_v20, %v8708_v18 }
0x1ac3   : > { %v8787_v11 = vsel %vm8786_vm7, %v8770_v22, %v8706_v29 }
0x1ac4   : > { %9992 = vmatprep.mubr.msk.f32.mxu0 %vm20260_vm8, %v8787_v11  ;;  %v11345_v11 = vpop.eup %11344  ;;  %vm20297_vm8 = vmmov %vm20291_vm0 }
0x1ac5   : > { %v8584_v4 = vpop.permute.xlu1 %8583  ;;  %9993 = vmatmul.mubr.msk.f32.vlgmr.msra.gmra.mrb[92].mxu0 %vm20261_vm10, %v8788_v14  ;;  %v11347_v14 = vpop.eup %11346  ;;  %vm20300_vm10 = vmmov %vm20291_vm0 }
0x1ac6   : > { %v8582_v52 = vpop.permute.xlu0 %8581  ;;  %v8756_v25 = vsel %vm550_vm1, %v2334_v50, %v8584_v4 }
0x1ac7   : > { %v8755_v19 = vsel %vm550_vm1, %v2333_v17, %v8582_v52  ;;  %v20280_v52 = vld [vmem:[#allocation67_spill] sm:$0xff] }
0x1ac8   : > { %11348 = vrcp.f32 %v20280_v52 }
0x1ac9   : > { %v8648_v62 = vpop.permute.xlu1 %8647  ;;  %11350 = vrcp.f32 %v20281_v5 }
0x1aca   : > { %v8646_v41 = vpop.permute.xlu0 %8645  ;;  %v8773_v38 = vsel %vm8769_vm6, %v8756_v25, %v8648_v62  ;;  %v20282_v62 = vld [vmem:[#allocation94_spill] sm:$0xff] }
0x1acb   : > { %v8772_v30 = vsel %vm8769_vm6, %v8755_v19, %v8646_v41  ;;  %v2339_v9 = vmul.f32 %v11345_v11, %v20282_v62  ;;  %v20283_v41 = vld [vmem:[#allocation42_spill] sm:$0xff]  ;;  %v20298_v11 = vld [vmem:[#allocation87_spill] sm:$0xff] }
0x1acc   : > { %v2340_v3 = vmul.f32 %v11347_v14, %v20283_v41 }
0x1acd   : > { %v8712_v28 = vpop.permute.xlu1 %8711 }
0x1ace   : > { %v8710_v0 = vpop.permute.xlu0 %8709  ;;  %v8790_v43 = vsel %vm8786_vm7, %v8773_v38, %v8712_v28 }
0x1acf   : > { %v8789_v48 = vsel %vm8786_vm7, %v8772_v30, %v8710_v0 }
0x1ad0   : > { %9995 = vmatprep.mubr.msk.f32.mxu0 %vm20266_vm12, %v8789_v48  ;;  %vm20301_vm12 = vmmov %vm20291_vm0 }
0x1ad1   : > { %v8588_v63 = vpop.permute.xlu1 %8587  ;;  %9996 = vmatmul.mubr.msk.f32.gmra.mrb[94].mxu0 %vm20267_vm13, %v8790_v43  ;;  %vm20305_vm13 = vmmov %vm20291_vm0 }
0x1ad2   : > { %v8586_v1 = vpop.permute.xlu0 %8585  ;;  %v8758_v13 = vsel %vm550_vm1, %v2336_v53, %v8588_v63  ;;  %v11349_v48 = vpop.eup %11348 }
0x1ad3   : > { %v8757_v34 = vsel %vm550_vm1, %v2335_v51, %v8586_v1  ;;  %v11351_v43 = vpop.eup %11350  ;;  %v20286_v1 = vld [vmem:[#allocation99_spill] sm:$0xff] }
0x1ad4   : > { %11352 = vrcp.f32 %v20286_v1 }
0x1ad5   : > { %v8652_v45 = vpop.permute.xlu1 %8651  ;;  %11354 = vrcp.f32 %v20287_v23 }
0x1ad6   : > { %v8650_v55 = vpop.permute.xlu0 %8649  ;;  %v8775_v61 = vsel %vm8769_vm6, %v8758_v13, %v8652_v45  ;;  %v20288_v45 = vld [vmem:[#allocation89_spill] sm:$0xff] }
0x1ad7   : > { %v8774_v44 = vsel %vm8769_vm6, %v8757_v34, %v8650_v55  ;;  %v2341_v32 = vmul.f32 %v11349_v48, %v20288_v45  ;;  %v20289_v55 = vld [vmem:[#allocation120_spill] sm:$0xff] }
0x1ad8   : > { %v2342_v12 = vmul.f32 %v11351_v43, %v20289_v55 }
0x1ad9   : > { %v8716_v46 = vpop.permute.xlu1 %8715 }
0x1ada   : > { %v8714_v27 = vpop.permute.xlu0 %8713  ;;  %v8792_v54 = vsel %vm8786_vm7, %v8775_v61, %v8716_v46 }
0x1adb   : > { %v8791_v6 = vsel %vm8786_vm7, %v8774_v44, %v8714_v27 }
0x1adc   : > { %9998 = vmatprep.mubr.msk.f32.mxu0 %vm20272_vm14, %v8791_v6  ;;  %vm20306_vm14 = vmmov %vm20291_vm0 }
0x1add   : > { %v8592_v24 = vpop.permute.xlu1 %8591  ;;  %9999 = vmatmul.mubr.msk.f32.gmra.mrb[96].mxu0 %vm20273_vm15, %v8792_v54  ;;  %vm20307_vm15 = vmmov %vm20291_vm0 }
0x1ade   : > { %v8590_v58 = vpop.permute.xlu0 %8589  ;;  %v8760_v60 = vsel %vm550_vm1, %v2338_v39, %v8592_v24  ;;  %v11353_v6 = vpop.eup %11352 }
0x1adf   : > { %v8759_v16 = vsel %vm550_vm1, %v2337_v21, %v8590_v58  ;;  %v11355_v54 = vpop.eup %11354  ;;  %v20292_v58 = vld [vmem:[#allocation118_spill] sm:$0xff] }
0x1ae0   : > { %11356 = vrcp.f32 %v20292_v58 }
0x1ae1   : > { %v8656_v36 = vpop.permute.xlu1 %8655  ;;  %11358 = vrcp.f32 %v20293_v35 }
0x1ae2   : > { %v8654_v2 = vpop.permute.xlu0 %8653  ;;  %v8777_v18 = vsel %vm8769_vm6, %v8760_v60, %v8656_v36  ;;  %v20294_v36 = vld [vmem:[#allocation138_spill] sm:$0xff] }
0x1ae3   : > { %v8776_v31 = vsel %vm8769_vm6, %v8759_v16, %v8654_v2  ;;  %v2343_v40 = vmul.f32 %v11353_v6, %v20294_v36  ;;  %v20295_v2 = vld [vmem:[#allocation113_spill] sm:$0xff] }
0x1ae4   : > { %v2344_v42 = vmul.f32 %v11355_v54, %v20295_v2 }
0x1ae5   : > { %v8720_v15 = vpop.permute.xlu1 %8719 }
0x1ae6   : > { %v8718_v10 = vpop.permute.xlu0 %8717  ;;  %v8794_v22 = vsel %vm8786_vm7, %v8777_v18, %v8720_v15 }
0x1ae7   : > { %v8793_v26 = vsel %vm8786_vm7, %v8776_v31, %v8718_v10 }
0x1ae8   : > { %10001 = vmatprep.mubr.msk.f32.mxu0 %vm20278_vm9, %v8793_v26  ;;  %vm20308_vm9 = vmmov %vm20291_vm0 }
0x1ae9   : > { %v8596_v29 = vpop.permute.xlu1 %8595  ;;  %10002 = vmatmul.mubr.msk.f32.gmra.mrb[98].mxu0 %vm20279_vm11, %v8794_v22  ;;  %vm20309_vm11 = vmmov %vm20291_vm0 }
0x1aea   : > { %v8594_v20 = vpop.permute.xlu0 %8593  ;;  %v8762_v56 = vsel %vm550_vm1, %v2340_v3, %v8596_v29  ;;  %v11357_v26 = vpop.eup %11356 }
0x1aeb   : > { %v8761_v7 = vsel %vm550_vm1, %v2339_v9, %v8594_v20  ;;  %v11359_v22 = vpop.eup %11358  ;;  %v2345_v14 = vmul.f32 %v11357_v26, %v20298_v11 }
0x1aed   : > { %v8660_v4 = vpop.permute.xlu1 %8659 }
0x1aee   : > { %v8658_v59 = vpop.permute.xlu0 %8657  ;;  %v8779_v28 = vsel %vm8769_vm6, %v8762_v56, %v8660_v4  ;;  %v20299_v4 = vld [vmem:[#allocation58_spill] sm:$0xff] }
0x1aef   : > { %v8778_v50 = vsel %vm8769_vm6, %v8761_v7, %v8658_v59  ;;  %v2346_v52 = vmul.f32 %v11359_v22, %v20299_v4 }
0x1af1   : > { %v8724_v17 = vpop.permute.xlu1 %8723 }
0x1af2   : > { %v8722_v19 = vpop.permute.xlu0 %8721  ;;  %v8796_v30 = vsel %vm8786_vm7, %v8779_v28, %v8724_v17 }
0x1af3   : > { %v8795_v25 = vsel %vm8786_vm7, %v8778_v50, %v8722_v19 }
0x1af4   : > { %10004 = vmatprep.mubr.msk.f32.mxu0 %vm20284_vm2, %v8795_v25  ;;  %vm20310_vm2 = vmmov %vm20291_vm0 }
0x1af5   : > { %v8600_v0 = vpop.permute.xlu1 %8599  ;;  %10005 = vmatmul.mubr.msk.f32.gmra.mrb[100].mxu0 %vm20285_vm3, %v8796_v30  ;;  %vm20311_vm3 = vmmov %vm20291_vm0 }
0x1af6   : > { %v8598_v38 = vpop.permute.xlu0 %8597  ;;  %v8764_v49 = vsel %vm550_vm1, %v2342_v12, %v8600_v0 }
0x1af7   : > { %v8763_v37 = vsel %vm550_vm1, %v2341_v32, %v8598_v38 }
0x1af9   : > { %v8664_v63 = vpop.permute.xlu1 %8663 }
0x1afa   : > { %v8662_v47 = vpop.permute.xlu0 %8661  ;;  %v8781_v46 = vsel %vm8769_vm6, %v8764_v49, %v8664_v63 }
0x1afb   : > { %v8780_v53 = vsel %vm8769_vm6, %v8763_v37, %v8662_v47 }
0x1afd   : > { %v8728_v51 = vpop.permute.xlu1 %8727 }
0x1afe   : > { %v8726_v34 = vpop.permute.xlu0 %8725  ;;  %v8798_v44 = vsel %vm8786_vm7, %v8781_v46, %v8728_v51 }
0x1aff   : > { %v8797_v13 = vsel %vm8786_vm7, %v8780_v53, %v8726_v34 }
0x1b00   : > { %10007 = vmatprep.mubr.msk.f32.mxu0 %vm20290_vm4, %v8797_v13  ;;  %vm20312_vm4 = vmmov %vm20291_vm0 }
0x1b01   : > { %v8604_v27 = vpop.permute.xlu1 %8603  ;;  %10008 = vmatmul.mubr.msk.f32.gmra.mrb[102].mxu0 %vm20291_vm0, %v8798_v44 }
0x1b02   : > { %v8602_v61 = vpop.permute.xlu0 %8601  ;;  %v8766_v8 = vsel %vm550_vm1, %v2344_v42, %v8604_v27 }
0x1b03   : > { %v8765_v57 = vsel %vm550_vm1, %v2343_v40, %v8602_v61 }
0x1b05   : > { %v8668_v24 = vpop.permute.xlu1 %8667 }
0x1b06   : > { %v8666_v33 = vpop.permute.xlu0 %8665  ;;  %v8783_v15 = vsel %vm8769_vm6, %v8766_v8, %v8668_v24 }
0x1b07   : > { %v8782_v39 = vsel %vm8769_vm6, %v8765_v57, %v8666_v33 }
0x1b09   : > { %v8732_v21 = vpop.permute.xlu1 %8731 }
0x1b0a   : > { %v8730_v16 = vpop.permute.xlu0 %8729  ;;  %v8800_v31 = vsel %vm8786_vm7, %v8783_v15, %v8732_v21 }
0x1b0b   : > { %v8799_v60 = vsel %vm8786_vm7, %v8782_v39, %v8730_v16 }
0x1b0c   : > { %10010 = vmatprep.mubr.msk.f32.mxu0 %vm20296_vm5, %v8799_v60  ;;  %vm20313_vm5 = vmmov %vm20291_vm0 }
0x1b0d   : > { %v8608_v10 = vpop.permute.xlu1 %8607  ;;  %10011 = vmatmul.mubr.msk.f32.gmra.mrb[104].mxu0 %vm20297_vm8, %v8800_v31  ;;  %vm20314_vm8 = vmmov %vm20291_vm0 }
0x1b0e   : > { %v8606_v18 = vpop.permute.xlu0 %8605  ;;  %v8768_v62 = vsel %vm550_vm1, %v2346_v52, %v8608_v10 }
0x1b0f   : > { %v8767_v59 = vsel %vm550_vm1, %v2345_v14, %v8606_v18  ;;  %vm20302_vm1 = vmmov %vm20291_vm0 }
0x1b11   : > { %v8672_v29 = vpop.permute.xlu1 %8671 }
0x1b12   : > { %v8670_v20 = vpop.permute.xlu0 %8669  ;;  %v8785_v3 = vsel %vm8769_vm6, %v8768_v62, %v8672_v29 }
0x1b13   : > { %v8784_v9 = vsel %vm8769_vm6, %v8767_v59, %v8670_v20  ;;  %vm20303_vm6 = vmmov %vm20291_vm0 }
0x1b15   : > { %v8736_v5 = vpop.permute.xlu1 %8735 }
0x1b16   : > { %v8734_v41 = vpop.permute.xlu0 %8733  ;;  %v8802_v17 = vsel %vm8786_vm7, %v8785_v3, %v8736_v5 }
0x1b17   : > { %v8801_v7 = vsel %vm8786_vm7, %v8784_v9, %v8734_v41  ;;  %vm20304_vm7 = vmmov %vm20291_vm0 }
0x1b18   : > { %10013 = vmatprep.mubr.msk.f32.mxu0 %vm20300_vm10, %v8801_v7  ;;  %vm20315_vm10 = vmmov %vm20291_vm0 }
0x1b19   : > { %10014 = vmatmul.mubr.msk.f32.gmra.mrb[106].mxu0 %vm20301_vm12, %v8802_v17  ;;  %vm20316_vm12 = vmmov %vm20291_vm0 }
0x1b98   : > { %v9994_v56 = vpop.f32.mrb[92].mxu0 }
0x1b99   : > { %9005 = vst.msk [vmem:[%s18714_s10 + $0x8] sm:$0xff] %vm20302_vm1, %v9994_v56  ;;  %v8925_v50 = vpop.f32.mrb[93].mxu0 }
0x1b9a   : > { %9004 = vst.msk [vmem:[%s18714_s10] sm:$0xff] %vm20303_vm6, %v8925_v50 }
0x1ba4   : > { %v9997_v19 = vpop.f32.mrb[94].mxu0 }
0x1ba5   : > { %9007 = vst.msk [vmem:[%s18714_s10 + $0x18] sm:$0xff] %vm20304_vm7, %v9997_v19  ;;  %v8935_v28 = vpop.f32.mrb[95].mxu0 }
0x1ba6   : > { %9006 = vst.msk [vmem:[%s18714_s10 + $0x10] sm:$0xff] %vm20305_vm13, %v8935_v28 }
0x1bb0   : > { %v10000_v25 = vpop.f32.mrb[96].mxu0 }
0x1bb1   : > { %9009 = vst.msk [vmem:[%s18714_s10 + $0x28] sm:$0xff] %vm20306_vm14, %v10000_v25  ;;  %v8945_v30 = vpop.f32.mrb[97].mxu0 }
0x1bb2   : > { %9008 = vst.msk [vmem:[%s18714_s10 + $0x20] sm:$0xff] %vm20307_vm15, %v8945_v30 }
0x1bbc   : > { %v10003_v0 = vpop.f32.mrb[98].mxu0 }
0x1bbd   : > { %9011 = vst.msk [vmem:[%s18714_s10 + $0x38] sm:$0xff] %vm20308_vm9, %v10003_v0  ;;  %v8955_v38 = vpop.f32.mrb[99].mxu0 }
0x1bbe   : > { %9010 = vst.msk [vmem:[%s18714_s10 + $0x30] sm:$0xff] %vm20309_vm11, %v8955_v38 }
0x1bc8   : > { %v10006_v48 = vpop.f32.mrb[100].mxu0 }
0x1bc9   : > { %9013 = vst.msk [vmem:[%s18714_s10 + $0x48] sm:$0xff] %vm20310_vm2, %v10006_v48  ;;  %v8965_v43 = vpop.f32.mrb[101].mxu0 }
0x1bca   : > { %9012 = vst.msk [vmem:[%s18714_s10 + $0x40] sm:$0xff] %vm20311_vm3, %v8965_v43 }
0x1bd4   : > { %v10009_v63 = vpop.f32.mrb[102].mxu0 }
0x1bd5   : > { %9015 = vst.msk [vmem:[%s18714_s10 + $0x58] sm:$0xff] %vm20312_vm4, %v10009_v63  ;;  %v8975_v1 = vpop.f32.mrb[103].mxu0 }
0x1bd6   : > { %9014 = vst.msk [vmem:[%s18714_s10 + $0x50] sm:$0xff] %vm20291_vm0, %v8975_v1 }
0x1be0   : > { %v10012_v47 = vpop.f32.mrb[104].mxu0 }
0x1be1   : > { %9017 = vst.msk [vmem:[%s18714_s10 + $0x68] sm:$0xff] %vm20313_vm5, %v10012_v47  ;;  %v8985_v23 = vpop.f32.mrb[105].mxu0 }
0x1be2   : > { %9016 = vst.msk [vmem:[%s18714_s10 + $0x60] sm:$0xff] %vm20314_vm8, %v8985_v23 }
0x1bec   : > { %v10015_v45 = vpop.f32.mrb[106].mxu0 }
0x1bed   : > { %9019 = vst.msk [vmem:[%s18714_s10 + $0x78] sm:$0xff] %vm20315_vm10, %v10015_v45  ;;  %v8995_v32 = vpop.f32.mrb[107].mxu0 }
0x1bee   : > { %9018 = vst.msk [vmem:[%s18714_s10 + $0x70] sm:$0xff] %vm20316_vm12, %v8995_v32 }
0x1bef PF: > { %s15_s18 = sadd.s32 1, %s11530_s18  }
0x1bf0   : > { %p12_p4 = scmp.ge.s32.totalorder %s15_s18, 4  }
0x1bf2   :  { %14 = sbr.rel (!%p12_p4) target bundleno = 1 (0x1), region = 70 }

</bundles_post_ra>
